<compile_context>
chip_gen: v6e
topology: v6e:2x2x1
jax: 0.10.0
libtpu: 0.0.40
codegen_flags: <defaults>
</compile_context>

<pallas_src>
import math
from functools import partial

import jax
import jax.numpy as jnp
from jax import lax
from jax.experimental import pallas as pl
from jax.experimental.pallas import tpu as pltpu


# ----------------------------------------------------------------------------
# helpers
# ----------------------------------------------------------------------------
def _gelu_exact(x):
    # PyTorch F.gelu default ('none' approximation) = erf form
    return 0.5 * x * (1.0 + lax.erf(x * (1.0 / math.sqrt(2.0))))


_LAYER_PARAM_NAMES = ("wqkv", "bqkv", "wo", "bo", "w1", "b1", "w2", "b2",
                      "n1s", "n1b", "n2s", "n2b")


# ----------------------------------------------------------------------------
# Fused backbone kernel
#   grid = (batch_tiles ["parallel"], nlayers ["arbitrary"])
#   step (bi, 0)     : conv1 -> conv2 -> *sqrt(d_model) + positional encoding
#   every step       : one TransformerBatchNormEncoderLayer (eval-mode BN)
#   step (bi, last)  : final GELU, emit bf16 (TB*L, d_model) tile
# ----------------------------------------------------------------------------
def _backbone_kernel(x_ref, c1w_ref, c1b_ref, c2w_ref, c2b_ref, pe_ref,
                     wqkv_ref, bqkv_ref, wo_ref, bo_ref,
                     w1_ref, b1_ref, w2_ref, b2_ref,
                     n1s_ref, n1b_ref, n2s_ref, n2b_ref,
                     o_ref, act_ref, *, TB, L, nhead, emb_scale):
    f32 = jnp.float32
    bf16 = jnp.bfloat16
    layer = pl.program_id(1)
    rows, D = act_ref.shape
    hd = D // nhead

    # -------- step (bi, 0): embed this batch tile into the resident scratch
    @pl.when(layer == 0)
    def _embed():
        lpos = lax.broadcasted_iota(jnp.int32, (TB, L, 1), 1).reshape(rows, 1)
        is_first = lpos == 0
        is_last = lpos == (L - 1)

        def conv(z, w_ref, b_ref):
            # Conv1d(k=3, stride=1, padding=1): 3 accumulating matmuls (one per
            # tap); sequence-boundary taps masked per folded (b, l) row.
            c = z.shape[-1]
            zrow = jnp.zeros((1, c), f32)
            zm = jnp.where(is_first, 0.0,
                           jnp.concatenate([zrow, z[:-1]], axis=0))   # x[l-1]
            zp = jnp.where(is_last, 0.0,
                           jnp.concatenate([z[1:], zrow], axis=0))    # x[l+1]
            out = jnp.dot(z.astype(bf16), w_ref[1], preferred_element_type=f32)
            out = out + jnp.dot(zm.astype(bf16), w_ref[0],
                                preferred_element_type=f32)
            out = out + jnp.dot(zp.astype(bf16), w_ref[2],
                                preferred_element_type=f32)
            return out + b_ref[...]

        h = conv(x_ref[...].astype(f32), c1w_ref, c1b_ref)          # (rows, 128)
        h = conv(h, c2w_ref, c2b_ref)                                # (rows, D)
        h = h * emb_scale                                            # * sqrt(d_model)
        h = (h.reshape(TB, L, D) + pe_ref[...]).reshape(rows, D)     # + pe (dropout=id)
        act_ref[...] = h

    # -------- encoder layer `layer` (BatchNorm folded to affine, eval mode)
    x2 = act_ref[...]                                                # (rows, D) f32
    xb = x2.astype(bf16)

    # fused QKV projection (1/sqrt(hd) pre-folded into the q columns / bias)
    qkv = jnp.dot(xb, wqkv_ref[0], preferred_element_type=f32) + bqkv_ref[0]
    qkvb = qkv.astype(bf16)                                          # single cast
    wo = wo_ref[0]                                                   # (D, D) bf16

    attn = jnp.zeros((rows, D), f32)
    for hi in range(nhead):            # static loop; each head's intermediates
        sl = slice(hi * hd, (hi + 1) * hd)   # die at its Wo-slice matmul below
        q = qkvb[:, sl].reshape(TB, L, hd)
        k = qkvb[:, D + hi * hd:D + (hi + 1) * hd].reshape(TB, L, hd)
        v = qkvb[:, 2 * D + hi * hd:2 * D + (hi + 1) * hd].reshape(TB, L, hd)
        s = jnp.einsum("bld,bmd->blm", q, k, preferred_element_type=f32)
        s = s - jnp.max(s, axis=-1, keepdims=True)
        p = jnp.exp(s)
        p = p * pl.reciprocal(jnp.sum(p, axis=-1, keepdims=True), approx=True)
        ctx = jnp.einsum("blm,bmd->bld", p.astype(bf16), v,
                         preferred_element_type=f32).reshape(rows, hd)
        attn = attn + jnp.dot(ctx.astype(bf16), wo[sl, :],
                              preferred_element_type=f32)

    src = x2 + attn + bo_ref[0]                  # residual (dropout1 = id)
    src = src * n1s_ref[0] + n1b_ref[0]          # BatchNorm1d #1 (eval affine)

    ff = jnp.dot(src.astype(bf16), w1_ref[0], preferred_element_type=f32) + b1_ref[0]
    ff = _gelu_exact(ff)                         # activation='gelu'
    src = src + jnp.dot(ff.astype(bf16), w2_ref[0],
                        preferred_element_type=f32) + b2_ref[0]      # dropout2 = id
    src = src * n2s_ref[0] + n2b_ref[0]          # BatchNorm1d #2 (eval affine)
    act_ref[...] = src

    # -------- last layer for this batch tile: final GELU, emit bf16
    @pl.when(layer == pl.num_programs(1) - 1)
    def _emit():
        o_ref[...] = _gelu_exact(src).astype(o_ref.dtype)


def _pick_batch_tile(B, L, max_rows=2048):
    # Prefer >= 2 batch tiles (v7x megacore), rows per tile a multiple of 16
    # (bf16 sublane tile), capped so the resident activation stays small.
    for tb in range(B // 2, 0, -1):
        if B % tb == 0 and (tb * L) % 16 == 0 and tb * L <= max_rows:
            return tb
    for tb in range(B // 2, 0, -1):
        if B % tb == 0 and (tb * L) % 16 == 0:
            return tb
    return B


def backbone(x2, params, *, B, L, D, nhead, block_batch):
    layers = params["layers"]
    nlayers = layers["wqkv"].shape[0]
    dff = layers["w1"].shape[-1]
    n_feat = x2.shape[1]
    TB = block_batch
    assert B % TB == 0 and D % nhead == 0
    nbt = B // TB
    rows = TB * L
    hd = D // nhead
    BL = B * L

    pe = params["pe"][:L]
    shared = [x2, params["conv1_w"], params["conv1_b"],
              params["conv2_w"], params["conv2_b"], pe]
    stacked = [layers[name] for name in _LAYER_PARAM_NAMES]

    in_specs = [pl.BlockSpec((rows, n_feat), lambda bi, l: (bi, 0))]
    in_specs += [pl.BlockSpec(a.shape, lambda bi, l, _n=a.ndim: (0,) * _n)
                 for a in shared[1:]]
    in_specs += [pl.BlockSpec((1,) + a.shape[1:],
                              lambda bi, l, _n=a.ndim: (l,) + (0,) * (_n - 1))
                 for a in stacked]

    def _bytes(a):
        return a.size * a.dtype.itemsize

    # advisory cost estimate
    flops = 2 * BL * (3 * n_feat * 128 + 3 * 128 * D)
    flops += nlayers * (2 * BL * D * 3 * D             # fused QKV
                        + 4 * B * nhead * L * L * hd   # scores + context
                        + 2 * BL * D * D               # output projection
                        + 4 * BL * D * dff)            # feed-forward
    transc = nlayers * (B * nhead * L * L + BL * dff) + BL * D
    bytes_acc = int(_bytes(x2) + sum(_bytes(a) for a in shared[1:])
                    + nbt * sum(_bytes(a) for a in stacked) + BL * D * 2)

    # explicit VMEM budget (v5e/v6e scoped defaults 16/32 MiB; v7x physical 64)
    layer_block_bytes = sum(_bytes(a) // nlayers for a in stacked)
    est = (rows * D * 4                               # resident activation
           + 2 * rows * n_feat * 4                    # input tile (dbl-buffered)
           + sum(_bytes(a) for a in shared[1:])       # conv weights + pe
           + 2 * layer_block_bytes                    # layer weights (dbl-buffered)
           + 2 * rows * D * 2                         # output tile
           + rows * (3 * D) * 6 + rows * dff * 8      # qkv / ffn intermediates
           + TB * L * L * 8 + 4 * rows * D * 4)       # scores + slack
    vmem_limit = int(min(64 * 1024 * 1024, max(32 * 1024 * 1024, 4 * est)))

    return pl.pallas_call(
        partial(_backbone_kernel, TB=TB, L=L, nhead=nhead,
                emb_scale=math.sqrt(D)),
        out_shape=jax.ShapeDtypeStruct((BL, D), jnp.bfloat16),
        grid=(nbt, nlayers),
        in_specs=in_specs,
        out_specs=pl.BlockSpec((rows, D), lambda bi, l: (bi, 0)),
        scratch_shapes=[pltpu.VMEM((rows, D), jnp.float32)],
        compiler_params=pltpu.CompilerParams(
            dimension_semantics=("parallel", "arbitrary"),
            vmem_limit_bytes=vmem_limit),
        cost_estimate=pl.CostEstimate(flops=int(flops),
                                      transcendentals=int(transc),
                                      bytes_accessed=bytes_acc),
    )(*shared, *stacked)


# ----------------------------------------------------------------------------
# Output head: Linear -> ReLU -> (dropout = id) -> Linear
#   (final GELU already applied in the backbone; it commutes with the flatten)
# ----------------------------------------------------------------------------
def _head_kernel(x_ref, w1_ref, b1_ref, w2_ref, b2_ref, o_ref):
    f32 = jnp.float32
    h = jnp.dot(x_ref[...], w1_ref[...], preferred_element_type=f32) + b1_ref[...]
    h = jnp.maximum(h, 0.0)
    o_ref[...] = (jnp.dot(h.astype(jnp.bfloat16), w2_ref[...],
                          preferred_element_type=f32) + b2_ref[...]).astype(o_ref.dtype)


def head(x_flat, w1, b1, w2, b2):
    B, Fin = x_flat.shape
    M = w1.shape[-1]
    C = w2.shape[-1]
    return pl.pallas_call(
        _head_kernel,
        out_shape=jax.ShapeDtypeStruct((B, C), jnp.float32),
        grid=(1,),
        in_specs=[pl.BlockSpec((B, Fin), lambda i: (0, 0)),
                  pl.BlockSpec((Fin, M), lambda i: (0, 0)),
                  pl.BlockSpec((1, M), lambda i: (0, 0)),
                  pl.BlockSpec((M, C), lambda i: (0, 0)),
                  pl.BlockSpec((1, C), lambda i: (0, 0))],
        out_specs=pl.BlockSpec((B, C), lambda i: (0, 0)),
    )(x_flat, w1, b1, w2, b2)


# ----------------------------------------------------------------------------
# parameter construction (deterministic, synthetic)
# ----------------------------------------------------------------------------
def _fixed_positional_encoding(max_len, d_model):
    position = jnp.arange(max_len, dtype=jnp.float32)[:, None]
    div_term = jnp.exp(jnp.arange(0, d_model, 2, dtype=jnp.float32)
                       * (-math.log(10000.0) / d_model))
    pe = jnp.zeros((max_len, d_model), jnp.float32)
    pe = pe.at[:, 0::2].set(jnp.sin(position * div_term))
    pe = pe.at[:, 1::2].set(jnp.cos(position * div_term))
    return pe


def init_params(key, *, n_features, d_model, nhead, dim_feedforward,
                nlayers, mlp_dim, n_classes, length_sequence, max_len=5000,
                matmul_dtype=jnp.bfloat16):
    keys = iter(jax.random.split(key, 16 + nlayers * 24))

    def w(shape, scale=0.05):
        return (scale * jax.random.normal(next(keys), shape)).astype(jnp.float32)

    def fold_bn(gamma, beta, mean, var, eps=1e-5):
        s = gamma / jnp.sqrt(var + eps)
        return s.reshape(1, -1), (beta - mean * s).reshape(1, -1)

    hd = d_model // nhead
    qscale = 1.0 / math.sqrt(hd)            # MHA q-scaling folded into Wq / bq

    params = {
        # Conv weights stored as (K, Cin, Cout): tap 0 -> x[l-1], 1 -> x[l], 2 -> x[l+1]
        "conv1_w": w((3, n_features, 128)).astype(matmul_dtype),
        "conv1_b": w((1, 128)),
        "conv2_w": w((3, 128, d_model)).astype(matmul_dtype),
        "conv2_b": w((1, d_model)),
        "pe": _fixed_positional_encoding(max_len, d_model),
        # head_w1 rows ordered (l, d) with d fastest, matching the flatten order
        "head_w1": w((d_model * length_sequence, mlp_dim)).astype(matmul_dtype),
        "head_b1": w((1, mlp_dim)),
        "head_w2": w((mlp_dim, n_classes)).astype(matmul_dtype),
        "head_b2": w((1, n_classes)),
    }

    per_layer = []
    for _ in range(nlayers):
        wq = w((d_model, d_model)) * qscale
        wk = w((d_model, d_model))
        wv = w((d_model, d_model))
        bq = w((1, d_model)) * qscale
        bk = w((1, d_model))
        bv = w((1, d_model))
        wo = w((d_model, d_model))
        bo = w((1, d_model))
        w1 = w((d_model, dim_feedforward))
        b1 = w((1, dim_feedforward))
        w2 = w((dim_feedforward, d_model))
        b2 = w((1, d_model))
        g1 = 1.0 + w((d_model,), 1.0)
        b1n, m1 = w((d_model,)), w((d_model,))
        v1 = 0.5 + jnp.abs(w((d_model,), 1.0))
        g2 = 1.0 + w((d_model,), 1.0)
        b2n, m2 = w((d_model,)), w((d_model,))
        v2 = 0.5 + jnp.abs(w((d_model,), 1.0))
        n1s, n1b = fold_bn(g1, b1n, m1, v1)
        n2s, n2b = fold_bn(g2, b2n, m2, v2)
        per_layer.append({
            "wqkv": jnp.concatenate([wq, wk, wv], axis=-1).astype(matmul_dtype),
            "bqkv": jnp.concatenate([bq, bk, bv], axis=-1),
            "wo": wo.astype(matmul_dtype), "bo": bo,
            "w1": w1.astype(matmul_dtype), "b1": b1,
            "w2": w2.astype(matmul_dtype), "b2": b2,
            "n1s": n1s, "n1b": n1b, "n2s": n2s, "n2b": n2b,
        })
    params["layers"] = {name: jnp.stack([lp[name] for lp in per_layer], axis=0)
                        for name in _LAYER_PARAM_NAMES}
    return params


# ----------------------------------------------------------------------------
# full forward pass
# ----------------------------------------------------------------------------
def transformer_forward(params, X, *, d_model, nhead, block_batch=None):
    # X: (B, n_features, L)  -- PyTorch Conv1d NCL layout
    B, n_features, L = X.shape
    if block_batch is None:
        block_batch = _pick_batch_tile(B, L)
    # fold batch and sequence into one row axis: (B*L, n_features), rows = b*L + l
    x2 = jnp.transpose(X, (0, 2, 1)).reshape(B * L, n_features).astype(jnp.float32)
    y = backbone(x2, params, B=B, L=L, D=d_model, nhead=nhead,
                 block_batch=block_batch)                  # (B*L, D) bf16, post-GELU
    # permute(1,0,2) + flatten  ==  (B*L, D) -> (B, L*D)   (free metadata reshape)
    x_flat = y.reshape(B, L * d_model)
    return head(x_flat, params["head_w1"], params["head_b1"],
                params["head_w2"], params["head_b2"])      # (B, n_classes) f32


# ----------------------------------------------------------------------------
if __name__ == "__main__":
    # small, deterministic config (B chosen so the batch axis splits into
    # two "parallel" tiles of 128 rows each)
    B, n_features, L = 16, 4, 16
    d_model, nhead, dim_ff, nlayers = 64, 4, 128, 2
    mlp_dim, n_classes = 32, 3

    key = jax.random.PRNGKey(0)
    kx, kp = jax.random.split(key)
    X = jax.random.normal(kx, (B, n_features, L), dtype=jnp.float32)

    params = init_params(kp, n_features=n_features, d_model=d_model,
                         nhead=nhead, dim_feedforward=dim_ff, nlayers=nlayers,
                         mlp_dim=mlp_dim, n_classes=n_classes,
                         length_sequence=L)

    # TODO(synk): training-mode Dropout / BatchNorm batch-statistics updates are
    # not modeled; eval-mode semantics are implemented instead.
    fwd = jax.jit(partial(transformer_forward, d_model=d_model, nhead=nhead))
    out = jax.block_until_ready(fwd(params, X))
    assert out.shape == (B, n_classes)
    assert bool(jnp.all(jnp.isfinite(out)))
    print("KERNEL_OK")
</pallas_src>

<mosaic_0001>
module attributes {stable_mosaic.version = 11 : i64} {
  func.func @_backbone_kernel(%arg0: i32, %arg1: i32, %arg2: memref<128x4xf32, #tpu.memory_space<vmem>>, %arg3: memref<3x4x128xbf16, #tpu.memory_space<vmem>>, %arg4: memref<1x128xf32, #tpu.memory_space<vmem>>, %arg5: memref<3x128x64xbf16, #tpu.memory_space<vmem>>, %arg6: memref<1x64xf32, #tpu.memory_space<vmem>>, %arg7: memref<16x64xf32, #tpu.memory_space<vmem>>, %arg8: memref<1x64x192xbf16, #tpu.memory_space<vmem>>, %arg9: memref<1x1x192xf32, #tpu.memory_space<vmem>>, %arg10: memref<1x64x64xbf16, #tpu.memory_space<vmem>>, %arg11: memref<1x1x64xf32, #tpu.memory_space<vmem>>, %arg12: memref<1x64x128xbf16, #tpu.memory_space<vmem>>, %arg13: memref<1x1x128xf32, #tpu.memory_space<vmem>>, %arg14: memref<1x128x64xbf16, #tpu.memory_space<vmem>>, %arg15: memref<1x1x64xf32, #tpu.memory_space<vmem>>, %arg16: memref<1x1x64xf32, #tpu.memory_space<vmem>>, %arg17: memref<1x1x64xf32, #tpu.memory_space<vmem>>, %arg18: memref<1x1x64xf32, #tpu.memory_space<vmem>>, %arg19: memref<1x1x64xf32, #tpu.memory_space<vmem>>, %arg20: memref<128x64xbf16, #tpu.memory_space<vmem>>, %arg21: memref<128x64xf32, #tpu.memory_space<vmem>>) attributes {dimension_semantics = [#tpu.dimension_semantics<parallel>, #tpu.dimension_semantics<arbitrary>], iteration_bounds = array<i64: 2, 2>, scalar_prefetch = 0 : i64, scratch_operands = 1 : i64, tpu.core_type = #tpu.core_type<tc>, window_params = [{transform_indices = @transform_0, window_bounds = array<i64: 128, 4>}, {pipeline_mode = #tpu.pipeline_mode<synchronous>, transform_indices = @transform_1, window_bounds = array<i64: 3, 4, 128>}, {pipeline_mode = #tpu.pipeline_mode<synchronous>, transform_indices = @transform_2, window_bounds = array<i64: 1, 128>}, {pipeline_mode = #tpu.pipeline_mode<synchronous>, transform_indices = @transform_3, window_bounds = array<i64: 3, 128, 64>}, {pipeline_mode = #tpu.pipeline_mode<synchronous>, transform_indices = @transform_4, window_bounds = array<i64: 1, 64>}, {pipeline_mode = #tpu.pipeline_mode<synchronous>, transform_indices = @transform_5, window_bounds = array<i64: 16, 64>}, {transform_indices = @transform_6, window_bounds = array<i64: 1, 64, 192>}, {transform_indices = @transform_7, window_bounds = array<i64: 1, 1, 192>}, {transform_indices = @transform_8, window_bounds = array<i64: 1, 64, 64>}, {transform_indices = @transform_9, window_bounds = array<i64: 1, 1, 64>}, {transform_indices = @transform_10, window_bounds = array<i64: 1, 64, 128>}, {transform_indices = @transform_11, window_bounds = array<i64: 1, 1, 128>}, {transform_indices = @transform_12, window_bounds = array<i64: 1, 128, 64>}, {transform_indices = @transform_13, window_bounds = array<i64: 1, 1, 64>}, {transform_indices = @transform_14, window_bounds = array<i64: 1, 1, 64>}, {transform_indices = @transform_15, window_bounds = array<i64: 1, 1, 64>}, {transform_indices = @transform_16, window_bounds = array<i64: 1, 1, 64>}, {transform_indices = @transform_17, window_bounds = array<i64: 1, 1, 64>}, {transform_indices = @transform_18, window_bounds = array<i64: 128, 64>}]} {
    %c0_i32 = arith.constant 0 : i32
    %0 = arith.cmpi eq, %arg1, %c0_i32 : i32
    %1 = arith.extui %0 : i1 to i32
    %c0_i32_0 = arith.constant 0 : i32
    %2 = arith.cmpi ne, %1, %c0_i32_0 : i32
    scf.if %2 {
      %162 = tpu.iota {dimensions = array<i32: 1>} : vector<8x16x1xi32>
      %163 = vector.shape_cast %162 : vector<8x16x1xi32> to vector<128x1xi32>
      %c0_i32_67 = arith.constant 0 : i32
      %164 = vector.broadcast %c0_i32_67 : i32 to vector<128x1xi32>
      %165 = arith.cmpi eq, %163, %164 : vector<128x1xi32>
      %c15_i32 = arith.constant 15 : i32
      %166 = vector.broadcast %c15_i32 : i32 to vector<128x1xi32>
      %167 = arith.cmpi eq, %163, %166 : vector<128x1xi32>
      %c0_68 = arith.constant 0 : index
      %c0_69 = arith.constant 0 : index
      %168 = vector.load %arg2[%c0_68, %c0_69] : memref<128x4xf32, #tpu.memory_space<vmem>>, vector<128x4xf32>
      %cst_70 = arith.constant 0.000000e+00 : f32
      %169 = vector.broadcast %cst_70 : f32 to vector<1x4xf32>
      %170 = vector.extract_strided_slice %168 {offsets = [0, 0], sizes = [127, 4], strides = [1, 1]} : vector<128x4xf32> to vector<127x4xf32>
      %171 = tpu.concatenate %169, %170 in 0 : vector<1x4xf32>, vector<127x4xf32> -> vector<128x4xf32>
      %cst_71 = arith.constant 0.000000e+00 : f32
      %172 = vector.shape_cast %165 : vector<128x1xi1> to vector<128x1xi1>
      %173 = vector.broadcast %172 : vector<128x1xi1> to vector<128x4xi1>
      %174 = vector.broadcast %cst_71 : f32 to vector<128x4xf32>
      %175 = arith.select %173, %174, %171 : vector<128x4xi1>, vector<128x4xf32>
      %176 = vector.extract_strided_slice %168 {offsets = [1, 0], sizes = [127, 4], strides = [1, 1]} : vector<128x4xf32> to vector<127x4xf32>
      %177 = tpu.concatenate %176, %169 in 0 : vector<127x4xf32>, vector<1x4xf32> -> vector<128x4xf32>
      %cst_72 = arith.constant 0.000000e+00 : f32
      %178 = vector.shape_cast %167 : vector<128x1xi1> to vector<128x1xi1>
      %179 = vector.broadcast %178 : vector<128x1xi1> to vector<128x4xi1>
      %180 = vector.broadcast %cst_72 : f32 to vector<128x4xf32>
      %181 = arith.select %179, %180, %177 : vector<128x4xi1>, vector<128x4xf32>
      %182 = arith.truncf %168 : vector<128x4xf32> to vector<128x4xbf16>
      %c1 = arith.constant 1 : index
      %c0_73 = arith.constant 0 : index
      %c0_74 = arith.constant 0 : index
      %183 = vector.load %arg3[%c1, %c0_73, %c0_74] : memref<3x4x128xbf16, #tpu.memory_space<vmem>>, vector<1x4x128xbf16>
      %184 = vector.shape_cast %183 : vector<1x4x128xbf16> to vector<4x128xbf16>
      %cst_75 = arith.constant dense<0.000000e+00> : vector<128x128xf32>
      %185 = tpu.matmul %182, %184, %cst_75 {dimension_numbers = #tpu.dot_dimension_numbers<[1], [0], [0], [1], [0, 0, 1, 1], [], []>} : vector<128x4xbf16>, vector<4x128xbf16>, vector<128x128xf32> -> vector<128x128xf32>
      %186 = arith.truncf %175 : vector<128x4xf32> to vector<128x4xbf16>
      %c0_76 = arith.constant 0 : index
      %c0_77 = arith.constant 0 : index
      %c0_78 = arith.constant 0 : index
      %187 = vector.load %arg3[%c0_76, %c0_77, %c0_78] : memref<3x4x128xbf16, #tpu.memory_space<vmem>>, vector<1x4x128xbf16>
      %188 = vector.shape_cast %187 : vector<1x4x128xbf16> to vector<4x128xbf16>
      %cst_79 = arith.constant dense<0.000000e+00> : vector<128x128xf32>
      %189 = tpu.matmul %186, %188, %cst_79 {dimension_numbers = #tpu.dot_dimension_numbers<[1], [0], [0], [1], [0, 0, 1, 1], [], []>} : vector<128x4xbf16>, vector<4x128xbf16>, vector<128x128xf32> -> vector<128x128xf32>
      %190 = arith.addf %185, %189 : vector<128x128xf32>
      %191 = arith.truncf %181 : vector<128x4xf32> to vector<128x4xbf16>
      %c2 = arith.constant 2 : index
      %c0_80 = arith.constant 0 : index
      %c0_81 = arith.constant 0 : index
      %192 = vector.load %arg3[%c2, %c0_80, %c0_81] : memref<3x4x128xbf16, #tpu.memory_space<vmem>>, vector<1x4x128xbf16>
      %193 = vector.shape_cast %192 : vector<1x4x128xbf16> to vector<4x128xbf16>
      %cst_82 = arith.constant dense<0.000000e+00> : vector<128x128xf32>
      %194 = tpu.matmul %191, %193, %cst_82 {dimension_numbers = #tpu.dot_dimension_numbers<[1], [0], [0], [1], [0, 0, 1, 1], [], []>} : vector<128x4xbf16>, vector<4x128xbf16>, vector<128x128xf32> -> vector<128x128xf32>
      %195 = arith.addf %190, %194 : vector<128x128xf32>
      %c0_83 = arith.constant 0 : index
      %c0_84 = arith.constant 0 : index
      %196 = vector.load %arg4[%c0_83, %c0_84] : memref<1x128xf32, #tpu.memory_space<vmem>>, vector<1x128xf32>
      %197 = vector.broadcast %196 : vector<1x128xf32> to vector<128x128xf32>
      %198 = arith.addf %195, %197 : vector<128x128xf32>
      %cst_85 = arith.constant 0.000000e+00 : f32
      %199 = vector.broadcast %cst_85 : f32 to vector<1x128xf32>
      %200 = vector.extract_strided_slice %198 {offsets = [0, 0], sizes = [127, 128], strides = [1, 1]} : vector<128x128xf32> to vector<127x128xf32>
      %201 = tpu.concatenate %199, %200 in 0 : vector<1x128xf32>, vector<127x128xf32> -> vector<128x128xf32>
      %cst_86 = arith.constant 0.000000e+00 : f32
      %202 = vector.shape_cast %165 : vector<128x1xi1> to vector<128x1xi1>
      %203 = vector.broadcast %202 : vector<128x1xi1> to vector<128x128xi1>
      %204 = vector.broadcast %cst_86 : f32 to vector<128x128xf32>
      %205 = arith.select %203, %204, %201 : vector<128x128xi1>, vector<128x128xf32>
      %206 = vector.extract_strided_slice %198 {offsets = [1, 0], sizes = [127, 128], strides = [1, 1]} : vector<128x128xf32> to vector<127x128xf32>
      %207 = tpu.concatenate %206, %199 in 0 : vector<127x128xf32>, vector<1x128xf32> -> vector<128x128xf32>
      %cst_87 = arith.constant 0.000000e+00 : f32
      %208 = vector.shape_cast %167 : vector<128x1xi1> to vector<128x1xi1>
      %209 = vector.broadcast %208 : vector<128x1xi1> to vector<128x128xi1>
      %210 = vector.broadcast %cst_87 : f32 to vector<128x128xf32>
      %211 = arith.select %209, %210, %207 : vector<128x128xi1>, vector<128x128xf32>
      %212 = arith.truncf %198 : vector<128x128xf32> to vector<128x128xbf16>
      %c1_88 = arith.constant 1 : index
      %c0_89 = arith.constant 0 : index
      %c0_90 = arith.constant 0 : index
      %213 = vector.load %arg5[%c1_88, %c0_89, %c0_90] : memref<3x128x64xbf16, #tpu.memory_space<vmem>>, vector<1x128x64xbf16>
      %214 = vector.shape_cast %213 : vector<1x128x64xbf16> to vector<128x64xbf16>
      %cst_91 = arith.constant dense<0.000000e+00> : vector<128x64xf32>
      %215 = tpu.matmul %212, %214, %cst_91 {dimension_numbers = #tpu.dot_dimension_numbers<[1], [0], [0], [1], [0, 0, 1, 1], [], []>} : vector<128x128xbf16>, vector<128x64xbf16>, vector<128x64xf32> -> vector<128x64xf32>
      %216 = arith.truncf %205 : vector<128x128xf32> to vector<128x128xbf16>
      %c0_92 = arith.constant 0 : index
      %c0_93 = arith.constant 0 : index
      %c0_94 = arith.constant 0 : index
      %217 = vector.load %arg5[%c0_92, %c0_93, %c0_94] : memref<3x128x64xbf16, #tpu.memory_space<vmem>>, vector<1x128x64xbf16>
      %218 = vector.shape_cast %217 : vector<1x128x64xbf16> to vector<128x64xbf16>
      %cst_95 = arith.constant dense<0.000000e+00> : vector<128x64xf32>
      %219 = tpu.matmul %216, %218, %cst_95 {dimension_numbers = #tpu.dot_dimension_numbers<[1], [0], [0], [1], [0, 0, 1, 1], [], []>} : vector<128x128xbf16>, vector<128x64xbf16>, vector<128x64xf32> -> vector<128x64xf32>
      %220 = arith.addf %215, %219 : vector<128x64xf32>
      %221 = arith.truncf %211 : vector<128x128xf32> to vector<128x128xbf16>
      %c2_96 = arith.constant 2 : index
      %c0_97 = arith.constant 0 : index
      %c0_98 = arith.constant 0 : index
      %222 = vector.load %arg5[%c2_96, %c0_97, %c0_98] : memref<3x128x64xbf16, #tpu.memory_space<vmem>>, vector<1x128x64xbf16>
      %223 = vector.shape_cast %222 : vector<1x128x64xbf16> to vector<128x64xbf16>
      %cst_99 = arith.constant dense<0.000000e+00> : vector<128x64xf32>
      %224 = tpu.matmul %221, %223, %cst_99 {dimension_numbers = #tpu.dot_dimension_numbers<[1], [0], [0], [1], [0, 0, 1, 1], [], []>} : vector<128x128xbf16>, vector<128x64xbf16>, vector<128x64xf32> -> vector<128x64xf32>
      %225 = arith.addf %220, %224 : vector<128x64xf32>
      %c0_100 = arith.constant 0 : index
      %c0_101 = arith.constant 0 : index
      %226 = vector.load %arg6[%c0_100, %c0_101] : memref<1x64xf32, #tpu.memory_space<vmem>>, vector<1x64xf32>
      %227 = vector.broadcast %226 : vector<1x64xf32> to vector<128x64xf32>
      %228 = arith.addf %225, %227 : vector<128x64xf32>
      %cst_102 = arith.constant 8.000000e+00 : f32
      %229 = vector.broadcast %cst_102 : f32 to vector<128x64xf32>
      %230 = arith.mulf %228, %229 : vector<128x64xf32>
      %231 = vector.shape_cast %230 : vector<128x64xf32> to vector<8x16x64xf32>
      %c0_103 = arith.constant 0 : index
      %c0_104 = arith.constant 0 : index
      %232 = vector.load %arg7[%c0_103, %c0_104] : memref<16x64xf32, #tpu.memory_space<vmem>>, vector<16x64xf32>
      %233 = vector.shape_cast %232 : vector<16x64xf32> to vector<1x16x64xf32>
      %234 = vector.broadcast %233 : vector<1x16x64xf32> to vector<8x16x64xf32>
      %235 = arith.addf %231, %234 : vector<8x16x64xf32>
      %236 = vector.shape_cast %235 : vector<8x16x64xf32> to vector<128x64xf32>
      %c0_105 = arith.constant 0 : index
      %c0_106 = arith.constant 0 : index
      %237 = vector.load %arg21[%c0_105, %c0_106] : memref<128x64xf32, #tpu.memory_space<vmem>>, vector<128x64xf32>
      tpu.vector_store %arg21[%c0_105, %c0_106], %236 {strides = array<i32>} : memref<128x64xf32, #tpu.memory_space<vmem>>, vector<128x64xf32>,
    } else {
    }
    %c0 = arith.constant 0 : index
    %c0_1 = arith.constant 0 : index
    %3 = vector.load %arg21[%c0, %c0_1] : memref<128x64xf32, #tpu.memory_space<vmem>>, vector<128x64xf32>
    %4 = arith.truncf %3 : vector<128x64xf32> to vector<128x64xbf16>
    %c0_2 = arith.constant 0 : index
    %c0_3 = arith.constant 0 : index
    %c0_4 = arith.constant 0 : index
    %5 = vector.load %arg8[%c0_2, %c0_3, %c0_4] : memref<1x64x192xbf16, #tpu.memory_space<vmem>>, vector<1x64x192xbf16>
    %6 = vector.shape_cast %5 : vector<1x64x192xbf16> to vector<64x192xbf16>
    %cst = arith.constant dense<0.000000e+00> : vector<128x192xf32>
    %7 = tpu.matmul %4, %6, %cst {dimension_numbers = #tpu.dot_dimension_numbers<[1], [0], [0], [1], [0, 0, 1, 1], [], []>} : vector<128x64xbf16>, vector<64x192xbf16>, vector<128x192xf32> -> vector<128x192xf32>
    %c0_5 = arith.constant 0 : index
    %c0_6 = arith.constant 0 : index
    %c0_7 = arith.constant 0 : index
    %8 = vector.load %arg9[%c0_5, %c0_6, %c0_7] : memref<1x1x192xf32, #tpu.memory_space<vmem>>, vector<1x1x192xf32>
    %9 = vector.shape_cast %8 : vector<1x1x192xf32> to vector<1x192xf32>
    %10 = vector.broadcast %9 : vector<1x192xf32> to vector<128x192xf32>
    %11 = arith.addf %7, %10 : vector<128x192xf32>
    %12 = arith.truncf %11 : vector<128x192xf32> to vector<128x192xbf16>
    %c0_8 = arith.constant 0 : index
    %c0_9 = arith.constant 0 : index
    %c0_10 = arith.constant 0 : index
    %13 = vector.load %arg10[%c0_8, %c0_9, %c0_10] : memref<1x64x64xbf16, #tpu.memory_space<vmem>>, vector<1x64x64xbf16>
    %14 = vector.shape_cast %13 : vector<1x64x64xbf16> to vector<64x64xbf16>
    %cst_11 = arith.constant 0.000000e+00 : f32
    %15 = vector.broadcast %cst_11 : f32 to vector<128x64xf32>
    %16 = vector.extract_strided_slice %12 {offsets = [0, 0], sizes = [128, 16], strides = [1, 1]} : vector<128x192xbf16> to vector<128x16xbf16>
    %17 = vector.shape_cast %16 : vector<128x16xbf16> to vector<8x16x16xbf16>
    %18 = vector.extract_strided_slice %12 {offsets = [0, 64], sizes = [128, 16], strides = [1, 1]} : vector<128x192xbf16> to vector<128x16xbf16>
    %19 = vector.shape_cast %18 : vector<128x16xbf16> to vector<8x16x16xbf16>
    %20 = vector.extract_strided_slice %12 {offsets = [0, 128], sizes = [128, 16], strides = [1, 1]} : vector<128x192xbf16> to vector<128x16xbf16>
    %21 = vector.shape_cast %20 : vector<128x16xbf16> to vector<8x16x16xbf16>
    "tpu.trace_start"() <{level = 10 : i32, message = "bld,bmd->blm"}> : () -> ()
    %cst_12 = arith.constant dense<0.000000e+00> : vector<8x16x16xf32>
    %22 = tpu.matmul %17, %19, %cst_12 {dimension_numbers = #tpu.dot_dimension_numbers<[2], [2], [1], [1], [0, 0, 0, 1, 1, 1], [0], [0]>} : vector<8x16x16xbf16>, vector<8x16x16xbf16>, vector<8x16x16xf32> -> vector<8x16x16xf32>
    "tpu.trace_stop"() : () -> ()
    %cst_13 = arith.constant dense<0xFF800000> : vector<8x16xf32>
    %23 = vector.multi_reduction <maximumf>, %22, %cst_13 [2] : vector<8x16x16xf32> to vector<8x16xf32>
    %24 = vector.shape_cast %23 : vector<8x16xf32> to vector<8x16x1xf32>
    %25 = vector.broadcast %24 : vector<8x16x1xf32> to vector<8x16x16xf32>
    %26 = arith.subf %22, %25 : vector<8x16x16xf32>
    %27 = math.exp %26 : vector<8x16x16xf32>
    %cst_14 = arith.constant dense<0.000000e+00> : vector<8x16xf32>
    %28 = vector.multi_reduction <add>, %27, %cst_14 [2] : vector<8x16x16xf32> to vector<8x16xf32>
    %29 = vector.shape_cast %28 : vector<8x16xf32> to vector<8x16x1xf32>
    %30 = tpu.reciprocal %29 {approx = true} : vector<8x16x1xf32> -> vector<8x16x1xf32>
    %31 = vector.broadcast %30 : vector<8x16x1xf32> to vector<8x16x16xf32>
    %32 = arith.mulf %27, %31 : vector<8x16x16xf32>
    %33 = arith.truncf %32 : vector<8x16x16xf32> to vector<8x16x16xbf16>
    "tpu.trace_start"() <{level = 10 : i32, message = "blm,bmd->bld"}> : () -> ()
    %cst_15 = arith.constant dense<0.000000e+00> : vector<8x16x16xf32>
    %34 = tpu.matmul %33, %21, %cst_15 {dimension_numbers = #tpu.dot_dimension_numbers<[2], [1], [1], [2], [0, 0, 0, 1, 1, 2], [0], [0]>} : vector<8x16x16xbf16>, vector<8x16x16xbf16>, vector<8x16x16xf32> -> vector<8x16x16xf32>
    "tpu.trace_stop"() : () -> ()
    %35 = vector.shape_cast %34 : vector<8x16x16xf32> to vector<128x16xf32>
    %36 = arith.truncf %35 : vector<128x16xf32> to vector<128x16xbf16>
    %37 = vector.extract_strided_slice %14 {offsets = [0, 0], sizes = [16, 64], strides = [1, 1]} : vector<64x64xbf16> to vector<16x64xbf16>
    %cst_16 = arith.constant dense<0.000000e+00> : vector<128x64xf32>
    %38 = tpu.matmul %36, %37, %cst_16 {dimension_numbers = #tpu.dot_dimension_numbers<[1], [0], [0], [1], [0, 0, 1, 1], [], []>} : vector<128x16xbf16>, vector<16x64xbf16>, vector<128x64xf32> -> vector<128x64xf32>
    %39 = arith.addf %15, %38 : vector<128x64xf32>
    %40 = vector.extract_strided_slice %12 {offsets = [0, 16], sizes = [128, 16], strides = [1, 1]} : vector<128x192xbf16> to vector<128x16xbf16>
    %41 = vector.shape_cast %40 : vector<128x16xbf16> to vector<8x16x16xbf16>
    %42 = vector.extract_strided_slice %12 {offsets = [0, 80], sizes = [128, 16], strides = [1, 1]} : vector<128x192xbf16> to vector<128x16xbf16>
    %43 = vector.shape_cast %42 : vector<128x16xbf16> to vector<8x16x16xbf16>
    %44 = vector.extract_strided_slice %12 {offsets = [0, 144], sizes = [128, 16], strides = [1, 1]} : vector<128x192xbf16> to vector<128x16xbf16>
    %45 = vector.shape_cast %44 : vector<128x16xbf16> to vector<8x16x16xbf16>
    "tpu.trace_start"() <{level = 10 : i32, message = "bld,bmd->blm"}> : () -> ()
    %cst_17 = arith.constant dense<0.000000e+00> : vector<8x16x16xf32>
    %46 = tpu.matmul %41, %43, %cst_17 {dimension_numbers = #tpu.dot_dimension_numbers<[2], [2], [1], [1], [0, 0, 0, 1, 1, 1], [0], [0]>} : vector<8x16x16xbf16>, vector<8x16x16xbf16>, vector<8x16x16xf32> -> vector<8x16x16xf32>
    "tpu.trace_stop"() : () -> ()
    %cst_18 = arith.constant dense<0xFF800000> : vector<8x16xf32>
    %47 = vector.multi_reduction <maximumf>, %46, %cst_18 [2] : vector<8x16x16xf32> to vector<8x16xf32>
    %48 = vector.shape_cast %47 : vector<8x16xf32> to vector<8x16x1xf32>
    %49 = vector.broadcast %48 : vector<8x16x1xf32> to vector<8x16x16xf32>
    %50 = arith.subf %46, %49 : vector<8x16x16xf32>
    %51 = math.exp %50 : vector<8x16x16xf32>
    %cst_19 = arith.constant dense<0.000000e+00> : vector<8x16xf32>
    %52 = vector.multi_reduction <add>, %51, %cst_19 [2] : vector<8x16x16xf32> to vector<8x16xf32>
    %53 = vector.shape_cast %52 : vector<8x16xf32> to vector<8x16x1xf32>
    %54 = tpu.reciprocal %53 {approx = true} : vector<8x16x1xf32> -> vector<8x16x1xf32>
    %55 = vector.broadcast %54 : vector<8x16x1xf32> to vector<8x16x16xf32>
    %56 = arith.mulf %51, %55 : vector<8x16x16xf32>
    %57 = arith.truncf %56 : vector<8x16x16xf32> to vector<8x16x16xbf16>
    "tpu.trace_start"() <{level = 10 : i32, message = "blm,bmd->bld"}> : () -> ()
    %cst_20 = arith.constant dense<0.000000e+00> : vector<8x16x16xf32>
    %58 = tpu.matmul %57, %45, %cst_20 {dimension_numbers = #tpu.dot_dimension_numbers<[2], [1], [1], [2], [0, 0, 0, 1, 1, 2], [0], [0]>} : vector<8x16x16xbf16>, vector<8x16x16xbf16>, vector<8x16x16xf32> -> vector<8x16x16xf32>
    "tpu.trace_stop"() : () -> ()
    %59 = vector.shape_cast %58 : vector<8x16x16xf32> to vector<128x16xf32>
    %60 = arith.truncf %59 : vector<128x16xf32> to vector<128x16xbf16>
    %61 = vector.extract_strided_slice %14 {offsets = [16, 0], sizes = [16, 64], strides = [1, 1]} : vector<64x64xbf16> to vector<16x64xbf16>
    %cst_21 = arith.constant dense<0.000000e+00> : vector<128x64xf32>
    %62 = tpu.matmul %60, %61, %cst_21 {dimension_numbers = #tpu.dot_dimension_numbers<[1], [0], [0], [1], [0, 0, 1, 1], [], []>} : vector<128x16xbf16>, vector<16x64xbf16>, vector<128x64xf32> -> vector<128x64xf32>
    %63 = arith.addf %39, %62 : vector<128x64xf32>
    %64 = vector.extract_strided_slice %12 {offsets = [0, 32], sizes = [128, 16], strides = [1, 1]} : vector<128x192xbf16> to vector<128x16xbf16>
    %65 = vector.shape_cast %64 : vector<128x16xbf16> to vector<8x16x16xbf16>
    %66 = vector.extract_strided_slice %12 {offsets = [0, 96], sizes = [128, 16], strides = [1, 1]} : vector<128x192xbf16> to vector<128x16xbf16>
    %67 = vector.shape_cast %66 : vector<128x16xbf16> to vector<8x16x16xbf16>
    %68 = vector.extract_strided_slice %12 {offsets = [0, 160], sizes = [128, 16], strides = [1, 1]} : vector<128x192xbf16> to vector<128x16xbf16>
    %69 = vector.shape_cast %68 : vector<128x16xbf16> to vector<8x16x16xbf16>
    "tpu.trace_start"() <{level = 10 : i32, message = "bld,bmd->blm"}> : () -> ()
    %cst_22 = arith.constant dense<0.000000e+00> : vector<8x16x16xf32>
    %70 = tpu.matmul %65, %67, %cst_22 {dimension_numbers = #tpu.dot_dimension_numbers<[2], [2], [1], [1], [0, 0, 0, 1, 1, 1], [0], [0]>} : vector<8x16x16xbf16>, vector<8x16x16xbf16>, vector<8x16x16xf32> -> vector<8x16x16xf32>
    "tpu.trace_stop"() : () -> ()
    %cst_23 = arith.constant dense<0xFF800000> : vector<8x16xf32>
    %71 = vector.multi_reduction <maximumf>, %70, %cst_23 [2] : vector<8x16x16xf32> to vector<8x16xf32>
    %72 = vector.shape_cast %71 : vector<8x16xf32> to vector<8x16x1xf32>
    %73 = vector.broadcast %72 : vector<8x16x1xf32> to vector<8x16x16xf32>
    %74 = arith.subf %70, %73 : vector<8x16x16xf32>
    %75 = math.exp %74 : vector<8x16x16xf32>
    %cst_24 = arith.constant dense<0.000000e+00> : vector<8x16xf32>
    %76 = vector.multi_reduction <add>, %75, %cst_24 [2] : vector<8x16x16xf32> to vector<8x16xf32>
    %77 = vector.shape_cast %76 : vector<8x16xf32> to vector<8x16x1xf32>
    %78 = tpu.reciprocal %77 {approx = true} : vector<8x16x1xf32> -> vector<8x16x1xf32>
    %79 = vector.broadcast %78 : vector<8x16x1xf32> to vector<8x16x16xf32>
    %80 = arith.mulf %75, %79 : vector<8x16x16xf32>
    %81 = arith.truncf %80 : vector<8x16x16xf32> to vector<8x16x16xbf16>
    "tpu.trace_start"() <{level = 10 : i32, message = "blm,bmd->bld"}> : () -> ()
    %cst_25 = arith.constant dense<0.000000e+00> : vector<8x16x16xf32>
    %82 = tpu.matmul %81, %69, %cst_25 {dimension_numbers = #tpu.dot_dimension_numbers<[2], [1], [1], [2], [0, 0, 0, 1, 1, 2], [0], [0]>} : vector<8x16x16xbf16>, vector<8x16x16xbf16>, vector<8x16x16xf32> -> vector<8x16x16xf32>
    "tpu.trace_stop"() : () -> ()
    %83 = vector.shape_cast %82 : vector<8x16x16xf32> to vector<128x16xf32>
    %84 = arith.truncf %83 : vector<128x16xf32> to vector<128x16xbf16>
    %85 = vector.extract_strided_slice %14 {offsets = [32, 0], sizes = [16, 64], strides = [1, 1]} : vector<64x64xbf16> to vector<16x64xbf16>
    %cst_26 = arith.constant dense<0.000000e+00> : vector<128x64xf32>
    %86 = tpu.matmul %84, %85, %cst_26 {dimension_numbers = #tpu.dot_dimension_numbers<[1], [0], [0], [1], [0, 0, 1, 1], [], []>} : vector<128x16xbf16>, vector<16x64xbf16>, vector<128x64xf32> -> vector<128x64xf32>
    %87 = arith.addf %63, %86 : vector<128x64xf32>
    %88 = vector.extract_strided_slice %12 {offsets = [0, 48], sizes = [128, 16], strides = [1, 1]} : vector<128x192xbf16> to vector<128x16xbf16>
    %89 = vector.shape_cast %88 : vector<128x16xbf16> to vector<8x16x16xbf16>
    %90 = vector.extract_strided_slice %12 {offsets = [0, 112], sizes = [128, 16], strides = [1, 1]} : vector<128x192xbf16> to vector<128x16xbf16>
    %91 = vector.shape_cast %90 : vector<128x16xbf16> to vector<8x16x16xbf16>
    %92 = vector.extract_strided_slice %12 {offsets = [0, 176], sizes = [128, 16], strides = [1, 1]} : vector<128x192xbf16> to vector<128x16xbf16>
    %93 = vector.shape_cast %92 : vector<128x16xbf16> to vector<8x16x16xbf16>
    "tpu.trace_start"() <{level = 10 : i32, message = "bld,bmd->blm"}> : () -> ()
    %cst_27 = arith.constant dense<0.000000e+00> : vector<8x16x16xf32>
    %94 = tpu.matmul %89, %91, %cst_27 {dimension_numbers = #tpu.dot_dimension_numbers<[2], [2], [1], [1], [0, 0, 0, 1, 1, 1], [0], [0]>} : vector<8x16x16xbf16>, vector<8x16x16xbf16>, vector<8x16x16xf32> -> vector<8x16x16xf32>
    "tpu.trace_stop"() : () -> ()
    %cst_28 = arith.constant dense<0xFF800000> : vector<8x16xf32>
    %95 = vector.multi_reduction <maximumf>, %94, %cst_28 [2] : vector<8x16x16xf32> to vector<8x16xf32>
    %96 = vector.shape_cast %95 : vector<8x16xf32> to vector<8x16x1xf32>
    %97 = vector.broadcast %96 : vector<8x16x1xf32> to vector<8x16x16xf32>
    %98 = arith.subf %94, %97 : vector<8x16x16xf32>
    %99 = math.exp %98 : vector<8x16x16xf32>
    %cst_29 = arith.constant dense<0.000000e+00> : vector<8x16xf32>
    %100 = vector.multi_reduction <add>, %99, %cst_29 [2] : vector<8x16x16xf32> to vector<8x16xf32>
    %101 = vector.shape_cast %100 : vector<8x16xf32> to vector<8x16x1xf32>
    %102 = tpu.reciprocal %101 {approx = true} : vector<8x16x1xf32> -> vector<8x16x1xf32>
    %103 = vector.broadcast %102 : vector<8x16x1xf32> to vector<8x16x16xf32>
    %104 = arith.mulf %99, %103 : vector<8x16x16xf32>
    %105 = arith.truncf %104 : vector<8x16x16xf32> to vector<8x16x16xbf16>
    "tpu.trace_start"() <{level = 10 : i32, message = "blm,bmd->bld"}> : () -> ()
    %cst_30 = arith.constant dense<0.000000e+00> : vector<8x16x16xf32>
    %106 = tpu.matmul %105, %93, %cst_30 {dimension_numbers = #tpu.dot_dimension_numbers<[2], [1], [1], [2], [0, 0, 0, 1, 1, 2], [0], [0]>} : vector<8x16x16xbf16>, vector<8x16x16xbf16>, vector<8x16x16xf32> -> vector<8x16x16xf32>
    "tpu.trace_stop"() : () -> ()
    %107 = vector.shape_cast %106 : vector<8x16x16xf32> to vector<128x16xf32>
    %108 = arith.truncf %107 : vector<128x16xf32> to vector<128x16xbf16>
    %109 = vector.extract_strided_slice %14 {offsets = [48, 0], sizes = [16, 64], strides = [1, 1]} : vector<64x64xbf16> to vector<16x64xbf16>
    %cst_31 = arith.constant dense<0.000000e+00> : vector<128x64xf32>
    %110 = tpu.matmul %108, %109, %cst_31 {dimension_numbers = #tpu.dot_dimension_numbers<[1], [0], [0], [1], [0, 0, 1, 1], [], []>} : vector<128x16xbf16>, vector<16x64xbf16>, vector<128x64xf32> -> vector<128x64xf32>
    %111 = arith.addf %87, %110 : vector<128x64xf32>
    %112 = arith.addf %3, %111 : vector<128x64xf32>
    %c0_32 = arith.constant 0 : index
    %c0_33 = arith.constant 0 : index
    %c0_34 = arith.constant 0 : index
    %113 = vector.load %arg11[%c0_32, %c0_33, %c0_34] : memref<1x1x64xf32, #tpu.memory_space<vmem>>, vector<1x1x64xf32>
    %114 = vector.shape_cast %113 : vector<1x1x64xf32> to vector<1x64xf32>
    %115 = vector.broadcast %114 : vector<1x64xf32> to vector<128x64xf32>
    %116 = arith.addf %112, %115 : vector<128x64xf32>
    %c0_35 = arith.constant 0 : index
    %c0_36 = arith.constant 0 : index
    %c0_37 = arith.constant 0 : index
    %117 = vector.load %arg16[%c0_35, %c0_36, %c0_37] : memref<1x1x64xf32, #tpu.memory_space<vmem>>, vector<1x1x64xf32>
    %118 = vector.shape_cast %117 : vector<1x1x64xf32> to vector<1x64xf32>
    %119 = vector.broadcast %118 : vector<1x64xf32> to vector<128x64xf32>
    %120 = arith.mulf %116, %119 : vector<128x64xf32>
    %c0_38 = arith.constant 0 : index
    %c0_39 = arith.constant 0 : index
    %c0_40 = arith.constant 0 : index
    %121 = vector.load %arg17[%c0_38, %c0_39, %c0_40] : memref<1x1x64xf32, #tpu.memory_space<vmem>>, vector<1x1x64xf32>
    %122 = vector.shape_cast %121 : vector<1x1x64xf32> to vector<1x64xf32>
    %123 = vector.broadcast %122 : vector<1x64xf32> to vector<128x64xf32>
    %124 = arith.addf %120, %123 : vector<128x64xf32>
    %125 = arith.truncf %124 : vector<128x64xf32> to vector<128x64xbf16>
    %c0_41 = arith.constant 0 : index
    %c0_42 = arith.constant 0 : index
    %c0_43 = arith.constant 0 : index
    %126 = vector.load %arg12[%c0_41, %c0_42, %c0_43] : memref<1x64x128xbf16, #tpu.memory_space<vmem>>, vector<1x64x128xbf16>
    %127 = vector.shape_cast %126 : vector<1x64x128xbf16> to vector<64x128xbf16>
    %cst_44 = arith.constant dense<0.000000e+00> : vector<128x128xf32>
    %128 = tpu.matmul %125, %127, %cst_44 {dimension_numbers = #tpu.dot_dimension_numbers<[1], [0], [0], [1], [0, 0, 1, 1], [], []>} : vector<128x64xbf16>, vector<64x128xbf16>, vector<128x128xf32> -> vector<128x128xf32>
    %c0_45 = arith.constant 0 : index
    %c0_46 = arith.constant 0 : index
    %c0_47 = arith.constant 0 : index
    %129 = vector.load %arg13[%c0_45, %c0_46, %c0_47] : memref<1x1x128xf32, #tpu.memory_space<vmem>>, vector<1x1x128xf32>
    %130 = vector.shape_cast %129 : vector<1x1x128xf32> to vector<1x128xf32>
    %131 = vector.broadcast %130 : vector<1x128xf32> to vector<128x128xf32>
    %132 = arith.addf %128, %131 : vector<128x128xf32>
    %cst_48 = arith.constant 5.000000e-01 : f32
    %133 = vector.broadcast %cst_48 : f32 to vector<128x128xf32>
    %134 = arith.mulf %133, %132 : vector<128x128xf32>
    %cst_49 = arith.constant 0.707106769 : f32
    %135 = vector.broadcast %cst_49 : f32 to vector<128x128xf32>
    %136 = arith.mulf %132, %135 : vector<128x128xf32>
    %137 = math.erf %136 : vector<128x128xf32>
    %cst_50 = arith.constant 1.000000e+00 : f32
    %138 = vector.broadcast %cst_50 : f32 to vector<128x128xf32>
    %139 = arith.addf %138, %137 : vector<128x128xf32>
    %140 = arith.mulf %134, %139 : vector<128x128xf32>
    %141 = arith.truncf %140 : vector<128x128xf32> to vector<128x128xbf16>
    %c0_51 = arith.constant 0 : index
    %c0_52 = arith.constant 0 : index
    %c0_53 = arith.constant 0 : index
    %142 = vector.load %arg14[%c0_51, %c0_52, %c0_53] : memref<1x128x64xbf16, #tpu.memory_space<vmem>>, vector<1x128x64xbf16>
    %143 = vector.shape_cast %142 : vector<1x128x64xbf16> to vector<128x64xbf16>
    %cst_54 = arith.constant dense<0.000000e+00> : vector<128x64xf32>
    %144 = tpu.matmul %141, %143, %cst_54 {dimension_numbers = #tpu.dot_dimension_numbers<[1], [0], [0], [1], [0, 0, 1, 1], [], []>} : vector<128x128xbf16>, vector<128x64xbf16>, vector<128x64xf32> -> vector<128x64xf32>
    %145 = arith.addf %124, %144 : vector<128x64xf32>
    %c0_55 = arith.constant 0 : index
    %c0_56 = arith.constant 0 : index
    %c0_57 = arith.constant 0 : index
    %146 = vector.load %arg15[%c0_55, %c0_56, %c0_57] : memref<1x1x64xf32, #tpu.memory_space<vmem>>, vector<1x1x64xf32>
    %147 = vector.shape_cast %146 : vector<1x1x64xf32> to vector<1x64xf32>
    %148 = vector.broadcast %147 : vector<1x64xf32> to vector<128x64xf32>
    %149 = arith.addf %145, %148 : vector<128x64xf32>
    %c0_58 = arith.constant 0 : index
    %c0_59 = arith.constant 0 : index
    %c0_60 = arith.constant 0 : index
    %150 = vector.load %arg18[%c0_58, %c0_59, %c0_60] : memref<1x1x64xf32, #tpu.memory_space<vmem>>, vector<1x1x64xf32>
    %151 = vector.shape_cast %150 : vector<1x1x64xf32> to vector<1x64xf32>
    %152 = vector.broadcast %151 : vector<1x64xf32> to vector<128x64xf32>
    %153 = arith.mulf %149, %152 : vector<128x64xf32>
    %c0_61 = arith.constant 0 : index
    %c0_62 = arith.constant 0 : index
    %c0_63 = arith.constant 0 : index
    %154 = vector.load %arg19[%c0_61, %c0_62, %c0_63] : memref<1x1x64xf32, #tpu.memory_space<vmem>>, vector<1x1x64xf32>
    %155 = vector.shape_cast %154 : vector<1x1x64xf32> to vector<1x64xf32>
    %156 = vector.broadcast %155 : vector<1x64xf32> to vector<128x64xf32>
    %157 = arith.addf %153, %156 : vector<128x64xf32>
    %c0_64 = arith.constant 0 : index
    %c0_65 = arith.constant 0 : index
    %158 = vector.load %arg21[%c0_64, %c0_65] : memref<128x64xf32, #tpu.memory_space<vmem>>, vector<128x64xf32>
    tpu.vector_store %arg21[%c0_64, %c0_65], %157 {strides = array<i32>} : memref<128x64xf32, #tpu.memory_space<vmem>>, vector<128x64xf32>,
    %c1_i32 = arith.constant 1 : i32
    %159 = arith.cmpi eq, %arg1, %c1_i32 : i32
    %160 = arith.extui %159 : i1 to i32
    %c0_i32_66 = arith.constant 0 : i32
    %161 = arith.cmpi ne, %160, %c0_i32_66 : i32
    scf.if %161 {
      %cst_67 = arith.constant 5.000000e-01 : f32
      %162 = vector.broadcast %cst_67 : f32 to vector<128x64xf32>
      %163 = arith.mulf %162, %157 : vector<128x64xf32>
      %cst_68 = arith.constant 0.707106769 : f32
      %164 = vector.broadcast %cst_68 : f32 to vector<128x64xf32>
      %165 = arith.mulf %157, %164 : vector<128x64xf32>
      %166 = math.erf %165 : vector<128x64xf32>
      %cst_69 = arith.constant 1.000000e+00 : f32
      %167 = vector.broadcast %cst_69 : f32 to vector<128x64xf32>
      %168 = arith.addf %167, %166 : vector<128x64xf32>
      %169 = arith.mulf %163, %168 : vector<128x64xf32>
      %170 = arith.truncf %169 : vector<128x64xf32> to vector<128x64xbf16>
      %c0_70 = arith.constant 0 : index
      %c0_71 = arith.constant 0 : index
      %171 = vector.load %arg20[%c0_70, %c0_71] : memref<128x64xbf16, #tpu.memory_space<vmem>>, vector<128x64xbf16>
      tpu.vector_store %arg20[%c0_70, %c0_71], %170 {strides = array<i32>} : memref<128x64xbf16, #tpu.memory_space<vmem>>, vector<128x64xbf16>,
    } else {
    }
    return
  }
  func.func @transform_0(%arg0: i32, %arg1: i32) -> (i32, i32) {
    %c0_i32 = arith.constant 0 : i32
    %c0_i32_0 = arith.constant 0 : i32
    return %arg0, %c0_i32 : i32, i32
  }
  func.func @transform_1(%arg0: i32, %arg1: i32) -> (i32, i32, i32) {
    %c0_i32 = arith.constant 0 : i32
    %c0_i32_0 = arith.constant 0 : i32
    %c0_i32_1 = arith.constant 0 : i32
    %c0_i32_2 = arith.constant 0 : i32
    return %c0_i32, %c0_i32_0, %c0_i32_1 : i32, i32, i32
  }
  func.func @transform_2(%arg0: i32, %arg1: i32) -> (i32, i32) {
    %c0_i32 = arith.constant 0 : i32
    %c0_i32_0 = arith.constant 0 : i32
    %c0_i32_1 = arith.constant 0 : i32
    return %c0_i32, %c0_i32_0 : i32, i32
  }
  func.func @transform_3(%arg0: i32, %arg1: i32) -> (i32, i32, i32) {
    %c0_i32 = arith.constant 0 : i32
    %c0_i32_0 = arith.constant 0 : i32
    %c0_i32_1 = arith.constant 0 : i32
    %c0_i32_2 = arith.constant 0 : i32
    return %c0_i32, %c0_i32_0, %c0_i32_1 : i32, i32, i32
  }
  func.func @transform_4(%arg0: i32, %arg1: i32) -> (i32, i32) {
    %c0_i32 = arith.constant 0 : i32
    %c0_i32_0 = arith.constant 0 : i32
    %c0_i32_1 = arith.constant 0 : i32
    return %c0_i32, %c0_i32_0 : i32, i32
  }
  func.func @transform_5(%arg0: i32, %arg1: i32) -> (i32, i32) {
    %c0_i32 = arith.constant 0 : i32
    %c0_i32_0 = arith.constant 0 : i32
    %c0_i32_1 = arith.constant 0 : i32
    return %c0_i32, %c0_i32_0 : i32, i32
  }
  func.func @transform_6(%arg0: i32, %arg1: i32) -> (i32, i32, i32) {
    %c0_i32 = arith.constant 0 : i32
    %c0_i32_0 = arith.constant 0 : i32
    %c0_i32_1 = arith.constant 0 : i32
    return %arg1, %c0_i32, %c0_i32_0 : i32, i32, i32
  }
  func.func @transform_7(%arg0: i32, %arg1: i32) -> (i32, i32, i32) {
    %c0_i32 = arith.constant 0 : i32
    %c0_i32_0 = arith.constant 0 : i32
    %c0_i32_1 = arith.constant 0 : i32
    return %arg1, %c0_i32, %c0_i32_0 : i32, i32, i32
  }
  func.func @transform_8(%arg0: i32, %arg1: i32) -> (i32, i32, i32) {
    %c0_i32 = arith.constant 0 : i32
    %c0_i32_0 = arith.constant 0 : i32
    %c0_i32_1 = arith.constant 0 : i32
    return %arg1, %c0_i32, %c0_i32_0 : i32, i32, i32
  }
  func.func @transform_9(%arg0: i32, %arg1: i32) -> (i32, i32, i32) {
    %c0_i32 = arith.constant 0 : i32
    %c0_i32_0 = arith.constant 0 : i32
    %c0_i32_1 = arith.constant 0 : i32
    return %arg1, %c0_i32, %c0_i32_0 : i32, i32, i32
  }
  func.func @transform_10(%arg0: i32, %arg1: i32) -> (i32, i32, i32) {
    %c0_i32 = arith.constant 0 : i32
    %c0_i32_0 = arith.constant 0 : i32
    %c0_i32_1 = arith.constant 0 : i32
    return %arg1, %c0_i32, %c0_i32_0 : i32, i32, i32
  }
  func.func @transform_11(%arg0: i32, %arg1: i32) -> (i32, i32, i32) {
    %c0_i32 = arith.constant 0 : i32
    %c0_i32_0 = arith.constant 0 : i32
    %c0_i32_1 = arith.constant 0 : i32
    return %arg1, %c0_i32, %c0_i32_0 : i32, i32, i32
  }
  func.func @transform_12(%arg0: i32, %arg1: i32) -> (i32, i32, i32) {
    %c0_i32 = arith.constant 0 : i32
    %c0_i32_0 = arith.constant 0 : i32
    %c0_i32_1 = arith.constant 0 : i32
    return %arg1, %c0_i32, %c0_i32_0 : i32, i32, i32
  }
  func.func @transform_13(%arg0: i32, %arg1: i32) -> (i32, i32, i32) {
    %c0_i32 = arith.constant 0 : i32
    %c0_i32_0 = arith.constant 0 : i32
    %c0_i32_1 = arith.constant 0 : i32
    return %arg1, %c0_i32, %c0_i32_0 : i32, i32, i32
  }
  func.func @transform_14(%arg0: i32, %arg1: i32) -> (i32, i32, i32) {
    %c0_i32 = arith.constant 0 : i32
    %c0_i32_0 = arith.constant 0 : i32
    %c0_i32_1 = arith.constant 0 : i32
    return %arg1, %c0_i32, %c0_i32_0 : i32, i32, i32
  }
  func.func @transform_15(%arg0: i32, %arg1: i32) -> (i32, i32, i32) {
    %c0_i32 = arith.constant 0 : i32
    %c0_i32_0 = arith.constant 0 : i32
    %c0_i32_1 = arith.constant 0 : i32
    return %arg1, %c0_i32, %c0_i32_0 : i32, i32, i32
  }
  func.func @transform_16(%arg0: i32, %arg1: i32) -> (i32, i32, i32) {
    %c0_i32 = arith.constant 0 : i32
    %c0_i32_0 = arith.constant 0 : i32
    %c0_i32_1 = arith.constant 0 : i32
    return %arg1, %c0_i32, %c0_i32_0 : i32, i32, i32
  }
  func.func @transform_17(%arg0: i32, %arg1: i32) -> (i32, i32, i32) {
    %c0_i32 = arith.constant 0 : i32
    %c0_i32_0 = arith.constant 0 : i32
    %c0_i32_1 = arith.constant 0 : i32
    return %arg1, %c0_i32, %c0_i32_0 : i32, i32, i32
  }
  func.func @transform_18(%arg0: i32, %arg1: i32) -> (i32, i32) {
    %c0_i32 = arith.constant 0 : i32
    %c0_i32_0 = arith.constant 0 : i32
    return %arg0, %c0_i32 : i32, i32
  }
}

module attributes {stable_mosaic.version = 11 : i64} {
  func.func @_head_kernel(%arg0: i32, %arg1: memref<16x1024xbf16, #tpu.memory_space<vmem>>, %arg2: memref<1024x32xbf16, #tpu.memory_space<vmem>>, %arg3: memref<1x32xf32, #tpu.memory_space<vmem>>, %arg4: memref<32x3xbf16, #tpu.memory_space<vmem>>, %arg5: memref<1x3xf32, #tpu.memory_space<vmem>>, %arg6: memref<16x3xf32, #tpu.memory_space<vmem>>) attributes {dimension_semantics = [#tpu.dimension_semantics<arbitrary>], iteration_bounds = array<i64: 1>, scalar_prefetch = 0 : i64, scratch_operands = 0 : i64, tpu.core_type = #tpu.core_type<tc>, window_params = [{pipeline_mode = #tpu.pipeline_mode<synchronous>, transform_indices = @transform_0, window_bounds = array<i64: 16, 1024>}, {pipeline_mode = #tpu.pipeline_mode<synchronous>, transform_indices = @transform_1, window_bounds = array<i64: 1024, 32>}, {pipeline_mode = #tpu.pipeline_mode<synchronous>, transform_indices = @transform_2, window_bounds = array<i64: 1, 32>}, {pipeline_mode = #tpu.pipeline_mode<synchronous>, transform_indices = @transform_3, window_bounds = array<i64: 32, 3>}, {pipeline_mode = #tpu.pipeline_mode<synchronous>, transform_indices = @transform_4, window_bounds = array<i64: 1, 3>}, {pipeline_mode = #tpu.pipeline_mode<synchronous>, transform_indices = @transform_5, window_bounds = array<i64: 16, 3>}]} {
    %c0 = arith.constant 0 : index
    %c0_0 = arith.constant 0 : index
    %0 = vector.load %arg1[%c0, %c0_0] : memref<16x1024xbf16, #tpu.memory_space<vmem>>, vector<16x1024xbf16>
    %c0_1 = arith.constant 0 : index
    %c0_2 = arith.constant 0 : index
    %1 = vector.load %arg2[%c0_1, %c0_2] : memref<1024x32xbf16, #tpu.memory_space<vmem>>, vector<1024x32xbf16>
    %cst = arith.constant dense<0.000000e+00> : vector<16x32xf32>
    %2 = tpu.matmul %0, %1, %cst {dimension_numbers = #tpu.dot_dimension_numbers<[1], [0], [0], [1], [0, 0, 1, 1], [], []>} : vector<16x1024xbf16>, vector<1024x32xbf16>, vector<16x32xf32> -> vector<16x32xf32>
    %c0_3 = arith.constant 0 : index
    %c0_4 = arith.constant 0 : index
    %3 = vector.load %arg3[%c0_3, %c0_4] : memref<1x32xf32, #tpu.memory_space<vmem>>, vector<1x32xf32>
    %4 = vector.broadcast %3 : vector<1x32xf32> to vector<16x32xf32>
    %5 = arith.addf %2, %4 : vector<16x32xf32>
    %cst_5 = arith.constant 0.000000e+00 : f32
    %6 = vector.broadcast %cst_5 : f32 to vector<16x32xf32>
    %7 = arith.maximumf %5, %6 : vector<16x32xf32>
    %8 = arith.truncf %7 : vector<16x32xf32> to vector<16x32xbf16>
    %c0_6 = arith.constant 0 : index
    %c0_7 = arith.constant 0 : index
    %9 = vector.load %arg4[%c0_6, %c0_7] : memref<32x3xbf16, #tpu.memory_space<vmem>>, vector<32x3xbf16>
    %cst_8 = arith.constant dense<0.000000e+00> : vector<16x3xf32>
    %10 = tpu.matmul %8, %9, %cst_8 {dimension_numbers = #tpu.dot_dimension_numbers<[1], [0], [0], [1], [0, 0, 1, 1], [], []>} : vector<16x32xbf16>, vector<32x3xbf16>, vector<16x3xf32> -> vector<16x3xf32>
    %c0_9 = arith.constant 0 : index
    %c0_10 = arith.constant 0 : index
    %11 = vector.load %arg5[%c0_9, %c0_10] : memref<1x3xf32, #tpu.memory_space<vmem>>, vector<1x3xf32>
    %12 = vector.broadcast %11 : vector<1x3xf32> to vector<16x3xf32>
    %13 = arith.addf %10, %12 : vector<16x3xf32>
    %c0_11 = arith.constant 0 : index
    %c0_12 = arith.constant 0 : index
    %14 = vector.load %arg6[%c0_11, %c0_12] : memref<16x3xf32, #tpu.memory_space<vmem>>, vector<16x3xf32>
    tpu.vector_store %arg6[%c0_11, %c0_12], %13 {strides = array<i32>} : memref<16x3xf32, #tpu.memory_space<vmem>>, vector<16x3xf32>,
    return
  }
  func.func @transform_0(%arg0: i32) -> (i32, i32) {
    %c0_i32 = arith.constant 0 : i32
    %c0_i32_0 = arith.constant 0 : i32
    %c0_i32_1 = arith.constant 0 : i32
    return %c0_i32, %c0_i32_0 : i32, i32
  }
  func.func @transform_1(%arg0: i32) -> (i32, i32) {
    %c0_i32 = arith.constant 0 : i32
    %c0_i32_0 = arith.constant 0 : i32
    %c0_i32_1 = arith.constant 0 : i32
    return %c0_i32, %c0_i32_0 : i32, i32
  }
  func.func @transform_2(%arg0: i32) -> (i32, i32) {
    %c0_i32 = arith.constant 0 : i32
    %c0_i32_0 = arith.constant 0 : i32
    %c0_i32_1 = arith.constant 0 : i32
    return %c0_i32, %c0_i32_0 : i32, i32
  }
  func.func @transform_3(%arg0: i32) -> (i32, i32) {
    %c0_i32 = arith.constant 0 : i32
    %c0_i32_0 = arith.constant 0 : i32
    %c0_i32_1 = arith.constant 0 : i32
    return %c0_i32, %c0_i32_0 : i32, i32
  }
  func.func @transform_4(%arg0: i32) -> (i32, i32) {
    %c0_i32 = arith.constant 0 : i32
    %c0_i32_0 = arith.constant 0 : i32
    %c0_i32_1 = arith.constant 0 : i32
    return %c0_i32, %c0_i32_0 : i32, i32
  }
  func.func @transform_5(%arg0: i32) -> (i32, i32) {
    %c0_i32 = arith.constant 0 : i32
    %c0_i32_0 = arith.constant 0 : i32
    %c0_i32_1 = arith.constant 0 : i32
    return %c0_i32, %c0_i32_0 : i32, i32
  }
}

</mosaic_0001>

<bundles_post_ra>
// kernel: transformer_forward.3
= control target key start
LH: loop header
LB: loop body
LE: loop exit
PB: predicated region body
PF: predicated region fallthrough
CT: control target
= control target key end

     0   :  { %vm1075_vm0 = vmmov 0   ;;  %vm778_vm1 = vcmask 261120   ;;  %vm823_vm2 = vcmask 23552   ;;  %s1340_s1 = inlined_call_operand.vmem [shape: bf16[1024,32], index: 1, kind: input, shape index: {}]   ;;  %s1341_s0 = inlined_call_operand.vmem [shape: bf16[16,1024], index: 0, kind: input, shape index: {}]   ;;  %s1342_s3 = inlined_call_operand.vmem [shape: bf16[32,3], index: 3, kind: input, shape index: {}]   ;;  %s1343_s2 = inlined_call_operand.vmem [shape: f32[1,32], index: 2, kind: input, shape index: {}]   ;;  %s1344_s4 = inlined_call_operand.vmem [shape: f32[1,3], index: 4, kind: input, shape index: {}]   ;;  %s1345_s5 = inlined_call_operand.vmem [shape: f32[16,3], index: 5, kind: output, shape index: {}]  }
   0x1   :  { %v1008_v0 = vld [vmem:[%s1340_s1 + $0x78] sm:$0xff]   ;;  %v1012_v4 = vld [vmem:[%s1340_s1 + $0x70] sm:$0xff]   ;;  %v1016_v8 = vld [vmem:[%s1340_s1 + $0x68] sm:$0xff]  }
   0x2   :  { %v1009_v1 = vld [vmem:[%s1340_s1 + $0xf8] sm:$0xff]   ;;  %907 = vmatprep.subr.bf16.mxu0 %v1008_v0  ;;  %v1013_v5 = vld [vmem:[%s1340_s1 + $0xf0] sm:$0xff]   ;;  %v1017_v9 = vld [vmem:[%s1340_s1 + $0xe8] sm:$0xff]  }
   0x3   :  { %v1010_v2 = vld [vmem:[%s1340_s1 + $0x38] sm:$0xff]   ;;  %929 = vmatprep.subr.bf16.mxu1 %v1009_v1  ;;  %v1014_v6 = vld [vmem:[%s1340_s1 + $0x30] sm:$0xff]   ;;  %v1018_v10 = vld [vmem:[%s1340_s1 + $0x28] sm:$0xff]  }
   0x4   :  { %v1011_v3 = vld [vmem:[%s1340_s1 + $0xb8] sm:$0xff]   ;;  %908 = vmatpush3.bf16.msra.mxu0 %v1010_v2  ;;  %v1015_v7 = vld [vmem:[%s1340_s1 + $0xb0] sm:$0xff]   ;;  %v1019_v11 = vld [vmem:[%s1340_s1 + $0xa8] sm:$0xff]  }
   0x5   :  { %930 = vmatpush3.bf16.msra.mxu1 %v1011_v3  ;;  %909 = vmatprep.subr.bf16.mxu0 %v1012_v4  ;;  %v1020_v12 = vld [vmem:[%s1340_s1 + $0x60] sm:$0xff]   ;;  %v1024_v16 = vld [vmem:[%s1340_s1 + $0x58] sm:$0xff]   ;;  %v1028_v20 = vld [vmem:[%s1340_s1 + $0x50] sm:$0xff]  }
   0x6   :  { %931 = vmatprep.subr.bf16.mxu1 %v1013_v5  ;;  %v1021_v13 = vld [vmem:[%s1340_s1 + $0xe0] sm:$0xff]   ;;  %v1025_v17 = vld [vmem:[%s1340_s1 + $0xd8] sm:$0xff]   ;;  %v1029_v21 = vld [vmem:[%s1340_s1 + $0xd0] sm:$0xff]  }
   0x7   :  { %v1022_v14 = vld [vmem:[%s1340_s1 + $0x20] sm:$0xff]   ;;  %v1026_v18 = vld [vmem:[%s1340_s1 + $0x18] sm:$0xff]   ;;  %v1030_v22 = vld [vmem:[%s1340_s1 + $0x10] sm:$0xff]  }
   0x8   :  { %910 = vmatpush3.bf16.msra.mxu0 %v1014_v6  ;;  %v1023_v15 = vld [vmem:[%s1340_s1 + $0xa0] sm:$0xff]   ;;  %v1027_v19 = vld [vmem:[%s1340_s1 + $0x98] sm:$0xff]   ;;  %v1031_v23 = vld [vmem:[%s1340_s1 + $0x90] sm:$0xff]  }
   0x9   :  { %932 = vmatpush3.bf16.msra.mxu1 %v1015_v7  ;;  %911 = vmatprep.subr.bf16.mxu0 %v1016_v8  ;;  %v1032_v24 = vld [vmem:[%s1340_s1 + $0x48] sm:$0xff]   ;;  %v1036_v28 = vld [vmem:[%s1340_s1 + $0x40] sm:$0xff]   ;;  %v1040_v40 = vld [vmem:[%s1340_s1 + $0x178] sm:$0xff]  }
   0xa   :  { %933 = vmatprep.subr.bf16.mxu1 %v1017_v9  ;;  %v1033_v25 = vld [vmem:[%s1340_s1 + $0xc8] sm:$0xff]   ;;  %v1037_v29 = vld [vmem:[%s1340_s1 + $0xc0] sm:$0xff]   ;;  %v1041_v41 = vld [vmem:[%s1340_s1 + $0x1f8] sm:$0xff]  }
   0xb   :  { %v1034_v26 = vld [vmem:[%s1340_s1 + $0x8] sm:$0xff]   ;;  %v1038_v30 = vld [vmem:[%s1340_s1] sm:$0xff]   ;;  %v1042_v42 = vld [vmem:[%s1340_s1 + $0x138] sm:$0xff]  }
   0xc   :  { %912 = vmatpush3.bf16.msra.mxu0 %v1018_v10  ;;  %v1035_v27 = vld [vmem:[%s1340_s1 + $0x88] sm:$0xff]   ;;  %v1039_v31 = vld [vmem:[%s1340_s1 + $0x80] sm:$0xff]   ;;  %v1043_v43 = vld [vmem:[%s1340_s1 + $0x1b8] sm:$0xff]  }
   0xd   :  { %934 = vmatpush3.bf16.msra.mxu1 %v1019_v11  ;;  %913 = vmatprep.subr.bf16.mxu0 %v1020_v12  ;;  %v21_v32 = vld [vmem:[%s1341_s0] sm:$0xff]  ;;  %v22_v34 = vld [vmem:[%s1341_s0 + $0x8] sm:$0xff]  ;;  %v1044_v44 = vld [vmem:[%s1340_s1 + $0x170] sm:$0xff]  }
   0xe   :  { %935 = vmatprep.subr.bf16.mxu1 %v1021_v13  ;;  %v25_v33 = vld [vmem:[%s1341_s0 + $0x20] sm:$0xff]  ;;  %v26_v37 = vld [vmem:[%s1341_s0 + $0x28] sm:$0xff]  ;;  %v1045_v45 = vld [vmem:[%s1340_s1 + $0x1f0] sm:$0xff]  }
   0xf   :  { %v831_v35 = vcombine.low %v21_v32, %v25_v33  ;;  %v832_v36 = vcombine.high %v21_v32, %v25_v33  ;;  %v833_v38 = vcombine.low %v22_v34, %v26_v37  ;;  %v834_v39 = vcombine.high %v22_v34, %v26_v37  ;;  %v1046_v46 = vld [vmem:[%s1340_s1 + $0x130] sm:$0xff]   ;;  %v1048_v48 = vld [vmem:[%s1340_s1 + $0x168] sm:$0xff]   ;;  %v1052_v52 = vld [vmem:[%s1340_s1 + $0x160] sm:$0xff]  }
  0x10   :  { %914 = vmatpush3.bf16.msra.mxu0 %v1022_v14  ;;  %v1047_v47 = vld [vmem:[%s1340_s1 + $0x1b0] sm:$0xff]   ;;  %v1049_v49 = vld [vmem:[%s1340_s1 + $0x1e8] sm:$0xff]   ;;  %v1053_v53 = vld [vmem:[%s1340_s1 + $0x1e0] sm:$0xff]  }
  0x11   :  { %936 = vmatpush3.bf16.msra.mxu1 %v1023_v15  ;;  %915 = vmatprep.subr.bf16.mxu0 %v1024_v16  ;;  %v1050_v50 = vld [vmem:[%s1340_s1 + $0x128] sm:$0xff]   ;;  %v1054_v54 = vld [vmem:[%s1340_s1 + $0x120] sm:$0xff]   ;;  %v1056_v56 = vld [vmem:[%s1340_s1 + $0x158] sm:$0xff]  }
  0x12   :  { %937 = vmatprep.subr.bf16.mxu1 %v1025_v17  ;;  %620 = vmatprep.mubr.bf16.mxu0 %v832_v36  ;;  %v1051_v51 = vld [vmem:[%s1340_s1 + $0x1a8] sm:$0xff]   ;;  %v1055_v55 = vld [vmem:[%s1340_s1 + $0x1a0] sm:$0xff]   ;;  %v1057_v57 = vld [vmem:[%s1340_s1 + $0x1d8] sm:$0xff]   ;;  %v1074_v17 = vmov 0.0  }
  0x13   :  { %661 = vmatprep.mubr.bf16.mxu1 %v834_v39  ;;  %v1058_v58 = vld [vmem:[%s1340_s1 + $0x118] sm:$0xff]   ;;  %v1060_v60 = vld [vmem:[%s1340_s1 + $0x150] sm:$0xff]   ;;  %v1064_v0 = vld [vmem:[%s1340_s1 + $0x148] sm:$0xff]  }
  0x14   :  { %916 = vmatpush3.bf16.msra.mxu0 %v1026_v18  ;;  %v1059_v59 = vld [vmem:[%s1340_s1 + $0x198] sm:$0xff]   ;;  %v1061_v61 = vld [vmem:[%s1340_s1 + $0x1d0] sm:$0xff]   ;;  %v1065_v1 = vld [vmem:[%s1340_s1 + $0x1c8] sm:$0xff]  }
  0x15   :  { %938 = vmatpush3.bf16.msra.mxu1 %v1027_v19  ;;  %917 = vmatprep.subr.bf16.mxu0 %v1028_v20  ;;  %v1062_v62 = vld [vmem:[%s1340_s1 + $0x110] sm:$0xff]   ;;  %v1066_v2 = vld [vmem:[%s1340_s1 + $0x108] sm:$0xff]   ;;  %v1068_v4 = vld [vmem:[%s1340_s1 + $0x140] sm:$0xff]  }
  0x16   :  { %939 = vmatprep.subr.bf16.mxu1 %v1029_v21  ;;  %v1063_v63 = vld [vmem:[%s1340_s1 + $0x190] sm:$0xff]   ;;  %v1067_v3 = vld [vmem:[%s1340_s1 + $0x188] sm:$0xff]   ;;  %v1069_v5 = vld [vmem:[%s1340_s1 + $0x1c0] sm:$0xff]  }
  0x17   :  { %v1070_v6 = vld [vmem:[%s1340_s1 + $0x100] sm:$0xff]   ;;  %v23_v8 = vld [vmem:[%s1341_s0 + $0x10] sm:$0xff]  ;;  %v24_v12 = vld [vmem:[%s1341_s0 + $0x18] sm:$0xff] }
  0x18   :  { %918 = vmatpush3.bf16.msra.mxu0 %v1030_v22  ;;  %v1071_v7 = vld [vmem:[%s1340_s1 + $0x180] sm:$0xff]   ;;  %v27_v9 = vld [vmem:[%s1341_s0 + $0x30] sm:$0xff]  ;;  %v28_v13 = vld [vmem:[%s1341_s0 + $0x38] sm:$0xff] }
  0x19   :  { %940 = vmatpush3.bf16.msra.mxu1 %v1031_v23  ;;  %919 = vmatprep.subr.bf16.mxu0 %v1032_v24  ;;  %v835_v10 = vcombine.low %v23_v8, %v27_v9  ;;  %v836_v11 = vcombine.high %v23_v8, %v27_v9  ;;  %v837_v14 = vcombine.low %v24_v12, %v28_v13  ;;  %v1072_v16 = vld [vmem:[%s1342_s3 + $0x8] sm:$0xff]   ;;  %v1073_v18 = vld [vmem:[%s1342_s3] sm:$0xff]  }
  0x1a   :  { %941 = vmatprep.subr.bf16.mxu1 %v1033_v25  ;;  %v838_v15 = vcombine.high %v24_v12, %v28_v13 }
  0x1c   :  { %920 = vmatpush3.bf16.msra.mxu0 %v1034_v26  ;;  %v830_v26 = vld [vmem:[%s1343_s2] ss:$0 sm:$0xff] }
  0x1d   :  { %942 = vmatpush3.bf16.msra.mxu1 %v1035_v27  ;;  %921 = vmatprep.subr.bf16.mxu0 %v1036_v28 }
  0x1e   :  { %943 = vmatprep.subr.bf16.mxu1 %v1037_v29 }
  0x20   :  { %922 = vmatpush3.bf16.msra.mxu0 %v1038_v30 }
  0x21   :  { %944 = vmatpush3.bf16.msra.mxu1 %v1039_v31  ;;  %951 = vmatprep.subr.bf16.mxu0 %v1040_v40 }
  0x22   :  { %973 = vmatprep.subr.bf16.mxu1 %v1041_v41 }
  0x23   :  { %621 = vmatmul.mubr.bf16.vlgmr.msra.gmra.mxu0 %v831_v35 }
  0x24   :  { %662 = vmatmul.mubr.bf16.vlgmr.msra.gmra.mxu1 %v833_v38  ;;  %952 = vmatpush3.bf16.msra.mxu0 %v1042_v42 }
  0x25   :  { %974 = vmatpush3.bf16.msra.mxu1 %v1043_v43  ;;  %953 = vmatprep.subr.bf16.mxu0 %v1044_v44 }
  0x26   :  { %975 = vmatprep.subr.bf16.mxu1 %v1045_v45  ;;  %702 = vmatprep.mubr.bf16.mxu0 %v836_v11 }
  0x27   :  { %743 = vmatprep.mubr.bf16.mxu1 %v838_v15 }
  0x28   :  { %954 = vmatpush3.bf16.msra.mxu0 %v1046_v46 }
  0x29   :  { %976 = vmatpush3.bf16.msra.mxu1 %v1047_v47  ;;  %955 = vmatprep.subr.bf16.mxu0 %v1048_v48 }
  0x2a   :  { %977 = vmatprep.subr.bf16.mxu1 %v1049_v49 }
  0x2c   :  { %956 = vmatpush3.bf16.msra.mxu0 %v1050_v50 }
  0x2d   :  { %978 = vmatpush3.bf16.msra.mxu1 %v1051_v51  ;;  %957 = vmatprep.subr.bf16.mxu0 %v1052_v52 }
  0x2e   :  { %979 = vmatprep.subr.bf16.mxu1 %v1053_v53 }
  0x30   :  { %958 = vmatpush3.bf16.msra.mxu0 %v1054_v54 }
  0x31   :  { %980 = vmatpush3.bf16.msra.mxu1 %v1055_v55  ;;  %959 = vmatprep.subr.bf16.mxu0 %v1056_v56  ;;  %v903_v55 = vld [vmem:[%s1344_s4] ss:$0 sm:$0xff] }
  0x32   :  { %981 = vmatprep.subr.bf16.mxu1 %v1057_v57 }
  0x34   :  { %960 = vmatpush3.bf16.msra.mxu0 %v1058_v58 }
  0x35   :  { %982 = vmatpush3.bf16.msra.mxu1 %v1059_v59  ;;  %961 = vmatprep.subr.bf16.mxu0 %v1060_v60 }
  0x36   :  { %983 = vmatprep.subr.bf16.mxu1 %v1061_v61 }
  0x38   :  { %962 = vmatpush3.bf16.msra.mxu0 %v1062_v62 }
  0x39   :  { %984 = vmatpush3.bf16.msra.mxu1 %v1063_v63  ;;  %963 = vmatprep.subr.bf16.mxu0 %v1064_v0 }
  0x3a   :  { %985 = vmatprep.subr.bf16.mxu1 %v1065_v1 }
  0x3c   :  { %964 = vmatpush3.bf16.msra.mxu0 %v1066_v2 }
  0x3d   :  { %986 = vmatpush3.bf16.msra.mxu1 %v1067_v3  ;;  %965 = vmatprep.subr.bf16.mxu0 %v1068_v4 }
  0x3e   :  { %987 = vmatprep.subr.bf16.mxu1 %v1069_v5 }
  0x40   :  { %966 = vmatpush3.bf16.msra.mxu0 %v1070_v6 }
  0x41   :  { %988 = vmatpush3.bf16.msra.mxu1 %v1071_v7  ;;  %998 = vmatprep.subr.bf16.mxu0 %v1074_v17 }
  0x43   :  { %703 = vmatmul.mubr.bf16.vlgmr.msra.gmra.mxu0 %v835_v10 }
  0x44   :  { %744 = vmatmul.mubr.bf16.vlgmr.msra.gmra.mxu1 %v837_v14  ;;  %999 = vmatpush3.bf16.msra.mxu0 %v1072_v16 }
  0x45   :  { %1000 = vmatprep.subr.bf16.mxu0 %v1074_v17  ;;  %1002 = vmatprep.mubr.msk.bf16.mxu0 %vm1075_vm0, %v1074_v17 }
  0x48   :  { %1001 = vmatpush3.bf16.msra.mxu0 %v1073_v18 }
  0xe3   :  { %v923_v19 = vpop.f32.mrf.mxu0 }
  0xe4   :  { %v945_v20 = vpop.f32.mrf.mxu1 }
  0xe5   :  { %v924_v21 = vpop.f32.mrf.mxu0 }
  0xe6   :  { %v946_v22 = vpop.f32.mrf.mxu1  ;;  %v925_v24 = vadd.f32 %v924_v21, %v923_v19 }
  0xe7   :  { %v926_v23 = vpop.f32.mrf.mxu0  ;;  %v947_v29 = vadd.f32 %v946_v22, %v945_v20 }
  0xe8   :  { %v948_v25 = vpop.f32.mrf.mxu1  ;;  %v623_v28 = vadd.f32 %v925_v24, %v830_v26 }
  0xe9   :  { %v927_v27 = vpop.f32.mrf.mxu0 }
  0xea   :  { %v928_v30 = vadd.f32 %v927_v27, %v926_v23  ;;  %v949_v31 = vpop.f32.mrf.mxu1  ;;  %v664_v35 = vadd.f32 %v947_v29, %v623_v28 }
  0xeb   :  { %v950_v40 = vadd.f32 %v949_v31, %v948_v25 }
  0xec   :  { %v626_v36 = vadd.f32 %v928_v30, %v830_v26 }
  0xee   :  { %v667_v44 = vadd.f32 %v950_v40, %v626_v36 }
 0x103   :  { %v967_v32 = vpop.f32.mrf.mxu0 }
 0x104   :  { %v989_v33 = vpop.f32.mrf.mxu1 }
 0x105   :  { %v968_v34 = vpop.f32.mrf.mxu0 }
 0x106   :  { %v969_v37 = vadd.f32 %v968_v34, %v967_v32  ;;  %v990_v38 = vpop.f32.mrf.mxu1 }
 0x107   :  { %v970_v39 = vpop.f32.mrf.mxu0  ;;  %v991_v45 = vadd.f32 %v990_v38, %v989_v33 }
 0x108   :  { %v705_v41 = vadd.f32 %v969_v37, %v664_v35  ;;  %v992_v42 = vpop.f32.mrf.mxu1 }
 0x109   :  { %v971_v43 = vpop.f32.mrf.mxu0 }
 0x10a   :  { %v972_v46 = vadd.f32 %v971_v43, %v970_v39  ;;  %v993_v47 = vpop.f32.mrf.mxu1  ;;  %v746_v48 = vadd.f32 %v991_v45, %v705_v41 }
 0x10b   :  { %v994_v50 = vadd.f32 %v993_v47, %v992_v42 }
 0x10c   :  { %v708_v49 = vadd.f32 %v972_v46, %v667_v44  ;;  %v752_v52 = vmax.f32 %v746_v48, 0.0 }
 0x10e   :  { %v749_v51 = vadd.f32 %v994_v50, %v708_v49 }
 0x110   :  { %v753_v53 = vmax.f32 %v749_v51, 0.0 }
 0x112   :  { %v754_v54 = vpack.c.bf16 %v753_v53, %v752_v52 }
 0x114   :  { %1003 = vmatmul.mubr.msk.bf16.vlgmr.msra.gmra.mxu0 %vm778_vm1, %v754_v54 }
 0x1d4   :  { %v816_v56 = vpop.f32.mrf.mxu0 }
 0x1d5   :  { %v817_v57 = vadd.f32 %v903_v55, %v816_v56 }
 0x1d6   :  { %v1004_v58 = vpop.f32.mrf.mxu0 }
 0x1d7   :  { %824 = vst.msk [vmem:[%s1345_s5] sm:$0xff] %vm823_vm2, %v817_v57 }
 0x1d8   :  { %v819_v59 = vpop.f32.mrf.mxu0 }
 0x1d9   :  { %v820_v60 = vadd.f32 %v903_v55, %v819_v59 }
 0x1da   :  { %v1005_v61 = vpop.f32.mrf.mxu0 }
 0x1db   :  { %825 = vst.msk [vmem:[%s1345_s5 + $0x8] sm:$0xff] %vm823_vm2, %v820_v60 }

// kernel: transformer_forward.2
= control target key start
LH: loop header
LB: loop body
LE: loop exit
PB: predicated region body
PF: predicated region fallthrough
CT: control target
= control target key end

     0   :  { %s13367_s0 = inlined_call_operand.vmem [shape: f32[256,4], index: 0, kind: input, shape index: {}]   ;;  %s13368_s1 = inlined_call_operand.hbm [shape: bf16[3,4,128], index: 1, kind: input, shape index: {}]   ;;  %s13369_s2 = inlined_call_operand.hbm [shape: f32[1,128], index: 2, kind: input, shape index: {}]   ;;  %s13370_s3 = inlined_call_operand.vmem [shape: bf16[3,128,64], index: 3, kind: input, shape index: {}]   ;;  %s13371_s4 = inlined_call_operand.hbm [shape: f32[1,64], index: 4, kind: input, shape index: {}]   ;;  %s13372_s5 = inlined_call_operand.vmem [shape: f32[16,64], index: 5, kind: input, shape index: {}]   ;;  %s13373_s6 = inlined_call_operand.hbm [shape: bf16[2,64,192], index: 6, kind: input, shape index: {}]   ;;  %s13374_s7 = inlined_call_operand.hbm [shape: f32[2,1,192], index: 7, kind: input, shape index: {}]   ;;  %s13375_s8 = inlined_call_operand.hbm [shape: bf16[2,64,64], index: 8, kind: input, shape index: {}]   ;;  %s13376_s9 = inlined_call_operand.hbm [shape: f32[2,1,64], index: 9, kind: input, shape index: {}]   ;;  %s13377_s10 = inlined_call_operand.hbm [shape: bf16[2,64,128], index: 10, kind: input, shape index: {}]   ;;  %s13378_s11 = inlined_call_operand.hbm [shape: f32[2,1,128], index: 11, kind: input, shape index: {}]   ;;  %s13379_s12 = inlined_call_operand.vmem [shape: bf16[2,128,64], index: 12, kind: input, shape index: {}]   ;;  %s13380_s13 = inlined_call_operand.hbm [shape: f32[2,1,64], index: 13, kind: input, shape index: {}]   ;;  %s13381_s14 = inlined_call_operand.hbm [shape: f32[2,1,64], index: 14, kind: input, shape index: {}]   ;;  %s13382_s15 = inlined_call_operand.hbm [shape: f32[2,1,64], index: 15, kind: input, shape index: {}]   ;;  %s13383_s16 = inlined_call_operand.hbm [shape: f32[2,1,64], index: 16, kind: input, shape index: {}]   ;;  %s13384_s17 = inlined_call_operand.hbm [shape: f32[2,1,64], index: 17, kind: input, shape index: {}]   ;;  %s13385_s18 = inlined_call_operand.vmem [shape: bf16[256,64], index: 18, kind: output, shape index: {}]  }
   0x1   :  { %13416 = sst [smem:[#allocation64_spill]] %s13367_s0 }
   0x2   :  { %13417 = sst [smem:[#allocation65_spill]] %s13368_s1 }
   0x3   :  { %13418 = sst [smem:[#allocation66_spill]] %s13369_s2 }
   0x4   :  { %13419 = sst [smem:[#allocation67_spill]] %s13370_s3 }
   0x5   :  { %13420 = sst [smem:[#allocation68_spill]] %s13371_s4 }
   0x6   :  { %13421 = sst [smem:[#allocation69_spill]] %s13372_s5 }
   0x7   :  { %13422 = sst [smem:[#allocation70_spill]] %s13373_s6 }
   0x8   :  { %13423 = sst [smem:[#allocation71_spill]] %s13375_s8 }
   0x9   :  { %13424 = sst [smem:[#allocation72_spill]] %s13379_s12 }
   0xa   :  { %13425 = sst [smem:[#allocation73_spill]] %s13381_s14 }
   0xb   :  { %13426 = sst [smem:[#allocation74_spill]] %s13383_s16 }
   0xc   :  { %13427 = sst [smem:[#allocation75_spill]] %s13384_s17 }
   0xd   :  { %13428 = sst [smem:[#allocation76_spill]] %s13385_s18 }
   0xe   :  { %23 = vsyncpa [#allocation4], 0 }
   0xf   :  { %24 = vsyncpa [#allocation6], 0 }
  0x10   :  { %25 = vsyncpa [#allocation9], 0 }
  0x11   :  { %27 = vsyncpa [#allocation9 + $0x1], 0 }
  0x12   :  { %28 = vsyncpa [#allocation12], 0 }
  0x13   :  { %30 = vsyncpa [#allocation12 + $0x1], 0 }
  0x14   :  { %31 = vsyncpa [#allocation15], 0 }
  0x15   :  { %33 = vsyncpa [#allocation15 + $0x1], 0 }
  0x16   :  { %34 = vsyncpa [#allocation18], 0 }
  0x17   :  { %36 = vsyncpa [#allocation18 + $0x1], 0 }
  0x18   :  { %37 = vsyncpa [#allocation21], 0 }
  0x19   :  { %39 = vsyncpa [#allocation21 + $0x1], 0 }
  0x1a   :  { %40 = vsyncpa [#allocation24], 0 }
  0x1b   :  { %42 = vsyncpa [#allocation24 + $0x1], 0  ;;  %s10629_s27 = smov 0   ;;  %s10631_s28 = smov 0  }
  0x1c   :  { %s10633_s29 = smov 0   ;;  %s10635_s30 = smov 0  }
  0x1d   :  { %s10637_s0 = smov 0   ;;  %s10639_s19 = smov 0  }
  0x1e   :  { %s10641_s1 = smov 0   ;;  %s10643_s20 = smov 0  }
  0x1f LB: > { %13429 = sst [smem:[#allocation33_spill]] %s10477_s28  ;;  %s13386_s21 = sadd.s32 4294967295, %s10501_s20   ;;  %s10501_s20 = sphi %s10643_s20, %s48_s20   ;;  %s10497_s1 = sphi %s10641_s1, %s13541_s1   ;;  %s10493_s19 = sphi %s10639_s19, %s13543_s19   ;;  %s10489_s0 = sphi %s10637_s0, %s13539_s0   ;;  %s10485_s30 = sphi %s10635_s30, %s13542_s30   ;;  %s10481_s29 = sphi %s10633_s29, %s13538_s29   ;;  %s10477_s28 = sphi %s10631_s28, %s13537_s28   ;;  %s10473_s27 = sphi %s10629_s27, %s13536_s27  }
  0x20   : > { %13430 = sst [smem:[#allocation34_spill]] %s10481_s29  ;;  %p205_p0 = scmp.ne.s32.totalorder %s10481_s29, %s10477_s28 }
  0x21   : > { %13431 = sst [smem:[#allocation35_spill]] %s10485_s30  ;;  %p206_p1 = scmp.eq.s32.totalorder %s10501_s20, 0 }
  0x22   : > { %13432 = sst [smem:[#allocation36_spill]] %s10489_s0  ;;  %p211_p2 = scmp.ne.s32.totalorder %s10477_s28, %s10473_s27 }
  0x23   : > { %13433 = sst [smem:[#allocation37_spill]] %s10497_s1  ;;  %p10675_p3 = scmp.eq.s32.totalorder %s13386_s21, 0 }
  0x24   : > { %13434 = sst [smem:[#allocation38_spill]] %s10501_s20  ;;  %p207_p4 = por %p206_p1, %p205_p0 }
  0x25   : > { %s13435_s2 = scalar_select %p10675_p3, 1, 0 }
  0x26   : > { %p8164_p5 = scmp.ge.s32.totalorder %s10501_s20, 1  ;;  %p10682_p6 = por %p10675_p3, %p211_p2 }
  0x27   : > { %13436 = sst [smem:[#allocation39_spill]] %s13435_s2  ;;  %p534_p7 = scmp.lt.s32.totalorder %s10501_s20, 5 }
  0x28   : > { %s13437_s23 = scalar_select %p10682_p6, 1, 0 }
  0x29   : > { %p10687_p8 = pnand %p8164_p5, %p534_p7  ;;  %s10503_s25 = smov [#allocation5]  }
  0x2a   : > { %13438 = sst [smem:[#allocation40_spill]] %s13437_s23  ;;  %s560_s26 = sshll.u32 %s10503_s25, 4  ;;  %s561_s26 = int_to_ptr.vmem [resolvable:$true] %s560_s26 }
  0x2b   : > { %s13439_s24 = scalar_select %p10687_p8, 1, 0 }
  0x2c   : > { %p9498_p9 = pneg %p10687_p8  ;;  %p9545_p10 = scmp.lt.s32.totalorder %s10501_s20, 4 }
  0x2d   : > { %13440 = sst [smem:[#allocation41_spill]] %s13439_s24  ;;  %s10695_s27 = sand.u32 1, %s10481_s29  }
  0x2e   : > { %p10699_p11 = pnand %p9498_p9, %p10675_p3  ;;  %p10703_p12 = pnand %p9545_p10, %p207_p4 }
  0x2f   : > { %s10032_s25 = scalar_lea.vmem %s561_s26, 16  ;;  %s10039_s5 = scalar_lea.vmem %s561_s26, 32 }
  0x30   : > { %p10023_p13 = pneg %p10699_p11  ;;  %p10033_p0 = scmp.ne.s32.totalorder %s561_s26, %s10032_s25 }
  0x31   : > { %p10040_p5 = scmp.lt.s32.totalorder %s561_s26, %s561_s26  ;;  %p10041_p7 = scmp.lt.s32.totalorder %s10039_s5, %s10032_s25 }
  0x32   : > { %p10035_p1 = pnand %p10033_p0, %p10023_p13 }
  0x33   : > { %p10042_p9 = por %p10041_p7, %p10040_p5 }
  0x34   : > { %p10036_p2 = pneg %p10035_p1 }
  0x36   : > { %p10043_p6 = pnand %p10042_p9, %p10036_p2 }
  0x38   : > { %10046 = shalt.err (!%p10043_p6)
}
  0x39   : > { %s13443_s12 = sld [smem:[#allocation66_spill]]  ;;  %s57_s30 = sadd.s32 1, %s10493_s19 }
  0x3a   : > { %p58_p4 = scmp.ge.s32.totalorder %s57_s30, 2  ;;  %s60_s5 = sadd.s32 1, %s10497_s1 }
  0x3b   : > { %s10720_s25 = sand.u32 1, %s10501_s20   ;;  %s8169_s0 = sshll.u32 %s10695_s27, 6 }
  0x3c   : > { %s13545_s30 = smov (%p58_p4, %s57_s30), 0  ;;  %s13547_s5 = smov (!%p58_p4, %s60_s5), %s10497_s1 }
  0x3d   : > { %13444 = sst [smem:[#allocation42_spill]] %s13545_s30  ;;  %s195_s3 = ssub.s32 %s10493_s19, %s13545_s30 }
  0x3e   : > { %p62_p6 = scmp.ge.s32.totalorder %s13547_s5, 2  ;;  %p196_p10 = scmp.eq.s32.totalorder %s195_s3, 0 }
  0x3f   : > { %9504 = dma.hbm_to_vmem [thread:$0]  (!%p10699_p11), %s13443_s12, 16, %s561_s26, [#allocation6]  }
  0x40   : > { %s8511_s18 = sshll.u32 %s10493_s19, 10  ;;  %s13549_s5 = smov (%p62_p6, %s13547_s5), 0 }
  0x41   : > { %13445 = sst [smem:[#allocation43_spill]] %s13549_s5  ;;  %s13446_s23 = sadd.s32 1, %s10481_s29 }
  0x42   : > { %s10734_s12 = scalar_select %p196_p10, %s10481_s29, %s13446_s23  }
  0x43   : > { %s13448_s6 = sld [smem:[#allocation70_spill]]  ;;  %s601_s2 = scalar_lea.vmem [#allocation8], %s8169_s0 }
  0x44   : > { %13447 = sst [smem:[#allocation44_spill]] %s10734_s12  ;;  %s608_s24 = sshll.u32 %s601_s2, 4  ;;  %s609_s24 = int_to_ptr.vmem [resolvable:$true] %s608_s24 }
  0x45   : > { %s13403_s17 = scalar_lea.sflag [#allocation9], %s10720_s25  ;;  %p10742_p0 = pneg %p10703_p12 }
  0x46   : > { %s10060_s3 = scalar_lea.vmem %s609_s24, 1024  ;;  %s10504_s23 = smov [#allocation8]  }
  0x47   : > { %p10061_p1 = scmp.ne.s32.totalorder %s609_s24, %s10060_s3  ;;  %s10065_s5 = sshll.u32 %s10504_s23, 4  ;;  %s10066_s5 = int_to_ptr.vmem [resolvable:$false] %s10065_s5 }
  0x48   : > { %s10067_s28 = scalar_lea.vmem %s10066_s5, 2048  ;;  %p10068_p7 = scmp.lt.s32.totalorder %s609_s24, %s10066_s5 }
  0x49   : > { %s607_s20 = scalar_lea.hbm %s13448_s6, %s8511_s18  ;;  %p10063_p2 = pnand %p10061_p1, %p10742_p0 }
  0x4a   : > { %p10069_p9 = scmp.lt.s32.totalorder %s10067_s28, %s10060_s3 }
  0x4b   : > { %p10064_p5 = pneg %p10063_p2 }
  0x4c   : > { %p10070_p4 = por %p10069_p9, %p10068_p7 }
  0x4e   : > { %p10071_p6 = pnand %p10070_p4, %p10064_p5 }
  0x50   : > { %10074 = shalt.err (!%p10071_p6)
}
  0x51   : > { %s10505_s0 = smov 128   ;;  %s10506_s2 = smov 8  }
  0x52   : > { %9511 = dma.hbm_to_vmem [thread:$0]  (!%p10703_p12), %s607_s20, 1024, %s609_s24, %s13403_s17, %s10505_s0, %s10505_s0, %s10506_s2  }
  0x53   : > { %s8175_s18 = sshll.u32 %s10695_s27, 5  ;;  %s8513_s26 = sshll.u32 %s10493_s19, 9 }
  0x54   : > { %s13450_s8 = sld [smem:[#allocation71_spill]]  ;;  %s641_s3 = scalar_lea.vmem [#allocation11], %s8175_s18 }
  0x55   : > { %s648_s28 = sshll.u32 %s641_s3, 4  ;;  %s638_s30 = scalar_lea.sflag [#allocation12], %s10720_s25  ;;  %s649_s28 = int_to_ptr.vmem [resolvable:$true] %s648_s28 }
  0x56   : > { %s10088_s12 = scalar_lea.vmem %s649_s28, 512  ;;  %s10507_s29 = smov [#allocation11]  }
  0x57   : > { %p10089_p10 = scmp.ne.s32.totalorder %s649_s28, %s10088_s12  ;;  %s10093_s16 = sshll.u32 %s10507_s29, 4  ;;  %s10094_s16 = int_to_ptr.vmem [resolvable:$false] %s10093_s16 }
  0x58   : > { %s10095_s14 = scalar_lea.vmem %s10094_s16, 1024  ;;  %p10096_p5 = scmp.lt.s32.totalorder %s649_s28, %s10094_s16 }
  0x59   : > { %p10091_p1 = pnand %p10089_p10, %p10742_p0  ;;  %p10097_p7 = scmp.lt.s32.totalorder %s10095_s14, %s10088_s12 }
  0x5a   : > { %s647_s5 = scalar_lea.hbm %s13450_s8, %s8513_s26 }
  0x5b   : > { %p10092_p2 = pneg %p10091_p1  ;;  %p10098_p9 = por %p10097_p7, %p10096_p5 }
  0x5d   : > { %p10099_p4 = pnand %p10098_p9, %p10092_p2 }
  0x5f   : > { %10102 = shalt.err (!%p10099_p4)
}
  0x60   : > { %s10508_s6 = smov 64   ;;  %s10509_s20 = smov 4  }
  0x61   : > { %9517 = dma.hbm_to_vmem [thread:$0]  (!%p10703_p12), %s647_s5, 512, %s649_s28, %s638_s30, %s10508_s6, %s10508_s6, %s10509_s20  }
  0x62   : > { %s685_s29 = scalar_lea.hbm %s13377_s10, %s8513_s26  ;;  %s679_s2 = scalar_lea.vmem [#allocation14], %s8175_s18 }
  0x63   : > { %s686_s16 = sshll.u32 %s679_s2, 4  ;;  %s10768_s14 = sshll.u32 %s10493_s19, 4  ;;  %s687_s16 = int_to_ptr.vmem [resolvable:$true] %s686_s16 }
  0x64   : > { %s676_s12 = scalar_lea.sflag [#allocation15], %s10720_s25  ;;  %s10116_s23 = scalar_lea.vmem %s687_s16, 512 }
  0x65   : > { %p10117_p6 = scmp.ne.s32.totalorder %s687_s16, %s10116_s23  ;;  %s10510_s3 = smov [#allocation14]  }
  0x66   : > { %s10121_s17 = sshll.u32 %s10510_s3, 4  ;;  %s10122_s17 = int_to_ptr.vmem [resolvable:$false] %s10121_s17 }
  0x67   : > { %p10119_p10 = pnand %p10117_p6, %p10742_p0  ;;  %s10123_s8 = scalar_lea.vmem %s10122_s17, 1024 }
  0x68   : > { %p10124_p2 = scmp.lt.s32.totalorder %s687_s16, %s10122_s17  ;;  %p10125_p5 = scmp.lt.s32.totalorder %s10123_s8, %s10116_s23 }
  0x69   : > { %p10120_p1 = pneg %p10119_p10 }
  0x6a   : > { %p10126_p7 = por %p10125_p5, %p10124_p2 }
  0x6c   : > { %p10127_p9 = pnand %p10126_p7, %p10120_p1 }
  0x6e   : > { %10130 = shalt.err (!%p10127_p9)
}
  0x6f   : > { %9523 = dma.hbm_to_vmem [thread:$0]  (!%p10703_p12), %s685_s29, 512, %s687_s16, %s676_s12, %s10508_s6, %s10508_s6, %s10509_s20  }
  0x70   : > { %s729_s5 = scalar_lea.hbm %s13380_s13, %s10768_s14  ;;  %s724_s28 = scalar_lea.vmem [#allocation17], %s10695_s27 }
  0x71   : > { %s731_s24 = sshll.u32 %s724_s28, 4  ;;  %s722_s8 = scalar_lea.sflag [#allocation18], %s10720_s25  ;;  %s732_s24 = int_to_ptr.vmem [resolvable:$true] %s731_s24 }
  0x72   : > { %s10144_s17 = scalar_lea.vmem %s732_s24, 16  ;;  %s10511_s0 = smov [#allocation17]  }
  0x73   : > { %p10145_p4 = scmp.ne.s32.totalorder %s732_s24, %s10144_s17  ;;  %s10149_s2 = sshll.u32 %s10511_s0, 4  ;;  %s10150_s2 = int_to_ptr.vmem [resolvable:$false] %s10149_s2 }
  0x74   : > { %s10151_s23 = scalar_lea.vmem %s10150_s2, 32  ;;  %p10152_p1 = scmp.lt.s32.totalorder %s732_s24, %s10150_s2 }
  0x75   : > { %p10147_p6 = pnand %p10145_p4, %p10742_p0  ;;  %p10153_p2 = scmp.lt.s32.totalorder %s10151_s23, %s10144_s17 }
  0x77   : > { %p10148_p10 = pneg %p10147_p6  ;;  %p10154_p5 = por %p10153_p2, %p10152_p1 }
  0x79   : > { %p10155_p7 = pnand %p10154_p5, %p10148_p10 }
  0x7b   : > { %10158 = shalt.err (!%p10155_p7)
}
  0x7c   : > { %9529 = dma.hbm_to_vmem [thread:$0]  (!%p10703_p12), %s729_s5, 16, %s732_s24, %s722_s8  }
  0x7d   : > { %s763_s29 = scalar_lea.hbm %s13382_s15, %s10768_s14  ;;  %s758_s16 = scalar_lea.vmem [#allocation20], %s10695_s27 }
  0x7e   : > { %s765_s3 = sshll.u32 %s758_s16, 4  ;;  %s756_s18 = scalar_lea.sflag [#allocation21], %s10720_s25  ;;  %s766_s3 = int_to_ptr.vmem [resolvable:$true] %s765_s3 }
  0x7f   : > { %s10172_s26 = scalar_lea.vmem %s766_s3, 16  ;;  %s10512_s28 = smov [#allocation20]  }
  0x80   : > { %p10173_p9 = scmp.ne.s32.totalorder %s766_s3, %s10172_s26  ;;  %s10177_s17 = sshll.u32 %s10512_s28, 4  ;;  %s10178_s17 = int_to_ptr.vmem [resolvable:$false] %s10177_s17 }
  0x81   : > { %s10179_s0 = scalar_lea.vmem %s10178_s17, 32  ;;  %p10180_p10 = scmp.lt.s32.totalorder %s766_s3, %s10178_s17 }
  0x82   : > { %p10175_p4 = pnand %p10173_p9, %p10742_p0  ;;  %p10181_p1 = scmp.lt.s32.totalorder %s10179_s0, %s10172_s26 }
  0x84   : > { %p10176_p6 = pneg %p10175_p4  ;;  %p10182_p2 = por %p10181_p1, %p10180_p10 }
  0x86   : > { %p10183_p5 = pnand %p10182_p2, %p10176_p6 }
  0x88   : > { %10186 = shalt.err (!%p10183_p5)
}
  0x89   : > { %9535 = dma.hbm_to_vmem [thread:$0]  (!%p10703_p12), %s763_s29, 16, %s766_s3, %s756_s18  }
  0x8a   : > { %s10513_s5 = smov [#allocation3]  }
  0x8b   : > { %s546_s24 = sshll.u32 %s10513_s5, 4  ;;  %s547_s24 = int_to_ptr.vmem [resolvable:$true] %s546_s24 }
  0x8c   : > { %s10198_s2 = scalar_lea.vmem %s547_s24, 96  ;;  %p10206_p3 = scmp.lt.s32.totalorder %s547_s24, %s547_s24 }
  0x8d   : > { %p10199_p7 = scmp.ne.s32.totalorder %s547_s24, %s10198_s2  ;;  %p10207_p8 = scmp.lt.s32.totalorder %s10198_s2, %s10198_s2 }
  0x8f   : > { %p10201_p9 = pnand %p10199_p7, %p10023_p13  ;;  %p10208_p10 = por %p10207_p8, %p10206_p3 }
  0x91   : > { %p10202_p4 = pneg %p10201_p9 }
  0x93   : > { %p10209_p6 = pnand %p10208_p10, %p10202_p4 }
  0x95   : > { %10212 = shalt.err (!%p10209_p6)
}
  0x96   : > { %s10514_s23 = smov 32   ;;  %s10515_s6 = smov 2  }
  0x97   : > { %s13451_s16 = sld [smem:[#allocation65_spill]]  ;;  %s10516_s3 = smov [#allocation7]  }
  0x98   : > { %s574_s26 = sshll.u32 %s10516_s3, 4  ;;  %s8172_s28 = sshll.u32 %s10695_s27, 1  ;;  %s575_s26 = int_to_ptr.vmem [resolvable:$true] %s574_s26 }
  0x99   : > { %s10224_s17 = scalar_lea.vmem %s575_s26, 16  ;;  %s10231_s0 = scalar_lea.vmem %s575_s26, 32 }
  0x9a   : > { %p10225_p1 = scmp.ne.s32.totalorder %s575_s26, %s10224_s17  ;;  %p10232_p2 = scmp.lt.s32.totalorder %s575_s26, %s575_s26 }
  0x9b   : > { %p10233_p5 = scmp.lt.s32.totalorder %s10231_s0, %s10224_s17 }
  0x9c   : > { %p10227_p3 = pnand %p10225_p1, %p10023_p13 }
  0x9d   : > { %9501 = dma.hbm_to_vmem [thread:$0]  (!%p10699_p11), %s13451_s16, 96, %s547_s24, [#allocation4], %s10514_s23, %s10514_s23, %s10515_s6  }
  0x9e   : > { %p10228_p8 = pneg %p10227_p3  ;;  %p10234_p7 = por %p10233_p5, %p10232_p2 }
  0xa0   : > { %p10235_p9 = pnand %p10234_p7, %p10228_p8 }
  0xa2   : > { %10238 = shalt.err (!%p10235_p9)
}
  0xa3   : > { %s13452_s4 = sld [smem:[#allocation68_spill]]  ;;  %s8512_s2 = sshll.u32 %s10493_s19, 5 }
  0xa4   : > { %s622_s23 = scalar_lea.vmem [#allocation10], %s8172_s28  ;;  %s628_s16 = scalar_lea.hbm %s13374_s7, %s8512_s2 }
  0xa5   : > { %s630_s6 = sshll.u32 %s622_s23, 4  ;;  %s10517_s21 = smov [#allocation10]   ;;  %s631_s6 = int_to_ptr.vmem [resolvable:$true] %s630_s6 }
  0xa6   : > { %s10252_s3 = scalar_lea.vmem %s631_s6, 32  ;;  %s10257_s17 = sshll.u32 %s10517_s21, 4  ;;  %s10258_s17 = int_to_ptr.vmem [resolvable:$false] %s10257_s17 }
  0xa7   : > { %p10253_p13 = scmp.ne.s32.totalorder %s631_s6, %s10252_s3  ;;  %s10259_s0 = scalar_lea.vmem %s10258_s17, 64 }
  0xa8   : > { %p10260_p6 = scmp.lt.s32.totalorder %s631_s6, %s10258_s17  ;;  %p10261_p1 = scmp.lt.s32.totalorder %s10259_s0, %s10252_s3 }
  0xa9   : > { %9507 = dma.hbm_to_vmem [thread:$0]  (!%p10699_p11), %s13452_s4, 16, %s575_s26, [#allocation6]  }
  0xaa   : > { %p10255_p4 = pnand %p10253_p13, %p10742_p0  ;;  %p10262_p11 = por %p10261_p1, %p10260_p6 }
  0xac   : > { %p10256_p10 = pneg %p10255_p4 }
  0xae   : > { %p10263_p3 = pnand %p10262_p11, %p10256_p10 }
  0xb0   : > { %10266 = shalt.err (!%p10263_p3)
}
  0xb1   : > { %s13453_s26 = scalar_lea.sflag [#allocation9], %s10720_s25  ;;  %s666_s24 = scalar_lea.hbm %s13376_s9, %s10768_s14 }
  0xb2   : > { %9514 = dma.hbm_to_vmem [thread:$0]  (!%p10703_p12), %s628_s16, 32, %s631_s6, %s13453_s26  }
  0xb3   : > { %s661_s2 = scalar_lea.vmem [#allocation13], %s10695_s27  ;;  %s704_s3 = scalar_lea.hbm %s13378_s11, %s10768_s14 }
  0xb4   : > { %s668_s23 = sshll.u32 %s661_s2, 4  ;;  %s10518_s17 = smov [#allocation13]   ;;  %s669_s23 = int_to_ptr.vmem [resolvable:$true] %s668_s23 }
  0xb5   : > { %s10280_s21 = scalar_lea.vmem %s669_s23, 16  ;;  %s10285_s0 = sshll.u32 %s10518_s17, 4  ;;  %s10286_s0 = int_to_ptr.vmem [resolvable:$false] %s10285_s0 }
  0xb6   : > { %p10281_p8 = scmp.ne.s32.totalorder %s669_s23, %s10280_s21  ;;  %s10287_s6 = scalar_lea.vmem %s10286_s0, 32 }
  0xb7   : > { %p10288_p7 = scmp.lt.s32.totalorder %s669_s23, %s10286_s0  ;;  %p10289_p9 = scmp.lt.s32.totalorder %s10287_s6, %s10280_s21 }
  0xb8   : > { %p10283_p2 = pnand %p10281_p8, %p10742_p0 }
  0xb9   : > { %p10290_p13 = por %p10289_p9, %p10288_p7 }
  0xba   : > { %p10284_p5 = pneg %p10283_p2 }
  0xbc   : > { %p10291_p4 = pnand %p10290_p13, %p10284_p5 }
  0xbe   : > { %10294 = shalt.err (!%p10291_p4)
}
  0xbf   : > { %9520 = dma.hbm_to_vmem [thread:$0]  (!%p10703_p12), %s666_s24, 16, %s669_s23, %s638_s30  }
  0xc0   : > { %s699_s16 = scalar_lea.vmem [#allocation16], %s10695_s27  ;;  %s13454_s2 = sld [smem:[#allocation73_spill]] }
  0xc1   : > { %s706_s26 = sshll.u32 %s699_s16, 4  ;;  %s10519_s21 = smov [#allocation16]   ;;  %s707_s26 = int_to_ptr.vmem [resolvable:$true] %s706_s26 }
  0xc2   : > { %s10308_s29 = scalar_lea.vmem %s707_s26, 16  ;;  %s10313_s17 = sshll.u32 %s10519_s21, 4  ;;  %s10314_s17 = int_to_ptr.vmem [resolvable:$false] %s10313_s17 }
  0xc3   : > { %p10309_p10 = scmp.ne.s32.totalorder %s707_s26, %s10308_s29  ;;  %s10315_s0 = scalar_lea.vmem %s10314_s17, 32 }
  0xc4   : > { %p10316_p11 = scmp.lt.s32.totalorder %s707_s26, %s10314_s17  ;;  %p10317_p3 = scmp.lt.s32.totalorder %s10315_s0, %s10308_s29 }
  0xc5   : > { %p10311_p6 = pnand %p10309_p10, %p10742_p0 }
  0xc6   : > { %s746_s20 = scalar_lea.hbm %s13454_s2, %s10768_s14  ;;  %p10318_p8 = por %p10317_p3, %p10316_p11 }
  0xc7   : > { %p10312_p1 = pneg %p10311_p6 }
  0xc9   : > { %p10319_p2 = pnand %p10318_p8, %p10312_p1 }
  0xcb   : > { %10322 = shalt.err (!%p10319_p2)
}
  0xcc   : > { %9526 = dma.hbm_to_vmem [thread:$0]  (!%p10703_p12), %s704_s3, 16, %s707_s26, %s676_s12  }
  0xcd   : > { %s741_s23 = scalar_lea.vmem [#allocation19], %s10695_s27  ;;  %s13455_s5 = sld [smem:[#allocation74_spill]] }
  0xce   : > { %s748_s6 = sshll.u32 %s741_s23, 4  ;;  %s10520_s17 = smov [#allocation19]   ;;  %s749_s6 = int_to_ptr.vmem [resolvable:$true] %s748_s6 }
  0xcf   : > { %s10336_s21 = scalar_lea.vmem %s749_s6, 16  ;;  %s10341_s0 = sshll.u32 %s10520_s17, 4  ;;  %s10342_s0 = int_to_ptr.vmem [resolvable:$false] %s10341_s0 }
  0xd0   : > { %p10337_p5 = scmp.ne.s32.totalorder %s749_s6, %s10336_s21  ;;  %s10343_s30 = scalar_lea.vmem %s10342_s0, 32 }
  0xd1   : > { %p10344_p13 = scmp.lt.s32.totalorder %s749_s6, %s10342_s0  ;;  %p10345_p4 = scmp.lt.s32.totalorder %s10343_s30, %s10336_s21 }
  0xd2   : > { %p10339_p7 = pnand %p10337_p5, %p10742_p0 }
  0xd3   : > { %s780_s29 = scalar_lea.hbm %s13455_s5, %s10768_s14  ;;  %p10346_p10 = por %p10345_p4, %p10344_p13 }
  0xd4   : > { %p10340_p9 = pneg %p10339_p7 }
  0xd6   : > { %p10347_p6 = pnand %p10346_p10, %p10340_p9 }
  0xd8   : > { %10350 = shalt.err (!%p10347_p6)
}
  0xd9   : > { %9532 = dma.hbm_to_vmem [thread:$0]  (!%p10703_p12), %s746_s20, 16, %s749_s6, %s722_s8  }
  0xda   : > { %s775_s26 = scalar_lea.vmem [#allocation22], %s10695_s27  ;;  %s10521_s16 = smov [#allocation22]  }
  0xdb   : > { %s782_s24 = sshll.u32 %s775_s26, 4  ;;  %s10369_s28 = sshll.u32 %s10521_s16, 4  ;;  %s783_s24 = int_to_ptr.vmem [resolvable:$true] %s782_s24  ;;  %s10370_s28 = int_to_ptr.vmem [resolvable:$false] %s10369_s28 }
  0xdc   : > { %s10364_s23 = scalar_lea.vmem %s783_s24, 16  ;;  %s10371_s21 = scalar_lea.vmem %s10370_s28, 32 }
  0xdd   : > { %p10365_p1 = scmp.ne.s32.totalorder %s783_s24, %s10364_s23  ;;  %p10372_p8 = scmp.lt.s32.totalorder %s783_s24, %s10370_s28 }
  0xde   : > { %p10373_p2 = scmp.lt.s32.totalorder %s10371_s21, %s10364_s23 }
  0xdf   : > { %p10367_p11 = pnand %p10365_p1, %p10742_p0 }
  0xe0   : > { %p10374_p5 = por %p10373_p2, %p10372_p8 }
  0xe1   : > { %p10368_p3 = pneg %p10367_p11 }
  0xe3   : > { %p10375_p7 = pnand %p10374_p5, %p10368_p3 }
  0xe5   : > { %10378 = shalt.err (!%p10375_p7)
}
  0xe6   : > { %9538 = dma.hbm_to_vmem [thread:$0]  (!%p10703_p12), %s780_s29, 16, %s783_s24, %s756_s18  }
  0xe7   : > { %s13456_s0 = sld [smem:[#allocation75_spill]]  ;;  %s792_s12 = scalar_lea.vmem [#allocation23], %s10695_s27 }
  0xe8   : > { %s799_s3 = sshll.u32 %s792_s12, 4  ;;  %s790_s26 = scalar_lea.sflag [#allocation24], %s10695_s27  ;;  %s800_s3 = int_to_ptr.vmem [resolvable:$true] %s799_s3 }
  0xe9   : > { %s10392_s23 = scalar_lea.vmem %s800_s3, 16  ;;  %s10522_s25 = smov [#allocation23]  }
  0xea   : > { %p10393_p9 = scmp.ne.s32.totalorder %s800_s3, %s10392_s23  ;;  %s10397_s16 = sshll.u32 %s10522_s25, 4  ;;  %s10398_s16 = int_to_ptr.vmem [resolvable:$false] %s10397_s16 }
  0xeb   : > { %s10399_s28 = scalar_lea.vmem %s10398_s16, 32  ;;  %p10400_p10 = scmp.lt.s32.totalorder %s800_s3, %s10398_s16 }
  0xec   : > { %p10395_p13 = pnand %p10393_p9, %p10742_p0  ;;  %p10401_p6 = scmp.lt.s32.totalorder %s10399_s28, %s10392_s23 }
  0xed   : > { %s797_s30 = scalar_lea.hbm %s13456_s0, %s10768_s14 }
  0xee   : > { %p10396_p4 = pneg %p10395_p13  ;;  %p10402_p1 = por %p10401_p6, %p10400_p10 }
  0xf0   : > { %p10403_p11 = pnand %p10402_p1, %p10396_p4 }
  0xf2   : > { %10406 = shalt.err (!%p10403_p11)
}
  0xf3   : > { %9541 = dma.hbm_to_vmem [thread:$0]  (!%p10703_p12), %s797_s30, 16, %s800_s3, %s790_s26  }
  0xf4   : > { %s13457_s14 = sld [smem:[#allocation41_spill]] }
  0xfa   : > { %p13458_p3 = scmp.ne.s32.totalorder %s13457_s14, 0 }
  0xfc   : > { %808 = sbr.rel (%p13458_p3) target bundleno = 4733 (0x127d), region = 92 }
 0x101   : > { %s13459_s27 = sld [smem:[#allocation39_spill]] }
 0x107   : > { %p13460_p8 = scmp.ne.s32.totalorder %s13459_s27, 0 }
 0x109   : > { %10440 = dma.done.wait (%p13460_p8), [#allocation4], 96  }
 0x10a   : > { %10442 = vsyncadd (%p13460_p8), [#allocation4], 4294967200 }
 0x10b   : > { %10444 = dma.done.wait (%p13460_p8), [#allocation6], 32  }
 0x10c   : > { %10446 = vsyncadd (%p13460_p8), [#allocation6], 4294967264  ;;  %s13461_s1 = sld [smem:[#allocation38_spill]] }
 0x10d   : > { %s13463_s29 = sld [smem:[#allocation33_spill]] }
 0x10e   : > { %s13464_s22 = sld [smem:[#allocation40_spill]] }
 0x112   : > { %s13462_s18 = sadd.s32 4294967295, %s13461_s1  }
 0x113   : > { %s822_s24 = sand.u32 1, %s13462_s18   ;;  %s10910_s21 = sand.u32 1, %s13463_s29  }
 0x114   : > { %s8192_s8 = sshll.u32 %s10910_s21, 6  ;;  %s823_s20 = scalar_lea.sflag [#allocation9], %s822_s24 }
 0x115   : > { %s10913_s6 = scalar_lea.vmem [#allocation8], %s8192_s8  ;;  %p13465_p12 = scmp.ne.s32.totalorder %s13464_s22, 0 }
 0x117   : > { %10448 = dma.done.wait (%p13465_p12), %s823_s20, 1056  }
 0x118   : > { %10450 = vsyncadd (%p13465_p12), %s823_s20, 4294966240  ;;  %s8193_s17 = sshll.u32 %s10910_s21, 1  ;;  %s8194_s0 = sshll.u32 %s10910_s21, 5 }
 0x119   : > { %s10921_s30 = scalar_lea.vmem [#allocation10], %s8193_s17  ;;  %s841_s12 = scalar_lea.sflag [#allocation12], %s822_s24 }
 0x11a   : > { %s10923_s3 = scalar_lea.vmem [#allocation11], %s8194_s0 }
 0x11b   : > { %10452 = dma.done.wait (%p13465_p12), %s841_s12, 528  }
 0x11c   : > { %10454 = vsyncadd (%p13465_p12), %s841_s12, 4294966768  ;;  %s858_s23 = scalar_lea.sflag [#allocation15], %s822_s24  ;;  %s10930_s25 = scalar_lea.vmem [#allocation14], %s8194_s0 }
 0x11d   : > { %10456 = dma.done.wait (%p13465_p12), %s858_s23, 528  }
 0x11e   : > { %10458 = vsyncadd (%p13465_p12), %s858_s23, 4294966768  ;;  %s875_s28 = scalar_lea.sflag [#allocation18], %s822_s24 }
 0x11f   : > { %10460 = dma.done.wait (%p13465_p12), %s875_s28, 32  }
 0x120   : > { %10462 = vsyncadd (%p13465_p12), %s875_s28, 4294967264  ;;  %s891_s1 = scalar_lea.sflag [#allocation21], %s822_s24 }
 0x121   : > { %10464 = dma.done.wait (%p13465_p12), %s891_s1, 32  }
 0x122   : > { %10466 = vsyncadd (%p13465_p12), %s891_s1, 4294967264  ;;  %s907_s8 = scalar_lea.sflag [#allocation24], %s10910_s21 }
 0x123   : > { %10468 = dma.done.wait (%p13465_p12), %s907_s8, 16  }
 0x124   : > { %10470 = vsyncadd (%p13465_p12), %s907_s8, 4294967280  ;;  %s13466_s17 = sld [smem:[#allocation36_spill]] }
 0x125   : > { %s13467_s24 = sld [smem:[#allocation35_spill]] }
 0x126   : > { %s13468_s29 = sld [smem:[#allocation72_spill]] }
 0x127   : > { %s13469_s27 = sld [smem:[#allocation64_spill]] }
 0x12a   : > { %s8196_s0 = sshll.u32 %s13466_s17, 4  ;;  %s13470_s17 = sld [smem:[#allocation76_spill]] }
 0x12b   : > { %p1021_p0 = scmp.lt.s32.totalorder %s13467_s24, 1  ;;  %p1016_p2 = scmp.lt.s32.totalorder %s8196_s0, 31 }
 0x12c   : > { %p8202_p5 = scmp.ne.s32.totalorder %s13467_s24, 0 }
 0x12d   : > { %s1022_s12 = scalar_select %p1021_p0, %s13467_s24, 1 }
 0x12e   : > { %s13551_s0 = smov (!%p1016_p2, %s8196_s0), 31  ;;  %1036 = sbr.rel (%p8202_p5) target bundleno = 821 (0x335), region = 152 }
 0x12f   : > { %s8515_s23 = sshll.u32 %s1022_s12, 6  ;;  %s8197_s28 = sshll.u32 %s13551_s0, 3 }
 0x130   : > { %s10961_s16 = scalar_lea.vmem %s13468_s29, %s8515_s23  ;;  %s10966_s22 = scalar_lea.vmem %s13469_s27, %s8197_s28 }
 0x131   : > { %s8201_s8 = sshll.u32 %s13551_s0, 2  ;;  %s13471_s14 = sld [smem:[#allocation67_spill]] (!%p8202_p5) }
 0x132   : > { %s10971_s4 = scalar_lea.vmem %s13470_s17, %s8201_s8  ;;  %s13478_s20 = sld [smem:[#allocation69_spill]] (!%p8202_p5) }
 0x133   : > { %v1232_v0 = vld [vmem:[#allocation3] sm:$0x3]  ;;  %vm1258_vm0 = vcmask 1041408   ;;  %v1223_v1 = vld [vmem:[#allocation3 + $0x2] sm:$0x3]  ;;  %v1037_v2 = vlaneseq  ;;  %v10982_v6 = vld [vmem:[%s10966_s22 + $0x8] sm:$0xff] }
 0x134   : > { %v10975_v3 = vld [vmem:[%s10966_s22] sm:$0xff]  ;;  %9461 = vmatprep.subr.msk.bf16.mxu0 %vm1258_vm0, %v1232_v0  ;;  %v1260_v4 = vsel %vm1258_vm0, %v1232_v0, 0  ;;  %9462 = vmatprep.subr.msk.bf16.mxu1 %vm1258_vm0, %v1223_v1  ;;  %v1384_v5 = vsel %vm1258_vm0, %v1223_v1, 0  ;;  %vm1076_vm1 = vcmask 1040384   ;;  %v10986_v8 = vld [vmem:[%s10966_s22 + $0x10] sm:$0xff]  ;;  %v1078_v10 = vrot.slane %v10982_v6, 7 }
 0x135   : > { %v1077_v7 = vrot.slane %v10975_v3, 7  ;;  %8800 = vmatpush3.bf16.msra.mxu0 %v1260_v4  ;;  %8818 = vmatpush3.bf16.msra.mxu1 %v1384_v5  ;;  %v10988_v9 = vshrl.u32 %v1037_v2, 7  ;;  %v1492_v11 = vld [vmem:[#allocation3 + $0x4] sm:$0x3]  ;;  %vm1233_vm2 = vcmask 31744   ;;  %v1214_v13 = vpack.c.bf16 %v10982_v6, %v10975_v3  ;;  %v10996_v14 = vld [vmem:[%s10966_s22 + $0x18] sm:$0xff] }
 0x136   : > { %9463 = vmatprep.subr.msk.bf16.mxu0 %vm1258_vm0, %v1492_v11  ;;  %v1080_v15 = vrot.slane %v10986_v8, 7  ;;  %v1082_v17 = vrot.slane %v10996_v14, 7  ;;  %v11003_v18 = vld [vmem:[%s10966_s22 + $0x20] sm:$0xff]  ;;  %v11006_v19 = vld [vmem:[%s10966_s22 + $0x28] sm:$0xff]  ;;  %v1215_v22 = vpack.c.bf16 %v10996_v14, %v10986_v8  ;;  %v11015_v23 = vld [vmem:[%s10966_s22 + $0x30] sm:$0xff]  ;;  %v1518_v30 = vsel %vm1258_vm0, %v1492_v11, 0 }
 0x137   : > { %v1124_v12 = vsel %vm1076_vm1, 0.0, %v1077_v7  ;;  %vm1040_vm3 = vcmp.eq.s32.totalorder %v10988_v9, 0  ;;  %v1079_v16 = vsel %vm1076_vm1, %v1077_v7, %v1078_v10  ;;  %8819 = vmatprep.mubr.msk.bf16.mxu1 %vm1233_vm2, %v1214_v13  ;;  %v11018_v24 = vld [vmem:[%s10966_s22 + $0x38] sm:$0xff]  ;;  %v11024_v28 = vld [vmem:[%s10966_s22 + $0x40] sm:$0xff]  ;;  %v1084_v31 = vrot.slane %v11003_v18, 7  ;;  %v11031_v33 = vld [vmem:[%s10966_s22 + $0x48] sm:$0xff] }
 0x138   : > { %v1129_v20 = vsel %vm1040_vm3, 0.0, %v1124_v12  ;;  %v1081_v21 = vsel %vm1076_vm1, %v1078_v10, %v1080_v15  ;;  %v1083_v26 = vsel %vm1076_vm1, %v1080_v15, %v1082_v17  ;;  %8820 = vmatmul.mubr.msk.bf16.vlgmr.msra.gmra.mxu1 %vm1233_vm2, %v1215_v22  ;;  %v1086_v32 = vrot.slane %v11006_v19, 7  ;;  %v11039_v37 = vld [vmem:[%s10966_s22 + $0x50] sm:$0xff]  ;;  %v11046_v41 = vld [vmem:[%s10966_s22 + $0x58] sm:$0xff]  ;;  %v11049_v42 = vld [vmem:[%s10966_s22 + $0x60] sm:$0xff]  ;;  %s13479_s24 = smov %s13478_s20 }
 0x139   : > { %v1224_v25 = vpack.c.bf16 %v1079_v16, %v1129_v20  ;;  %v1131_v27 = vsel %vm1040_vm3, 0.0, %v1081_v21  ;;  %v1216_v34 = vpack.c.bf16 %v11006_v19, %v11003_v18  ;;  %v1088_v35 = vrot.slane %v11015_v23, 7  ;;  %v11063_v51 = vld [vmem:[%s10966_s22 + $0x68] sm:$0xff]  ;;  %v11080_v63 = vld [vmem:[%s10966_s22 + $0x70] sm:$0xff]  ;;  %v11089_v4 = vld [vmem:[%s10966_s22 + $0x78] sm:$0xff] }
 0x13a   : > { %v1225_v29 = vpack.c.bf16 %v1083_v26, %v1131_v27  ;;  %v1090_v36 = vrot.slane %v11018_v24, 7  ;;  %v1085_v38 = vsel %vm1076_vm1, %v1082_v17, %v1084_v31  ;;  %v1087_v39 = vsel %vm1076_vm1, %v1084_v31, %v1086_v32  ;;  %vm11261_vm6 = vmneg %vm1040_vm3 }
 0x13b   : > { %8801 = vmatprep.mubr.msk.bf16.mxu0 %vm1233_vm2, %v1224_v25  ;;  %v1092_v40 = vrot.slane %v11024_v28, 7  ;;  %v1133_v43 = vsel %vm1040_vm3, 0.0, %v1085_v38  ;;  %8823 = vmatprep.mubr.msk.bf16.mxu1 %vm1233_vm2, %v1216_v34  ;;  %v1089_v44 = vsel %vm1076_vm1, %v1086_v32, %v1088_v35  ;;  %v1094_v46 = vrot.slane %v11031_v33, 7 }
 0x13c   : > { %8802 = vmatmul.mubr.msk.bf16.vlgmr.msra.gmra.mxu0 %vm1233_vm2, %v1225_v29  ;;  %v1091_v45 = vsel %vm1076_vm1, %v1088_v35, %v1090_v36  ;;  %v1226_v47 = vpack.c.bf16 %v1087_v39, %v1133_v43  ;;  %v1135_v48 = vsel %vm1040_vm3, 0.0, %v1089_v44  ;;  %v1217_v49 = vpack.c.bf16 %v11018_v24, %v11015_v23 }
 0x13d   : > { %8836 = vmatpush3.bf16.msra.mxu0 %v1518_v30  ;;  %v1093_v50 = vsel %vm1076_vm1, %v1090_v36, %v1092_v40  ;;  %v1095_v52 = vsel %vm1076_vm1, %v1092_v40, %v1094_v46  ;;  %v1218_v54 = vpack.c.bf16 %v11031_v33, %v11024_v28  ;;  %v1096_v55 = vrot.slane %v11039_v37, 7 }
 0x13e   : > { %v1137_v53 = vsel %vm1040_vm3, 0.0, %v1093_v50  ;;  %8805 = vmatprep.mubr.msk.bf16.mxu0 %vm1233_vm2, %v1226_v47  ;;  %v1227_v56 = vpack.c.bf16 %v1091_v45, %v1135_v48  ;;  %v1100_v57 = vrot.slane %v11049_v42, 7  ;;  %v1098_v59 = vrot.slane %v11046_v41, 7 }
 0x13f   : > { %v1228_v58 = vpack.c.bf16 %v1095_v52, %v1137_v53  ;;  %v1097_v60 = vsel %vm1076_vm1, %v1094_v46, %v1096_v55  ;;  %v1102_v61 = vrot.slane %v11063_v51, 7  ;;  %v1147_v0 = vrot.slane %v10982_v6, 1 }
 0x140   : > { %8824 = vmatmul.mubr.msk.bf16.gmra.mxu1 %vm1233_vm2, %v1217_v49  ;;  %v1101_v62 = vsel %vm1076_vm1, %v1098_v59, %v1100_v57  ;;  %v1099_v1 = vsel %vm1076_vm1, %v1096_v55, %v1098_v59  ;;  %v1139_v2 = vsel %vm1040_vm3, 0.0, %v1097_v60  ;;  %v1219_v5 = vpack.c.bf16 %v11046_v41, %v11039_v37 }
 0x141   : > { %8827 = vmatprep.mubr.msk.bf16.mxu1 %vm1233_vm2, %v1218_v54  ;;  %v1103_v7 = vsel %vm1076_vm1, %v1100_v57, %v1102_v61  ;;  %v1141_v10 = vsel %vm1040_vm3, 0.0, %v1101_v62  ;;  %v1104_v11 = vrot.slane %v11080_v63, 7  ;;  %v11098_v6 = vadd.s32 8, %v10988_v9 }
 0x142   : > { %v1220_v12 = vpack.c.bf16 %v11063_v51, %v11049_v42  ;;  %v1149_v13 = vrot.slane %v10986_v8, 1  ;;  %v1229_v15 = vpack.c.bf16 %v1099_v1, %v1139_v2  ;;  %vm1145_vm4 = vcmask 1046528   ;;  %v9633_v2 = vld [vmem:[%s13471_s14 + $0x78] sm:$0xff]  }
 0x143   : > { %v1230_v16 = vpack.c.bf16 %v1103_v7, %v1141_v10  ;;  %v1106_v17 = vrot.slane %v11089_v4, 7  ;;  %v1146_v20 = vrot.slane %v10975_v3, 1  ;;  %v1105_v21 = vsel %vm1076_vm1, %v1102_v61, %v1104_v11  ;;  %8885 = vmatprep.subr.bf16.mxu0 %v9633_v2  ;;  %v9636_v7 = vld [vmem:[%s13471_s14 + $0x30] sm:$0xff]   ;;  %v9637_v10 = vld [vmem:[%s13471_s14 + $0x68] sm:$0xff]  }
 0x144   : > { %8806 = vmatmul.mubr.msk.bf16.gmra.mxu0 %vm1233_vm2, %v1227_v56  ;;  %vm1043_vm5 = vcmp.eq.s32.totalorder %v11098_v6, 15  ;;  %v1150_v22 = vsel %vm1145_vm4, %v1147_v0, %v1149_v13  ;;  %v1151_v8 = vrot.slane %v10996_v14, 1  ;;  %v1143_v3 = vsel %vm1040_vm3, 0.0, %v1105_v21  ;;  %v9645_v21 = vld [vmem:[%s13471_s14 + $0x48] sm:$0xff]   ;;  %v9656_v6 = vld [vmem:[%s13471_s14 + $0x80] sm:$0xff]  }
 0x145   : > { %8809 = vmatprep.mubr.msk.bf16.mxu0 %vm1233_vm2, %v1228_v58  ;;  %v1107_v25 = vsel %vm1076_vm1, %v1104_v11, %v1106_v17  ;;  %v1153_v26 = vrot.slane %v11003_v18, 1  ;;  %v1221_v27 = vpack.c.bf16 %v11089_v4, %v11080_v63  ;;  %v1148_v29 = vsel %vm1145_vm4, %v1146_v20, %v1147_v0  ;;  %v9638_v11 = vld [vmem:[%s13471_s14 + $0x28] sm:$0xff]   ;;  %v9643_v17 = vld [vmem:[%s13471_s14 + $0x50] sm:$0xff]   ;;  %vm8316_vm9 = vmneg %vm1043_vm5 }
 0x146   : > { %v1199_v30 = vsel %vm1043_vm5, 0.0, %v1150_v22  ;;  %v1155_v31 = vrot.slane %v11006_v19, 1  ;;  %v1157_v14 = vrot.slane %v11015_v23, 1  ;;  %v1231_v32 = vpack.c.bf16 %v1107_v25, %v1143_v3  ;;  %v9644_v20 = vld [vmem:[%s13471_s14 + $0x10] sm:$0xff]   ;;  %v9646_v22 = vld [vmem:[%s13471_s14 + $0x8] sm:$0xff]   ;;  %v9648_v25 = vld [vmem:[%s13471_s14] sm:$0xff]  }
 0x147   : > { %v1483_v34 = vpack.c.bf16 %v1199_v30, %v1148_v29  ;;  %v1154_v35 = vsel %vm1145_vm4, %v1151_v8, %v1153_v26  ;;  %v1152_v36 = vsel %vm1145_vm4, %v1149_v13, %v1151_v8  ;;  %v1159_v39 = vrot.slane %v11018_v24, 1  ;;  %v9640_v13 = vld [vmem:[%s13471_s14 + $0x20] sm:$0xff]   ;;  %v11222_v3 = vld [vmem:[%s13471_s14 + $0xb8] sm:$0xff]  }
 0x148   : > { %8828 = vmatmul.mubr.msk.bf16.gmra.mxu1 %vm1233_vm2, %v1219_v5  ;;  %v1158_v18 = vsel %vm1145_vm4, %v1155_v31, %v1157_v14  ;;  %v1201_v38 = vsel %vm1043_vm5, 0.0, %v1154_v35  ;;  %v1156_v19 = vsel %vm1145_vm4, %v1153_v26, %v1155_v31  ;;  %v1161_v40 = vrot.slane %v11024_v28, 1  ;;  %v9635_v5 = vld [vmem:[%s13471_s14 + $0x70] sm:$0xff]   ;;  %v9647_v8 = vld [vmem:[%s13471_s14 + $0x40] sm:$0xff]  }
 0x149   : > { %8831 = vmatprep.mubr.msk.bf16.mxu1 %vm1233_vm2, %v1220_v12  ;;  %v1203_v23 = vsel %vm1043_vm5, 0.0, %v1158_v18  ;;  %v1163_v43 = vrot.slane %v11031_v33, 1  ;;  %v1165_v44 = vrot.slane %v11039_v37, 1  ;;  %v1484_v45 = vpack.c.bf16 %v1201_v38, %v1152_v36  ;;  %v9639_v12 = vld [vmem:[%s13471_s14 + $0x60] sm:$0xff]  }
 0x14a   : > { %v1485_v46 = vpack.c.bf16 %v1203_v23, %v1156_v19  ;;  %v1162_v47 = vsel %vm1145_vm4, %v1159_v39, %v1161_v40  ;;  %v1160_v49 = vsel %vm1145_vm4, %v1157_v14, %v1159_v39  ;;  %v1167_v37 = vrot.slane %v11046_v41, 1 }
 0x14b   : > { %v1166_v48 = vsel %vm1145_vm4, %v1163_v43, %v1165_v44  ;;  %v1205_v24 = vsel %vm1043_vm5, 0.0, %v1162_v47  ;;  %v1164_v28 = vsel %vm1145_vm4, %v1161_v40, %v1163_v43  ;;  %v1169_v50 = vrot.slane %v11049_v42, 1 }
 0x14c   : > { %8810 = vmatmul.mubr.msk.bf16.gmra.mxu0 %vm1233_vm2, %v1229_v15  ;;  %v1207_v33 = vsel %vm1043_vm5, 0.0, %v1166_v48  ;;  %v1171_v52 = vrot.slane %v11063_v51, 1  ;;  %v1173_v53 = vrot.slane %v11080_v63, 1  ;;  %v1486_v54 = vpack.c.bf16 %v1205_v24, %v1160_v49  ;;  %v9641_v15 = vld [vmem:[%s13471_s14 + $0x58] sm:$0xff]  }
 0x14d   : > { %8813 = vmatprep.mubr.msk.bf16.mxu0 %vm1233_vm2, %v1230_v16  ;;  %v1487_v55 = vpack.c.bf16 %v1207_v33, %v1164_v28  ;;  %v1170_v56 = vsel %vm1145_vm4, %v1167_v37, %v1169_v50  ;;  %v1168_v58 = vsel %vm1145_vm4, %v1165_v44, %v1167_v37  ;;  %v1175_v59 = vrot.slane %v11089_v4, 1  ;;  %v9634_v4 = vld [vmem:[%s13471_s14 + $0x38] sm:$0xff]  }
 0x14e   : > { %v1174_v57 = vsel %vm1145_vm4, %v1171_v52, %v1173_v53  ;;  %v1209_v41 = vsel %vm1043_vm5, 0.0, %v1170_v56  ;;  %v1172_v42 = vsel %vm1145_vm4, %v1169_v50, %v1171_v52  ;;  %8853 = vmatprep.subr.bf16.mxu1 %v9634_v4  ;;  %v9642_v16 = vld [vmem:[%s13471_s14 + $0x18] sm:$0xff]   ;;  %vm10523_vm7 = vmmov 1  }
 0x14f   : > { %v1211_v51 = vsel %vm1043_vm5, 0.0, %v1174_v57  ;;  %v1488_v60 = vpack.c.bf16 %v1209_v41, %v1168_v58  ;;  %v1193_v62 = vsel %vm1145_vm4, %v1175_v59, 0.0  ;;  %v1176_v63 = vsel %vm1145_vm4, %v1173_v53, %v1175_v59  ;;  %8854 = vmatpush3.bf16.msra.mxu1 %v9634_v4  ;;  %v11241_v57 = vld [vmem:[#allocation5] ss:$0 sm:$0xff]  ;;  %vm11279_vm8 = vmpackc.low %vm10523_vm7, %vm11261_vm6 }
 0x150   : > { %8832 = vmatmul.mubr.msk.bf16.gmra.mxu1 %vm1233_vm2, %v1221_v27  ;;  %v1489_v61 = vpack.c.bf16 %v1211_v51, %v1172_v42  ;;  %v1213_v0 = vsel %vm1043_vm5, 0.0, %v1193_v62  ;;  %8855 = vmatprep.subr.bf16.mxu1 %v9636_v7  ;;  %vm11401_vm10 = vmpackc.low %vm8316_vm9, %vm10523_vm7  ;;  %vm2382_vm11 = vcmask 523264  }
 0x151   : > { %v1490_v1 = vpack.c.bf16 %v1213_v0, %v1176_v63 }
 0x153   : > { %8856 = vmatpush3.bf16.msra.mxu1 %v9636_v7 }
 0x154   : > { %8814 = vmatmul.mubr.msk.bf16.gmra.mxu0 %vm1233_vm2, %v1231_v32  ;;  %8857 = vmatprep.subr.bf16.mxu1 %v9638_v11 }
 0x155   : > { %8837 = vmatprep.mubr.msk.bf16.mxu0 %vm1233_vm2, %v1483_v34 }
 0x157   : > { %8858 = vmatpush3.bf16.msra.mxu1 %v9638_v11 }
 0x158   : > { %8859 = vmatprep.subr.bf16.mxu1 %v9640_v13 }
 0x15b   : > { %8860 = vmatpush3.bf16.msra.mxu1 %v9640_v13 }
 0x15c   : > { %8838 = vmatmul.mubr.msk.bf16.vlgmr.msra.gmra.mxu0 %vm1233_vm2, %v1484_v45  ;;  %8861 = vmatprep.subr.bf16.mxu1 %v9642_v16 }
 0x15d   : > { %8841 = vmatprep.mubr.msk.bf16.mxu0 %vm1233_vm2, %v1485_v46  ;;  %8886 = vmatpush3.bf16.msra.mxu0 %v9633_v2 }
 0x15e   : > { %8887 = vmatprep.subr.bf16.mxu0 %v9635_v5 }
 0x15f   : > { %8862 = vmatpush3.bf16.msra.mxu1 %v9642_v16 }
 0x160   : > { %8863 = vmatprep.subr.bf16.mxu1 %v9644_v20 }
 0x161   : > { %8888 = vmatpush3.bf16.msra.mxu0 %v9635_v5 }
 0x162   : > { %8889 = vmatprep.subr.bf16.mxu0 %v9637_v10 }
 0x163   : > { %8864 = vmatpush3.bf16.msra.mxu1 %v9644_v20 }
 0x164   : > { %8842 = vmatmul.mubr.msk.bf16.gmra.mxu0 %vm1233_vm2, %v1486_v54  ;;  %8865 = vmatprep.subr.bf16.mxu1 %v9646_v22 }
 0x165   : > { %8845 = vmatprep.mubr.msk.bf16.mxu0 %vm1233_vm2, %v1487_v55  ;;  %8890 = vmatpush3.bf16.msra.mxu0 %v9637_v10 }
 0x166   : > { %8891 = vmatprep.subr.bf16.mxu0 %v9639_v12 }
 0x167   : > { %8866 = vmatpush3.bf16.msra.mxu1 %v9646_v22 }
 0x168   : > { %8867 = vmatprep.subr.bf16.mxu1 %v9648_v25 }
 0x169   : > { %8892 = vmatpush3.bf16.msra.mxu0 %v9639_v12 }
 0x16a   : > { %8893 = vmatprep.subr.bf16.mxu0 %v9641_v15 }
 0x16b   : > { %8868 = vmatpush3.bf16.msra.mxu1 %v9648_v25 }
 0x16c   : > { %8846 = vmatmul.mubr.msk.bf16.gmra.mxu0 %vm1233_vm2, %v1488_v60  ;;  %8917 = vmatprep.subr.bf16.mxu1 %v11222_v3 }
 0x16d   : > { %8849 = vmatprep.mubr.msk.bf16.mxu0 %vm1233_vm2, %v1489_v61  ;;  %8894 = vmatpush3.bf16.msra.mxu0 %v9641_v15 }
 0x16e   : > { %8895 = vmatprep.subr.bf16.mxu0 %v9643_v17 }
 0x171   : > { %8896 = vmatpush3.bf16.msra.mxu0 %v9643_v17  ;;  %v9652_v17 = vld [vmem:[%s13471_s14 + $0xa0] sm:$0xff]  }
 0x172   : > { %8897 = vmatprep.subr.bf16.mxu0 %v9645_v21 }
 0x174   : > { %8850 = vmatmul.mubr.msk.bf16.gmra.mxu0 %vm1233_vm2, %v1490_v1 }
 0x175   : > { %8898 = vmatpush3.bf16.msra.mxu0 %v9645_v21 }
 0x176   : > { %8899 = vmatprep.subr.bf16.mxu0 %v9647_v8 }
 0x179   : > { %8900 = vmatpush3.bf16.msra.mxu0 %v9647_v8 }
 0x1f8   : > { %v8821_v26 = vpop.f32.mrf.mxu1 }
 0x1fa   : > { %v1420_v30 = vpop.f32.mrf.mxu1 }
 0x1fc   : > { %v8803_v27 = vpop.f32.mrf.mxu0  ;;  %v8822_v14 = vpop.f32.mrf.mxu1 }
 0x1fd   : > { %v1429_v37 = vadd.f32 %v8821_v26, %v8803_v27 }
 0x1fe   : > { %v1296_v29 = vpop.f32.mrf.mxu0  ;;  %v1423_v35 = vpop.f32.mrf.mxu1 }
 0x1ff   : > { %v1421_v50 = vadd.f32 %v1420_v30, %v1296_v29 }
 0x200   : > { %v8804_v31 = vpop.f32.mrf.mxu0  ;;  %v8825_v38 = vpop.f32.mrf.mxu1 }
 0x201   : > { %v1432_v54 = vadd.f32 %v8822_v14, %v8804_v31 }
 0x202   : > { %v1299_v32 = vpop.f32.mrf.mxu0  ;;  %v1436_v39 = vpop.f32.mrf.mxu1 }
 0x203   : > { %v1424_v41 = vadd.f32 %v1423_v35, %v1299_v32 }
 0x204   : > { %v8807_v34 = vpop.f32.mrf.mxu0  ;;  %v8826_v44 = vpop.f32.mrf.mxu1 }
 0x205   : > { %v1445_v4 = vadd.f32 %v8825_v38, %v8807_v34 }
 0x206   : > { %v1312_v18 = vpop.f32.mrf.mxu0  ;;  %v1439_v47 = vpop.f32.mrf.mxu1 }
 0x207   : > { %v1437_v5 = vadd.f32 %v1436_v39, %v1312_v18 }
 0x208   : > { %v8808_v36 = vpop.f32.mrf.mxu0  ;;  %v8829_v24 = vpop.f32.mrf.mxu1 }
 0x209   : > { %v1448_v12 = vadd.f32 %v8826_v44, %v8808_v36  ;;  %v9650_v44 = vld [vmem:[%s13471_s14 + $0xb0] sm:$0xff]  }
 0x20a   : > { %v1315_v19 = vpop.f32.mrf.mxu0  ;;  %v1452_v52 = vpop.f32.mrf.mxu1 }
 0x20b   : > { %v1440_v13 = vadd.f32 %v1439_v47, %v1315_v19 }
 0x20c   : > { %v11225_v23 = vpop.f32.mrf.mxu0  ;;  %v8830_v51 = vpop.f32.mrf.mxu1 }
 0x20e   : > { %v11227_v40 = vpop.f32.mrf.mxu0  ;;  %v1455_v7 = vpop.f32.mrf.mxu1 }
 0x210   : > { %v11229_v43 = vpop.f32.mrf.mxu0  ;;  %v8833_v30 = vpop.f32.mrf.mxu1 }
 0x212   : > { %v11231_v45 = vpop.f32.mrf.mxu0 }
 0x214   : > { %v11233_v46 = vpop.f32.mrf.mxu0 }
 0x216   : > { %v11235_v48 = vpop.f32.mrf.mxu0 }
 0x218   : > { %v11237_v49 = vpop.f32.mrf.mxu0 }
 0x21a   : > { %v11239_v28 = vpop.f32.mrf.mxu0 }
 0x21c   : > { %v8839_v33 = vpop.f32.mrf.mxu0 }
 0x21d   : > { %v1619_v55 = vadd.f32 %v8839_v33, %v1429_v37  ;;  %v1461_v37 = vadd.f32 %v8829_v24, %v11225_v23 }
 0x21e   : > { %v1554_v53 = vpop.f32.mrf.mxu0 }
 0x21f   : > { %v1617_v56 = vadd.f32 %v1554_v53, %v1421_v50  ;;  %v11247_v61 = vadd.f32 %v11241_v57, %v1619_v55  ;;  %v1453_v50 = vadd.f32 %v1452_v52, %v11227_v40  ;;  %v1468_v53 = vpop.f32.mrf.mxu1 }
 0x220   : > { %v8840_v58 = vpop.f32.mrf.mxu0 }
 0x221   : > { %v1620_v42 = vadd.f32 %v8840_v58, %v1432_v54  ;;  %v11244_v59 = vadd.f32 %v11241_v57, %v1617_v56  ;;  %v1675_v15 = vrot.slane %v11247_v61, 7  ;;  %v1464_v56 = vadd.f32 %v8830_v51, %v11229_v43 }
 0x222   : > { %v1557_v60 = vpop.f32.mrf.mxu0  ;;  %v1456_v58 = vadd.f32 %v1455_v7, %v11231_v45 }
 0x223   : > { %v11250_v62 = vadd.f32 %v11241_v57, %v1620_v42  ;;  %v1618_v63 = vadd.f32 %v1557_v60, %v1424_v41  ;;  %v1672_v10 = vrot.slane %v11244_v59, 7  ;;  %v9651_v60 = vld [vmem:[%s13471_s14 + $0xa8] sm:$0xff]  }
 0x224   : > { %v8843_v0 = vpop.f32.mrf.mxu0 }
 0x225   : > { %v1677_v1 = vrot.slane %v11250_v62, 7  ;;  %v11254_v2 = vadd.f32 %v11241_v57, %v1618_v63  ;;  %v1801_v20 = vpack.c.bf16 %v11250_v62, %v11247_v61  ;;  %v1623_v21 = vadd.f32 %v8843_v0, %v1445_v4  ;;  %v8834_v63 = vpop.f32.mrf.mxu1 }
 0x226   : > { %v1570_v11 = vpop.f32.mrf.mxu0  ;;  %v1719_v34 = vsel %vm1076_vm1, 0.0, %v1672_v10 }
 0x227   : > { %v1673_v16 = vrot.slane %v11254_v2, 7  ;;  %v1621_v22 = vadd.f32 %v1570_v11, %v1437_v5  ;;  %v1800_v25 = vpack.c.bf16 %v11254_v2, %v11244_v59  ;;  %v1678_v26 = vsel %vm1076_vm1, %v1675_v15, %v1677_v1 }
 0x228   : > { %v8844_v8 = vpop.f32.mrf.mxu0  ;;  %v11287_v19 = vadd.f32 %v11241_v57, %v1623_v21 }
 0x229   : > { %v1676_v27 = vsel %vm1076_vm1, %v1673_v16, %v1675_v15  ;;  %v1624_v29 = vadd.f32 %v8844_v8, %v1448_v12  ;;  %v1674_v9 = vsel %vm1076_vm1, %v1672_v10, %v1673_v16  ;;  %v11273_v14 = vadd.f32 %v11241_v57, %v1621_v22  ;;  %8901 = vmatprep.mubr.bf16.mxu0 %v1800_v25  ;;  %v1471_v22 = vpop.f32.mrf.mxu1 }
 0x22a   : > { %v8258_v31 = vpack.c.bf16 %v1678_v26, %v1676_v27  ;;  %v1573_v32 = vpop.f32.mrf.mxu0  ;;  %8902 = vmatmul.mubr.bf16.vlgmr.msra.gmra.mxu0 %v1801_v20  ;;  %v8254_v38 = vpack.c.bf16 %v1674_v9, %v1719_v34  ;;  %v1683_v42 = vrot.slane %v11287_v19, 7  ;;  %v1469_v20 = vadd.f32 %v1468_v53, %v11235_v48 }
 0x22b   : > { %v11284_v18 = vadd.f32 %v11241_v57, %v1624_v29  ;;  %v1622_v36 = vadd.f32 %v1573_v32, %v1440_v13  ;;  %v1679_v47 = vrot.slane %v11273_v14, 7  ;;  %v1477_v13 = vadd.f32 %v8833_v30, %v11233_v46  ;;  %v9653_v32 = vld [vmem:[%s13471_s14 + $0x98] sm:$0xff]  }
 0x22c   : > { %v8847_v39 = vpop.f32.mrf.mxu0  ;;  %8869 = vmatprep.mubr.msk.bf16.mxu1 %vm11279_vm8, %v8254_v38  ;;  %v1480_v26 = vadd.f32 %v8834_v63, %v11237_v49  ;;  %v1472_v34 = vadd.f32 %v1471_v22, %v11239_v28 }
 0x22d   : > { %v11294_v33 = vadd.f32 %v11241_v57, %v1622_v36  ;;  %v1685_v54 = vrot.slane %v11284_v18, 7  ;;  %8870 = vmatmul.mubr.msk.bf16.vlgmr.msra.gmra.mxu1 %vm11279_vm8, %v8258_v31  ;;  %v1627_v23 = vadd.f32 %v8847_v39, %v1461_v37  ;;  %v1803_v45 = vpack.c.bf16 %v11284_v18, %v11287_v19 }
 0x22e   : > { %v1586_v55 = vpop.f32.mrf.mxu0  ;;  %8918 = vmatpush3.bf16.msra.mxu1 %v11222_v3  ;;  %v1680_v51 = vsel %vm1076_vm1, %v1677_v1, %v1679_v47 }
 0x22f   : > { %v1681_v41 = vrot.slane %v11294_v33, 7  ;;  %v1625_v24 = vadd.f32 %v1586_v55, %v1453_v50  ;;  %8919 = vmatprep.subr.bf16.mxu1 %v9650_v44  ;;  %v1802_v52 = vpack.c.bf16 %v11294_v33, %v11273_v14  ;;  %v1686_v10 = vsel %vm1076_vm1, %v1683_v42, %v1685_v54 }
 0x230   : > { %v8848_v40 = vpop.f32.mrf.mxu0  ;;  %v11327_v15 = vadd.f32 %v11241_v57, %v1627_v23 }
 0x231   : > { %v1628_v43 = vadd.f32 %v8848_v40, %v1464_v56  ;;  %v1682_v3 = vsel %vm1076_vm1, %v1679_v47, %v1681_v41  ;;  %v11318_v0 = vadd.f32 %v11241_v57, %v1625_v24  ;;  %8905 = vmatprep.mubr.bf16.mxu0 %v1802_v52  ;;  %v1684_v7 = vsel %vm1076_vm1, %v1681_v41, %v1683_v42 }
 0x232   : > { %v1589_v4 = vpop.f32.mrf.mxu0  ;;  %v8262_v5 = vpack.c.bf16 %v1682_v3, %v1680_v51  ;;  %8920 = vmatpush3.bf16.msra.mxu1 %v9650_v44  ;;  %8906 = vmatmul.mubr.bf16.gmra.mxu0 %v1803_v45  ;;  %v8266_v1 = vpack.c.bf16 %v1686_v10, %v1684_v7  ;;  %v1691_v48 = vrot.slane %v11327_v15, 7  ;;  %v1737_v24 = vrot.slane %v11254_v2, 1  ;;  %v9655_v3 = vld [vmem:[%s13471_s14 + $0x88] sm:$0xff]  }
 0x233   : > { %v11323_v11 = vadd.f32 %v11241_v57, %v1628_v43  ;;  %v1626_v12 = vadd.f32 %v1589_v4, %v1456_v58  ;;  %8921 = vmatprep.subr.bf16.mxu1 %v9651_v60  ;;  %v1687_v46 = vrot.slane %v11318_v0, 7  ;;  %v1736_v45 = vrot.slane %v11244_v59, 1  ;;  %v11467_v10 = vld [vmem:[#allocation7] ss:$0 sm:$0xff] }
 0x234   : > { %v8851_v16 = vpop.f32.mrf.mxu0  ;;  %8873 = vmatprep.mubr.msk.bf16.mxu1 %vm11279_vm8, %v8262_v5 }
 0x235   : > { %v11336_v21 = vadd.f32 %v11241_v57, %v1626_v12  ;;  %v1631_v8 = vadd.f32 %v8851_v16, %v1477_v13  ;;  %8874 = vmatmul.mubr.msk.bf16.gmra.mxu1 %vm11279_vm8, %v8266_v1  ;;  %v1693_v27 = vrot.slane %v11323_v11, 7  ;;  %v1805_v38 = vpack.c.bf16 %v11323_v11, %v11327_v15 }
 0x236   : > { %v1602_v25 = vpop.f32.mrf.mxu0  ;;  %8922 = vmatpush3.bf16.msra.mxu1 %v9651_v60  ;;  %v1688_v47 = vsel %vm1076_vm1, %v1685_v54, %v1687_v46  ;;  %v9654_v54 = vld [vmem:[%s13471_s14 + $0x90] sm:$0xff]   ;;  %v1739_v60 = vrot.slane %v11247_v61, 1  ;;  %v1738_v5 = vsel %vm1145_vm4, %v1736_v45, %v1737_v24  ;;  %v1743_v12 = vrot.slane %v11273_v14, 1 }
 0x237   : > { %v1689_v29 = vrot.slane %v11336_v21, 7  ;;  %v1629_v9 = vadd.f32 %v1602_v25, %v1469_v20  ;;  %8923 = vmatprep.subr.bf16.mxu1 %v9652_v17  ;;  %v1804_v31 = vpack.c.bf16 %v11336_v21, %v11318_v0  ;;  %v11357_v39 = vadd.f32 %v11241_v57, %v1631_v8 }
 0x238   : > { %v8852_v30 = vpop.f32.mrf.mxu0  ;;  %v1694_v55 = vsel %vm1076_vm1, %v1691_v48, %v1693_v27  ;;  %v1740_v7 = vsel %vm1145_vm4, %v1737_v24, %v1739_v60  ;;  %v1745_v13 = vrot.slane %v11294_v33, 1  ;;  %v1741_v16 = vrot.slane %v11250_v62, 1 }
 0x239   : > { %v11352_v49 = vadd.f32 %v11241_v57, %v1629_v9  ;;  %v1632_v36 = vadd.f32 %v8852_v30, %v1480_v26  ;;  %8909 = vmatprep.mubr.bf16.mxu0 %v1804_v31  ;;  %v1690_v37 = vsel %vm1076_vm1, %v1687_v46, %v1689_v29  ;;  %v1692_v50 = vsel %vm1076_vm1, %v1689_v29, %v1691_v48 }
 0x23a   : > { %v1605_v44 = vpop.f32.mrf.mxu0  ;;  %8924 = vmatpush3.bf16.msra.mxu1 %v9652_v17  ;;  %8910 = vmatmul.mubr.bf16.gmra.mxu0 %v1805_v38  ;;  %v8270_v56 = vpack.c.bf16 %v1690_v37, %v1688_v47  ;;  %v8274_v58 = vpack.c.bf16 %v1694_v55, %v1692_v50  ;;  %v1699_v40 = vrot.slane %v11357_v39, 7  ;;  %v8318_v1 = vpack.c.bf16 %v1740_v7, %v1738_v5 }
 0x23b   : > { %v11363_v28 = vadd.f32 %v11241_v57, %v1632_v36  ;;  %v1630_v53 = vadd.f32 %v1605_v44, %v1472_v34  ;;  %8925 = vmatprep.subr.bf16.mxu1 %v9653_v32  ;;  %v1695_v41 = vrot.slane %v11352_v49, 7  ;;  %v1747_v17 = vrot.slane %v11287_v19, 1 }
 0x23c   : > { %8877 = vmatprep.mubr.msk.bf16.mxu1 %vm11279_vm8, %v8270_v56  ;;  %v1744_v20 = vsel %vm1145_vm4, %v1741_v16, %v1743_v12  ;;  %v1746_v22 = vsel %vm1145_vm4, %v1743_v12, %v1745_v13  ;;  %v1742_v33 = vsel %vm1145_vm4, %v1739_v60, %v1741_v16  ;;  %v1751_v46 = vrot.slane %v11318_v0, 1 }
 0x23d   : > { %v11368_v42 = vadd.f32 %v11241_v57, %v1630_v53  ;;  %v1701_v23 = vrot.slane %v11363_v28, 7  ;;  %8878 = vmatmul.mubr.msk.bf16.gmra.mxu1 %vm11279_vm8, %v8274_v58  ;;  %v1807_v43 = vpack.c.bf16 %v11363_v28, %v11357_v39  ;;  %v1696_v2 = vsel %vm1076_vm1, %v1693_v27, %v1695_v41 }
 0x23e   : > { %8926 = vmatpush3.bf16.msra.mxu1 %v9653_v32  ;;  %v1748_v14 = vsel %vm1145_vm4, %v1745_v13, %v1747_v17  ;;  %v8322_v35 = vpack.c.bf16 %v1744_v20, %v1742_v33  ;;  %v1753_v8 = vrot.slane %v11336_v21, 1  ;;  %v1749_v19 = vrot.slane %v11284_v18, 1 }
 0x23f   : > { %v1697_v52 = vrot.slane %v11368_v42, 7  ;;  %v1806_v57 = vpack.c.bf16 %v11368_v42, %v11352_v49  ;;  %8927 = vmatprep.subr.bf16.mxu1 %v9654_v54  ;;  %v1702_v61 = vsel %vm1076_vm1, %v1699_v40, %v1701_v23  ;;  %v8326_v62 = vpack.c.bf16 %v1748_v14, %v1746_v22  ;;  %v11473_v22 = vld [vmem:[%s13478_s20] sm:$0xff] }
 0x240   : > { %v1755_v25 = vrot.slane %v11327_v15, 1  ;;  %v1752_v26 = vsel %vm1145_vm4, %v1749_v19, %v1751_v46  ;;  %v1754_v27 = vsel %vm1145_vm4, %v1751_v46, %v1753_v8  ;;  %v1750_v0 = vsel %vm1145_vm4, %v1747_v17, %v1749_v19 }
 0x241   : > { %8913 = vmatprep.mubr.bf16.mxu0 %v1806_v57  ;;  %v1698_v51 = vsel %vm1076_vm1, %v1695_v41, %v1697_v52  ;;  %v1700_v63 = vsel %vm1076_vm1, %v1697_v52, %v1699_v40  ;;  %v8330_v9 = vpack.c.bf16 %v1752_v26, %v1750_v0  ;;  %v1759_v21 = vrot.slane %v11352_v49, 1 }
 0x242   : > { %v8278_v4 = vpack.c.bf16 %v1698_v51, %v1696_v2  ;;  %8914 = vmatmul.mubr.bf16.gmra.mxu0 %v1807_v43  ;;  %v8282_v59 = vpack.c.bf16 %v1702_v61, %v1700_v63  ;;  %8928 = vmatpush3.bf16.msra.mxu1 %v9654_v54  ;;  %v1756_v29 = vsel %vm1145_vm4, %v1753_v8, %v1755_v25  ;;  %v1761_v30 = vrot.slane %v11368_v42, 1 }
 0x243   : > { %8929 = vmatprep.subr.bf16.mxu1 %v9655_v3  ;;  %v8334_v48 = vpack.c.bf16 %v1756_v29, %v1754_v27  ;;  %v1757_v18 = vrot.slane %v11323_v11, 1  ;;  %v1763_v15 = vrot.slane %v11357_v39, 1  ;;  %v1765_v38 = vrot.slane %v11363_v28, 1 }
 0x244   : > { %8881 = vmatprep.mubr.msk.bf16.mxu1 %vm11279_vm8, %v8278_v4  ;;  %v1762_v32 = vsel %vm1145_vm4, %v1759_v21, %v1761_v30 }
 0x245   : > { %8882 = vmatmul.mubr.msk.bf16.gmra.mxu1 %vm11279_vm8, %v8282_v59  ;;  %v1760_v31 = vsel %vm1145_vm4, %v1757_v18, %v1759_v21  ;;  %v1764_v34 = vsel %vm1145_vm4, %v1761_v30, %v1763_v15  ;;  %v1758_v49 = vsel %vm1145_vm4, %v1755_v25, %v1757_v18  ;;  %v1766_v11 = vsel %vm1145_vm4, %v1763_v15, %v1765_v38  ;;  %v11481_v21 = vld [vmem:[%s13479_s24 + $0x8] sm:$0xff] }
 0x246   : > { %8930 = vmatpush3.bf16.msra.mxu1 %v9655_v3  ;;  %8933 = vmatprep.mubr.msk.bf16.mxu1 %vm11401_vm10, %v8318_v1  ;;  %v8338_v36 = vpack.c.bf16 %v1760_v31, %v1758_v49  ;;  %v8342_v44 = vpack.c.bf16 %v1764_v34, %v1762_v32  ;;  %v1783_v39 = vsel %vm1145_vm4, %v1765_v38, 0.0 }
 0x247   : > { %8931 = vmatprep.subr.bf16.mxu1 %v9656_v6  ;;  %v8346_v47 = vpack.c.bf16 %v1783_v39, %v1766_v11 }
 0x24a   : > { %8932 = vmatpush3.bf16.msra.mxu1 %v9656_v6 }
 0x24d   : > { %8934 = vmatmul.mubr.msk.bf16.vlgmr.msra.gmra.mxu1 %vm11401_vm10, %v8322_v35 }
 0x24e   : > { %8937 = vmatprep.mubr.msk.bf16.mxu1 %vm11401_vm10, %v8326_v62 }
 0x255   : > { %8938 = vmatmul.mubr.msk.bf16.gmra.mxu1 %vm11401_vm10, %v8330_v9 }
 0x256   : > { %8941 = vmatprep.mubr.msk.bf16.mxu1 %vm11401_vm10, %v8334_v48 }
 0x25d   : > { %8942 = vmatmul.mubr.msk.bf16.gmra.mxu1 %vm11401_vm10, %v8338_v36 }
 0x25e   : > { %8945 = vmatprep.mubr.msk.bf16.mxu1 %vm11401_vm10, %v8342_v44 }
 0x265   : > { %8946 = vmatmul.mubr.msk.bf16.gmra.mxu1 %vm11401_vm10, %v8346_v47 }
 0x2ea   : > { %v8903_v37 = vpop.f32.mrf.mxu0 }
 0x2ec   : > { %v2076_v55 = vpop.f32.mrf.mxu0 }
 0x2ed   : > { %v8871_v50 = vpop.f32.mrf.mxu1 }
 0x2ee   : > { %v8904_v58 = vpop.f32.mrf.mxu0  ;;  %v2085_v59 = vadd.f32 %v8903_v37, %v8871_v50 }
 0x2ef   : > { %v1931_v53 = vpop.f32.mrf.mxu1 }
 0x2f0   : > { %v2079_v54 = vpop.f32.mrf.mxu0  ;;  %v2077_v6 = vadd.f32 %v2076_v55, %v1931_v53 }
 0x2f1   : > { %v8872_v28 = vpop.f32.mrf.mxu1 }
 0x2f2   : > { %v8907_v40 = vpop.f32.mrf.mxu0  ;;  %v2088_v13 = vadd.f32 %v8904_v58, %v8872_v28 }
 0x2f3   : > { %v1934_v56 = vpop.f32.mrf.mxu1 }
 0x2f4   : > { %v2092_v60 = vpop.f32.mrf.mxu0  ;;  %v2080_v33 = vadd.f32 %v2079_v54, %v1934_v56 }
 0x2f5   : > { %v8875_v41 = vpop.f32.mrf.mxu1 }
 0x2f6   : > { %v8908_v2 = vpop.f32.mrf.mxu0  ;;  %v2101_v8 = vadd.f32 %v8907_v40, %v8875_v41 }
 0x2f7   : > { %v1947_v42 = vpop.f32.mrf.mxu1 }
 0x2f8   : > { %v2095_v63 = vpop.f32.mrf.mxu0  ;;  %v2093_v9 = vadd.f32 %v2092_v60, %v1947_v42 }
 0x2f9   : > { %v8876_v23 = vpop.f32.mrf.mxu1 }
 0x2fa   : > { %v8911_v5 = vpop.f32.mrf.mxu0  ;;  %v2104_v32 = vadd.f32 %v8908_v2, %v8876_v23 }
 0x2fb   : > { %v1950_v24 = vpop.f32.mrf.mxu1 }
 0x2fc   : > { %v2108_v16 = vpop.f32.mrf.mxu0  ;;  %v2096_v39 = vadd.f32 %v2095_v63, %v1950_v24 }
 0x2fd   : > { %v8879_v52 = vpop.f32.mrf.mxu1 }
 0x2fe   : > { %v8912_v25 = vpop.f32.mrf.mxu0  ;;  %v2117_v28 = vadd.f32 %v8911_v5, %v8879_v52 }
 0x2ff   : > { %v11453_v57 = vpop.f32.mrf.mxu1 }
 0x300   : > { %v2111_v49 = vpop.f32.mrf.mxu0  ;;  %v2109_v24 = vadd.f32 %v2108_v16, %v11453_v57 }
 0x301   : > { %v11455_v43 = vpop.f32.mrf.mxu1 }
 0x302   : > { %v8915_v58 = vpop.f32.mrf.mxu0 }
 0x303   : > { %v11457_v45 = vpop.f32.mrf.mxu1 }
 0x305   : > { %v11459_v51 = vpop.f32.mrf.mxu1 }
 0x307   : > { %v11461_v3 = vpop.f32.mrf.mxu1 }
 0x309   : > { %v11463_v4 = vpop.f32.mrf.mxu1 }
 0x30b   : > { %v11465_v61 = vpop.f32.mrf.mxu1 }
 0x30d   : > { %v8935_v7 = vpop.f32.mrf.mxu1 }
 0x30e   : > { %v2311_v12 = vadd.f32 %v8935_v7, %v2085_v59  ;;  %v2120_v59 = vadd.f32 %v8912_v25, %v11455_v43  ;;  %v2124_v7 = vpop.f32.mrf.mxu0 }
 0x30f   : > { %v2246_v1 = vpop.f32.mrf.mxu1  ;;  %v2125_v25 = vadd.f32 %v2124_v7, %v11461_v3 }
 0x310   : > { %v2334_v17 = vadd.f32 %v11467_v10, %v2311_v12  ;;  %v2309_v20 = vadd.f32 %v2246_v1, %v2077_v6 }
 0x311   : > { %v8936_v14 = vpop.f32.mrf.mxu1 }
 0x312   : > { %v2350_v35 = vmul.f32 8.0, %v2334_v17  ;;  %v2332_v46 = vadd.f32 %v11467_v10, %v2309_v20  ;;  %v2312_v62 = vadd.f32 %v8936_v14, %v2088_v13  ;;  %v2112_v13 = vadd.f32 %v2111_v49, %v11457_v45 }
 0x313   : > { %v2249_v19 = vpop.f32.mrf.mxu1 }
 0x314   : > { %v2368_v26 = vadd.f32 %v11473_v22, %v2350_v35  ;;  %v2348_v27 = vmul.f32 8.0, %v2332_v46  ;;  %v2335_v29 = vadd.f32 %v11467_v10, %v2312_v62  ;;  %v2310_v0 = vadd.f32 %v2249_v19, %v2080_v33  ;;  %v8916_v46 = vpop.f32.mrf.mxu0 }
 0x315   : > { %v8939_v48 = vpop.f32.mrf.mxu1  ;;  %v2133_v33 = vadd.f32 %v8915_v58, %v11459_v51 }
 0x316   : > { %2385 = vst.msk [vmem:[#allocation2 + $0x10] sm:$0xff] %vm2382_vm11, %v2368_v26  ;;  %v2366_v30 = vadd.f32 %v11473_v22, %v2348_v27  ;;  %v2351_v18 = vmul.f32 8.0, %v2335_v29  ;;  %v2333_v15 = vadd.f32 %v11467_v10, %v2310_v0  ;;  %v2315_v31 = vadd.f32 %v8939_v48, %v2101_v8 }
 0x317   : > { %v2262_v34 = vpop.f32.mrf.mxu1 }
 0x318   : > { %2383 = vst.msk [vmem:[#allocation2] sm:$0xff] %vm2382_vm11, %v2366_v30  ;;  %v2369_v36 = vadd.f32 %v11481_v21, %v2351_v18  ;;  %v2349_v38 = vmul.f32 8.0, %v2333_v15  ;;  %v2338_v44 = vadd.f32 %v11467_v10, %v2315_v31  ;;  %v2313_v11 = vadd.f32 %v2262_v34, %v2093_v9  ;;  %v2127_v30 = vpop.f32.mrf.mxu0 }
 0x319   : > { %v8940_v47 = vpop.f32.mrf.mxu1  ;;  %v2136_v9 = vadd.f32 %v8916_v46, %v11463_v4 }
 0x31a   : > { %2386 = vst.msk [vmem:[#allocation2 + $0x18] sm:$0xff] %vm2382_vm11, %v2369_v36  ;;  %v2367_v37 = vadd.f32 %v11481_v21, %v2349_v38  ;;  %v2354_v50 = vmul.f32 8.0, %v2338_v44  ;;  %v2336_v53 = vadd.f32 %v11467_v10, %v2313_v11  ;;  %v2316_v55 = vadd.f32 %v8940_v47, %v2104_v32 }
 0x31b   : > { %v2265_v56 = vpop.f32.mrf.mxu1  ;;  %v2128_v32 = vadd.f32 %v2127_v30, %v11465_v61 }
 0x31c   : > { %2384 = vst.msk [vmem:[#allocation2 + $0x8] sm:$0xff] %vm2382_vm11, %v2367_v37  ;;  %v2372_v41 = vadd.f32 %v11473_v22, %v2354_v50  ;;  %v2352_v42 = vmul.f32 8.0, %v2336_v53  ;;  %v2339_v54 = vadd.f32 %v11467_v10, %v2316_v55  ;;  %v2314_v23 = vadd.f32 %v2265_v56, %v2096_v39 }
 0x31d   : > { %v8943_v40 = vpop.f32.mrf.mxu1 }
 0x31e   : > { %2389 = vst.msk [vmem:[#allocation2 + $0x30] sm:$0xff] %vm2382_vm11, %v2372_v41  ;;  %v2370_v60 = vadd.f32 %v11473_v22, %v2352_v42  ;;  %v2355_v2 = vmul.f32 8.0, %v2339_v54  ;;  %v2337_v52 = vadd.f32 %v11467_v10, %v2314_v23  ;;  %v2319_v63 = vadd.f32 %v8943_v40, %v2117_v28 }
 0x31f   : > { %v2278_v5 = vpop.f32.mrf.mxu1 }
 0x320   : > { %2387 = vst.msk [vmem:[#allocation2 + $0x20] sm:$0xff] %vm2382_vm11, %v2370_v60  ;;  %v2373_v6 = vadd.f32 %v11481_v21, %v2355_v2  ;;  %v2353_v12 = vmul.f32 8.0, %v2337_v52  ;;  %v2342_v57 = vadd.f32 %v11467_v10, %v2319_v63  ;;  %v2317_v1 = vadd.f32 %v2278_v5, %v2109_v24 }
 0x321   : > { %v8944_v16 = vpop.f32.mrf.mxu1 }
 0x322   : > { %2390 = vst.msk [vmem:[#allocation2 + $0x38] sm:$0xff] %vm2382_vm11, %v2373_v6  ;;  %v2371_v17 = vadd.f32 %v11481_v21, %v2353_v12  ;;  %v2358_v20 = vmul.f32 8.0, %v2342_v57  ;;  %v2340_v43 = vadd.f32 %v11467_v10, %v2317_v1  ;;  %v2320_v14 = vadd.f32 %v8944_v16, %v2120_v59 }
 0x323   : > { %v2281_v35 = vpop.f32.mrf.mxu1 }
 0x324   : > { %2388 = vst.msk [vmem:[#allocation2 + $0x28] sm:$0xff] %vm2382_vm11, %v2371_v17  ;;  %v2376_v62 = vadd.f32 %v11473_v22, %v2358_v20  ;;  %v2356_v8 = vmul.f32 8.0, %v2340_v43  ;;  %v2343_v45 = vadd.f32 %v11467_v10, %v2320_v14  ;;  %v2318_v19 = vadd.f32 %v2281_v35, %v2112_v13 }
 0x325   : > { %v8947_v26 = vpop.f32.mrf.mxu1 }
 0x326   : > { %2393 = vst.msk [vmem:[#allocation2 + $0x50] sm:$0xff] %vm2382_vm11, %v2376_v62  ;;  %v2374_v27 = vadd.f32 %v11473_v22, %v2356_v8  ;;  %v2359_v29 = vmul.f32 8.0, %v2343_v45  ;;  %v2341_v51 = vadd.f32 %v11467_v10, %v2318_v19  ;;  %v2323_v0 = vadd.f32 %v8947_v26, %v2133_v33 }
 0x327   : > { %v2294_v48 = vpop.f32.mrf.mxu1 }
 0x328   : > { %2391 = vst.msk [vmem:[#allocation2 + $0x40] sm:$0xff] %vm2382_vm11, %v2374_v27  ;;  %v2377_v18 = vadd.f32 %v11481_v21, %v2359_v29  ;;  %v2357_v15 = vmul.f32 8.0, %v2341_v51  ;;  %v2346_v3 = vadd.f32 %v11467_v10, %v2323_v0  ;;  %v2321_v31 = vadd.f32 %v2294_v48, %v2125_v25 }
 0x329   : > { %v8948_v34 = vpop.f32.mrf.mxu1 }
 0x32a   : > { %2394 = vst.msk [vmem:[#allocation2 + $0x58] sm:$0xff] %vm2382_vm11, %v2377_v18  ;;  %v2375_v49 = vadd.f32 %v11481_v21, %v2357_v15  ;;  %v2362_v36 = vmul.f32 8.0, %v2346_v3  ;;  %v2344_v4 = vadd.f32 %v11467_v10, %v2321_v31  ;;  %v2324_v38 = vadd.f32 %v8948_v34, %v2136_v9 }
 0x32b   : > { %v2297_v44 = vpop.f32.mrf.mxu1 }
 0x32c   : > { %2392 = vst.msk [vmem:[#allocation2 + $0x48] sm:$0xff] %vm2382_vm11, %v2375_v49  ;;  %v2380_v11 = vadd.f32 %v11473_v22, %v2362_v36  ;;  %v2360_v39 = vmul.f32 8.0, %v2344_v4  ;;  %v2347_v47 = vadd.f32 %v11467_v10, %v2324_v38  ;;  %v2322_v37 = vadd.f32 %v2297_v44, %v2128_v32 }
 0x32e   : > { %2397 = vst.msk [vmem:[#allocation2 + $0x70] sm:$0xff] %vm2382_vm11, %v2380_v11  ;;  %v2378_v61 = vadd.f32 %v11473_v22, %v2360_v39  ;;  %v2363_v50 = vmul.f32 8.0, %v2347_v47  ;;  %v2345_v53 = vadd.f32 %v11467_v10, %v2322_v37 }
 0x330   : > { %2395 = vst.msk [vmem:[#allocation2 + $0x60] sm:$0xff] %vm2382_vm11, %v2378_v61  ;;  %v2381_v55 = vadd.f32 %v11481_v21, %v2363_v50  ;;  %v2361_v28 = vmul.f32 8.0, %v2345_v53 }
 0x332   : > { %2398 = vst.msk [vmem:[#allocation2 + $0x78] sm:$0xff] %vm2382_vm11, %v2381_v55  ;;  %v2379_v56 = vadd.f32 %v11481_v21, %v2361_v28 }
 0x334   : > { %2396 = vst.msk [vmem:[#allocation2 + $0x68] sm:$0xff] %vm2382_vm11, %v2379_v56 }
 0x335 PF: > { %v9657_v10 = vld [vmem:[%s10913_s6 + $0x34] ss:$8 sps:$4 sm:$0xff]   ;;  %v9659_v22 = vld [vmem:[%s10913_s6 + $0x30] ss:$8 sps:$4 sm:$0xff]   ;;  %v10524_v58 = vmov 0   ;;  %vm2483_vm12 = vcmask 523264   ;;  %v2433_v19 = vlaneseq }
 0x336   : > { %2540 = vmatprep.mubr.bf16.mxu0 %v10524_v58  ;;  %2516 = vmatprep.subr.bf16.mxu0 %v9657_v10  ;;  %v9660_v41 = vld [vmem:[%s10913_s6 + $0x24] ss:$8 sps:$4 sm:$0xff]   ;;  %v9662_v42 = vld [vmem:[%s10913_s6 + $0x20] ss:$8 sps:$4 sm:$0xff]   ;;  %v9663_v21 = vld [vmem:[%s10913_s6 + $0x14] ss:$8 sps:$4 sm:$0xff]  }
 0x337   : > { %2517 = vmatpush1.bf16.msra.mxu0 %v9659_v22  ;;  %v9665_v54 = vld [vmem:[%s10913_s6 + $0x10] ss:$8 sps:$4 sm:$0xff]   ;;  %v9666_v23 = vld [vmem:[%s10913_s6 + $0x4] ss:$8 sps:$4 sm:$0xff]   ;;  %v9668_v24 = vld [vmem:[%s10913_s6] ss:$8 sps:$4 sm:$0xff]  }
 0x338   : > { %2518 = vmatprep.subr.bf16.mxu0 %v9660_v41  ;;  %v2399_v40 = vld [vmem:[#allocation2] sm:$0xff]  ;;  %v2400_v60 = vld [vmem:[#allocation2 + $0x8] sm:$0xff]  ;;  %v2401_v52 = vld [vmem:[#allocation2 + $0x10] sm:$0xff]  ;;  %v2434_v27 = vshrl.u32 %v2433_v19, 7  ;;  %v13408_v51 = vmov 0.0   ;;  %vm10526_vm13 = vmmov 0  }
 0x339   : > { %v2415_v2 = vpack.c.bf16 %v2400_v60, %v2399_v40  ;;  %v2402_v63 = vld [vmem:[#allocation2 + $0x18] sm:$0xff]  ;;  %v2403_v5 = vld [vmem:[#allocation2 + $0x20] sm:$0xff]  ;;  %v2404_v7 = vld [vmem:[#allocation2 + $0x28] sm:$0xff]  ;;  %8955 = vmatprep.subr.bf16.mxu1 %v13408_v51  ;;  %8957 = vmatprep.mubr.msk.bf16.mxu1 %vm10526_vm13, %v13408_v51  ;;  %s10527_s6 = smov 64   ;;  %vm2648_vm14 = vcmask 130048   ;;  %s10529_s23 = smov 112  }
 0x33a   : > { %v2416_v59 = vpack.c.bf16 %v2402_v63, %v2401_v52  ;;  %v2417_v6 = vpack.c.bf16 %v2404_v7, %v2403_v5  ;;  %v2405_v12 = vld [vmem:[#allocation2 + $0x30] sm:$0xff]  ;;  %v2406_v57 = vld [vmem:[#allocation2 + $0x38] sm:$0xff]  ;;  %v2407_v13 = vld [vmem:[#allocation2 + $0x40] sm:$0xff]  ;;  %v2435_v9 = vsub.s32 0, %v2434_v27  ;;  %v2439_v31 = vsub.s32 1, %v2434_v27  ;;  %s10530_s28 = smov 32  }
 0x33b   : > { %2519 = vmatpush1.bf16.msra.mxu0 %v9662_v42  ;;  %v2418_v1 = vpack.c.bf16 %v2406_v57, %v2405_v12  ;;  %v2408_v16 = vld [vmem:[#allocation2 + $0x48] sm:$0xff]  ;;  %v2409_v20 = vld [vmem:[#allocation2 + $0x50] sm:$0xff]  ;;  %v2410_v43 = vld [vmem:[#allocation2 + $0x58] sm:$0xff]  ;;  %s10531_s1 = smov 96   ;;  %s10532_s22 = smov 80  }
 0x33c   : > { %2520 = vmatprep.subr.bf16.mxu0 %v9663_v21  ;;  %v2419_v17 = vpack.c.bf16 %v2408_v16, %v2407_v13  ;;  %v2420_v14 = vpack.c.bf16 %v2410_v43, %v2409_v20  ;;  %v2411_v33 = vld [vmem:[#allocation2 + $0x60] sm:$0xff]  ;;  %v2412_v35 = vld [vmem:[#allocation2 + $0x68] sm:$0xff]  ;;  %v2413_v62 = vld [vmem:[#allocation2 + $0x70] sm:$0xff]  ;;  %s10533_s8 = smov 16   ;;  %s13529_s17 = scalar_lea.vmem [#allocation20], %s10910_s21 }
 0x33d   : > { %v2421_v46 = vpack.c.bf16 %v2412_v35, %v2411_v33  ;;  %v2414_v8 = vld [vmem:[#allocation2 + $0x78] sm:$0xff]  ;;  %v2431_v48 = vld [vmem:[%s10921_s30] sm:$0x3]  ;;  %s10528_s30 = smov 48   ;;  %s13530_s2 = scalar_lea.vmem [#allocation16], %s10910_s21 }
 0x33e   : > { %v2422_v45 = vpack.c.bf16 %v2414_v8, %v2413_v62  ;;  %v11563_v15 = vrot.slane %v2431_v48, %v2435_v9  ;;  %v11571_v38 = vrot.slane %v2431_v48, %v2439_v31  ;;  %s13532_s26 = scalar_lea.vmem [#allocation22], %s10910_s21  ;;  %s13533_s27 = scalar_lea.vmem [#allocation23], %s10910_s21 }
 0x33f   : > { %2521 = vmatpush1.bf16.msra.mxu0 %v9665_v54 }
 0x340   : > { %2522 = vmatprep.subr.bf16.mxu0 %v9666_v23 }
 0x343   : > { %2523 = vmatpush1.bf16.msra.mxu0 %v9668_v24 }
 0x344   : > { %8949 = vmatprep.subr.bf16.mxu0 %v13408_v51 }
 0x346   : > { %8357 = vmatmul.mubr.msk.bf16.vlgmr.msra.gmra.mxu0 %vm2483_vm12, %v2415_v2 }
 0x347   : > { %2550 = vmatprep.mubr.bf16.mxu0 %v10524_v58 }
 0x34e   : > { %8358 = vmatmul.mubr.msk.bf16.gmra.mxu0 %vm2483_vm12, %v2416_v59 }
 0x34f   : > { %2560 = vmatprep.mubr.bf16.mxu0 %v10524_v58 }
 0x356   : > { %8359 = vmatmul.mubr.msk.bf16.gmra.mxu0 %vm2483_vm12, %v2417_v6 }
 0x357   : > { %2570 = vmatprep.mubr.bf16.mxu0 %v10524_v58 }
 0x35e   : > { %8360 = vmatmul.mubr.msk.bf16.gmra.mxu0 %vm2483_vm12, %v2418_v1 }
 0x35f   : > { %2580 = vmatprep.mubr.bf16.mxu0 %v10524_v58 }
 0x366   : > { %8361 = vmatmul.mubr.msk.bf16.gmra.mxu0 %vm2483_vm12, %v2419_v17 }
 0x367   : > { %2590 = vmatprep.mubr.bf16.mxu0 %v10524_v58 }
 0x36e   : > { %8362 = vmatmul.mubr.msk.bf16.gmra.mxu0 %vm2483_vm12, %v2420_v14 }
 0x36f   : > { %2600 = vmatprep.mubr.bf16.mxu0 %v10524_v58 }
 0x376   : > { %8363 = vmatmul.mubr.msk.bf16.gmra.mxu0 %vm2483_vm12, %v2421_v46 }
 0x377   : > { %2610 = vmatprep.mubr.bf16.mxu0 %v10524_v58 }
 0x37e   : > { %8364 = vmatmul.mubr.msk.bf16.gmra.mxu0 %vm2483_vm12, %v2422_v45 }
 0x37f   : > { %8951 = vmatprep.mubr.msk.bf16.mxu0 %vm10526_vm13, %v13408_v51 }
 0x406   : > { %v2542_v25 = vpop.f32.mrf.mxu0 }
 0x407   : > { %v2543_v40 = vadd.f32 %v2542_v25, %v11563_v15 }
 0x408   : > { %v11550_v26 = vpop.f32.mrf.mxu0 }
 0x40a   : > { %v2546_v29 = vpop.f32.mrf.mxu0 }
 0x40b   : > { %v2547_v21 = vadd.f32 %v2546_v29, %v11563_v15 }
 0x40c   : > { %v11554_v0 = vpop.f32.mrf.mxu0 }
 0x40d   : > { %v11597_v52 = vpack.c.bf16 %v2547_v21, %v2543_v40 }
 0x40e   : > { %v2552_v30 = vpop.f32.mrf.mxu0 }
 0x40f   : > { %v2553_v32 = vadd.f32 %v2552_v30, %v11563_v15 }
 0x410   : > { %v11561_v18 = vpop.f32.mrf.mxu0 }
 0x412   : > { %v2556_v3 = vpop.f32.mrf.mxu0 }
 0x413   : > { %v2557_v34 = vadd.f32 %v2556_v3, %v11563_v15 }
 0x414   : > { %v11567_v49 = vpop.f32.mrf.mxu0 }
 0x415   : > { %v11569_v36 = vpack.c.bf16 %v2557_v34, %v2553_v32 }
 0x416   : > { %v2562_v4 = vpop.f32.mrf.mxu0 }
 0x417   : > { %2697 = vrot.lane.b32.xlu0 %v11569_v36, %s10527_s6  ;;  %v2563_v47 = vadd.f32 %v2562_v4, %v11563_v15 }
 0x418   : > { %v2564_v44 = vpop.f32.mrf.mxu0 }
 0x419   : > { %v2565_v11 = vadd.f32 %v2564_v44, %v11571_v38 }
 0x41a   : > { %v2566_v39 = vpop.f32.mrf.mxu0 }
 0x41b   : > { %v2567_v37 = vadd.f32 %v2566_v39, %v11563_v15 }
 0x41c   : > { %v2568_v61 = vpop.f32.mrf.mxu0 }
 0x41d   : > { %v11578_v50 = vpack.c.bf16 %v2567_v37, %v2563_v47  ;;  %v2569_v53 = vadd.f32 %v2568_v61, %v11571_v38 }
 0x41e   : > { %v2572_v55 = vpop.f32.mrf.mxu0 }
 0x41f   : > { %v11581_v28 = vpack.c.bf16 %v2569_v53, %v2565_v11  ;;  %2747 = vrot.lane.b32.xlu0 %v11578_v50, %s10527_s6  ;;  %v2573_v58 = vadd.f32 %v2572_v55, %v11563_v15 }
 0x420   : > { %v2574_v56 = vpop.f32.mrf.mxu0 }
 0x421   : > { %13480 = vst [vmem:[#allocation45_spill] sm:$0xff] %v11581_v28  ;;  %v2575_v10 = vadd.f32 %v2574_v56, %v11571_v38 }
 0x422   : > { %v2576_v22 = vpop.f32.mrf.mxu0 }
 0x423   : > { %v2577_v41 = vadd.f32 %v2576_v22, %v11563_v15 }
 0x424   : > { %v2578_v42 = vpop.f32.mrf.mxu0 }
 0x425   : > { %v11589_v54 = vpack.c.bf16 %v2577_v41, %v2573_v58  ;;  %v2579_v23 = vadd.f32 %v2578_v42, %v11571_v38  ;;  %v2559_v42 = vadd.f32 %v11567_v49, %v11571_v38 }
 0x426   : > { %v2582_v24 = vpop.f32.mrf.mxu0 }
 0x427   : > { %v11593_v60 = vpack.c.bf16 %v2579_v23, %v2575_v10  ;;  %2797 = vrot.lane.b32.xlu1 %v11589_v54, %s10527_s6  ;;  %v2583_v5 = vadd.f32 %v2582_v24, %v11563_v15  ;;  %v2555_v24 = vadd.f32 %v11561_v18, %v11571_v38 }
 0x428   : > { %v2584_v2 = vpop.f32.mrf.mxu0 }
 0x429   : > { %13481 = vst [vmem:[#allocation46_spill] sm:$0xff] %v11593_v60  ;;  %v2585_v63 = vadd.f32 %v2584_v2, %v11571_v38  ;;  %v11667_v40 = vpack.c.bf16 %v2559_v42, %v2555_v24 }
 0x42a   : > { %v2586_v59 = vpop.f32.mrf.mxu0 }
 0x42b   : > { %v2587_v7 = vadd.f32 %v2586_v59, %v11563_v15  ;;  %2646 = vrot.lane.b32.xlu1 %v11597_v52, %s10527_s6  ;;  %13483 = vst [vmem:[#allocation48_spill] sm:$0xff] %v11667_v40 }
 0x42c   : > { %v2588_v6 = vpop.f32.mrf.mxu0 }
 0x42d   : > { %v11604_v12 = vpack.c.bf16 %v2587_v7, %v2583_v5  ;;  %v2589_v57 = vadd.f32 %v2588_v6, %v11571_v38  ;;  %v2549_v7 = vadd.f32 %v11554_v0, %v11571_v38  ;;  %v2545_v6 = vadd.f32 %v11550_v26, %v11571_v38 }
 0x42e   : > { %v2592_v1 = vpop.f32.mrf.mxu0 }
 0x42f   : > { %v11607_v13 = vpack.c.bf16 %v2589_v57, %v2585_v63  ;;  %2847 = vrot.lane.b32.xlu0 %v11604_v12, %s10527_s6  ;;  %v2593_v43 = vadd.f32 %v2592_v1, %v11563_v15  ;;  %v11697_v57 = vpack.c.bf16 %v2549_v7, %v2545_v6 }
 0x430   : > { %v2594_v16 = vpop.f32.mrf.mxu0 }
 0x431   : > { %v2595_v17 = vadd.f32 %v2594_v16, %v11571_v38  ;;  %13484 = vst [vmem:[#allocation49_spill] sm:$0xff] %v11697_v57 }
 0x432   : > { %v2596_v20 = vpop.f32.mrf.mxu0 }
 0x433   : > { %v2597_v14 = vadd.f32 %v2596_v20, %v11563_v15 }
 0x434   : > { %v2598_v33 = vpop.f32.mrf.mxu0 }
 0x435   : > { %v11614_v35 = vpack.c.bf16 %v2597_v14, %v2593_v43  ;;  %v2599_v46 = vadd.f32 %v2598_v33, %v11571_v38 }
 0x436   : > { %v2602_v62 = vpop.f32.mrf.mxu0 }
 0x437   : > { %v11617_v8 = vpack.c.bf16 %v2599_v46, %v2595_v17  ;;  %2897 = vrot.lane.b32.xlu1 %v11614_v35, %s10527_s6  ;;  %v2603_v27 = vadd.f32 %v2602_v62, %v11563_v15 }
 0x438   : > { %v2604_v45 = vpop.f32.mrf.mxu0 }
 0x439   : > { %v2605_v19 = vadd.f32 %v2604_v45, %v11571_v38 }
 0x43a   : > { %v2606_v25 = vpop.f32.mrf.mxu0 }
 0x43b   : > { %v2607_v29 = vadd.f32 %v2606_v25, %v11563_v15 }
 0x43c   : > { %v2608_v9 = vpop.f32.mrf.mxu0 }
 0x43d   : > { %v11624_v48 = vpack.c.bf16 %v2607_v29, %v2603_v27  ;;  %v2609_v30 = vadd.f32 %v2608_v9, %v11571_v38 }
 0x43e   : > { %v2612_v3 = vpop.f32.mrf.mxu0 }
 0x43f   : > { %v11627_v31 = vpack.c.bf16 %v2609_v30, %v2605_v19  ;;  %2947 = vrot.lane.b32.xlu0 %v11624_v48, %s10527_s6  ;;  %v2613_v44 = vadd.f32 %v2612_v3, %v11563_v15 }
 0x440   : > { %v2614_v32 = vpop.f32.mrf.mxu0 }
 0x441   : > { %v2615_v34 = vadd.f32 %v2614_v32, %v11571_v38 }
 0x442   : > { %v2616_v4 = vpop.f32.mrf.mxu0 }
 0x443   : > { %v2617_v11 = vadd.f32 %v2616_v4, %v11563_v15 }
 0x444   : > { %v2618_v39 = vpop.f32.mrf.mxu0 }
 0x445   : > { %v11634_v47 = vpack.c.bf16 %v2617_v11, %v2613_v44  ;;  %v2619_v37 = vadd.f32 %v2618_v39, %v11571_v38 }
 0x447   : > { %13482 = vst [vmem:[#allocation47_spill] sm:$0xff] %v11634_v47  ;;  %2997 = vrot.lane.b32.xlu1 %v11634_v47, %s10527_s6  ;;  %v11639_v61 = vpack.c.bf16 %v2619_v37, %v2615_v34 }
 0x489   : > { %v2698_v53 = vpop.permute.xlu0 %2697 }
 0x48a   : > { %v2703_v55 = vsel %vm2648_vm14, %v2698_v53, 0 }
 0x48b   : > { %8956 = vmatpush3.bf16.xpose.msra.mxu1 %v2703_v55 }
 0x48c   : > { %8961 = vmatprep.subr.bf16.mxu1 %v13408_v51 }
 0x491   : > { %v2748_v56 = vpop.permute.xlu0 %2747 }
 0x492   : > { %v2753_v15 = vsel %vm2648_vm14, %v2748_v56, 0  ;;  %8958 = vmatmul.mubr.msk.bf16.vlgmr.msra.gmra.mxu1 %vm2648_vm14, %v11569_v36 }
 0x493   : > { %8962 = vmatpush3.bf16.xpose.msra.mxu1 %v2753_v15  ;;  %8963 = vmatprep.mubr.msk.bf16.mxu1 %vm10526_vm13, %v13408_v51 }
 0x494   : > { %8967 = vmatprep.subr.bf16.mxu1 %v13408_v51 }
 0x499   : > { %v2798_v10 = vpop.permute.xlu1 %2797 }
 0x49a   : > { %v2803_v22 = vsel %vm2648_vm14, %v2798_v10, 0  ;;  %8964 = vmatmul.mubr.msk.bf16.vlgmr.msra.gmra.mxu1 %vm2648_vm14, %v11578_v50 }
 0x49b   : > { %8968 = vmatpush3.bf16.xpose.msra.mxu1 %v2803_v22  ;;  %8969 = vmatprep.mubr.msk.bf16.mxu1 %vm10526_vm13, %v13408_v51 }
 0x49c   : > { %8973 = vmatprep.subr.bf16.mxu1 %v13408_v51 }
 0x49d   : > { %v2647_v58 = vpop.permute.xlu1 %2646 }
 0x49e   : > { %v2653_v41 = vsel %vm2648_vm14, %v2647_v58, 0 }
 0x49f   : > { %8950 = vmatpush3.bf16.xpose.msra.mxu0 %v2653_v41 }
 0x4a0   : > { %9003 = vmatprep.subr.bf16.mxu0 %v13408_v51 }
 0x4a1   : > { %v2848_v21 = vpop.permute.xlu0 %2847 }
 0x4a2   : > { %v2853_v23 = vsel %vm2648_vm14, %v2848_v21, 0  ;;  %8970 = vmatmul.mubr.msk.bf16.vlgmr.msra.gmra.mxu1 %vm2648_vm14, %v11589_v54 }
 0x4a3   : > { %8974 = vmatpush3.bf16.xpose.msra.mxu1 %v2853_v23  ;;  %8975 = vmatprep.mubr.msk.bf16.mxu1 %vm10526_vm13, %v13408_v51 }
 0x4a4   : > { %8979 = vmatprep.subr.bf16.mxu1 %v13408_v51 }
 0x4a6   : > { %8952 = vmatmul.mubr.msk.bf16.vlgmr.msra.gmra.mxu0 %vm2648_vm14, %v11597_v52 }
 0x4a7   : > { %9004 = vmatpush3.bf16.msra.mxu0 %v11667_v40  ;;  %9005 = vmatprep.mubr.msk.bf16.mxu0 %vm10526_vm13, %v13408_v51 }
 0x4a8   : > { %9015 = vmatprep.subr.bf16.mxu0 %v13408_v51 }
 0x4a9   : > { %v2898_v49 = vpop.permute.xlu1 %2897 }
 0x4aa   : > { %v2903_v18 = vsel %vm2648_vm14, %v2898_v49, 0  ;;  %8976 = vmatmul.mubr.msk.bf16.vlgmr.msra.gmra.mxu1 %vm2648_vm14, %v11604_v12 }
 0x4ab   : > { %8980 = vmatpush3.bf16.xpose.msra.mxu1 %v2903_v18  ;;  %8981 = vmatprep.mubr.msk.bf16.mxu1 %vm10526_vm13, %v13408_v51 }
 0x4ac   : > { %8985 = vmatprep.subr.bf16.mxu1 %v13408_v51 }
 0x4b1   : > { %v2948_v2 = vpop.permute.xlu0 %2947 }
 0x4b2   : > { %v2953_v63 = vsel %vm2648_vm14, %v2948_v2, 0  ;;  %8982 = vmatmul.mubr.msk.bf16.vlgmr.msra.gmra.mxu1 %vm2648_vm14, %v11614_v35 }
 0x4b3   : > { %8986 = vmatpush3.bf16.xpose.msra.mxu1 %v2953_v63  ;;  %8987 = vmatprep.mubr.msk.bf16.mxu1 %vm10526_vm13, %v13408_v51 }
 0x4b4   : > { %8991 = vmatprep.subr.bf16.mxu1 %v13408_v51 }
 0x4b9   : > { %v2998_v59 = vpop.permute.xlu1 %2997 }
 0x4ba   : > { %v3003_v5 = vsel %vm2648_vm14, %v2998_v59, 0  ;;  %8988 = vmatmul.mubr.msk.bf16.vlgmr.msra.gmra.mxu1 %vm2648_vm14, %v11624_v48 }
 0x4bb   : > { %8992 = vmatpush3.bf16.xpose.msra.mxu1 %v3003_v5  ;;  %8993 = vmatprep.mubr.msk.bf16.mxu1 %vm10526_vm13, %v13408_v51 }
 0x4bc   : > { %8997 = vmatprep.subr.bf16.mxu1 %v13408_v51 }
 0x4c2   : > { %8994 = vmatmul.mubr.msk.bf16.vlgmr.msra.gmra.mxu1 %vm2648_vm14, %v11634_v47 }
 0x4c3   : > { %8998 = vmatpush3.bf16.msra.mxu1 %v11697_v57  ;;  %8999 = vmatprep.mubr.msk.bf16.mxu1 %vm10526_vm13, %v13408_v51 }
 0x4c4   : > { %9009 = vmatprep.subr.bf16.mxu1 %v13408_v51 }
 0x552   : > { %v11705_v1 = vpop.f32.mrf.mxu1 }
 0x553   : > { %v3052_v9 = vsel %vm2648_vm14, %v11705_v1, -inf }
 0x554   : > { %v8959_v16 = vpop.f32.mrf.mxu1 }
 0x556   : > { %v11707_v17 = vpop.f32.mrf.mxu1 }
 0x557   : > { %v3055_v4 = vsel %vm2648_vm14, %v11707_v17, -inf }
 0x558   : > { %v8960_v0 = vpop.f32.mrf.mxu1 }
 0x55a   : > { %v11709_v20 = vpop.f32.mrf.mxu1 }
 0x55b   : > { %v3058_v44 = vsel %vm2648_vm14, %v11709_v20, -inf }
 0x55c   : > { %v8965_v26 = vpop.f32.mrf.mxu1 }
 0x55e   : > { %v11711_v38 = vpop.f32.mrf.mxu1 }
 0x55f   : > { %v3061_v37 = vsel %vm2648_vm14, %v11711_v38, -inf }
 0x560   : > { %v8966_v43 = vpop.f32.mrf.mxu1 }
 0x562   : > { %v11713_v14 = vpop.f32.mrf.mxu1 }
 0x563   : > { %v3064_v53 = vsel %vm2648_vm14, %v11713_v14, -inf }
 0x564   : > { %v8971_v33 = vpop.f32.mrf.mxu1 }
 0x566   : > { %v2689_v46 = vpop.f32.mrf.mxu0  ;;  %v11715_v62 = vpop.f32.mrf.mxu1 }
 0x567   : > { %v3046_v45 = vsel %vm2648_vm14, %v2689_v46, -inf  ;;  %v3067_v15 = vsel %vm2648_vm14, %v11715_v62, -inf }
 0x568   : > { %v8972_v19 = vpop.f32.mrf.mxu1  ;;  %3047 = vmax.xlane.f32.xlu0 %v3046_v45  ;;  %v8953_v25 = vpop.f32.mrf.mxu0 }
 0x56a   : > { %v2692_v27 = vpop.f32.mrf.mxu0  ;;  %v11718_v29 = vpop.f32.mrf.mxu1 }
 0x56b   : > { %v3049_v30 = vsel %vm2648_vm14, %v2692_v27, -inf  ;;  %v3070_v10 = vsel %vm2648_vm14, %v11718_v29, -inf }
 0x56c   : > { %v8977_v3 = vpop.f32.mrf.mxu1  ;;  %3053 = vmax.xlane.f32.xlu0 %v3052_v9  ;;  %3050 = vmax.xlane.f32.xlu1 %v3049_v30  ;;  %v8954_v32 = vpop.f32.mrf.mxu0 }
 0x56e   : > { %v11723_v34 = vpop.f32.mrf.mxu1 }
 0x56f   : > { %v3073_v41 = vsel %vm2648_vm14, %v11723_v34, -inf }
 0x570   : > { %v8978_v11 = vpop.f32.mrf.mxu1  ;;  %3056 = vmax.xlane.f32.xlu0 %v3055_v4  ;;  %3059 = vmax.xlane.f32.xlu1 %v3058_v44 }
 0x572   : > { %v11729_v39 = vpop.f32.mrf.mxu1 }
 0x573   : > { %v3076_v42 = vsel %vm2648_vm14, %v11729_v39, -inf }
 0x574   : > { %3062 = vmax.xlane.f32.xlu0 %v3061_v37  ;;  %3065 = vmax.xlane.f32.xlu1 %v3064_v53  ;;  %v8983_v55 = vpop.f32.mrf.mxu1 }
 0x576   : > { %v11735_v56 = vpop.f32.mrf.mxu1 }
 0x577   : > { %v3079_v24 = vsel %vm2648_vm14, %v11735_v56, -inf }
 0x578   : > { %3068 = vmax.xlane.f32.xlu0 %v3067_v15  ;;  %3071 = vmax.xlane.f32.xlu1 %v3070_v10  ;;  %v8984_v22 = vpop.f32.mrf.mxu1 }
 0x57a   : > { %v11741_v58 = vpop.f32.mrf.mxu1 }
 0x57b   : > { %v3082_v49 = vsel %vm2648_vm14, %v11741_v58, -inf }
 0x57c   : > { %3074 = vmax.xlane.f32.xlu0 %v3073_v41  ;;  %3077 = vmax.xlane.f32.xlu1 %v3076_v42  ;;  %v8989_v21 = vpop.f32.mrf.mxu1 }
 0x57e   : > { %v11747_v23 = vpop.f32.mrf.mxu1 }
 0x57f   : > { %v3085_v63 = vsel %vm2648_vm14, %v11747_v23, -inf }
 0x580   : > { %3080 = vmax.xlane.f32.xlu0 %v3079_v24  ;;  %3083 = vmax.xlane.f32.xlu1 %v3082_v49  ;;  %v8990_v18 = vpop.f32.mrf.mxu1 }
 0x582   : > { %v11753_v2 = vpop.f32.mrf.mxu1 }
 0x583   : > { %v3088_v59 = vsel %vm2648_vm14, %v11753_v2, -inf }
 0x584   : > { %3086 = vmax.xlane.f32.xlu0 %v3085_v63  ;;  %3089 = vmax.xlane.f32.xlu1 %v3088_v59  ;;  %v8995_v5 = vpop.f32.mrf.mxu1 }
 0x586   : > { %v11759_v7 = vpop.f32.mrf.mxu1 }
 0x587   : > { %v3091_v6 = vsel %vm2648_vm14, %v11759_v7, -inf }
 0x588   : > { %3092 = vmax.xlane.f32.xlu0 %v3091_v6  ;;  %v8996_v16 = vpop.f32.mrf.mxu1 }
 0x595   : > { %3592 = vrot.lane.b32.xlu1 %v11597_v52, %s10528_s30 }
 0x5f1   : > { %v3048_v0 = vpop.xlane.xlu0 %3047 }
 0x5f2   : > { %v3094_v26 = vsub.f32 %v2689_v46, %v3048_v0 }
 0x5f4   : > { %v3110_v43 = vmul.f32 1.442695, %v3094_v26 }
 0x5f5   : > { %v3054_v33 = vpop.xlane.xlu0 %3053  ;;  %v3051_v45 = vpop.xlane.xlu1 %3050 }
 0x5f6   : > { %9685 = vpow2.f32 %v3110_v43  ;;  %v3096_v19 = vsub.f32 %v11705_v1, %v3054_v33  ;;  %v3095_v25 = vsub.f32 %v2692_v27, %v3051_v45 }
 0x5f8   : > { %v3114_v9 = vmul.f32 1.442695, %v3096_v19  ;;  %v3112_v30 = vmul.f32 1.442695, %v3095_v25 }
 0x5f9   : > { %v3057_v3 = vpop.xlane.xlu0 %3056  ;;  %v3060_v32 = vpop.xlane.xlu1 %3059 }
 0x5fa   : > { %9687 = vpow2.f32 %v3114_v9  ;;  %v3097_v4 = vsub.f32 %v11707_v17, %v3057_v3  ;;  %v3098_v44 = vsub.f32 %v11709_v20, %v3060_v32 }
 0x5fb   : > { %9689 = vpow2.f32 %v3112_v30 }
 0x5fc   : > { %v3116_v11 = vmul.f32 1.442695, %v3097_v4  ;;  %v3118_v37 = vmul.f32 1.442695, %v3098_v44 }
 0x5fd   : > { %v3063_v46 = vpop.xlane.xlu0 %3062  ;;  %v3066_v53 = vpop.xlane.xlu1 %3065 }
 0x5fe   : > { %9691 = vpow2.f32 %v3116_v11  ;;  %v3099_v55 = vsub.f32 %v11711_v38, %v3063_v46  ;;  %v3100_v1 = vsub.f32 %v11713_v14, %v3066_v53 }
 0x5ff   : > { %9693 = vpow2.f32 %v3118_v37 }
 0x600   : > { %v3120_v27 = vmul.f32 1.442695, %v3099_v55  ;;  %v3122_v15 = vmul.f32 1.442695, %v3100_v1 }
 0x601   : > { %v3069_v10 = vpop.xlane.xlu0 %3068  ;;  %v3072_v22 = vpop.xlane.xlu1 %3071 }
 0x602   : > { %9695 = vpow2.f32 %v3120_v27  ;;  %v3101_v17 = vsub.f32 %v11715_v62, %v3069_v10  ;;  %v3102_v20 = vsub.f32 %v11718_v29, %v3072_v22 }
 0x603   : > { %v11772_v41 = vpop.eup %9685  ;;  %9697 = vpow2.f32 %v3122_v15 }
 0x604   : > { %v3124_v42 = vmul.f32 1.442695, %v3101_v17  ;;  %v3126_v21 = vmul.f32 1.442695, %v3102_v20  ;;  %v3142_v38 = vsel %vm2648_vm14, %v11772_v41, 0.0 }
 0x605   : > { %v3075_v24 = vpop.xlane.xlu0 %3074  ;;  %3143 = vadd.xlane.f32.xlu1 %v3142_v38  ;;  %v3078_v14 = vpop.xlane.xlu1 %3077 }
 0x606   : > { %9699 = vpow2.f32 %v3124_v42  ;;  %v3103_v49 = vsub.f32 %v11723_v34, %v3075_v24  ;;  %v3104_v18 = vsub.f32 %v11729_v39, %v3078_v14 }
 0x607   : > { %v11778_v63 = vpop.eup %9687  ;;  %9701 = vpow2.f32 %v3126_v21 }
 0x608   : > { %v11780_v62 = vpop.eup %9689  ;;  %v3128_v29 = vmul.f32 1.442695, %v3103_v49  ;;  %v3130_v59 = vmul.f32 1.442695, %v3104_v18  ;;  %v3148_v5 = vsel %vm2648_vm14, %v11778_v63, 0.0 }
 0x609   : > { %v3081_v6 = vpop.xlane.xlu0 %3080  ;;  %3149 = vadd.xlane.f32.xlu1 %v3148_v5  ;;  %v3145_v16 = vsel %vm2648_vm14, %v11780_v62, 0.0  ;;  %v3084_v0 = vpop.xlane.xlu1 %3083 }
 0x60a   : > { %9703 = vpow2.f32 %v3128_v29  ;;  %v3105_v34 = vsub.f32 %v11735_v56, %v3081_v6  ;;  %3146 = vadd.xlane.f32.xlu0 %v3145_v16  ;;  %v3106_v39 = vsub.f32 %v11741_v58, %v3084_v0 }
 0x60b   : > { %v11788_v26 = vpop.eup %9691  ;;  %9705 = vpow2.f32 %v3130_v59 }
 0x60c   : > { %v11790_v43 = vpop.eup %9693  ;;  %v3132_v33 = vmul.f32 1.442695, %v3105_v34  ;;  %v3134_v45 = vmul.f32 1.442695, %v3106_v39  ;;  %v3151_v19 = vsel %vm2648_vm14, %v11788_v26, 0.0 }
 0x60d   : > { %v3087_v25 = vpop.xlane.xlu0 %3086  ;;  %v3154_v9 = vsel %vm2648_vm14, %v11790_v43, 0.0  ;;  %v3090_v30 = vpop.xlane.xlu1 %3089 }
 0x60e   : > { %9707 = vpow2.f32 %v3132_v33  ;;  %v3107_v56 = vsub.f32 %v11747_v23, %v3087_v25  ;;  %3152 = vadd.xlane.f32.xlu0 %v3151_v19  ;;  %3155 = vadd.xlane.f32.xlu1 %v3154_v9  ;;  %v3108_v58 = vsub.f32 %v11753_v2, %v3090_v30 }
 0x60f   : > { %v11798_v3 = vpop.eup %9695  ;;  %9709 = vpow2.f32 %v3134_v45 }
 0x610   : > { %v11800_v32 = vpop.eup %9697  ;;  %v3136_v4 = vmul.f32 1.442695, %v3107_v56  ;;  %v3138_v44 = vmul.f32 1.442695, %v3108_v58  ;;  %v3157_v11 = vsel %vm2648_vm14, %v11798_v3, 0.0 }
 0x611   : > { %v3093_v37 = vpop.xlane.xlu0 %3092  ;;  %v3160_v46 = vsel %vm2648_vm14, %v11800_v32, 0.0  ;;  %v11875_v59 = vpop.permute.xlu1 %3592 }
 0x612   : > { %9711 = vpow2.f32 %v3136_v4  ;;  %v3109_v23 = vsub.f32 %v11759_v7, %v3093_v37  ;;  %3158 = vadd.xlane.f32.xlu0 %v3157_v11  ;;  %3161 = vadd.xlane.f32.xlu1 %v3160_v46 }
 0x613   : > { %v11807_v2 = vpop.eup %9699  ;;  %9713 = vpow2.f32 %v3138_v44 }
 0x614   : > { %v11809_v53 = vpop.eup %9701  ;;  %v3140_v55 = vmul.f32 1.442695, %v3109_v23  ;;  %v3163_v1 = vsel %vm2648_vm14, %v11807_v2, 0.0 }
 0x615   : > { %v3166_v27 = vsel %vm2648_vm14, %v11809_v53, 0.0 }
 0x616   : > { %9715 = vpow2.f32 %v3140_v55  ;;  %3164 = vadd.xlane.f32.xlu0 %v3163_v1  ;;  %3167 = vadd.xlane.f32.xlu1 %v3166_v27 }
 0x617   : > { %v11815_v15 = vpop.eup %9703 }
 0x618   : > { %v11817_v7 = vpop.eup %9705  ;;  %v3169_v10 = vsel %vm2648_vm14, %v11815_v15, 0.0 }
 0x619   : > { %v3172_v22 = vsel %vm2648_vm14, %v11817_v7, 0.0 }
 0x61a   : > { %3170 = vadd.xlane.f32.xlu0 %v3169_v10  ;;  %3173 = vadd.xlane.f32.xlu1 %v3172_v22 }
 0x61b   : > { %v11823_v17 = vpop.eup %9707 }
 0x61c   : > { %v11825_v20 = vpop.eup %9709  ;;  %v3175_v42 = vsel %vm2648_vm14, %v11823_v17, 0.0 }
 0x61d   : > { %v3178_v21 = vsel %vm2648_vm14, %v11825_v20, 0.0 }
 0x61e   : > { %3176 = vadd.xlane.f32.xlu0 %v3175_v42  ;;  %3179 = vadd.xlane.f32.xlu1 %v3178_v21 }
 0x61f   : > { %v11831_v38 = vpop.eup %9711 }
 0x620   : > { %v11833_v24 = vpop.eup %9713  ;;  %v3181_v14 = vsel %vm2648_vm14, %v11831_v38, 0.0 }
 0x621   : > { %v3184_v49 = vsel %vm2648_vm14, %v11833_v24, 0.0 }
 0x622   : > { %3182 = vadd.xlane.f32.xlu0 %v3181_v14  ;;  %3185 = vadd.xlane.f32.xlu1 %v3184_v49 }
 0x623   : > { %v11839_v18 = vpop.eup %9715 }
 0x624   : > { %v3187_v29 = vsel %vm2648_vm14, %v11839_v18, 0.0 }
 0x626   : > { %3188 = vadd.xlane.f32.xlu0 %v3187_v29 }
 0x633   : > { %3590 = vrot.lane.b32.xlu1 %v11597_v52, %s10529_s23 }
 0x637   : > { %3694 = vrot.lane.b32.xlu1 %v11578_v50, %s10528_s30 }
 0x63b   : > { %3745 = vrot.lane.b32.xlu1 %v11589_v54, %s10528_s30 }
 0x63c   : > { %3643 = vrot.lane.b32.xlu0 %v11569_v36, %s10528_s30 }
 0x63f   : > { %3796 = vrot.lane.b32.xlu1 %v11604_v12, %s10528_s30 }
 0x640   : > { %3641 = vrot.lane.b32.xlu0 %v11569_v36, %s10529_s23 }
 0x643   : > { %3847 = vrot.lane.b32.xlu1 %v11614_v35, %s10528_s30 }
 0x644   : > { %3692 = vrot.lane.b32.xlu0 %v11578_v50, %s10529_s23 }
 0x647   : > { %3898 = vrot.lane.b32.xlu1 %v11624_v48, %s10528_s30 }
 0x648   : > { %3743 = vrot.lane.b32.xlu0 %v11589_v54, %s10529_s23 }
 0x64b   : > { %3949 = vrot.lane.b32.xlu1 %v11634_v47, %s10528_s30 }
 0x64c   : > { %3794 = vrot.lane.b32.xlu0 %v11604_v12, %s10529_s23 }
 0x64f   : > { %3947 = vrot.lane.b32.xlu1 %v11634_v47, %s10529_s23 }
 0x650   : > { %3845 = vrot.lane.b32.xlu0 %v11614_v35, %s10529_s23 }
 0x653   : > { %4183 = vrot.lane.b32.xlu1 %v11697_v57, %s10529_s23 }
 0x654   : > { %3896 = vrot.lane.b32.xlu0 %v11624_v48, %s10529_s23 }
 0x68e   : > { %v3144_v5 = vpop.xlane.xlu1 %3143 }
 0x68f   : > { %9717 = vrcp.f32 %v3144_v5 }
 0x692   : > { %v3150_v6 = vpop.xlane.xlu1 %3149 }
 0x693   : > { %v3147_v16 = vpop.xlane.xlu0 %3146 }
 0x694   : > { %9719 = vrcp.f32 %v3147_v16 }
 0x695   : > { %9721 = vrcp.f32 %v3150_v6 }
 0x697   : > { %v3153_v0 = vpop.xlane.xlu0 %3152  ;;  %v3156_v34 = vpop.xlane.xlu1 %3155 }
 0x698   : > { %9723 = vrcp.f32 %v3153_v0 }
 0x699   : > { %9725 = vrcp.f32 %v3156_v34 }
 0x69b   : > { %v3159_v39 = vpop.xlane.xlu0 %3158  ;;  %v3162_v33 = vpop.xlane.xlu1 %3161 }
 0x69c   : > { %9727 = vrcp.f32 %v3159_v39  ;;  %v9718_v45 = vpop.eup %9717 }
 0x69d   : > { %9729 = vrcp.f32 %v3162_v33  ;;  %v3206_v30 = vmul.f32 %v9718_v45, %v11772_v41 }
 0x69f   : > { %v3165_v19 = vpop.xlane.xlu0 %3164  ;;  %v3168_v25 = vpop.xlane.xlu1 %3167 }
 0x6a0   : > { %9731 = vrcp.f32 %v3165_v19 }
 0x6a1   : > { %v9720_v9 = vpop.eup %9719  ;;  %9733 = vrcp.f32 %v3168_v25 }
 0x6a2   : > { %v3207_v56 = vmul.f32 %v9720_v9, %v11780_v62  ;;  %v9722_v58 = vpop.eup %9721 }
 0x6a3   : > { %v3171_v4 = vpop.xlane.xlu0 %3170  ;;  %v3174_v44 = vpop.xlane.xlu1 %3173  ;;  %v3208_v46 = vmul.f32 %v9722_v58, %v11778_v63 }
 0x6a4   : > { %9735 = vrcp.f32 %v3171_v4  ;;  %v3222_v11 = vpack.c.bf16 %v3207_v56, %v3206_v30 }
 0x6a5   : > { %v9724_v37 = vpop.eup %9723  ;;  %9737 = vrcp.f32 %v3174_v44  ;;  %v3598_v44 = vsel %vm2648_vm14, %v11875_v59, 0 }
 0x6a6   : > { %9000 = vmatmul.mubr.msk.bf16.vlgmr.msra.gmra.mxu1 %vm2648_vm14, %v3222_v11  ;;  %v3209_v23 = vmul.f32 %v9724_v37, %v11788_v26  ;;  %v9726_v55 = vpop.eup %9725 }
 0x6a7   : > { %9010 = vmatpush3.bf16.msra.mxu1 %v11581_v28  ;;  %v3177_v1 = vpop.xlane.xlu0 %3176  ;;  %v3180_v41 = vpop.xlane.xlu1 %3179  ;;  %9011 = vmatprep.mubr.msk.bf16.mxu1 %vm10526_vm13, %v13408_v51  ;;  %v3210_v63 = vmul.f32 %v9726_v55, %v11790_v43 }
 0x6a8   : > { %9739 = vrcp.f32 %v3177_v1  ;;  %v3223_v62 = vpack.c.bf16 %v3209_v23, %v3208_v46  ;;  %9021 = vmatprep.subr.bf16.mxu1 %v13408_v51 }
 0x6a9   : > { %v9728_v27 = vpop.eup %9727  ;;  %9741 = vrcp.f32 %v3180_v41 }
 0x6aa   : > { %9006 = vmatmul.mubr.msk.bf16.vlgmr.msra.gmra.mxu0 %vm2648_vm14, %v3223_v62  ;;  %v3211_v26 = vmul.f32 %v9728_v27, %v11798_v3  ;;  %v9730_v10 = vpop.eup %9729 }
 0x6ab   : > { %9016 = vmatpush3.bf16.msra.mxu0 %v11593_v60  ;;  %v3183_v22 = vpop.xlane.xlu0 %3182  ;;  %v3186_v42 = vpop.xlane.xlu1 %3185  ;;  %9017 = vmatprep.mubr.msk.bf16.mxu0 %vm10526_vm13, %v13408_v51  ;;  %v3212_v43 = vmul.f32 %v9730_v10, %v11800_v32 }
 0x6ac   : > { %9743 = vrcp.f32 %v3183_v22  ;;  %v3224_v21 = vpack.c.bf16 %v3211_v26, %v3210_v63  ;;  %9027 = vmatprep.subr.bf16.mxu0 %v13408_v51 }
 0x6ad   : > { %v9732_v14 = vpop.eup %9731  ;;  %9745 = vrcp.f32 %v3186_v42 }
 0x6ae   : > { %9012 = vmatmul.mubr.msk.bf16.vlgmr.msra.gmra.mxu1 %vm2648_vm14, %v3224_v21  ;;  %v3213_v3 = vmul.f32 %v9732_v14, %v11807_v2  ;;  %v9734_v49 = vpop.eup %9733 }
 0x6af   : > { %9022 = vmatpush3.bf16.msra.mxu1 %v11607_v13  ;;  %v3189_v29 = vpop.xlane.xlu0 %3188  ;;  %v3591_v5 = vpop.permute.xlu1 %3590  ;;  %9023 = vmatprep.mubr.msk.bf16.mxu1 %vm10526_vm13, %v13408_v51  ;;  %v3214_v0 = vmul.f32 %v9734_v49, %v11809_v53 }
 0x6b0   : > { %9747 = vrcp.f32 %v3189_v29  ;;  %v3225_v6 = vpack.c.bf16 %v3213_v3, %v3212_v43  ;;  %9033 = vmatprep.subr.bf16.mxu1 %v13408_v51 }
 0x6b1   : > { %v9736_v16 = vpop.eup %9735 }
 0x6b2   : > { %9018 = vmatmul.mubr.msk.bf16.vlgmr.msra.gmra.mxu0 %vm2648_vm14, %v3225_v6  ;;  %v3215_v32 = vmul.f32 %v9736_v16, %v11815_v15  ;;  %v9738_v2 = vpop.eup %9737 }
 0x6b3   : > { %9028 = vmatpush3.bf16.msra.mxu0 %v11617_v8  ;;  %9029 = vmatprep.mubr.msk.bf16.mxu0 %vm10526_vm13, %v13408_v51  ;;  %v3695_v34 = vpop.permute.xlu1 %3694  ;;  %v3216_v45 = vmul.f32 %v9738_v2, %v11817_v7  ;;  %v3644_v9 = vpop.permute.xlu0 %3643 }
 0x6b4   : > { %v3226_v39 = vpack.c.bf16 %v3215_v32, %v3214_v0  ;;  %9039 = vmatprep.subr.bf16.mxu0 %v13408_v51  ;;  %v3649_v23 = vsel %vm2648_vm14, %v3644_v9, 0 }
 0x6b5   : > { %v9740_v33 = vpop.eup %9739 }
 0x6b6   : > { %9024 = vmatmul.mubr.msk.bf16.vlgmr.msra.gmra.mxu1 %vm2648_vm14, %v3226_v39  ;;  %v3217_v19 = vmul.f32 %v9740_v33, %v11823_v17  ;;  %v9742_v53 = vpop.eup %9741 }
 0x6b7   : > { %9034 = vmatpush3.bf16.msra.mxu1 %v11627_v31  ;;  %9035 = vmatprep.mubr.msk.bf16.mxu1 %vm10526_vm13, %v13408_v51  ;;  %v3746_v30 = vpop.permute.xlu1 %3745  ;;  %v3218_v56 = vmul.f32 %v9742_v53, %v11825_v20 }
 0x6b8   : > { %v3227_v15 = vpack.c.bf16 %v3217_v19, %v3216_v45  ;;  %9045 = vmatprep.subr.bf16.mxu1 %v13408_v51  ;;  %v3751_v55 = vsel %vm2648_vm14, %v3746_v30, 0 }
 0x6b9   : > { %v9744_v25 = vpop.eup %9743 }
 0x6ba   : > { %9030 = vmatmul.mubr.msk.bf16.vlgmr.msra.gmra.mxu0 %vm2648_vm14, %v3227_v15  ;;  %v3219_v7 = vmul.f32 %v9744_v25, %v11831_v38  ;;  %v9746_v58 = vpop.eup %9745  ;;  %v3642_v38 = vpop.permute.xlu0 %3641 }
 0x6bb   : > { %9040 = vmatpush3.bf16.msra.mxu0 %v11639_v61  ;;  %9041 = vmatprep.mubr.msk.bf16.mxu0 %vm10526_vm13, %v13408_v51  ;;  %v3220_v11 = vmul.f32 %v9746_v58, %v11833_v24  ;;  %v3797_v37 = vpop.permute.xlu1 %3796 }
 0x6bc   : > { %v3228_v17 = vpack.c.bf16 %v3219_v7, %v3218_v56  ;;  %9051 = vmatprep.subr.bf16.mxu0 %v13408_v51  ;;  %v3802_v62 = vsel %vm2648_vm14, %v3797_v37, 0 }
 0x6bd   : > { %v9748_v4 = vpop.eup %9747 }
 0x6be   : > { %9036 = vmatmul.mubr.msk.bf16.vlgmr.msra.gmra.mxu1 %vm2648_vm14, %v3228_v17  ;;  %v3221_v20 = vmul.f32 %v9748_v4, %v11839_v18  ;;  %v3693_v24 = vpop.permute.xlu0 %3692  ;;  %v3700_v18 = vsel %vm2648_vm14, %v3695_v34, 0 }
 0x6bf   : > { %9046 = vmatpush3.bf16.xpose.msra.mxu1 %v3598_v44  ;;  %9047 = vmatprep.mubr.msk.bf16.mxu1 %vm10526_vm13, %v13408_v51  ;;  %v3848_v59 = vpop.permute.xlu1 %3847 }
 0x6c0   : > { %v3229_v46 = vpack.c.bf16 %v3221_v20, %v3220_v11  ;;  %9057 = vmatprep.subr.bf16.mxu1 %v13408_v51  ;;  %v3853_v63 = vsel %vm2648_vm14, %v3848_v59, 0 }
 0x6c2   : > { %9042 = vmatmul.mubr.msk.bf16.vlgmr.msra.gmra.mxu0 %vm2648_vm14, %v3229_v46  ;;  %v3744_v1 = vpop.permute.xlu0 %3743 }
 0x6c3   : > { %9052 = vmatpush3.bf16.xpose.msra.mxu0 %v3649_v23  ;;  %9053 = vmatprep.mubr.msk.bf16.mxu0 %vm10526_vm13, %v13408_v51  ;;  %v3899_v41 = vpop.permute.xlu1 %3898 }
 0x6c4   : > { %9063 = vmatprep.subr.bf16.mxu0 %v13408_v51  ;;  %v3904_v10 = vsel %vm2648_vm14, %v3899_v41, 0 }
 0x6c6   : > { %9048 = vmatmul.mubr.msk.bf16.vlgmr.msra.gmra.mxu1 %vm2648_vm14, %v3591_v5  ;;  %v3795_v27 = vpop.permute.xlu0 %3794 }
 0x6c7   : > { %9058 = vmatpush3.bf16.xpose.msra.mxu1 %v3700_v18  ;;  %9059 = vmatprep.mubr.msk.bf16.mxu1 %vm10526_vm13, %v13408_v51  ;;  %v3950_v26 = vpop.permute.xlu1 %3949 }
 0x6c8   : > { %9069 = vmatprep.subr.bf16.mxu1 %v13408_v51  ;;  %v3955_v21 = vsel %vm2648_vm14, %v3950_v26, 0 }
 0x6ca   : > { %9054 = vmatmul.mubr.msk.bf16.vlgmr.msra.gmra.mxu0 %vm2648_vm14, %v3642_v38  ;;  %v3846_v22 = vpop.permute.xlu0 %3845 }
 0x6cb   : > { %9064 = vmatpush3.bf16.xpose.msra.mxu0 %v3751_v55  ;;  %9065 = vmatprep.mubr.msk.bf16.mxu0 %vm10526_vm13, %v13408_v51  ;;  %v3948_v42 = vpop.permute.xlu1 %3947 }
 0x6cc   : > { %9075 = vmatprep.subr.bf16.mxu0 %v13408_v51 }
 0x6ce   : > { %9060 = vmatmul.mubr.msk.bf16.vlgmr.msra.gmra.mxu1 %vm2648_vm14, %v3693_v24  ;;  %v3897_v14 = vpop.permute.xlu0 %3896 }
 0x6cf   : > { %9070 = vmatpush3.bf16.xpose.msra.mxu1 %v3802_v62  ;;  %9071 = vmatprep.mubr.msk.bf16.mxu1 %vm10526_vm13, %v13408_v51  ;;  %v4184_v43 = vpop.permute.xlu1 %4183 }
 0x6d0   : > { %9081 = vmatprep.subr.bf16.mxu1 %v13408_v51 }
 0x6d2   : > { %9066 = vmatmul.mubr.msk.bf16.vlgmr.msra.gmra.mxu0 %vm2648_vm14, %v3744_v1 }
 0x6d3   : > { %9076 = vmatpush3.bf16.xpose.msra.mxu0 %v3853_v63  ;;  %9077 = vmatprep.mubr.msk.bf16.mxu0 %vm10526_vm13, %v13408_v51 }
 0x6d4   : > { %9087 = vmatprep.subr.bf16.mxu0 %v13408_v51 }
 0x6d6   : > { %9072 = vmatmul.mubr.msk.bf16.vlgmr.msra.gmra.mxu1 %vm2648_vm14, %v3795_v27 }
 0x6d7   : > { %9082 = vmatpush3.bf16.xpose.msra.mxu1 %v3904_v10  ;;  %9083 = vmatprep.mubr.msk.bf16.mxu1 %vm10526_vm13, %v13408_v51 }
 0x6d8   : > { %9093 = vmatprep.subr.bf16.mxu1 %v13408_v51 }
 0x6da   : > { %9078 = vmatmul.mubr.msk.bf16.vlgmr.msra.gmra.mxu0 %vm2648_vm14, %v3846_v22 }
 0x6db   : > { %9088 = vmatpush3.bf16.xpose.msra.mxu0 %v3955_v21  ;;  %9089 = vmatprep.mubr.msk.bf16.mxu0 %vm10526_vm13, %v13408_v51 }
 0x6dc   : > { %9099 = vmatprep.subr.bf16.mxu0 %v13408_v51 }
 0x6de   : > { %9084 = vmatmul.mubr.msk.bf16.vlgmr.msra.gmra.mxu1 %vm2648_vm14, %v3897_v14 }
 0x6df   : > { %9094 = vmatpush3.bf16.msra.mxu1 %v4184_v43  ;;  %9095 = vmatprep.mubr.msk.bf16.mxu1 %vm10526_vm13, %v13408_v51 }
 0x6e0   : > { %9105 = vmatprep.subr.bf16.mxu1 %v13408_v51 }
 0x6e2   : > { %9090 = vmatmul.mubr.msk.bf16.vlgmr.msra.gmra.mxu0 %vm2648_vm14, %v3948_v42 }
 0x6e3   : > { %9101 = vmatprep.mubr.msk.bf16.mxu0 %vm10526_vm13, %v13408_v51 }
 0x766   : > { %v11971_v3 = vpop.f32.mrf.mxu1 }
 0x768   : > { %v9001_v49 = vpop.f32.mrf.mxu1 }
 0x76a   : > { %v11973_v29 = vpop.f32.mrf.mxu1  ;;  %v11975_v5 = vpop.f32.mrf.mxu0 }
 0x76c   : > { %v9002_v16 = vpop.f32.mrf.mxu1  ;;  %v9007_v0 = vpop.f32.mrf.mxu0 }
 0x76e   : > { %v11979_v32 = vpop.f32.mrf.mxu0  ;;  %v11981_v2 = vpop.f32.mrf.mxu1 }
 0x770   : > { %v9008_v39 = vpop.f32.mrf.mxu0  ;;  %v9013_v33 = vpop.f32.mrf.mxu1 }
 0x772   : > { %v11985_v45 = vpop.f32.mrf.mxu1  ;;  %v11987_v19 = vpop.f32.mrf.mxu0 }
 0x774   : > { %v9014_v15 = vpop.f32.mrf.mxu1  ;;  %v9019_v25 = vpop.f32.mrf.mxu0 }
 0x776   : > { %v11991_v9 = vpop.f32.mrf.mxu0  ;;  %v11993_v30 = vpop.f32.mrf.mxu1 }
 0x778   : > { %v9020_v7 = vpop.f32.mrf.mxu0  ;;  %v9025_v58 = vpop.f32.mrf.mxu1 }
 0x77a   : > { %v11997_v17 = vpop.f32.mrf.mxu1  ;;  %v11999_v4 = vpop.f32.mrf.mxu0 }
 0x77c   : > { %v9026_v11 = vpop.f32.mrf.mxu1  ;;  %v9031_v20 = vpop.f32.mrf.mxu0 }
 0x77e   : > { %v12003_v38 = vpop.f32.mrf.mxu0  ;;  %v12005_v37 = vpop.f32.mrf.mxu1 }
 0x780   : > { %v9032_v23 = vpop.f32.mrf.mxu0  ;;  %v9037_v24 = vpop.f32.mrf.mxu1 }
 0x782   : > { %v12009_v18 = vpop.f32.mrf.mxu1  ;;  %v12011_v59 = vpop.f32.mrf.mxu0 }
 0x784   : > { %v9038_v1 = vpop.f32.mrf.mxu1  ;;  %v9043_v41 = vpop.f32.mrf.mxu0 }
 0x786   : > { %v12015_v62 = vpop.f32.mrf.mxu0  ;;  %v12017_v27 = vpop.f32.mrf.mxu1 }
 0x787   : > { %v3998_v26 = vsel %vm2648_vm14, %v12017_v27, -inf }
 0x788   : > { %v9044_v10 = vpop.f32.mrf.mxu0  ;;  %3999 = vmax.xlane.f32.xlu0 %v3998_v26  ;;  %v9049_v22 = vpop.f32.mrf.mxu1 }
 0x78a   : > { %v12023_v42 = vpop.f32.mrf.mxu1  ;;  %v12025_v21 = vpop.f32.mrf.mxu0 }
 0x78b   : > { %v4004_v14 = vsel %vm2648_vm14, %v12025_v21, -inf  ;;  %v4001_v43 = vsel %vm2648_vm14, %v12023_v42, -inf }
 0x78c   : > { %v9055_v49 = vpop.f32.mrf.mxu0  ;;  %4005 = vmax.xlane.f32.xlu0 %v4004_v14  ;;  %4002 = vmax.xlane.f32.xlu1 %v4001_v43  ;;  %v9050_v16 = vpop.f32.mrf.mxu1 }
 0x78e   : > { %v12031_v0 = vpop.f32.mrf.mxu0  ;;  %v12033_v39 = vpop.f32.mrf.mxu1 }
 0x78f   : > { %v4007_v33 = vsel %vm2648_vm14, %v12031_v0, -inf  ;;  %v4010_v15 = vsel %vm2648_vm14, %v12033_v39, -inf }
 0x790   : > { %v9056_v25 = vpop.f32.mrf.mxu0  ;;  %4008 = vmax.xlane.f32.xlu0 %v4007_v33  ;;  %4011 = vmax.xlane.f32.xlu1 %v4010_v15  ;;  %v9061_v7 = vpop.f32.mrf.mxu1 }
 0x792   : > { %v12039_v58 = vpop.f32.mrf.mxu1  ;;  %v12041_v11 = vpop.f32.mrf.mxu0 }
 0x793   : > { %v4013_v20 = vsel %vm2648_vm14, %v12039_v58, -inf  ;;  %v4016_v23 = vsel %vm2648_vm14, %v12041_v11, -inf }
 0x794   : > { %4014 = vmax.xlane.f32.xlu0 %v4013_v20  ;;  %v9062_v24 = vpop.f32.mrf.mxu1  ;;  %4017 = vmax.xlane.f32.xlu1 %v4016_v23  ;;  %v9067_v1 = vpop.f32.mrf.mxu0 }
 0x796   : > { %v12047_v41 = vpop.f32.mrf.mxu0  ;;  %v12049_v26 = vpop.f32.mrf.mxu1 }
 0x797   : > { %v4019_v10 = vsel %vm2648_vm14, %v12047_v41, -inf  ;;  %v4022_v22 = vsel %vm2648_vm14, %v12049_v26, -inf }
 0x798   : > { %4020 = vmax.xlane.f32.xlu0 %v4019_v10  ;;  %v9068_v14 = vpop.f32.mrf.mxu0  ;;  %4023 = vmax.xlane.f32.xlu1 %v4022_v22  ;;  %v9073_v43 = vpop.f32.mrf.mxu1 }
 0x79a   : > { %v12055_v49 = vpop.f32.mrf.mxu1  ;;  %v12057_v16 = vpop.f32.mrf.mxu0 }
 0x79b   : > { %v4025_v33 = vsel %vm2648_vm14, %v12055_v49, -inf  ;;  %v4028_v15 = vsel %vm2648_vm14, %v12057_v16, -inf }
 0x79c   : > { %4026 = vmax.xlane.f32.xlu0 %v4025_v33  ;;  %v9074_v25 = vpop.f32.mrf.mxu1  ;;  %4029 = vmax.xlane.f32.xlu1 %v4028_v15  ;;  %v9079_v7 = vpop.f32.mrf.mxu0 }
 0x79e   : > { %v12063_v20 = vpop.f32.mrf.mxu0  ;;  %v12065_v23 = vpop.f32.mrf.mxu1 }
 0x79f   : > { %v4031_v24 = vsel %vm2648_vm14, %v12063_v20, -inf  ;;  %v4034_v1 = vsel %vm2648_vm14, %v12065_v23, -inf }
 0x7a0   : > { %4032 = vmax.xlane.f32.xlu0 %v4031_v24  ;;  %v9080_v10 = vpop.f32.mrf.mxu0  ;;  %4035 = vmax.xlane.f32.xlu1 %v4034_v1  ;;  %v9085_v22 = vpop.f32.mrf.mxu1 }
 0x7a2   : > { %v12071_v14 = vpop.f32.mrf.mxu1  ;;  %v12073_v43 = vpop.f32.mrf.mxu0 }
 0x7a3   : > { %v4037_v33 = vsel %vm2648_vm14, %v12071_v14, -inf  ;;  %v4040_v15 = vsel %vm2648_vm14, %v12073_v43, -inf }
 0x7a4   : > { %4038 = vmax.xlane.f32.xlu0 %v4037_v33  ;;  %v9086_v25 = vpop.f32.mrf.mxu1  ;;  %4041 = vmax.xlane.f32.xlu1 %v4040_v15  ;;  %v9091_v7 = vpop.f32.mrf.mxu0 }
 0x7a6   : > { %v12079_v63 = vpop.f32.mrf.mxu0 }
 0x7a7   : > { %v4043_v24 = vsel %vm2648_vm14, %v12079_v63, -inf }
 0x7a8   : > { %4044 = vmax.xlane.f32.xlu0 %v4043_v24  ;;  %v9092_v1 = vpop.f32.mrf.mxu0 }
 0x7b5   : > { %4279 = vrot.lane.b32.xlu1 %v11581_v28, %s10529_s23 }
 0x7b9   : > { %4327 = vrot.lane.b32.xlu1 %v11593_v60, %s10529_s23 }
 0x7bd   : > { %4423 = vrot.lane.b32.xlu1 %v11617_v8, %s10529_s23 }
 0x7be   : > { %4231 = vrot.lane.b32.xlu0 %v11667_v40, %s10529_s23 }
 0x7c2   : > { %4375 = vrot.lane.b32.xlu0 %v11607_v13, %s10529_s23 }
 0x811   : > { %v4000_v10 = vpop.xlane.xlu0 %3999 }
 0x812   : > { %v4046_v22 = vsub.f32 %v12017_v27, %v4000_v10 }
 0x814   : > { %v4062_v33 = vmul.f32 1.442695, %v4046_v22 }
 0x815   : > { %v4006_v15 = vpop.xlane.xlu0 %4005  ;;  %v4003_v25 = vpop.xlane.xlu1 %4002 }
 0x816   : > { %9749 = vpow2.f32 %v4062_v33  ;;  %v4048_v7 = vsub.f32 %v12025_v21, %v4006_v15  ;;  %v4047_v24 = vsub.f32 %v12023_v42, %v4003_v25 }
 0x818   : > { %v4066_v1 = vmul.f32 1.442695, %v4048_v7  ;;  %v4064_v55 = vmul.f32 1.442695, %v4047_v24 }
 0x819   : > { %v4009_v46 = vpop.xlane.xlu0 %4008  ;;  %v4012_v44 = vpop.xlane.xlu1 %4011 }
 0x81a   : > { %9751 = vpow2.f32 %v4066_v1  ;;  %v4049_v56 = vsub.f32 %v12031_v0, %v4009_v46  ;;  %v4050_v53 = vsub.f32 %v12033_v39, %v4012_v44 }
 0x81b   : > { %9753 = vpow2.f32 %v4064_v55 }
 0x81c   : > { %v4068_v34 = vmul.f32 1.442695, %v4049_v56  ;;  %v4070_v27 = vmul.f32 1.442695, %v4050_v53 }
 0x81d   : > { %v4015_v10 = vpop.xlane.xlu0 %4014  ;;  %v4018_v22 = vpop.xlane.xlu1 %4017 }
 0x81e   : > { %9755 = vpow2.f32 %v4068_v34  ;;  %v4051_v33 = vsub.f32 %v12039_v58, %v4015_v10  ;;  %v4052_v21 = vsub.f32 %v12041_v11, %v4018_v22 }
 0x81f   : > { %9757 = vpow2.f32 %v4070_v27 }
 0x820   : > { %v4072_v42 = vmul.f32 1.442695, %v4051_v33  ;;  %v4074_v15 = vmul.f32 1.442695, %v4052_v21 }
 0x821   : > { %v4021_v25 = vpop.xlane.xlu0 %4020  ;;  %v4024_v7 = vpop.xlane.xlu1 %4023 }
 0x822   : > { %9759 = vpow2.f32 %v4072_v42  ;;  %v4053_v46 = vsub.f32 %v12047_v41, %v4021_v25  ;;  %v4054_v44 = vsub.f32 %v12049_v26, %v4024_v7 }
 0x823   : > { %v12102_v55 = vpop.eup %9749  ;;  %9761 = vpow2.f32 %v4074_v15 }
 0x824   : > { %v4076_v53 = vmul.f32 1.442695, %v4053_v46  ;;  %v4078_v56 = vmul.f32 1.442695, %v4054_v44  ;;  %v4094_v34 = vsel %vm2648_vm14, %v12102_v55, 0.0 }
 0x825   : > { %v4027_v0 = vpop.xlane.xlu0 %4026  ;;  %4095 = vadd.xlane.f32.xlu1 %v4094_v34  ;;  %v4030_v39 = vpop.xlane.xlu1 %4029 }
 0x826   : > { %9763 = vpow2.f32 %v4076_v53  ;;  %v4055_v58 = vsub.f32 %v12055_v49, %v4027_v0  ;;  %v4056_v11 = vsub.f32 %v12057_v16, %v4030_v39 }
 0x827   : > { %v12108_v24 = vpop.eup %9751  ;;  %9765 = vpow2.f32 %v4078_v56 }
 0x828   : > { %v12110_v41 = vpop.eup %9753  ;;  %v4080_v26 = vmul.f32 1.442695, %v4055_v58  ;;  %v4082_v1 = vmul.f32 1.442695, %v4056_v11  ;;  %v4100_v27 = vsel %vm2648_vm14, %v12108_v24, 0.0 }
 0x829   : > { %v4033_v10 = vpop.xlane.xlu0 %4032  ;;  %4101 = vadd.xlane.f32.xlu1 %v4100_v27  ;;  %v4097_v22 = vsel %vm2648_vm14, %v12110_v41, 0.0  ;;  %v4036_v33 = vpop.xlane.xlu1 %4035 }
 0x82a   : > { %9767 = vpow2.f32 %v4080_v26  ;;  %v4057_v49 = vsub.f32 %v12063_v20, %v4033_v10  ;;  %4098 = vadd.xlane.f32.xlu0 %v4097_v22  ;;  %v4058_v16 = vsub.f32 %v12065_v23, %v4036_v33 }
 0x82b   : > { %v12118_v21 = vpop.eup %9755  ;;  %9769 = vpow2.f32 %v4082_v1 }
 0x82c   : > { %v12120_v42 = vpop.eup %9757  ;;  %v4084_v15 = vmul.f32 1.442695, %v4057_v49  ;;  %v4086_v25 = vmul.f32 1.442695, %v4058_v16  ;;  %v4103_v7 = vsel %vm2648_vm14, %v12118_v21, 0.0 }
 0x82d   : > { %v4039_v46 = vpop.xlane.xlu0 %4038  ;;  %v4106_v44 = vsel %vm2648_vm14, %v12120_v42, 0.0  ;;  %v4042_v53 = vpop.xlane.xlu1 %4041 }
 0x82e   : > { %9771 = vpow2.f32 %v4084_v15  ;;  %v4059_v20 = vsub.f32 %v12071_v14, %v4039_v46  ;;  %4104 = vadd.xlane.f32.xlu0 %v4103_v7  ;;  %4107 = vadd.xlane.f32.xlu1 %v4106_v44  ;;  %v4060_v23 = vsub.f32 %v12073_v43, %v4042_v53 }
 0x82f   : > { %v12128_v56 = vpop.eup %9759  ;;  %9773 = vpow2.f32 %v4086_v25 }
 0x830   : > { %v12130_v34 = vpop.eup %9761  ;;  %v4088_v0 = vmul.f32 1.442695, %v4059_v20  ;;  %v4090_v39 = vmul.f32 1.442695, %v4060_v23  ;;  %v4109_v58 = vsel %vm2648_vm14, %v12128_v56, 0.0 }
 0x831   : > { %v4045_v11 = vpop.xlane.xlu0 %4044  ;;  %v4112_v26 = vsel %vm2648_vm14, %v12130_v34, 0.0 }
 0x832   : > { %9775 = vpow2.f32 %v4088_v0  ;;  %v4061_v14 = vsub.f32 %v12079_v63, %v4045_v11  ;;  %4110 = vadd.xlane.f32.xlu0 %v4109_v58  ;;  %4113 = vadd.xlane.f32.xlu1 %v4112_v26  ;;  %v4280_v11 = vpop.permute.xlu1 %4279 }
 0x833   : > { %v12137_v43 = vpop.eup %9763  ;;  %9777 = vpow2.f32 %v4090_v39 }
 0x834   : > { %v12139_v1 = vpop.eup %9765  ;;  %v4092_v27 = vmul.f32 1.442695, %v4061_v14  ;;  %v4115_v10 = vsel %vm2648_vm14, %v12137_v43, 0.0 }
 0x835   : > { %v4232_v22 = vpop.permute.xlu0 %4231  ;;  %v4118_v33 = vsel %vm2648_vm14, %v12139_v1, 0.0 }
 0x836   : > { %9779 = vpow2.f32 %v4092_v27  ;;  %4116 = vadd.xlane.f32.xlu0 %v4115_v10  ;;  %4119 = vadd.xlane.f32.xlu1 %v4118_v33  ;;  %v4328_v26 = vpop.permute.xlu1 %4327 }
 0x837   : > { %v12145_v49 = vpop.eup %9767  ;;  %9100 = vmatpush3.bf16.msra.mxu0 %v4232_v22 }
 0x838   : > { %v12147_v63 = vpop.eup %9769  ;;  %v4121_v16 = vsel %vm2648_vm14, %v12145_v49, 0.0  ;;  %9111 = vmatprep.subr.bf16.mxu0 %v13408_v51 }
 0x839   : > { %v4124_v15 = vsel %vm2648_vm14, %v12147_v63, 0.0  ;;  %v4376_v10 = vpop.permute.xlu0 %4375 }
 0x83a   : > { %4122 = vadd.xlane.f32.xlu0 %v4121_v16  ;;  %4125 = vadd.xlane.f32.xlu1 %v4124_v15  ;;  %v12204_v14 = vpop.permute.xlu1 %4423 }
 0x83b   : > { %v12154_v25 = vpop.eup %9771 }
 0x83c   : > { %v12156_v7 = vpop.eup %9773  ;;  %v4127_v46 = vsel %vm2648_vm14, %v12154_v25, 0.0 }
 0x83d   : > { %v4130_v44 = vsel %vm2648_vm14, %v12156_v7, 0.0 }
 0x83e   : > { %4128 = vadd.xlane.f32.xlu0 %v4127_v46  ;;  %4131 = vadd.xlane.f32.xlu1 %v4130_v44 }
 0x83f   : > { %v12162_v53 = vpop.eup %9775 }
 0x840   : > { %v12164_v20 = vpop.eup %9777  ;;  %v4133_v23 = vsel %vm2648_vm14, %v12162_v53, 0.0 }
 0x841   : > { %v4136_v0 = vsel %vm2648_vm14, %v12164_v20, 0.0 }
 0x842   : > { %4134 = vadd.xlane.f32.xlu0 %v4133_v23  ;;  %4137 = vadd.xlane.f32.xlu1 %v4136_v0 }
 0x843   : > { %v12170_v39 = vpop.eup %9779 }
 0x844   : > { %v4139_v58 = vsel %vm2648_vm14, %v12170_v39, 0.0 }
 0x846   : > { %4140 = vadd.xlane.f32.xlu0 %v4139_v58 }
 0x853   : > { %4519 = vrot.lane.b32.xlu1 %v11639_v61, %s10529_s23 }
 0x857   : > { %4881 = vrot.lane.b32.xlu1 %v11569_v36, %s10530_s28 }
 0x85b   : > { %4932 = vrot.lane.b32.xlu1 %v11578_v50, %s10530_s28 }
 0x85c   : > { %4471 = vrot.lane.b32.xlu0 %v11627_v31, %s10529_s23 }
 0x85f   : > { %4983 = vrot.lane.b32.xlu1 %v11589_v54, %s10530_s28 }
 0x860   : > { %4830 = vrot.lane.b32.xlu0 %v11597_v52, %s10530_s28 }
 0x863   : > { %5034 = vrot.lane.b32.xlu1 %v11604_v12, %s10530_s28 }
 0x864   : > { %4828 = vrot.lane.b32.xlu0 %v11597_v52, %s10531_s1 }
 0x867   : > { %5085 = vrot.lane.b32.xlu1 %v11614_v35, %s10530_s28 }
 0x868   : > { %4879 = vrot.lane.b32.xlu0 %v11569_v36, %s10531_s1 }
 0x86b   : > { %5136 = vrot.lane.b32.xlu1 %v11624_v48, %s10530_s28 }
 0x86c   : > { %4930 = vrot.lane.b32.xlu0 %v11578_v50, %s10531_s1 }
 0x86f   : > { %5187 = vrot.lane.b32.xlu1 %v11634_v47, %s10530_s28 }
 0x870   : > { %4981 = vrot.lane.b32.xlu0 %v11589_v54, %s10531_s1 }
 0x873   : > { %5185 = vrot.lane.b32.xlu1 %v11634_v47, %s10531_s1 }
 0x874   : > { %5032 = vrot.lane.b32.xlu0 %v11604_v12, %s10531_s1 }
 0x877   : > { %5420 = vrot.lane.b32.xlu1 %v11697_v57, %s10531_s1 }
 0x878   : > { %5083 = vrot.lane.b32.xlu0 %v11614_v35, %s10531_s1 }
 0x87c   : > { %5134 = vrot.lane.b32.xlu0 %v11624_v48, %s10531_s1 }
 0x8ae   : > { %v4096_v27 = vpop.xlane.xlu1 %4095 }
 0x8af   : > { %9781 = vrcp.f32 %v4096_v27 }
 0x8b2   : > { %v4102_v22 = vpop.xlane.xlu1 %4101 }
 0x8b3   : > { %v4099_v33 = vpop.xlane.xlu0 %4098 }
 0x8b4   : > { %9783 = vrcp.f32 %v4099_v33 }
 0x8b5   : > { %9785 = vrcp.f32 %v4102_v22 }
 0x8b7   : > { %v4105_v16 = vpop.xlane.xlu0 %4104  ;;  %v4108_v15 = vpop.xlane.xlu1 %4107 }
 0x8b8   : > { %9787 = vrcp.f32 %v4105_v16 }
 0x8b9   : > { %9789 = vrcp.f32 %v4108_v15 }
 0x8bb   : > { %v4111_v46 = vpop.xlane.xlu0 %4110  ;;  %v4114_v44 = vpop.xlane.xlu1 %4113 }
 0x8bc   : > { %9791 = vrcp.f32 %v4111_v46  ;;  %v9782_v23 = vpop.eup %9781 }
 0x8bd   : > { %9793 = vrcp.f32 %v4114_v44  ;;  %v4158_v27 = vmul.f32 %v9782_v23, %v12102_v55  ;;  %v13485_v55 = vmov 0.0  }
 0x8bf   : > { %v4117_v0 = vpop.xlane.xlu0 %4116  ;;  %v4120_v58 = vpop.xlane.xlu1 %4119 }
 0x8c0   : > { %9795 = vrcp.f32 %v4117_v0 }
 0x8c1   : > { %v9784_v6 = vpop.eup %9783  ;;  %9797 = vrcp.f32 %v4120_v58 }
 0x8c2   : > { %v4159_v51 = vmul.f32 %v9784_v6, %v12110_v41  ;;  %v9786_v33 = vpop.eup %9785 }
 0x8c3   : > { %v4123_v22 = vpop.xlane.xlu0 %4122  ;;  %v4126_v57 = vpop.xlane.xlu1 %4125  ;;  %v4160_v46 = vmul.f32 %v9786_v33, %v12108_v24 }
 0x8c4   : > { %9799 = vrcp.f32 %v4123_v22  ;;  %v4174_v16 = vpack.c.bf16 %v4159_v51, %v4158_v27 }
 0x8c5   : > { %v9788_v15 = vpop.eup %9787  ;;  %9801 = vrcp.f32 %v4126_v57 }
 0x8c6   : > { %9096 = vmatmul.mubr.msk.bf16.vlgmr.msra.gmra.mxu1 %vm2648_vm14, %v4174_v16  ;;  %v4161_v44 = vmul.f32 %v9788_v15, %v12118_v21  ;;  %v9790_v0 = vpop.eup %9789 }
 0x8c7   : > { %9106 = vmatpush3.bf16.msra.mxu1 %v4280_v11  ;;  %v4129_v58 = vpop.xlane.xlu0 %4128  ;;  %v4132_v47 = vpop.xlane.xlu1 %4131  ;;  %9107 = vmatprep.mubr.msk.bf16.mxu1 %vm10526_vm13, %v13485_v55  ;;  %v4162_v57 = vmul.f32 %v9790_v0, %v12120_v42 }
 0x8c8   : > { %9803 = vrcp.f32 %v4129_v58  ;;  %v4175_v6 = vpack.c.bf16 %v4161_v44, %v4160_v46  ;;  %9117 = vmatprep.subr.bf16.mxu1 %v13485_v55 }
 0x8c9   : > { %v9792_v51 = vpop.eup %9791  ;;  %9805 = vrcp.f32 %v4132_v47 }
 0x8ca   : > { %9102 = vmatmul.mubr.msk.bf16.vlgmr.msra.gmra.mxu0 %vm2648_vm14, %v4175_v6  ;;  %v4163_v24 = vmul.f32 %v9792_v51, %v12128_v56  ;;  %v9794_v41 = vpop.eup %9793 }
 0x8cb   : > { %9112 = vmatpush3.bf16.msra.mxu0 %v4328_v26  ;;  %v4135_v21 = vpop.xlane.xlu0 %4134  ;;  %v4138_v11 = vpop.xlane.xlu1 %4137  ;;  %9113 = vmatprep.mubr.msk.bf16.mxu0 %vm10526_vm13, %v13485_v55  ;;  %v4164_v47 = vmul.f32 %v9794_v41, %v12130_v34 }
 0x8cc   : > { %9807 = vrcp.f32 %v4135_v21  ;;  %v4176_v23 = vpack.c.bf16 %v4163_v24, %v4162_v57  ;;  %9123 = vmatprep.subr.bf16.mxu0 %v13485_v55 }
 0x8cd   : > { %v9796_v27 = vpop.eup %9795  ;;  %9809 = vrcp.f32 %v4138_v11 }
 0x8ce   : > { %9108 = vmatmul.mubr.msk.bf16.vlgmr.msra.gmra.mxu1 %vm2648_vm14, %v4176_v23  ;;  %v4165_v42 = vmul.f32 %v9796_v27, %v12137_v43  ;;  %v9798_v56 = vpop.eup %9797  ;;  %v13487_v27 = vpack.c.bf16 %v11979_v32, %v11975_v5 }
 0x8cf   : > { %9118 = vmatpush3.bf16.msra.mxu1 %v4376_v10  ;;  %v4141_v26 = vpop.xlane.xlu0 %4140  ;;  %9119 = vmatprep.mubr.msk.bf16.mxu1 %vm10526_vm13, %v13485_v55  ;;  %v4166_v16 = vmul.f32 %v9798_v56, %v12139_v1  ;;  %v4520_v6 = vpop.permute.xlu1 %4519 }
 0x8d0   : > { %9811 = vrcp.f32 %v4141_v26  ;;  %v4177_v33 = vpack.c.bf16 %v4165_v42, %v4164_v47  ;;  %9129 = vmatprep.subr.bf16.mxu1 %v13485_v55 }
 0x8d1   : > { %v9800_v22 = vpop.eup %9799 }
 0x8d2   : > { %9114 = vmatmul.mubr.msk.bf16.vlgmr.msra.gmra.mxu0 %vm2648_vm14, %v4177_v33  ;;  %v4167_v34 = vmul.f32 %v9800_v22, %v12145_v49  ;;  %v9802_v15 = vpop.eup %9801 }
 0x8d3   : > { %9124 = vmatpush3.bf16.msra.mxu0 %v12204_v14  ;;  %9125 = vmatprep.mubr.msk.bf16.mxu0 %vm10526_vm13, %v13485_v55  ;;  %v4472_v46 = vpop.permute.xlu0 %4471  ;;  %v4168_v44 = vmul.f32 %v9802_v15, %v12147_v63  ;;  %v9669_v14 = vld [vmem:[%s10923_s3] sm:$0xff]  }
 0x8d4   : > { %v4178_v43 = vpack.c.bf16 %v4167_v34, %v4166_v16  ;;  %9135 = vmatprep.subr.bf16.mxu0 %v13485_v55 }
 0x8d5   : > { %v9804_v10 = vpop.eup %9803 }
 0x8d6   : > { %9120 = vmatmul.mubr.msk.bf16.vlgmr.msra.gmra.mxu1 %vm2648_vm14, %v4178_v43  ;;  %v4169_v1 = vmul.f32 %v9804_v10, %v12154_v25  ;;  %v9806_v0 = vpop.eup %9805 }
 0x8d7   : > { %9130 = vmatpush3.bf16.msra.mxu1 %v4472_v46  ;;  %9131 = vmatprep.mubr.msk.bf16.mxu1 %vm10526_vm13, %v13485_v55  ;;  %v4170_v51 = vmul.f32 %v9806_v0, %v12156_v7  ;;  %v13486_v7 = vpack.c.bf16 %v11973_v29, %v11971_v3  ;;  %v13489_v3 = vpack.c.bf16 %v11991_v9, %v11987_v19  ;;  %v4831_v5 = vpop.permute.xlu0 %4830 }
 0x8d8   : > { %v4179_v49 = vpack.c.bf16 %v4169_v1, %v4168_v44  ;;  %v13490_v29 = vpack.c.bf16 %v11997_v17, %v11993_v30  ;;  %v13492_v19 = vpack.c.bf16 %v12009_v18, %v12005_v37  ;;  %v13493_v17 = vpack.c.bf16 %v12015_v62, %v12011_v59  ;;  %v9670_v18 = vld [vmem:[%s10923_s3 + $0x8] sm:$0xff]  }
 0x8d9   : > { %v9808_v58 = vpop.eup %9807  ;;  %9141 = vmatprep.subr.bf16.mxu1 %v9670_v18 }
 0x8da   : > { %9126 = vmatmul.mubr.msk.bf16.vlgmr.msra.gmra.mxu0 %vm2648_vm14, %v4179_v49  ;;  %v4171_v57 = vmul.f32 %v9808_v58, %v12162_v53  ;;  %v9810_v24 = vpop.eup %9809  ;;  %v4882_v53 = vpop.permute.xlu1 %4881 }
 0x8db   : > { %9136 = vmatpush3.bf16.msra.mxu0 %v4520_v6  ;;  %9137 = vmatprep.mubr.msk.bf16.mxu0 %vm10526_vm13, %v13485_v55  ;;  %v4172_v41 = vmul.f32 %v9810_v24, %v12164_v20  ;;  %v4887_v23 = vsel %vm2648_vm14, %v4882_v53, 0  ;;  %v13488_v20 = vpack.c.bf16 %v11985_v45, %v11981_v2  ;;  %v13491_v2 = vpack.c.bf16 %v12003_v38, %v11999_v4  ;;  %v12277_v45 = vpop.permute.xlu0 %4828 }
 0x8dc   : > { %v4180_v63 = vpack.c.bf16 %v4171_v57, %v4170_v51  ;;  %9159 = vmatprep.subr.bf16.mxu0 %v9669_v14  ;;  %v4836_v6 = vsel %vm2648_vm14, %v4831_v5, 0 }
 0x8dd   : > { %v9812_v25 = vpop.eup %9811 }
 0x8de   : > { %9132 = vmatmul.mubr.msk.bf16.vlgmr.msra.gmra.mxu1 %vm2648_vm14, %v4180_v63  ;;  %v4173_v21 = vmul.f32 %v9812_v25, %v12170_v39  ;;  %v12271_v32 = vpop.permute.xlu1 %4932 }
 0x8df   : > { %v4880_v30 = vpop.permute.xlu0 %4879  ;;  %9142 = vmatpush3.bf16.msra.mxu1 %v9670_v18 }
 0x8e0   : > { %v4181_v11 = vpack.c.bf16 %v4173_v21, %v4172_v41  ;;  %9177 = vmatprep.subr.bf16.mxu1 %v13485_v55 }
 0x8e2   : > { %9138 = vmatmul.mubr.msk.bf16.vlgmr.msra.gmra.mxu0 %vm2648_vm14, %v4181_v11  ;;  %v4984_v9 = vpop.permute.xlu1 %4983 }
 0x8e3   : > { %9161 = vmatprep.mubr.msk.bf16.mxu0 %vm2648_vm14, %v13486_v7  ;;  %9160 = vmatpush3.bf16.msra.mxu0 %v9669_v14  ;;  %v12291_v38 = vpop.permute.xlu0 %4930  ;;  %v4989_v39 = vsel %vm2648_vm14, %v4984_v9, 0 }
 0x8e4   : > { %9183 = vmatprep.subr.bf16.mxu0 %v13485_v55 }
 0x8e6   : > { %v12289_v4 = vpop.permute.xlu1 %5034 }
 0x8e7   : > { %v4982_v59 = vpop.permute.xlu0 %4981 }
 0x8ea   : > { %9162 = vmatmul.mubr.msk.bf16.vlgmr.msra.gmra.mxu0 %vm2648_vm14, %v13487_v27  ;;  %v5086_v37 = vpop.permute.xlu1 %5085 }
 0x8eb   : > { %9184 = vmatpush3.bf16.xpose.msra.mxu0 %v4887_v23  ;;  %9165 = vmatprep.mubr.msk.bf16.mxu0 %vm2648_vm14, %v13488_v20  ;;  %v5091_v47 = vsel %vm2648_vm14, %v5086_v37, 0  ;;  %v12304_v42 = vpop.permute.xlu0 %5032 }
 0x8ec   : > { %9195 = vmatprep.subr.bf16.mxu0 %v13485_v55 }
 0x8ee   : > { %v12300_v62 = vpop.permute.xlu1 %5136 }
 0x8ef   : > { %v5084_v26 = vpop.permute.xlu0 %5083 }
 0x8f2   : > { %9166 = vmatmul.mubr.msk.bf16.gmra.mxu0 %vm2648_vm14, %v13489_v3  ;;  %v5188_v56 = vpop.permute.xlu1 %5187 }
 0x8f3   : > { %9169 = vmatprep.mubr.msk.bf16.mxu0 %vm2648_vm14, %v13490_v29  ;;  %v5193_v33 = vsel %vm2648_vm14, %v5188_v56, 0 }
 0x8f6   : > { %v5186_v22 = vpop.permute.xlu1 %5185 }
 0x8fa   : > { %9170 = vmatmul.mubr.msk.bf16.gmra.mxu0 %vm2648_vm14, %v13491_v2 }
 0x8fb   : > { %9173 = vmatprep.mubr.msk.bf16.mxu0 %vm2648_vm14, %v13492_v19 }
 0x902   : > { %9174 = vmatmul.mubr.msk.bf16.gmra.mxu0 %vm2648_vm14, %v13493_v17 }
 0x903   : > { %9185 = vmatprep.mubr.msk.bf16.mxu0 %vm10526_vm13, %v13485_v55 }
 0x90a   : > { %9186 = vmatmul.mubr.msk.bf16.vlgmr.msra.gmra.mxu0 %vm2648_vm14, %v4880_v30 }
 0x90b   : > { %9196 = vmatpush3.bf16.xpose.msra.mxu0 %v4989_v39  ;;  %9197 = vmatprep.mubr.msk.bf16.mxu0 %vm10526_vm13, %v13485_v55 }
 0x90c   : > { %9207 = vmatprep.subr.bf16.mxu0 %v13485_v55 }
 0x912   : > { %9198 = vmatmul.mubr.msk.bf16.vlgmr.msra.gmra.mxu0 %vm2648_vm14, %v4982_v59 }
 0x913   : > { %9208 = vmatpush3.bf16.xpose.msra.mxu0 %v5091_v47  ;;  %9209 = vmatprep.mubr.msk.bf16.mxu0 %vm10526_vm13, %v13485_v55 }
 0x914   : > { %9219 = vmatprep.subr.bf16.mxu0 %v13485_v55 }
 0x91a   : > { %9210 = vmatmul.mubr.msk.bf16.vlgmr.msra.gmra.mxu0 %vm2648_vm14, %v5084_v26 }
 0x91b   : > { %9220 = vmatpush3.bf16.xpose.msra.mxu0 %v5193_v33  ;;  %9221 = vmatprep.mubr.msk.bf16.mxu0 %vm10526_vm13, %v13485_v55 }
 0x91c   : > { %9231 = vmatprep.subr.bf16.mxu0 %v13485_v55 }
 0x922   : > { %9222 = vmatmul.mubr.msk.bf16.vlgmr.msra.gmra.mxu0 %vm2648_vm14, %v5186_v22 }
 0x923   : > { %9233 = vmatprep.mubr.msk.bf16.mxu0 %vm10526_vm13, %v13485_v55 }
 0x986   : > { %v4223_v16 = vpop.f32.mrf.mxu1 }
 0x988   : > { %v9097_v34 = vpop.f32.mrf.mxu1 }
 0x98a   : > { %v4226_v15 = vpop.f32.mrf.mxu1  ;;  %v4271_v43 = vpop.f32.mrf.mxu0 }
 0x98b   : > { %v4566_v10 = vpack.c.bf16 %v4226_v15, %v4223_v16  ;;  %v4938_v15 = vsel %vm2648_vm14, %v12271_v32, 0  ;;  %v5040_v32 = vsel %vm2648_vm14, %v12289_v4, 0  ;;  %v5142_v4 = vsel %vm2648_vm14, %v12300_v62, 0 }
 0x98c   : > { %v9098_v46 = vpop.f32.mrf.mxu1  ;;  %v9103_v44 = vpop.f32.mrf.mxu0 }
 0x98d   : > { %9143 = vmatprep.mubr.msk.bf16.mxu1 %vm2648_vm14, %v4566_v10 }
 0x98e   : > { %v4274_v1 = vpop.f32.mrf.mxu0  ;;  %v4319_v0 = vpop.f32.mrf.mxu1 }
 0x98f   : > { %v4567_v49 = vpack.c.bf16 %v4274_v1, %v4271_v43 }
 0x990   : > { %v9104_v14 = vpop.f32.mrf.mxu0  ;;  %v9109_v58 = vpop.f32.mrf.mxu1 }
 0x991   : > { %9144 = vmatmul.mubr.msk.bf16.vlgmr.msra.gmra.mxu1 %vm2648_vm14, %v4567_v49 }
 0x992   : > { %9178 = vmatpush3.bf16.xpose.msra.mxu1 %v4836_v6  ;;  %v4322_v51 = vpop.f32.mrf.mxu1  ;;  %v4367_v57 = vpop.f32.mrf.mxu0 }
 0x993   : > { %v4568_v24 = vpack.c.bf16 %v4322_v51, %v4319_v0  ;;  %9189 = vmatprep.subr.bf16.mxu1 %v13485_v55  ;;  %v5135_v6 = vpop.permute.xlu0 %5134 }
 0x994   : > { %v9110_v63 = vpop.f32.mrf.mxu1  ;;  %v9115_v25 = vpop.f32.mrf.mxu0 }
 0x995   : > { %9147 = vmatprep.mubr.msk.bf16.mxu1 %vm2648_vm14, %v4568_v24 }
 0x996   : > { %v4370_v41 = vpop.f32.mrf.mxu0  ;;  %v4415_v21 = vpop.f32.mrf.mxu1 }
 0x997   : > { %v4569_v11 = vpack.c.bf16 %v4370_v41, %v4367_v57  ;;  %v5421_v57 = vpop.permute.xlu1 %5420 }
 0x998   : > { %v9116_v7 = vpop.f32.mrf.mxu0  ;;  %v9121_v53 = vpop.f32.mrf.mxu1 }
 0x999   : > { %9148 = vmatmul.mubr.msk.bf16.gmra.mxu1 %vm2648_vm14, %v4569_v11 }
 0x99a   : > { %v4418_v23 = vpop.f32.mrf.mxu1  ;;  %v4463_v27 = vpop.f32.mrf.mxu0 }
 0x99b   : > { %v4570_v20 = vpack.c.bf16 %v4418_v23, %v4415_v21 }
 0x99c   : > { %v9122_v3 = vpop.f32.mrf.mxu1  ;;  %v9127_v29 = vpop.f32.mrf.mxu0 }
 0x99d   : > { %9151 = vmatprep.mubr.msk.bf16.mxu1 %vm2648_vm14, %v4570_v20 }
 0x99e   : > { %v4466_v5 = vpop.f32.mrf.mxu0  ;;  %v4511_v2 = vpop.f32.mrf.mxu1 }
 0x99f   : > { %v4571_v19 = vpack.c.bf16 %v4466_v5, %v4463_v27 }
 0x9a0   : > { %v9128_v9 = vpop.f32.mrf.mxu0  ;;  %v9133_v30 = vpop.f32.mrf.mxu1 }
 0x9a1   : > { %9152 = vmatmul.mubr.msk.bf16.gmra.mxu1 %vm2648_vm14, %v4571_v19 }
 0x9a2   : > { %v4514_v17 = vpop.f32.mrf.mxu1  ;;  %v4559_v39 = vpop.f32.mrf.mxu0 }
 0x9a3   : > { %v4572_v37 = vpack.c.bf16 %v4514_v17, %v4511_v2 }
 0x9a4   : > { %v9134_v18 = vpop.f32.mrf.mxu1  ;;  %v9139_v59 = vpop.f32.mrf.mxu0 }
 0x9a5   : > { %9155 = vmatprep.mubr.msk.bf16.mxu1 %vm2648_vm14, %v4572_v37 }
 0x9a6   : > { %v4562_v47 = vpop.f32.mrf.mxu0 }
 0x9a7   : > { %v4573_v56 = vpack.c.bf16 %v4562_v47, %v4559_v39 }
 0x9a8   : > { %v9140_v26 = vpop.f32.mrf.mxu0 }
 0x9a9   : > { %9156 = vmatmul.mubr.msk.bf16.gmra.mxu1 %vm2648_vm14, %v4573_v56 }
 0x9aa   : > { %v12327_v33 = vpop.f32.mrf.mxu0  ;;  %9179 = vmatprep.mubr.msk.bf16.mxu1 %vm10526_vm13, %v13485_v55 }
 0x9ac   : > { %v12331_v22 = vpop.f32.mrf.mxu0 }
 0x9ae   : > { %v12333_v16 = vpop.f32.mrf.mxu0 }
 0x9b0   : > { %v12335_v34 = vpop.f32.mrf.mxu0 }
 0x9b1   : > { %13494 = vst [vmem:[#allocation50_spill] sm:$0xff] %v12335_v34  ;;  %9180 = vmatmul.mubr.msk.bf16.vlgmr.msra.gmra.mxu1 %vm2648_vm14, %v12277_v45 }
 0x9b2   : > { %9190 = vmatpush3.bf16.xpose.msra.mxu1 %v4938_v15  ;;  %v12341_v43 = vpop.f32.mrf.mxu0  ;;  %9191 = vmatprep.mubr.msk.bf16.mxu1 %vm10526_vm13, %v13485_v55 }
 0x9b3   : > { %9201 = vmatprep.subr.bf16.mxu1 %v13485_v55 }
 0x9b4   : > { %v12346_v10 = vpop.f32.mrf.mxu0 }
 0x9b6   : > { %v12348_v46 = vpop.f32.mrf.mxu0 }
 0x9b8   : > { %v12350_v44 = vpop.f32.mrf.mxu0 }
 0x9b9   : > { %13495 = vst [vmem:[#allocation51_spill] sm:$0xff] %v12350_v44  ;;  %9192 = vmatmul.mubr.msk.bf16.vlgmr.msra.gmra.mxu1 %vm2648_vm14, %v12291_v38 }
 0x9ba   : > { %9202 = vmatpush3.bf16.xpose.msra.mxu1 %v5040_v32  ;;  %v12356_v45 = vpop.f32.mrf.mxu0  ;;  %9203 = vmatprep.mubr.msk.bf16.mxu1 %vm10526_vm13, %v13485_v55 }
 0x9bb   : > { %9213 = vmatprep.subr.bf16.mxu1 %v13485_v55 }
 0x9bc   : > { %v12361_v1 = vpop.f32.mrf.mxu0 }
 0x9be   : > { %v12363_v0 = vpop.f32.mrf.mxu0 }
 0x9c0   : > { %v12365_v49 = vpop.f32.mrf.mxu0 }
 0x9c1   : > { %13496 = vst [vmem:[#allocation52_spill] sm:$0xff] %v12365_v49  ;;  %9204 = vmatmul.mubr.msk.bf16.vlgmr.msra.gmra.mxu1 %vm2648_vm14, %v12304_v42 }
 0x9c2   : > { %9214 = vmatpush3.bf16.xpose.msra.mxu1 %v5142_v4  ;;  %v12371_v38 = vpop.f32.mrf.mxu0  ;;  %9215 = vmatprep.mubr.msk.bf16.mxu1 %vm10526_vm13, %v13485_v55 }
 0x9c3   : > { %13497 = vst [vmem:[#allocation53_spill] sm:$0xff] %v12371_v38  ;;  %9225 = vmatprep.subr.bf16.mxu1 %v13485_v55 }
 0x9c4   : > { %v12376_v14 = vpop.f32.mrf.mxu0 }
 0x9c5   : > { %13498 = vst [vmem:[#allocation54_spill] sm:$0xff] %v12376_v14 }
 0x9c6   : > { %v12378_v58 = vpop.f32.mrf.mxu0 }
 0x9c7   : > { %13499 = vst [vmem:[#allocation55_spill] sm:$0xff] %v12378_v58 }
 0x9c8   : > { %v12380_v51 = vpop.f32.mrf.mxu0 }
 0x9c9   : > { %13500 = vst [vmem:[#allocation56_spill] sm:$0xff] %v12380_v51  ;;  %9216 = vmatmul.mubr.msk.bf16.vlgmr.msra.gmra.mxu1 %vm2648_vm14, %v5135_v6 }
 0x9ca   : > { %9226 = vmatpush3.bf16.msra.mxu1 %v5421_v57  ;;  %v4923_v62 = vpop.f32.mrf.mxu0  ;;  %9227 = vmatprep.mubr.msk.bf16.mxu1 %vm10526_vm13, %v13485_v55 }
 0x9cb   : > { %v5242_v42 = vsel %vm2648_vm14, %v4923_v62, -inf  ;;  %9237 = vmatprep.subr.bf16.mxu1 %v13485_v55 }
 0x9cc   : > { %5243 = vmax.xlane.f32.xlu0 %v5242_v42  ;;  %v9187_v24 = vpop.f32.mrf.mxu0 }
 0x9ce   : > { %v4926_v63 = vpop.f32.mrf.mxu0 }
 0x9cf   : > { %v5245_v25 = vsel %vm2648_vm14, %v4926_v63, -inf }
 0x9d0   : > { %5246 = vmax.xlane.f32.xlu0 %v5245_v25  ;;  %v9188_v41 = vpop.f32.mrf.mxu0 }
 0x9d2   : > { %v5025_v21 = vpop.f32.mrf.mxu0 }
 0x9d3   : > { %v5254_v11 = vsel %vm2648_vm14, %v5025_v21, -inf }
 0x9d4   : > { %5255 = vmax.xlane.f32.xlu1 %v5254_v11  ;;  %v9199_v7 = vpop.f32.mrf.mxu0 }
 0x9d6   : > { %v5028_v53 = vpop.f32.mrf.mxu0 }
 0x9d7   : > { %v5257_v23 = vsel %vm2648_vm14, %v5028_v53, -inf }
 0x9d8   : > { %5258 = vmax.xlane.f32.xlu0 %v5257_v23  ;;  %v9200_v27 = vpop.f32.mrf.mxu0 }
 0x9da   : > { %v5127_v20 = vpop.f32.mrf.mxu0 }
 0x9db   : > { %v5266_v3 = vsel %vm2648_vm14, %v5127_v20, -inf }
 0x9dc   : > { %5267 = vmax.xlane.f32.xlu1 %v5266_v3  ;;  %v9211_v29 = vpop.f32.mrf.mxu0 }
 0x9de   : > { %v5130_v5 = vpop.f32.mrf.mxu0 }
 0x9df   : > { %v5269_v2 = vsel %vm2648_vm14, %v5130_v5, -inf }
 0x9e0   : > { %5270 = vmax.xlane.f32.xlu0 %v5269_v2  ;;  %v9212_v19 = vpop.f32.mrf.mxu0 }
 0x9e2   : > { %v5229_v9 = vpop.f32.mrf.mxu0 }
 0x9e3   : > { %v5278_v30 = vsel %vm2648_vm14, %v5229_v9, -inf }
 0x9e4   : > { %5279 = vmax.xlane.f32.xlu1 %v5278_v30  ;;  %v9223_v17 = vpop.f32.mrf.mxu0 }
 0x9e6   : > { %v12393_v39 = vpop.f32.mrf.mxu0 }
 0x9e7   : > { %v5281_v37 = vsel %vm2648_vm14, %v12393_v39, -inf }
 0x9e8   : > { %5282 = vmax.xlane.f32.xlu0 %v5281_v37  ;;  %v9224_v18 = vpop.f32.mrf.mxu0 }
 0xa51   : > { %v12397_v59 = vpop.f32.mrf.mxu1 }
 0xa53   : > { %v12399_v47 = vpop.f32.mrf.mxu1 }
 0xa55   : > { %v12401_v56 = vpop.f32.mrf.mxu1  ;;  %v5244_v26 = vpop.xlane.xlu0 %5243 }
 0xa56   : > { %v5286_v15 = vsub.f32 %v4923_v62, %v5244_v26 }
 0xa57   : > { %v12403_v32 = vpop.f32.mrf.mxu1 }
 0xa58   : > { %13501 = vst [vmem:[#allocation57_spill] sm:$0xff] %v12403_v32  ;;  %v5304_v4 = vmul.f32 1.442695, %v5286_v15 }
 0xa59   : > { %v12405_v6 = vpop.f32.mrf.mxu1  ;;  %v5247_v57 = vpop.xlane.xlu0 %5246 }
 0xa5a   : > { %9813 = vpow2.f32 %v5304_v4  ;;  %v5287_v42 = vsub.f32 %v4926_v63, %v5247_v57 }
 0xa5b   : > { %v12407_v24 = vpop.f32.mrf.mxu1 }
 0xa5c   : > { %v5306_v25 = vmul.f32 1.442695, %v5287_v42 }
 0xa5d   : > { %v12409_v41 = vpop.f32.mrf.mxu1  ;;  %v5256_v11 = vpop.xlane.xlu1 %5255 }
 0xa5e   : > { %9815 = vpow2.f32 %v5306_v25  ;;  %v5290_v7 = vsub.f32 %v5025_v21, %v5256_v11 }
 0xa5f   : > { %v12411_v23 = vpop.f32.mrf.mxu1 }
 0xa60   : > { %13502 = vst [vmem:[#allocation58_spill] sm:$0xff] %v12411_v23  ;;  %v5312_v27 = vmul.f32 1.442695, %v5290_v7 }
 0xa61   : > { %v12413_v62 = vpop.f32.mrf.mxu1  ;;  %v5259_v3 = vpop.xlane.xlu0 %5258 }
 0xa62   : > { %9817 = vpow2.f32 %v5312_v27  ;;  %v5291_v29 = vsub.f32 %v5028_v53, %v5259_v3 }
 0xa63   : > { %v12415_v2 = vpop.f32.mrf.mxu1 }
 0xa64   : > { %v5314_v19 = vmul.f32 1.442695, %v5291_v29 }
 0xa65   : > { %v12417_v63 = vpop.f32.mrf.mxu1  ;;  %v5268_v30 = vpop.xlane.xlu1 %5267 }
 0xa66   : > { %9819 = vpow2.f32 %v5314_v19  ;;  %v5294_v17 = vsub.f32 %v5127_v20, %v5268_v30 }
 0xa67   : > { %v12419_v37 = vpop.eup %9813  ;;  %v12421_v18 = vpop.f32.mrf.mxu1 }
 0xa68   : > { %13503 = vst [vmem:[#allocation59_spill] sm:$0xff] %v12421_v18  ;;  %v5320_v21 = vmul.f32 1.442695, %v5294_v17  ;;  %v5338_v26 = vsel %vm2648_vm14, %v12419_v37, 0.0 }
 0xa69   : > { %v12425_v15 = vpop.f32.mrf.mxu1  ;;  %v5271_v4 = vpop.xlane.xlu0 %5270  ;;  %5339 = vadd.xlane.f32.xlu1 %v5338_v26 }
 0xa6a   : > { %13504 = vst [vmem:[#allocation60_spill] sm:$0xff] %v12425_v15  ;;  %9821 = vpow2.f32 %v5320_v21  ;;  %v5295_v53 = vsub.f32 %v5130_v5, %v5271_v4 }
 0xa6b   : > { %v12427_v57 = vpop.eup %9815  ;;  %v12429_v42 = vpop.f32.mrf.mxu1 }
 0xa6c   : > { %13505 = vst [vmem:[#allocation61_spill] sm:$0xff] %v12429_v42  ;;  %v5322_v25 = vmul.f32 1.442695, %v5295_v53  ;;  %v5341_v20 = vsel %vm2648_vm14, %v12427_v57, 0.0 }
 0xa6d   : > { %v12433_v11 = vpop.f32.mrf.mxu1  ;;  %5342 = vadd.xlane.f32.xlu0 %v5341_v20  ;;  %v5280_v7 = vpop.xlane.xlu1 %5279 }
 0xa6e   : > { %13506 = vst [vmem:[#allocation62_spill] sm:$0xff] %v12433_v11  ;;  %9823 = vpow2.f32 %v5322_v25  ;;  %v5298_v27 = vsub.f32 %v5229_v9, %v5280_v7 }
 0xa6f   : > { %v12435_v3 = vpop.eup %9817  ;;  %v12437_v29 = vpop.f32.mrf.mxu1 }
 0xa70   : > { %13507 = vst [vmem:[#allocation63_spill] sm:$0xff] %v12437_v29  ;;  %v5328_v19 = vmul.f32 1.442695, %v5298_v27  ;;  %v5350_v5 = vsel %vm2648_vm14, %v12435_v3, 0.0 }
 0xa71   : > { %v4872_v30 = vpop.f32.mrf.mxu1  ;;  %v5283_v17 = vpop.xlane.xlu0 %5282  ;;  %5351 = vadd.xlane.f32.xlu1 %v5350_v5 }
 0xa72   : > { %9825 = vpow2.f32 %v5328_v19  ;;  %v5299_v21 = vsub.f32 %v12393_v39, %v5283_v17  ;;  %v5236_v26 = vsel %vm2648_vm14, %v4872_v30, -inf }
 0xa73   : > { %v12443_v4 = vpop.eup %9819  ;;  %v9181_v53 = vpop.f32.mrf.mxu1  ;;  %5237 = vmax.xlane.f32.xlu0 %v5236_v26 }
 0xa74   : > { %v5330_v9 = vmul.f32 1.442695, %v5299_v21  ;;  %v5353_v20 = vsel %vm2648_vm14, %v12443_v4, 0.0 }
 0xa75   : > { %v4875_v25 = vpop.f32.mrf.mxu1 }
 0xa76   : > { %9827 = vpow2.f32 %v5330_v9  ;;  %v5239_v7 = vsel %vm2648_vm14, %v4875_v25, -inf }
 0xa77   : > { %v12448_v27 = vpop.eup %9821  ;;  %v9182_v5 = vpop.f32.mrf.mxu1  ;;  %5354 = vadd.xlane.f32.xlu0 %v5353_v20  ;;  %5240 = vmax.xlane.f32.xlu1 %v5239_v7 }
 0xa78   : > { %v5362_v19 = vsel %vm2648_vm14, %v12448_v27, 0.0 }
 0xa79   : > { %v4974_v39 = vpop.f32.mrf.mxu1 }
 0xa7a   : > { %v5248_v9 = vsel %vm2648_vm14, %v4974_v39, -inf }
 0xa7b   : > { %v12452_v17 = vpop.eup %9823  ;;  %v9193_v26 = vpop.f32.mrf.mxu1  ;;  %5363 = vadd.xlane.f32.xlu1 %v5362_v19 }
 0xa7c   : > { %v5365_v21 = vsel %vm2648_vm14, %v12452_v17, 0.0 }
 0xa7d   : > { %v4977_v53 = vpop.f32.mrf.mxu1  ;;  %5366 = vadd.xlane.f32.xlu0 %v5365_v21 }
 0xa7e   : > { %v5251_v20 = vsel %vm2648_vm14, %v4977_v53, -inf }
 0xa7f   : > { %v12457_v44 = vpop.eup %9825  ;;  %v9194_v5 = vpop.f32.mrf.mxu1  ;;  %5249 = vmax.xlane.f32.xlu1 %v5248_v9 }
 0xa80   : > { %v5374_v26 = vsel %vm2648_vm14, %v12457_v44, 0.0 }
 0xa81   : > { %v12460_v7 = vpop.f32.mrf.mxu1  ;;  %5252 = vmax.xlane.f32.xlu0 %v5251_v20 }
 0xa82   : > { %v5260_v9 = vsel %vm2648_vm14, %v12460_v7, -inf }
 0xa83   : > { %v12464_v19 = vpop.eup %9827  ;;  %v9205_v23 = vpop.f32.mrf.mxu1  ;;  %5375 = vadd.xlane.f32.xlu1 %v5374_v26 }
 0xa84   : > { %v5377_v21 = vsel %vm2648_vm14, %v12464_v19, 0.0 }
 0xa85   : > { %v12468_v34 = vpop.f32.mrf.mxu1  ;;  %5378 = vadd.xlane.f32.xlu0 %v5377_v21 }
 0xa86   : > { %v5263_v20 = vsel %vm2648_vm14, %v12468_v34, -inf }
 0xa87   : > { %v9206_v5 = vpop.f32.mrf.mxu1  ;;  %5261 = vmax.xlane.f32.xlu1 %v5260_v9 }
 0xa89   : > { %v12474_v32 = vpop.f32.mrf.mxu1  ;;  %5264 = vmax.xlane.f32.xlu0 %v5263_v20 }
 0xa8a   : > { %v5272_v23 = vsel %vm2648_vm14, %v12474_v32, -inf }
 0xa8b   : > { %v9217_v26 = vpop.f32.mrf.mxu1  ;;  %5273 = vmax.xlane.f32.xlu1 %v5272_v23 }
 0xa8d   : > { %v12478_v51 = vpop.f32.mrf.mxu1 }
 0xa8e   : > { %v5275_v21 = vsel %vm2648_vm14, %v12478_v51, -inf }
 0xa8f   : > { %v9218_v29 = vpop.f32.mrf.mxu1  ;;  %5276 = vmax.xlane.f32.xlu0 %v5275_v21 }
 0xa9c   : > { %5514 = vrot.lane.b32.xlu1 %v11581_v28, %s10531_s1 }
 0xaa0   : > { %5561 = vrot.lane.b32.xlu1 %v11593_v60, %s10531_s1 }
 0xaa5   : > { %5467 = vrot.lane.b32.xlu0 %v11667_v40, %s10531_s1 }
 0xaf2   : > { %v5340_v9 = vpop.xlane.xlu1 %5339 }
 0xaf6   : > { %v5343_v5 = vpop.xlane.xlu0 %5342 }
 0xafa   : > { %v5352_v20 = vpop.xlane.xlu1 %5351 }
 0xafc   : > { %v5238_v23 = vpop.xlane.xlu0 %5237 }
 0xafd   : > { %v5284_v26 = vsub.f32 %v4872_v30, %v5238_v23 }
 0xaff   : > { %v5300_v58 = vmul.f32 1.442695, %v5284_v26 }
 0xb00   : > { %v5241_v11 = vpop.xlane.xlu1 %5240  ;;  %v5355_v29 = vpop.xlane.xlu0 %5354 }
 0xb01   : > { %9829 = vpow2.f32 %v5300_v58  ;;  %v5285_v14 = vsub.f32 %v4875_v25, %v5241_v11 }
 0xb03   : > { %v5302_v21 = vmul.f32 1.442695, %v5285_v14 }
 0xb04   : > { %v5364_v42 = vpop.xlane.xlu1 %5363 }
 0xb05   : > { %9831 = vpow2.f32 %v5302_v21 }
 0xb06   : > { %9833 = vrcp.f32 %v5364_v42  ;;  %v5367_v28 = vpop.xlane.xlu0 %5366 }
 0xb07   : > { %9835 = vrcp.f32 %v5367_v28 }
 0xb08   : > { %v5250_v60 = vpop.xlane.xlu1 %5249  ;;  %9837 = vrcp.f32 %v5343_v5 }
 0xb09   : > { %v5288_v38 = vsub.f32 %v4974_v39, %v5250_v60  ;;  %9839 = vrcp.f32 %v5340_v9 }
 0xb0a   : > { %v5253_v40 = vpop.xlane.xlu0 %5252 }
 0xb0b   : > { %v5308_v15 = vmul.f32 1.442695, %v5288_v38  ;;  %v5289_v49 = vsub.f32 %v4977_v53, %v5253_v40 }
 0xb0c   : > { %v5376_v18 = vpop.xlane.xlu1 %5375 }
 0xb0d   : > { %9841 = vpow2.f32 %v5308_v15  ;;  %v5310_v30 = vmul.f32 1.442695, %v5289_v49 }
 0xb0e   : > { %v12488_v23 = vpop.eup %9829  ;;  %9843 = vrcp.f32 %v5376_v18  ;;  %v5379_v58 = vpop.xlane.xlu0 %5378 }
 0xb0f   : > { %9845 = vpow2.f32 %v5310_v30  ;;  %v5332_v14 = vsel %vm2648_vm14, %v12488_v23, 0.0 }
 0xb10   : > { %9847 = vrcp.f32 %v5379_v58  ;;  %5333 = vadd.xlane.f32.xlu1 %v5332_v14  ;;  %v5262_v28 = vpop.xlane.xlu1 %5261 }
 0xb11   : > { %9849 = vrcp.f32 %v5355_v29 }
 0xb12   : > { %v12492_v60 = vpop.eup %9831  ;;  %9851 = vrcp.f32 %v5352_v20  ;;  %v5265_v49 = vpop.xlane.xlu0 %5264 }
 0xb13   : > { %v9834_v38 = vpop.eup %9833  ;;  %v5335_v40 = vsel %vm2648_vm14, %v12492_v60, 0.0 }
 0xb14   : > { %v9836_v15 = vpop.eup %9835  ;;  %5336 = vadd.xlane.f32.xlu0 %v5335_v40  ;;  %v5274_v18 = vpop.xlane.xlu1 %5273  ;;  %v12497_v42 = vmul.f32 %v9834_v38, %v12448_v27 }
 0xb15   : > { %v12500_v11 = vmul.f32 %v9836_v15, %v12452_v17  ;;  %v9838_v25 = vpop.eup %9837 }
 0xb16   : > { %v9840_v9 = vpop.eup %9839  ;;  %v5399_v26 = vmul.f32 %v9838_v25, %v12427_v57 }
 0xb17   : > { %v5417_v39 = vpack.c.bf16 %v12500_v11, %v12497_v42  ;;  %v5398_v17 = vmul.f32 %v9840_v9, %v12419_v37 }
 0xb18   : > { %v5277_v53 = vpop.xlane.xlu0 %5276  ;;  %v12507_v20 = vpop.permute.xlu1 %5514 }
 0xb19   : > { %v5413_v38 = vpack.c.bf16 %v5399_v26, %v5398_v17  ;;  %v5296_v17 = vsub.f32 %v12474_v32, %v5274_v18  ;;  %v13508_v18 = vld [vmem:[#allocation47_spill] sm:$0xff] }
 0xb1a   : > { %v12504_v5 = vpop.eup %9841 }
 0xb1b   : > { %v9844_v29 = vpop.eup %9843  ;;  %v5344_v27 = vsel %vm2648_vm14, %v12504_v5, 0.0 }
 0xb1c   : > { %v12511_v21 = vpop.eup %9845  ;;  %v5468_v30 = vpop.permute.xlu0 %5467  ;;  %5345 = vadd.xlane.f32.xlu1 %v5344_v27  ;;  %v12517_v57 = vmul.f32 %v9844_v29, %v12457_v44  ;;  %v5292_v29 = vsub.f32 %v12460_v7, %v5262_v28 }
 0xb1d   : > { %v9848_v58 = vpop.eup %9847  ;;  %9232 = vmatpush3.bf16.msra.mxu0 %v5468_v30  ;;  %v5347_v14 = vsel %vm2648_vm14, %v12511_v21, 0.0  ;;  %v5562_v25 = vpop.permute.xlu1 %5561  ;;  %v5297_v30 = vsub.f32 %v12478_v51, %v5277_v53 }
 0xb1e   : > { %v12520_v40 = vmul.f32 %v9848_v58, %v12464_v19  ;;  %5348 = vadd.xlane.f32.xlu0 %v5347_v14  ;;  %9243 = vmatprep.subr.bf16.mxu0 %v13485_v55  ;;  %v9850_v15 = vpop.eup %9849  ;;  %v5316_v27 = vmul.f32 1.442695, %v5292_v29  ;;  %v5324_v58 = vmul.f32 1.442695, %v5296_v17 }
 0xb1f   : > { %v9852_v9 = vpop.eup %9851  ;;  %v5403_v44 = vmul.f32 %v9850_v15, %v12443_v4  ;;  %v5293_v4 = vsub.f32 %v12468_v34, %v5265_v49  ;;  %v5326_v14 = vmul.f32 1.442695, %v5297_v30 }
 0xb20   : > { %v5419_v37 = vpack.c.bf16 %v12520_v40, %v12517_v57  ;;  %9234 = vmatmul.mubr.msk.bf16.vlgmr.msra.gmra.mxu0 %vm2648_vm14, %v5413_v38  ;;  %v5402_v19 = vmul.f32 %v9852_v9, %v12435_v3  ;;  %9853 = vpow2.f32 %v5316_v27 }
 0xb21   : > { %9244 = vmatpush3.bf16.msra.mxu0 %v5562_v25  ;;  %9245 = vmatprep.mubr.msk.bf16.mxu0 %vm10526_vm13, %v13485_v55  ;;  %v5318_v3 = vmul.f32 1.442695, %v5293_v4 }
 0xb22   : > { %9255 = vmatprep.subr.bf16.mxu0 %v13485_v55  ;;  %v5415_v26 = vpack.c.bf16 %v5403_v44, %v5402_v19 }
 0xb23   : > { %9855 = vpow2.f32 %v5318_v3 }
 0xb24   : > { %9857 = vpow2.f32 %v5324_v58 }
 0xb25   : > { %9859 = vpow2.f32 %v5326_v14 }
 0xb28   : > { %9246 = vmatmul.mubr.msk.bf16.vlgmr.msra.gmra.mxu0 %vm2648_vm14, %v5415_v26 }
 0xb29   : > { %9257 = vmatprep.mubr.msk.bf16.mxu0 %vm10526_vm13, %v13485_v55 }
 0xb2d   : > { %5655 = vrot.lane.b32.xlu1 %v11617_v8, %s10531_s1  ;;  %v12542_v38 = vpop.eup %9853 }
 0xb2e   : > { %v5356_v7 = vsel %vm2648_vm14, %v12542_v38, 0.0 }
 0xb30   : > { %v12544_v15 = vpop.eup %9855 }
 0xb31   : > { %v12548_v34 = vpop.eup %9857  ;;  %v5359_v32 = vsel %vm2648_vm14, %v12544_v15, 0.0 }
 0xb32   : > { %v12552_v51 = vpop.eup %9859  ;;  %v5368_v28 = vsel %vm2648_vm14, %v12548_v34, 0.0 }
 0xb33   : > { %v5371_v49 = vsel %vm2648_vm14, %v12552_v51, 0.0 }
 0xb34   : > { %5608 = vrot.lane.b32.xlu0 %v11607_v13, %s10531_s1 }
 0xb51   : > { %5357 = vadd.xlane.f32.xlu1 %v5356_v7 }
 0xb53   : > { %5360 = vadd.xlane.f32.xlu0 %v5359_v32 }
 0xb55   : > { %5369 = vadd.xlane.f32.xlu1 %v5368_v28 }
 0xb57   : > { %5372 = vadd.xlane.f32.xlu0 %v5371_v49 }
 0xb66   : > { %5749 = vrot.lane.b32.xlu1 %v11639_v61, %s10531_s1 }
 0xb6a   : > { %5947 = vrot.lane.b32.xlu1 %v11597_v52, %s10532_s22 }
 0xb6d   : > { %5702 = vrot.lane.b32.xlu0 %v11627_v31, %s10531_s1 }
 0xb6e   : > { %5998 = vrot.lane.b32.xlu1 %v11569_v36, %s10532_s22 }
 0xb71   : > { %5949 = vrot.lane.b32.xlu0 %v11597_v52, %s10533_s8 }
 0xb72   : > { %6049 = vrot.lane.b32.xlu1 %v11578_v50, %s10532_s22 }
 0xb75   : > { %6000 = vrot.lane.b32.xlu0 %v11569_v36, %s10533_s8 }
 0xb76   : > { %6153 = vrot.lane.b32.xlu1 %v11604_v12, %s10533_s8 }
 0xb79   : > { %6051 = vrot.lane.b32.xlu0 %v11578_v50, %s10533_s8 }
 0xb7a   : > { %6204 = vrot.lane.b32.xlu1 %v11614_v35, %s10533_s8 }
 0xb7d   : > { %6102 = vrot.lane.b32.xlu0 %v11589_v54, %s10533_s8 }
 0xb7e   : > { %6255 = vrot.lane.b32.xlu1 %v11624_v48, %s10533_s8 }
 0xb81   : > { %6100 = vrot.lane.b32.xlu0 %v11589_v54, %s10532_s22 }
 0xb82   : > { %6306 = vrot.lane.b32.xlu1 %v13508_v18, %s10533_s8 }
 0xb85   : > { %6151 = vrot.lane.b32.xlu0 %v11604_v12, %s10532_s22 }
 0xb86   : > { %6304 = vrot.lane.b32.xlu1 %v13508_v18, %s10532_s22 }
 0xb89   : > { %6202 = vrot.lane.b32.xlu0 %v11614_v35, %s10532_s22 }
 0xb8d   : > { %6253 = vrot.lane.b32.xlu0 %v11624_v48, %s10532_s22 }
 0xb99   : > { %v5334_v36 = vpop.xlane.xlu1 %5333 }
 0xb9a   : > { %9861 = vrcp.f32 %v5334_v36 }
 0xb9d   : > { %v5337_v50 = vpop.xlane.xlu0 %5336 }
 0xb9e   : > { %9863 = vrcp.f32 %v5337_v50 }
 0xba5   : > { %v5346_v52 = vpop.xlane.xlu1 %5345 }
 0xba6   : > { %9865 = vrcp.f32 %v5346_v52 }
 0xba7   : > { %v5349_v54 = vpop.xlane.xlu0 %5348  ;;  %v9862_v53 = vpop.eup %9861 }
 0xba8   : > { %9867 = vrcp.f32 %v5349_v54  ;;  %v5396_v9 = vmul.f32 %v9862_v53, %v12488_v23 }
 0xba9   : > { %v5656_v25 = vpop.permute.xlu1 %5655 }
 0xbaa   : > { %9256 = vmatpush3.bf16.msra.mxu0 %v5656_v25 }
 0xbab   : > { %v9864_v12 = vpop.eup %9863  ;;  %9267 = vmatprep.subr.bf16.mxu0 %v13485_v55 }
 0xbac   : > { %v5397_v35 = vmul.f32 %v9864_v12, %v12492_v60 }
 0xbad   : > { %9258 = vmatmul.mubr.msk.bf16.vlgmr.msra.gmra.mxu0 %vm2648_vm14, %v5417_v39  ;;  %v5609_v39 = vpop.permute.xlu0 %5608 }
 0xbae   : > { %v5412_v48 = vpack.c.bf16 %v5397_v35, %v5396_v9  ;;  %9269 = vmatprep.mubr.msk.bf16.mxu0 %vm10526_vm13, %v13485_v55  ;;  %v9671_v9 = vld [vmem:[%s10923_s3 + $0x10] sm:$0xff]  }
 0xbb0   : > { %9228 = vmatmul.mubr.msk.bf16.vlgmr.msra.gmra.mxu1 %vm2648_vm14, %v5412_v48 }
 0xbb1   : > { %9238 = vmatpush3.bf16.msra.mxu1 %v12507_v20  ;;  %9239 = vmatprep.mubr.msk.bf16.mxu1 %vm10526_vm13, %v13485_v55 }
 0xbb2   : > { %9249 = vmatprep.subr.bf16.mxu1 %v13485_v55 }
 0xbb3   : > { %v9866_v23 = vpop.eup %9865 }
 0xbb4   : > { %v5400_v44 = vmul.f32 %v9866_v23, %v12504_v5 }
 0xbb5   : > { %v9868_v60 = vpop.eup %9867 }
 0xbb6   : > { %v5401_v42 = vmul.f32 %v9868_v60, %v12511_v21 }
 0xbb8   : > { %v5414_v11 = vpack.c.bf16 %v5401_v42, %v5400_v44 }
 0xbba   : > { %9240 = vmatmul.mubr.msk.bf16.vlgmr.msra.gmra.mxu1 %vm2648_vm14, %v5414_v11 }
 0xbbb   : > { %9250 = vmatpush3.bf16.msra.mxu1 %v5609_v39  ;;  %9251 = vmatprep.mubr.msk.bf16.mxu1 %vm10526_vm13, %v13485_v55 }
 0xbbc   : > { %9261 = vmatprep.subr.bf16.mxu1 %v13485_v55 }
 0xbda   : > { %v5358_v20 = vpop.xlane.xlu1 %5357 }
 0xbdb   : > { %9869 = vrcp.f32 %v5358_v20 }
 0xbdc   : > { %v5361_v19 = vpop.xlane.xlu0 %5360 }
 0xbdd   : > { %9871 = vrcp.f32 %v5361_v19 }
 0xbde   : > { %v5370_v26 = vpop.xlane.xlu1 %5369 }
 0xbe0   : > { %v12606_v29 = vpop.f32.mrf.mxu0  ;;  %v5373_v5 = vpop.xlane.xlu0 %5372 }
 0xbe1   : > { %9873 = vrcp.f32 %v5373_v5 }
 0xbe2   : > { %v9235_v21 = vpop.f32.mrf.mxu0  ;;  %v5750_v4 = vpop.permute.xlu1 %5749  ;;  %9875 = vrcp.f32 %v5370_v26 }
 0xbe3   : > { %9268 = vmatpush3.bf16.msra.mxu0 %v5750_v4 }
 0xbe4   : > { %v12608_v27 = vpop.f32.mrf.mxu0  ;;  %v5703_v17 = vpop.permute.xlu0 %5702  ;;  %9291 = vmatprep.subr.bf16.mxu0 %v13485_v55 }
 0xbe5   : > { %v5797_v3 = vpack.c.bf16 %v12608_v27, %v12606_v29 }
 0xbe6   : > { %v9236_v30 = vpop.f32.mrf.mxu0  ;;  %9270 = vmatmul.mubr.msk.bf16.vlgmr.msra.gmra.mxu0 %vm2648_vm14, %v5419_v37  ;;  %v5948_v49 = vpop.permute.xlu1 %5947 }
 0xbe7   : > { %9293 = vmatprep.mubr.msk.bf16.mxu0 %vm10526_vm13, %v13485_v55 }
 0xbe8   : > { %v9870_v58 = vpop.eup %9869  ;;  %v5950_v14 = vpop.permute.xlu0 %5949 }
 0xbe9   : > { %v12619_v7 = vpop.f32.mrf.mxu0  ;;  %v5955_v32 = vsel %vm2648_vm14, %v5950_v14, 0  ;;  %v5404_v36 = vmul.f32 %v9870_v58, %v12542_v38 }
 0xbea   : > { %v9872_v28 = vpop.eup %9871  ;;  %9292 = vmatpush3.bf16.xpose.msra.mxu0 %v5955_v32  ;;  %v5999_v12 = vpop.permute.xlu1 %5998 }
 0xbeb   : > { %v9247_v18 = vpop.f32.mrf.mxu0  ;;  %v5405_v50 = vmul.f32 %v9872_v28, %v12544_v15  ;;  %9297 = vmatprep.subr.bf16.mxu0 %v13485_v55 }
 0xbec   : > { %v6001_v54 = vpop.permute.xlu0 %6000 }
 0xbed   : > { %v12625_v57 = vpop.f32.mrf.mxu0  ;;  %v5416_v40 = vpack.c.bf16 %v5405_v50, %v5404_v36  ;;  %v6006_v15 = vsel %vm2648_vm14, %v6001_v54, 0 }
 0xbee   : > { %v5799_v37 = vpack.c.bf16 %v12625_v57, %v12619_v7  ;;  %v9874_v52 = vpop.eup %9873  ;;  %v6050_v23 = vpop.permute.xlu1 %6049 }
 0xbef   : > { %v9248_v53 = vpop.f32.mrf.mxu0  ;;  %9252 = vmatmul.mubr.msk.bf16.vlgmr.msra.gmra.mxu1 %vm2648_vm14, %v5416_v40  ;;  %v9876_v25 = vpop.eup %9875  ;;  %v5409_v38 = vmul.f32 %v9874_v52, %v12552_v51 }
 0xbf0   : > { %9262 = vmatpush3.bf16.msra.mxu1 %v5703_v17  ;;  %9263 = vmatprep.mubr.msk.bf16.mxu1 %vm10526_vm13, %v13485_v55  ;;  %v5408_v35 = vmul.f32 %v9876_v25, %v12548_v34  ;;  %v6052_v60 = vpop.permute.xlu0 %6051 }
 0xbf1   : > { %9294 = vmatmul.mubr.msk.bf16.vlgmr.msra.gmra.mxu0 %vm2648_vm14, %v5948_v49  ;;  %9273 = vmatprep.subr.bf16.mxu1 %v9671_v9  ;;  %v6057_v51 = vsel %vm2648_vm14, %v6052_v60, 0 }
 0xbf2   : > { %9298 = vmatpush3.bf16.xpose.msra.mxu0 %v6006_v15  ;;  %9299 = vmatprep.mubr.msk.bf16.mxu0 %vm10526_vm13, %v13485_v55  ;;  %v5418_v48 = vpack.c.bf16 %v5409_v38, %v5408_v35  ;;  %v6154_v34 = vpop.permute.xlu1 %6153 }
 0xbf3   : > { %9303 = vmatprep.subr.bf16.mxu0 %v13485_v55  ;;  %v6159_v52 = vsel %vm2648_vm14, %v6154_v34, 0 }
 0xbf4   : > { %v6103_v44 = vpop.permute.xlu0 %6102 }
 0xbf5   : > { %v6108_v42 = vsel %vm2648_vm14, %v6103_v44, 0 }
 0xbf6   : > { %v6205_v11 = vpop.permute.xlu1 %6204 }
 0xbf7   : > { %9264 = vmatmul.mubr.msk.bf16.vlgmr.msra.gmra.mxu1 %vm2648_vm14, %v5418_v48  ;;  %v6210_v19 = vsel %vm2648_vm14, %v6205_v11, 0 }
 0xbf8   : > { %9274 = vmatpush3.bf16.msra.mxu1 %v9671_v9  ;;  %v6101_v39 = vpop.permute.xlu0 %6100 }
 0xbf9   : > { %9300 = vmatmul.mubr.msk.bf16.vlgmr.msra.gmra.mxu0 %vm2648_vm14, %v5999_v12  ;;  %9315 = vmatprep.subr.bf16.mxu1 %v13485_v55 }
 0xbfa   : > { %9304 = vmatpush3.bf16.xpose.msra.mxu0 %v6057_v51  ;;  %9305 = vmatprep.mubr.msk.bf16.mxu0 %vm10526_vm13, %v13485_v55  ;;  %v12652_v20 = vpop.permute.xlu1 %6255 }
 0xbfb   : > { %9309 = vmatprep.subr.bf16.mxu0 %v13485_v55 }
 0xbfc   : > { %v12656_v26 = vpop.permute.xlu0 %6151 }
 0xbfe   : > { %v6307_v5 = vpop.permute.xlu1 %6306 }
 0xbff   : > { %v6312_v4 = vsel %vm2648_vm14, %v6307_v5, 0 }
 0xc00   : > { %v6203_v21 = vpop.permute.xlu0 %6202 }
 0xc01   : > { %9306 = vmatmul.mubr.msk.bf16.vlgmr.msra.gmra.mxu0 %vm2648_vm14, %v6050_v23 }
 0xc02   : > { %9310 = vmatpush3.bf16.xpose.msra.mxu0 %v6108_v42  ;;  %9311 = vmatprep.mubr.msk.bf16.mxu0 %vm10526_vm13, %v13485_v55  ;;  %v6305_v17 = vpop.permute.xlu1 %6304 }
 0xc03   : > { %9321 = vmatprep.subr.bf16.mxu0 %v13485_v55 }
 0xc09   : > { %9312 = vmatmul.mubr.msk.bf16.vlgmr.msra.gmra.mxu0 %vm2648_vm14, %v6101_v39 }
 0xc0a   : > { %9322 = vmatpush3.bf16.xpose.msra.mxu0 %v6210_v19  ;;  %9323 = vmatprep.mubr.msk.bf16.mxu0 %vm10526_vm13, %v13485_v55 }
 0xc0b   : > { %9333 = vmatprep.subr.bf16.mxu0 %v13485_v55 }
 0xc11   : > { %9324 = vmatmul.mubr.msk.bf16.vlgmr.msra.gmra.mxu0 %vm2648_vm14, %v6203_v21 }
 0xc12   : > { %9334 = vmatpush3.bf16.xpose.msra.mxu0 %v6312_v4  ;;  %9335 = vmatprep.mubr.msk.bf16.mxu0 %vm10526_vm13, %v13485_v55 }
 0xc13   : > { %9345 = vmatprep.subr.bf16.mxu0 %v13485_v55 }
 0xc19   : > { %9336 = vmatmul.mubr.msk.bf16.vlgmr.msra.gmra.mxu0 %vm2648_vm14, %v6305_v17 }
 0xc1a   : > { %9347 = vmatprep.mubr.msk.bf16.mxu0 %vm10526_vm13, %v13485_v55 }
 0xc6d   : > { %v5695_v30 = vpop.f32.mrf.mxu0 }
 0xc6f   : > { %v9259_v58 = vpop.f32.mrf.mxu0 }
 0xc70   : > { %v5460_v14 = vpop.f32.mrf.mxu1 }
 0xc71   : > { %v5698_v32 = vpop.f32.mrf.mxu0 }
 0xc72   : > { %v5801_v28 = vpack.c.bf16 %v5698_v32, %v5695_v30  ;;  %v9229_v49 = vpop.f32.mrf.mxu1 }
 0xc73   : > { %v9260_v18 = vpop.f32.mrf.mxu0 }
 0xc74   : > { %v5463_v36 = vpop.f32.mrf.mxu1 }
 0xc75   : > { %v5796_v50 = vpack.c.bf16 %v5463_v36, %v5460_v14 }
 0xc76   : > { %v9230_v40 = vpop.f32.mrf.mxu1 }
 0xc77   : > { %9275 = vmatprep.mubr.msk.bf16.mxu1 %vm2648_vm14, %v5796_v50  ;;  %v6261_v40 = vsel %vm2648_vm14, %v12652_v20, 0  ;;  %v6254_v20 = vpop.permute.xlu0 %6253 }
 0xc78   : > { %9276 = vmatmul.mubr.msk.bf16.vlgmr.msra.gmra.mxu1 %vm2648_vm14, %v5797_v3 }
 0xc79   : > { %9316 = vmatpush3.bf16.xpose.msra.mxu1 %v6159_v52 }
 0xc7a   : > { %v5554_v54 = vpop.f32.mrf.mxu1  ;;  %9327 = vmatprep.subr.bf16.mxu1 %v13485_v55 }
 0xc7c   : > { %v9241_v53 = vpop.f32.mrf.mxu1 }
 0xc7e   : > { %v5557_v25 = vpop.f32.mrf.mxu1 }
 0xc7f   : > { %v5798_v12 = vpack.c.bf16 %v5557_v25, %v5554_v54 }
 0xc80   : > { %v9242_v38 = vpop.f32.mrf.mxu1 }
 0xc81   : > { %9279 = vmatprep.mubr.msk.bf16.mxu1 %vm2648_vm14, %v5798_v12 }
 0xc82   : > { %9280 = vmatmul.mubr.msk.bf16.gmra.mxu1 %vm2648_vm14, %v5799_v37 }
 0xca6   : > { %v5789_v15 = vpop.f32.mrf.mxu0 }
 0xca8   : > { %v9271_v9 = vpop.f32.mrf.mxu0 }
 0xcaa   : > { %v5792_v29 = vpop.f32.mrf.mxu0 }
 0xcab   : > { %v5803_v17 = vpack.c.bf16 %v5792_v29, %v5789_v15 }
 0xcac   : > { %v9272_v27 = vpop.f32.mrf.mxu0 }
 0xcaf   : > { %v5648_v3 = vpop.f32.mrf.mxu1 }
 0xcb1   : > { %v9253_v35 = vpop.f32.mrf.mxu1  ;;  %v12681_v48 = vpop.f32.mrf.mxu0 }
 0xcb2   : > { %v6355_v23 = vsel %vm2648_vm14, %v12681_v48, -inf }
 0xcb3   : > { %v5651_v60 = vpop.f32.mrf.mxu1  ;;  %6356 = vmax.xlane.f32.xlu0 %v6355_v23  ;;  %v9295_v51 = vpop.f32.mrf.mxu0 }
 0xcb4   : > { %v5800_v34 = vpack.c.bf16 %v5651_v60, %v5648_v3 }
 0xcb5   : > { %v9254_v44 = vpop.f32.mrf.mxu1  ;;  %v12685_v42 = vpop.f32.mrf.mxu0 }
 0xcb6   : > { %9283 = vmatprep.mubr.msk.bf16.mxu1 %vm2648_vm14, %v5800_v34  ;;  %v6358_v7 = vsel %vm2648_vm14, %v12685_v42, -inf }
 0xcb7   : > { %v5742_v57 = vpop.f32.mrf.mxu1  ;;  %9284 = vmatmul.mubr.msk.bf16.gmra.mxu1 %vm2648_vm14, %v5801_v28  ;;  %6359 = vmax.xlane.f32.xlu1 %v6358_v7  ;;  %v9296_v37 = vpop.f32.mrf.mxu0  ;;  %v4774_v7 = vadd.f32 %v12327_v33, %v12397_v59  ;;  %v4790_v33 = vadd.f32 %v12341_v43, %v12405_v6  ;;  %v4806_v43 = vadd.f32 %v12356_v45, %v12413_v62 }
 0xcb8   : > { %v4766_v37 = vadd.f32 %v12331_v22, %v12399_v47  ;;  %v4782_v22 = vadd.f32 %v12346_v10, %v12407_v24  ;;  %v4798_v24 = vadd.f32 %v12361_v1, %v12415_v2 }
 0xcb9   : > { %v9265_v11 = vpop.f32.mrf.mxu1  ;;  %v12691_v39 = vpop.f32.mrf.mxu0 }
 0xcba   : > { %v6361_v19 = vsel %vm2648_vm14, %v12691_v39, -inf }
 0xcbb   : > { %v5745_v5 = vpop.f32.mrf.mxu1  ;;  %6362 = vmax.xlane.f32.xlu0 %v6361_v19  ;;  %v9301_v21 = vpop.f32.mrf.mxu0 }
 0xcbc   : > { %v5802_v4 = vpack.c.bf16 %v5745_v5, %v5742_v57  ;;  %v4777_v5 = vadd.f32 %v12333_v16, %v12401_v56  ;;  %v4793_v16 = vadd.f32 %v12348_v46, %v12409_v41 }
 0xcbd   : > { %v9266_v30 = vpop.f32.mrf.mxu1  ;;  %v12695_v58 = vpop.f32.mrf.mxu0 }
 0xcbe   : > { %9287 = vmatprep.mubr.msk.bf16.mxu1 %vm2648_vm14, %v5802_v4  ;;  %v6364_v14 = vsel %vm2648_vm14, %v12695_v58, -inf }
 0xcbf   : > { %9288 = vmatmul.mubr.msk.bf16.gmra.mxu1 %vm2648_vm14, %v5803_v17  ;;  %6365 = vmax.xlane.f32.xlu0 %v6364_v14  ;;  %v9302_v32 = vpop.f32.mrf.mxu0 }
 0xcc0   : > { %9317 = vmatprep.mubr.msk.bf16.mxu1 %vm10526_vm13, %v13485_v55 }
 0xcc1   : > { %v12703_v28 = vpop.f32.mrf.mxu0 }
 0xcc2   : > { %v6367_v49 = vsel %vm2648_vm14, %v12703_v28, -inf }
 0xcc3   : > { %6368 = vmax.xlane.f32.xlu1 %v6367_v49  ;;  %v9307_v18 = vpop.f32.mrf.mxu0 }
 0xcc5   : > { %v12707_v36 = vpop.f32.mrf.mxu0 }
 0xcc6   : > { %v6370_v50 = vsel %vm2648_vm14, %v12707_v36, -inf }
 0xcc7   : > { %6371 = vmax.xlane.f32.xlu0 %v6370_v50  ;;  %v9308_v52 = vpop.f32.mrf.mxu0  ;;  %9318 = vmatmul.mubr.msk.bf16.vlgmr.msra.gmra.mxu1 %vm2648_vm14, %v12656_v26 }
 0xcc8   : > { %9328 = vmatpush3.bf16.xpose.msra.mxu1 %v6261_v40  ;;  %9329 = vmatprep.mubr.msk.bf16.mxu1 %vm10526_vm13, %v13485_v55 }
 0xcc9   : > { %v12717_v54 = vpop.f32.mrf.mxu0  ;;  %9339 = vmatprep.subr.bf16.mxu1 %v13485_v55 }
 0xcca   : > { %v6373_v53 = vsel %vm2648_vm14, %v12717_v54, -inf }
 0xccb   : > { %6374 = vmax.xlane.f32.xlu1 %v6373_v53  ;;  %v9313_v25 = vpop.f32.mrf.mxu0 }
 0xccc   : > { %v4809_v25 = vadd.f32 %v12363_v0, %v12417_v63 }
 0xccd   : > { %v12722_v12 = vpop.f32.mrf.mxu0 }
 0xcce   : > { %v6376_v38 = vsel %vm2648_vm14, %v12722_v12, -inf }
 0xccf   : > { %6377 = vmax.xlane.f32.xlu0 %v6376_v38  ;;  %v9314_v26 = vpop.f32.mrf.mxu0  ;;  %9330 = vmatmul.mubr.msk.bf16.vlgmr.msra.gmra.mxu1 %vm2648_vm14, %v6254_v20  ;;  %v13509_v38 = vld [vmem:[#allocation59_spill] sm:$0xff] }
 0xcd0   : > { %9341 = vmatprep.mubr.msk.bf16.mxu1 %vm10526_vm13, %v13485_v55  ;;  %v13510_v26 = vld [vmem:[#allocation52_spill] sm:$0xff] }
 0xcd1   : > { %v12729_v15 = vpop.f32.mrf.mxu0  ;;  %v4801_v45 = vadd.f32 %v13510_v26, %v13509_v38 }
 0xcd2   : > { %v6385_v9 = vsel %vm2648_vm14, %v12729_v15, -inf }
 0xcd3   : > { %6386 = vmax.xlane.f32.xlu1 %v6385_v9  ;;  %v9325_v29 = vpop.f32.mrf.mxu0 }
 0xcd4   : > { %v13511_v29 = vld [vmem:[#allocation60_spill] sm:$0xff] }
 0xcd5   : > { %v12733_v27 = vpop.f32.mrf.mxu0 }
 0xcd6   : > { %v6388_v3 = vsel %vm2648_vm14, %v12733_v27, -inf }
 0xcd7   : > { %6389 = vmax.xlane.f32.xlu0 %v6388_v3  ;;  %v9326_v35 = vpop.f32.mrf.mxu0  ;;  %v13512_v3 = vld [vmem:[#allocation53_spill] sm:$0xff] }
 0xcd8   : > { %v4822_v35 = vadd.f32 %v13512_v3, %v13511_v29 }
 0xcd9   : > { %v12737_v23 = vpop.f32.mrf.mxu0 }
 0xcda   : > { %v6397_v60 = vsel %vm2648_vm14, %v12737_v23, -inf }
 0xcdb   : > { %6398 = vmax.xlane.f32.xlu1 %v6397_v60  ;;  %v9337_v51 = vpop.f32.mrf.mxu0 }
 0xcdc   : > { %v13513_v51 = vld [vmem:[#allocation61_spill] sm:$0xff] }
 0xcdd   : > { %v12741_v34 = vpop.f32.mrf.mxu0 }
 0xcdf   : > { %v9338_v44 = vpop.f32.mrf.mxu0 }
 0xce0   : > { %v13514_v44 = vld [vmem:[#allocation54_spill] sm:$0xff] }
 0xd38   : > { %v9277_v57 = vpop.f32.mrf.mxu1 }
 0xd39   : > { %v12747_v11 = vadd.f32 %v9277_v57, %v4774_v7  ;;  %v4814_v7 = vadd.f32 %v13514_v44, %v13513_v51 }
 0xd3a   : > { %v5868_v19 = vpop.f32.mrf.mxu1 }
 0xd3b   : > { %v12751_v21 = vadd.f32 %v5868_v19, %v4766_v37 }
 0xd3c   : > { %v9278_v4 = vpop.f32.mrf.mxu1  ;;  %v6357_v18 = vpop.xlane.xlu0 %6356 }
 0xd3d   : > { %v12753_v17 = vadd.f32 %v9278_v4, %v4777_v5  ;;  %v6403_v50 = vsub.f32 %v12681_v48, %v6357_v18 }
 0xd3e   : > { %v12755_v30 = vpop.f32.mrf.mxu1 }
 0xd3f   : > { %v6419_v10 = vmul.f32 1.442695, %v6403_v50 }
 0xd40   : > { %v6360_v52 = vpop.xlane.xlu1 %6359 }
 0xd41   : > { %9877 = vpow2.f32 %v6419_v10  ;;  %v6404_v0 = vsub.f32 %v12685_v42, %v6360_v52 }
 0xd42   : > { %v9281_v59 = vpop.f32.mrf.mxu1 }
 0xd43   : > { %v12761_v47 = vadd.f32 %v9281_v59, %v4790_v33  ;;  %v13515_v33 = vld [vmem:[#allocation62_spill] sm:$0xff]  ;;  %v13516_v59 = vld [vmem:[#allocation55_spill] sm:$0xff]  ;;  %v6421_v18 = vmul.f32 1.442695, %v6404_v0 }
 0xd44   : > { %v5884_v14 = vpop.f32.mrf.mxu1  ;;  %v6363_v41 = vpop.xlane.xlu0 %6362 }
 0xd45   : > { %v12765_v56 = vadd.f32 %v5884_v14, %v4782_v22  ;;  %v6405_v62 = vsub.f32 %v12691_v39, %v6363_v41  ;;  %v4825_v22 = vadd.f32 %v13516_v59, %v13515_v33 }
 0xd46   : > { %v9282_v32 = vpop.f32.mrf.mxu1 }
 0xd47   : > { %v12767_v49 = vadd.f32 %v9282_v32, %v4793_v16  ;;  %v6423_v57 = vmul.f32 1.442695, %v6405_v62  ;;  %v13517_v16 = vld [vmem:[#allocation63_spill] sm:$0xff]  ;;  %v13518_v32 = vld [vmem:[#allocation56_spill] sm:$0xff] }
 0xd48   : > { %v12770_v40 = vpop.f32.mrf.mxu1  ;;  %v6366_v37 = vpop.xlane.xlu0 %6365  ;;  %v4817_v42 = vadd.f32 %v13518_v32, %v13517_v16 }
 0xd49   : > { %v6406_v50 = vsub.f32 %v12695_v58, %v6366_v37  ;;  %9879 = vpow2.f32 %v6423_v57 }
 0xd4a   : > { %9881 = vpow2.f32 %v6421_v18 }
 0xd4c   : > { %v6369_v1 = vpop.xlane.xlu1 %6368 }
 0xd4d   : > { %v6407_v19 = vsub.f32 %v12703_v28, %v6369_v1 }
 0xd4e   : > { %v12812_v26 = vpop.eup %9877 }
 0xd4f   : > { %v6427_v10 = vmul.f32 1.442695, %v6407_v19 }
 0xd51   : > { %9883 = vpow2.f32 %v6427_v10 }
 0xd54   : > { %v6375_v5 = vpop.xlane.xlu1 %6374 }
 0xd55   : > { %v6409_v28 = vsub.f32 %v12717_v54, %v6375_v5 }
 0xd57   : > { %v6431_v58 = vmul.f32 1.442695, %v6409_v28 }
 0xd5c   : > { %v6387_v52 = vpop.xlane.xlu1 %6386 }
 0xd5d   : > { %v6413_v62 = vsub.f32 %v12729_v15, %v6387_v52 }
 0xd5f   : > { %v6439_v0 = vmul.f32 1.442695, %v6413_v62 }
 0xd64   : > { %v6399_v1 = vpop.xlane.xlu1 %6398 }
 0xd77   : > { %v9285_v6 = vpop.f32.mrf.mxu1 }
 0xd78   : > { %v12776_v46 = vadd.f32 %v9285_v6, %v4806_v43  ;;  %v6372_v6 = vpop.xlane.xlu0 %6371 }
 0xd79   : > { %v5900_v53 = vpop.f32.mrf.mxu1 }
 0xd7a   : > { %v12780_v20 = vadd.f32 %v5900_v53, %v4798_v24 }
 0xd7b   : > { %v9286_v48 = vpop.f32.mrf.mxu1 }
 0xd7c   : > { %v12785_v9 = vadd.f32 %v9286_v48, %v4809_v25  ;;  %v6425_v25 = vmul.f32 1.442695, %v6406_v50  ;;  %v6408_v48 = vsub.f32 %v12707_v36, %v6372_v6 }
 0xd7d   : > { %v5903_v2 = vpop.f32.mrf.mxu1 }
 0xd7e   : > { %v12789_v60 = vadd.f32 %v5903_v2, %v4801_v45  ;;  %v6378_v45 = vpop.xlane.xlu0 %6377  ;;  %9885 = vpow2.f32 %v6425_v25  ;;  %v6429_v29 = vmul.f32 1.442695, %v6408_v48 }
 0xd7f   : > { %v9289_v63 = vpop.f32.mrf.mxu1  ;;  %v6410_v3 = vsub.f32 %v12722_v12, %v6378_v45  ;;  %9887 = vpow2.f32 %v6431_v58  ;;  %v6400_v12 = vsel %vm2648_vm14, %v12741_v34, -inf }
 0xd80   : > { %v12795_v39 = vadd.f32 %v9289_v63, %v4822_v35  ;;  %v6451_v35 = vsel %vm2648_vm14, %v12812_v26, 0.0  ;;  %v6417_v63 = vsub.f32 %v12737_v23, %v6399_v1  ;;  %9889 = vpow2.f32 %v6429_v29  ;;  %v12829_v23 = vpop.eup %9879  ;;  %v13519_v29 = vld [vmem:[#allocation49_spill] sm:$0xff] }
 0xd81   : > { %v5916_v4 = vpop.f32.mrf.mxu1  ;;  %9891 = vpow2.f32 %v6439_v0  ;;  %v12833_v59 = vpop.eup %9881  ;;  %v6457_v16 = vsel %vm2648_vm14, %v12829_v23, 0.0 }
 0xd82   : > { %v12799_v14 = vadd.f32 %v5916_v4, %v4814_v7  ;;  %v6390_v51 = vpop.xlane.xlu0 %6389  ;;  %v6433_v7 = vmul.f32 1.442695, %v6410_v3  ;;  %v6447_v19 = vmul.f32 1.442695, %v6417_v63  ;;  %v12839_v32 = vpop.eup %9883  ;;  %v6454_v50 = vsel %vm2648_vm14, %v12833_v59, 0.0  ;;  %v13520_v3 = vld [vmem:[#allocation45_spill] sm:$0xff] }
 0xd83   : > { %v9290_v43 = vpop.f32.mrf.mxu1  ;;  %v6414_v37 = vsub.f32 %v12733_v27, %v6390_v51 }
 0xd84   : > { %v12805_v24 = vadd.f32 %v9290_v43, %v4825_v22  ;;  %9893 = vpow2.f32 %v6433_v7  ;;  %v6463_v43 = vsel %vm2648_vm14, %v12839_v32, 0.0 }
 0xd85   : > { %v5919_v41 = vpop.f32.mrf.mxu1  ;;  %v6441_v22 = vmul.f32 1.442695, %v6414_v37  ;;  %9895 = vpow2.f32 %v6447_v19 }
 0xd86   : > { %v12807_v53 = vadd.f32 %v5919_v41, %v4817_v42 }
 0xd87   : > { %v12810_v38 = vpop.f32.mrf.mxu1  ;;  %9897 = vpow2.f32 %v6441_v22 }
 0xd88   : > { %v6379_v54 = vsel %vm2648_vm14, %v12810_v38, -inf }
 0xd89   : > { %v9319_v2 = vpop.f32.mrf.mxu1  ;;  %6380 = vmax.xlane.f32.xlu1 %v6379_v54 }
 0xd8b   : > { %v12818_v36 = vpop.f32.mrf.mxu1  ;;  %v12841_v18 = vpop.eup %9885 }
 0xd8c   : > { %v6382_v15 = vsel %vm2648_vm14, %v12818_v36, -inf  ;;  %v12847_v10 = vpop.eup %9887  ;;  %v6460_v28 = vsel %vm2648_vm14, %v12841_v18, 0.0 }
 0xd8d   : > { %v9320_v44 = vpop.f32.mrf.mxu1  ;;  %6383 = vmax.xlane.f32.xlu0 %v6382_v15  ;;  %6452 = vadd.xlane.f32.xlu1 %v6451_v35  ;;  %v12849_v6 = vpop.eup %9889  ;;  %v6469_v52 = vsel %vm2648_vm14, %v12847_v10, 0.0  ;;  %v13521_v35 = vld [vmem:[#allocation46_spill] sm:$0xff] }
 0xd8e   : > { %v12855_v41 = vpop.eup %9891  ;;  %v6466_v48 = vsel %vm2648_vm14, %v12849_v6, 0.0 }
 0xd8f   : > { %v6297_v57 = vpop.f32.mrf.mxu1  ;;  %v6481_v58 = vsel %vm2648_vm14, %v12855_v41, 0.0 }
 0xd90   : > { %v6391_v5 = vsel %vm2648_vm14, %v6297_v57, -inf }
 0xd91   : > { %v9331_v4 = vpop.f32.mrf.mxu1  ;;  %6392 = vmax.xlane.f32.xlu1 %v6391_v5  ;;  %6401 = vmax.xlane.f32.xlu0 %v6400_v12  ;;  %v12857_v25 = vpop.eup %9893 }
 0xd92   : > { %v12863_v45 = vpop.eup %9895  ;;  %v6472_v62 = vsel %vm2648_vm14, %v12857_v25, 0.0 }
 0xd93   : > { %v12831_v33 = vpop.f32.mrf.mxu1  ;;  %v6493_v54 = vsel %vm2648_vm14, %v12863_v45, 0.0 }
 0xd94   : > { %v6394_v27 = vsel %vm2648_vm14, %v12831_v33, -inf  ;;  %v12869_v1 = vpop.eup %9897 }
 0xd95   : > { %v9332_v42 = vpop.f32.mrf.mxu1  ;;  %6458 = vadd.xlane.f32.xlu1 %v6457_v16  ;;  %6395 = vmax.xlane.f32.xlu0 %v6394_v27  ;;  %v6484_v2 = vsel %vm2648_vm14, %v12869_v1, 0.0 }
 0xd99   : > { %6455 = vadd.xlane.f32.xlu0 %v6454_v50  ;;  %6464 = vadd.xlane.f32.xlu1 %v6463_v43 }
 0xd9d   : > { %6461 = vadd.xlane.f32.xlu0 %v6460_v28  ;;  %6470 = vadd.xlane.f32.xlu1 %v6469_v52 }
 0xda1   : > { %6467 = vadd.xlane.f32.xlu0 %v6466_v48  ;;  %6482 = vadd.xlane.f32.xlu1 %v6481_v58 }
 0xda5   : > { %6473 = vadd.xlane.f32.xlu0 %v6472_v62  ;;  %6494 = vadd.xlane.f32.xlu1 %v6493_v54 }
 0xda9   : > { %6485 = vadd.xlane.f32.xlu0 %v6484_v2 }
 0xdb6   : > { %6539 = vrot.lane.b32.xlu1 %v13519_v29, %s10532_s22 }
 0xdba   : > { %6633 = vrot.lane.b32.xlu1 %v13520_v3, %s10532_s22 }
 0xdbe   : > { %6680 = vrot.lane.b32.xlu1 %v13521_v35, %s10532_s22 }
 0xdc2   : > { %6774 = vrot.lane.b32.xlu1 %v11617_v8, %s10532_s22 }
 0xe12   : > { %v6381_v0 = vpop.xlane.xlu1 %6380 }
 0xe13   : > { %v6411_v63 = vsub.f32 %v12810_v38, %v6381_v0 }
 0xe15   : > { %v6435_v15 = vmul.f32 1.442695, %v6411_v63 }
 0xe16   : > { %v12882_v51 = vpop.xlane.xlu0 %6383  ;;  %v6453_v44 = vpop.xlane.xlu1 %6452 }
 0xe17   : > { %9899 = vpow2.f32 %v6435_v15 }
 0xe1a   : > { %v6402_v7 = vpop.xlane.xlu0 %6401  ;;  %v6393_v12 = vpop.xlane.xlu1 %6392 }
 0xe1b   : > { %v6418_v37 = vsub.f32 %v12741_v34, %v6402_v7  ;;  %v6415_v19 = vsub.f32 %v6297_v57, %v6393_v12 }
 0xe1d   : > { %v6449_v5 = vmul.f32 1.442695, %v6418_v37  ;;  %v6443_v4 = vmul.f32 1.442695, %v6415_v19 }
 0xe1e   : > { %v6396_v22 = vpop.xlane.xlu0 %6395  ;;  %v6459_v16 = vpop.xlane.xlu1 %6458 }
 0xe1f   : > { %9901 = vpow2.f32 %v6449_v5 }
 0xe20   : > { %9903 = vpow2.f32 %v6443_v4 }
 0xe21   : > { %9905 = vrcp.f32 %v6453_v44 }
 0xe22   : > { %v6456_v8 = vpop.xlane.xlu0 %6455  ;;  %v6465_v27 = vpop.xlane.xlu1 %6464 }
 0xe23   : > { %9907 = vrcp.f32 %v6456_v8 }
 0xe24   : > { %v12885_v38 = vpop.eup %9899  ;;  %9909 = vrcp.f32 %v6459_v16 }
 0xe25   : > { %v6475_v42 = vsel %vm2648_vm14, %v12885_v38, 0.0 }
 0xe26   : > { %v6462_v50 = vpop.xlane.xlu0 %6461  ;;  %6476 = vadd.xlane.f32.xlu1 %v6475_v42  ;;  %v6471_v34 = vpop.xlane.xlu1 %6470 }
 0xe27   : > { %9911 = vrcp.f32 %v6462_v50 }
 0xe28   : > { %9913 = vrcp.f32 %v6465_v27 }
 0xe2a   : > { %v6468_v57 = vpop.xlane.xlu0 %6467  ;;  %v6483_v43 = vpop.xlane.xlu1 %6482 }
 0xe2b   : > { %9915 = vrcp.f32 %v6468_v57 }
 0xe2c   : > { %v12889_v28 = vpop.eup %9901 }
 0xe2d   : > { %v12891_v52 = vpop.eup %9903  ;;  %v6496_v48 = vsel %vm2648_vm14, %v12889_v28, 0.0 }
 0xe2e   : > { %6497 = vadd.xlane.f32.xlu0 %v6496_v48  ;;  %v6487_v58 = vsel %vm2648_vm14, %v12891_v52, 0.0  ;;  %v12897_v62 = vpop.xlane.xlu1 %6494  ;;  %v9906_v54 = vpop.eup %9905 }
 0xe2f   : > { %6488 = vadd.xlane.f32.xlu1 %v6487_v58  ;;  %v6515_v3 = vmul.f32 %v9906_v54, %v12812_v26 }
 0xe30   : > { %v9908_v2 = vpop.eup %9907 }
 0xe31   : > { %v9910_v29 = vpop.eup %9909  ;;  %v6516_v35 = vmul.f32 %v9908_v2, %v12833_v59 }
 0xe32   : > { %v6540_v0 = vpop.permute.xlu1 %6539  ;;  %v6517_v44 = vmul.f32 %v9910_v29, %v12829_v23  ;;  %v13522_v23 = vld [vmem:[#allocation48_spill] sm:$0xff] }
 0xe33   : > { %9340 = vmatpush3.bf16.msra.mxu1 %v6540_v0  ;;  %v6531_v15 = vpack.c.bf16 %v6516_v35, %v6515_v3 }
 0xe34   : > { %v9912_v63 = vpop.eup %9911  ;;  %9351 = vmatprep.subr.bf16.mxu1 %v13485_v55 }
 0xe35   : > { %v6518_v7 = vmul.f32 %v9912_v63, %v12841_v18  ;;  %v9914_v12 = vpop.eup %9913 }
 0xe36   : > { %9342 = vmatmul.mubr.msk.bf16.vlgmr.msra.gmra.mxu1 %vm2648_vm14, %v6531_v15  ;;  %v6634_v37 = vpop.permute.xlu1 %6633  ;;  %v6519_v59 = vmul.f32 %v9914_v12, %v12839_v32  ;;  %v6412_v32 = vsub.f32 %v12818_v36, %v12882_v51  ;;  %v6474_v36 = vpop.xlane.xlu0 %6473 }
 0xe37   : > { %v6532_v19 = vpack.c.bf16 %v6518_v7, %v6517_v44  ;;  %9352 = vmatpush3.bf16.msra.mxu1 %v6634_v37  ;;  %9353 = vmatprep.mubr.msk.bf16.mxu1 %vm10526_vm13, %v13485_v55 }
 0xe38   : > { %v9916_v26 = vpop.eup %9915  ;;  %9363 = vmatprep.subr.bf16.mxu1 %v13485_v55  ;;  %v6437_v18 = vmul.f32 1.442695, %v6412_v32 }
 0xe39   : > { %v6520_v5 = vmul.f32 %v9916_v26, %v12849_v6  ;;  %v6416_v6 = vsub.f32 %v12831_v33, %v6396_v22 }
 0xe3a   : > { %9917 = vpow2.f32 %v6437_v18  ;;  %v6486_v33 = vpop.xlane.xlu0 %6485  ;;  %v6681_v22 = vpop.permute.xlu1 %6680  ;;  %v9672_v18 = vld [vmem:[%s10923_s3 + $0x18] sm:$0xff]   ;;  %s13525_s3 = scalar_lea.vmem [#allocation13], %s10910_s21 }
 0xe3b   : > { %v6533_v4 = vpack.c.bf16 %v6520_v5, %v6519_v59  ;;  %v6445_v16 = vmul.f32 1.442695, %v6416_v6 }
 0xe3d   : > { %9919 = vpow2.f32 %v6445_v16 }
 0xe3e   : > { %9354 = vmatmul.mubr.msk.bf16.vlgmr.msra.gmra.mxu1 %vm2648_vm14, %v6533_v4  ;;  %9921 = vrcp.f32 %v6474_v36  ;;  %v6775_v58 = vpop.permute.xlu1 %6774 }
 0xe3f   : > { %9365 = vmatprep.mubr.msk.bf16.mxu1 %vm10526_vm13, %v13485_v55  ;;  %9923 = vrcp.f32 %v6471_v34 }
 0xe40   : > { %6868 = vrot.lane.b32.xlu1 %v11639_v61, %s10532_s22  ;;  %9925 = vrcp.f32 %v6486_v33 }
 0xe41   : > { %9927 = vrcp.f32 %v6483_v43 }
 0xe44   : > { %6586 = vrot.lane.b32.xlu0 %v13522_v23, %s10532_s22 }
 0xe47   : > { %v12922_v8 = vpop.eup %9917 }
 0xe48   : > { %6727 = vrot.lane.b32.xlu0 %v11607_v13, %s10532_s22  ;;  %v6478_v61 = vsel %vm2648_vm14, %v12922_v8, 0.0 }
 0xe4a   : > { %v12926_v27 = vpop.eup %9919 }
 0xe4b   : > { %v6490_v13 = vsel %vm2648_vm14, %v12926_v27, 0.0  ;;  %v9922_v50 = vpop.eup %9921 }
 0xe4c   : > { %v9924_v48 = vpop.eup %9923 }
 0xe4d   : > { %v6521_v34 = vmul.f32 %v9924_v48, %v12847_v10  ;;  %v9926_v2 = vpop.eup %9925 }
 0xe4e   : > { %v9928_v29 = vpop.eup %9927 }
 0xe4f   : > { %v6525_v35 = vmul.f32 %v9928_v29, %v12855_v41 }
 0xe67   : > { %6479 = vadd.xlane.f32.xlu0 %v6478_v61 }
 0xe6b   : > { %6491 = vadd.xlane.f32.xlu0 %v6490_v13 }
 0xe81   : > { %6821 = vrot.lane.b32.xlu0 %v11627_v31, %s10532_s22  ;;  %v6522_v31 = vmul.f32 %v9922_v50, %v12857_v25  ;;  %v6526_v25 = vmul.f32 %v9926_v2, %v12869_v1 }
 0xe83   : > { %v6534_v43 = vpack.c.bf16 %v6522_v31, %v6521_v34  ;;  %v6536_v10 = vpack.c.bf16 %v6526_v25, %v6525_v35 }
 0xeaf   : > { %v6477_v54 = vpop.xlane.xlu1 %6476 }
 0xeb7   : > { %v6498_v51 = vpop.xlane.xlu0 %6497 }
 0xeb8   : > { %9929 = vrcp.f32 %v6498_v51  ;;  %v6489_v3 = vpop.xlane.xlu1 %6488 }
 0xeb9   : > { %9931 = vrcp.f32 %v12897_v62 }
 0xeba   : > { %9933 = vrcp.f32 %v6477_v54 }
 0xebb   : > { %v6587_v42 = vpop.permute.xlu0 %6586 }
 0xebc   : > { %9346 = vmatpush3.bf16.msra.mxu0 %v6587_v42  ;;  %v6869_v62 = vpop.permute.xlu1 %6868 }
 0xebd   : > { %9357 = vmatprep.subr.bf16.mxu0 %v13485_v55 }
 0xebf   : > { %v6728_v57 = vpop.permute.xlu0 %6727  ;;  %9348 = vmatmul.mubr.msk.bf16.vlgmr.msra.gmra.mxu0 %vm2648_vm14, %v6532_v19 }
 0xec0   : > { %9358 = vmatpush3.bf16.msra.mxu0 %v6681_v22  ;;  %9364 = vmatpush3.bf16.msra.mxu1 %v6728_v57 }
 0xec1   : > { %9359 = vmatprep.mubr.msk.bf16.mxu0 %vm10526_vm13, %v13485_v55  ;;  %9369 = vmatprep.subr.bf16.mxu0 %v13485_v55 }
 0xec2   : > { %9375 = vmatprep.subr.bf16.mxu1 %v13485_v55 }
 0xec5   : > { %v9930_v0 = vpop.eup %9929 }
 0xec6   : > { %v9932_v63 = vpop.eup %9931  ;;  %v6530_v15 = vmul.f32 %v9930_v0, %v12889_v28 }
 0xec7   : > { %9360 = vmatmul.mubr.msk.bf16.vlgmr.msra.gmra.mxu0 %vm2648_vm14, %v6534_v43  ;;  %v6529_v44 = vmul.f32 %v9932_v63, %v12863_v45  ;;  %v9934_v26 = vpop.eup %9933 }
 0xec8   : > { %9370 = vmatpush3.bf16.msra.mxu0 %v6775_v58  ;;  %9371 = vmatprep.mubr.msk.bf16.mxu0 %vm10526_vm13, %v13485_v55  ;;  %v6523_v28 = vmul.f32 %v9934_v26, %v12885_v38 }
 0xec9   : > { %9381 = vmatprep.subr.bf16.mxu0 %v13485_v55  ;;  %v6538_v1 = vpack.c.bf16 %v6530_v15, %v6529_v44 }
 0xecf   : > { %9372 = vmatmul.mubr.msk.bf16.vlgmr.msra.gmra.mxu0 %vm2648_vm14, %v6536_v10 }
 0xed0   : > { %9382 = vmatpush3.bf16.msra.mxu0 %v6869_v62  ;;  %9383 = vmatprep.mubr.msk.bf16.mxu0 %vm10526_vm13, %v13485_v55 }
 0xed7   : > { %9384 = vmatmul.mubr.msk.bf16.vlgmr.msra.gmra.mxu0 %vm2648_vm14, %v6538_v1 }
 0xef0   : > { %v6480_v7 = vpop.xlane.xlu0 %6479 }
 0xef1   : > { %9935 = vrcp.f32 %v6480_v7  ;;  %v9673_v7 = vld [vmem:[%s10930_s25 + $0x18] sm:$0xff]  }
 0xef2   : > { %9405 = vmatprep.subr.bf16.mxu0 %v9673_v7 }
 0xef3   : > { %9406 = vmatpush3.bf16.msra.mxu0 %v9673_v7 }
 0xef4   : > { %v6492_v41 = vpop.xlane.xlu0 %6491 }
 0xef5   : > { %9937 = vrcp.f32 %v6492_v41 }
 0xef6   : > { %v6579_v12 = vpop.f32.mrf.mxu1  ;;  %9939 = vrcp.f32 %v6489_v3 }
 0xef8   : > { %v9343_v37 = vpop.f32.mrf.mxu1  ;;  %v6822_v61 = vpop.permute.xlu0 %6821 }
 0xef9   : > { %v9674_v37 = vld [vmem:[%s10930_s25 + $0x10] sm:$0xff]  }
 0xefa   : > { %v6582_v19 = vpop.f32.mrf.mxu1  ;;  %9407 = vmatprep.subr.bf16.mxu0 %v9674_v37 }
 0xefb   : > { %v6915_v22 = vpack.c.bf16 %v6582_v19, %v6579_v12  ;;  %9408 = vmatpush3.bf16.msra.mxu0 %v9674_v37 }
 0xefc   : > { %v9344_v59 = vpop.f32.mrf.mxu1 }
 0xefe   : > { %v9936_v5 = vpop.eup %9935  ;;  %v6673_v4 = vpop.f32.mrf.mxu1 }
 0xeff   : > { %v6524_v45 = vmul.f32 %v9936_v5, %v12922_v8 }
 0xf00   : > { %v9355_v23 = vpop.f32.mrf.mxu1 }
 0xf01   : > { %v6535_v32 = vpack.c.bf16 %v6524_v45, %v6523_v28  ;;  %v9676_v28 = vld [vmem:[%s10930_s25] sm:$0xff]  }
 0xf02   : > { %v9938_v6 = vpop.eup %9937  ;;  %v6676_v16 = vpop.f32.mrf.mxu1 }
 0xf03   : > { %v6917_v13 = vpack.c.bf16 %v6676_v16, %v6673_v4  ;;  %9366 = vmatmul.mubr.msk.bf16.vlgmr.msra.gmra.mxu1 %vm2648_vm14, %v6535_v32  ;;  %v9940_v36 = vpop.eup %9939  ;;  %v6528_v51 = vmul.f32 %v9938_v6, %v12926_v27  ;;  %v9675_v4 = vld [vmem:[%s10930_s25 + $0x8] sm:$0xff]   ;;  %v13524_v6 = vld [vmem:[#allocation50_spill] sm:$0xff]  ;;  %s13526_s25 = scalar_lea.vmem [#allocation19], %s10910_s21 }
 0xf04   : > { %9376 = vmatpush3.bf16.msra.mxu1 %v6822_v61  ;;  %v9356_v33 = vpop.f32.mrf.mxu1  ;;  %9377 = vmatprep.mubr.msk.bf16.mxu1 %vm10526_vm13, %v13485_v55  ;;  %v6527_v38 = vmul.f32 %v9940_v36, %v12891_v52 }
 0xf05   : > { %9387 = vmatprep.subr.bf16.mxu1 %v9672_v18  ;;  %9409 = vmatprep.subr.bf16.mxu0 %v9675_v4 }
 0xf06   : > { %v6537_v8 = vpack.c.bf16 %v6528_v51, %v6527_v38  ;;  %9410 = vmatpush3.bf16.msra.mxu0 %v9675_v4  ;;  %v12981_v38 = vld [vmem:[%s13525_s3] ss:$0 sm:$0xff] }
 0xf07   : > { %9411 = vmatprep.subr.bf16.mxu0 %v9676_v28 }
 0xf0a   : > { %9412 = vmatpush3.bf16.msra.mxu0 %v9676_v28 }
 0xf0b   : > { %9378 = vmatmul.mubr.msk.bf16.vlgmr.msra.gmra.mxu1 %vm2648_vm14, %v6537_v8  ;;  %v9974_v8 = vld [vmem:[#allocation2] sm:$0xff] }
 0xf0c   : > { %9389 = vmatprep.mubr.msk.bf16.mxu1 %vm2648_vm14, %v6915_v22  ;;  %9388 = vmatpush3.bf16.msra.mxu1 %v9672_v18  ;;  %v13523_v18 = vld [vmem:[#allocation57_spill] sm:$0xff] }
 0xf0d   : > { %v4769_v16 = vadd.f32 %v13524_v6, %v13523_v18 }
 0xf0f   : > { %v5932_v51 = vadd.f32 %v12755_v30, %v4769_v16 }
 0xf7f   : > { %v6626_v42 = vpop.f32.mrf.mxu0 }
 0xf81   : > { %v9349_v50 = vpop.f32.mrf.mxu0 }
 0xf83   : > { %v6629_v57 = vpop.f32.mrf.mxu0 }
 0xf84   : > { %v6916_v48 = vpack.c.bf16 %v6629_v57, %v6626_v42  ;;  %v9975_v57 = vld [vmem:[#allocation2 + $0x18] sm:$0xff] }
 0xf85   : > { %v9350_v31 = vpop.f32.mrf.mxu0 }
 0xf86   : > { %9390 = vmatmul.mubr.msk.bf16.vlgmr.msra.gmra.mxu1 %vm2648_vm14, %v6916_v48 }
 0xf87   : > { %v6720_v55 = vpop.f32.mrf.mxu0  ;;  %9393 = vmatprep.mubr.msk.bf16.mxu1 %vm2648_vm14, %v6917_v13  ;;  %v9973_v13 = vld [vmem:[#allocation2 + $0x10] sm:$0xff] }
 0xf89   : > { %v9361_v27 = vpop.f32.mrf.mxu0 }
 0xf8a   : > { %v12988_v27 = vld [vmem:[%s13526_s25] ss:$0 sm:$0xff] }
 0xf8b   : > { %v6723_v58 = vpop.f32.mrf.mxu0 }
 0xf8c   : > { %v6918_v52 = vpack.c.bf16 %v6723_v58, %v6720_v55  ;;  %v9976_v58 = vld [vmem:[#allocation2 + $0x8] sm:$0xff] }
 0xf8d   : > { %v9362_v34 = vpop.f32.mrf.mxu0 }
 0xf8e   : > { %9394 = vmatmul.mubr.msk.bf16.gmra.mxu1 %vm2648_vm14, %v6918_v52 }
 0xf8f   : > { %v6814_v43 = vpop.f32.mrf.mxu0 }
 0xf91   : > { %v9373_v54 = vpop.f32.mrf.mxu0 }
 0xf93   : > { %v6817_v2 = vpop.f32.mrf.mxu0 }
 0xf94   : > { %v6920_v44 = vpack.c.bf16 %v6817_v2, %v6814_v43 }
 0xf95   : > { %v9374_v29 = vpop.f32.mrf.mxu0 }
 0xf97   : > { %v6908_v25 = vpop.f32.mrf.mxu0 }
 0xf99   : > { %v9385_v3 = vpop.f32.mrf.mxu0 }
 0xf9a   : > { %v13528_v3 = vld [vmem:[#allocation51_spill] sm:$0xff] }
 0xf9b   : > { %v6911_v35 = vpop.f32.mrf.mxu0 }
 0xf9c   : > { %v6922_v59 = vpack.c.bf16 %v6911_v35, %v6908_v25  ;;  %v13527_v25 = vld [vmem:[#allocation58_spill] sm:$0xff] }
 0xf9d   : > { %v9386_v10 = vpop.f32.mrf.mxu0  ;;  %v4785_v35 = vadd.f32 %v13528_v3, %v13527_v25 }
 0xfc3   : > { %v6767_v0 = vpop.f32.mrf.mxu1 }
 0xfc5   : > { %v9367_v62 = vpop.f32.mrf.mxu1 }
 0xfc6   : > { %v13001_v62 = vld [vmem:[%s13529_s17] ss:$0 sm:$0xff] }
 0xfc7   : > { %v6770_v63 = vpop.f32.mrf.mxu1 }
 0xfc8   : > { %v6919_v15 = vpack.c.bf16 %v6770_v63, %v6767_v0  ;;  %v9977_v63 = vld [vmem:[#allocation2 + $0x30] sm:$0xff] }
 0xfc9   : > { %v9368_v1 = vpop.f32.mrf.mxu1 }
 0xfca   : > { %9397 = vmatprep.mubr.msk.bf16.mxu1 %vm2648_vm14, %v6919_v15 }
 0xfcb   : > { %v6861_v41 = vpop.f32.mrf.mxu1  ;;  %9398 = vmatmul.mubr.msk.bf16.gmra.mxu1 %vm2648_vm14, %v6920_v44  ;;  %v9978_v44 = vld [vmem:[#allocation2 + $0x20] sm:$0xff] }
 0xfcd   : > { %v9379_v12 = vpop.f32.mrf.mxu1 }
 0xfcf   : > { %v6864_v19 = vpop.f32.mrf.mxu1 }
 0xfd0   : > { %v6921_v26 = vpack.c.bf16 %v6864_v19, %v6861_v41  ;;  %v5936_v41 = vadd.f32 %v12770_v40, %v4785_v35 }
 0xfd1   : > { %v9380_v5 = vpop.f32.mrf.mxu1 }
 0xfd2   : > { %9401 = vmatprep.mubr.msk.bf16.mxu1 %vm2648_vm14, %v6921_v26  ;;  %v9979_v26 = vld [vmem:[#allocation2 + $0x38] sm:$0xff] }
 0xfd3   : > { %9402 = vmatmul.mubr.msk.bf16.gmra.mxu1 %vm2648_vm14, %v6922_v59 }
0x1046   : > { %v9391_v45 = vpop.f32.mrf.mxu1 }
0x1047   : > { %v7052_v23 = vadd.f32 %v9391_v45, %v12747_v11 }
0x1048   : > { %v6987_v32 = vpop.f32.mrf.mxu1 }
0x1049   : > { %v7050_v61 = vadd.f32 %v6987_v32, %v12751_v21  ;;  %v7068_v36 = vadd.f32 %v9973_v13, %v7052_v23  ;;  %v9980_v32 = vld [vmem:[#allocation2 + $0x28] sm:$0xff] }
0x104a   : > { %v9392_v33 = vpop.f32.mrf.mxu1 }
0x104b   : > { %v7066_v22 = vadd.f32 %v9974_v8, %v7050_v61  ;;  %v7053_v42 = vadd.f32 %v9392_v33, %v12753_v17  ;;  %v7091_v21 = vadd.f32 %v12981_v38, %v7068_v36 }
0x104c   : > { %v6990_v11 = vpop.f32.mrf.mxu1 }
0x104d   : > { %v7089_v50 = vadd.f32 %v12981_v38, %v7066_v22  ;;  %v7069_v48 = vadd.f32 %v9975_v57, %v7053_v42  ;;  %v7051_v31 = vadd.f32 %v6990_v11, %v5932_v51  ;;  %v7114_v10 = vmul.f32 %v12988_v27, %v7091_v21  ;;  %v9981_v21 = vld [vmem:[#allocation2 + $0x50] sm:$0xff] }
0x104e   : > { %v9395_v55 = vpop.f32.mrf.mxu1 }
0x104f   : > { %v7092_v30 = vadd.f32 %v12981_v38, %v7069_v48  ;;  %v7067_v52 = vadd.f32 %v9976_v58, %v7051_v31  ;;  %v7056_v34 = vadd.f32 %v9395_v55, %v12761_v47  ;;  %v7112_v43 = vmul.f32 %v12988_v27, %v7089_v50  ;;  %v9982_v58 = vld [vmem:[#allocation2 + $0x40] sm:$0xff] }
0x1050   : > { %v7003_v17 = vpop.f32.mrf.mxu1  ;;  %v13016_v5 = vadd.f32 %v13001_v62, %v7114_v10 }
0x1051   : > { %v7115_v54 = vmul.f32 %v12988_v27, %v7092_v30  ;;  %v7090_v2 = vadd.f32 %v12981_v38, %v7067_v52  ;;  %v7054_v29 = vadd.f32 %v7003_v17, %v12765_v56  ;;  %v7072_v15 = vadd.f32 %v9977_v63, %v7056_v34 }
0x1052   : > { %v9396_v0 = vpop.f32.mrf.mxu1  ;;  %v13010_v37 = vadd.f32 %v13001_v62, %v7112_v43 }
0x1053   : > { %v7113_v47 = vmul.f32 %v12988_v27, %v7090_v2  ;;  %v7070_v1 = vadd.f32 %v9978_v44, %v7054_v29  ;;  %v7057_v7 = vadd.f32 %v9396_v0, %v12767_v49  ;;  %v13007_v56 = vadd.f32 %v13001_v62, %v7115_v54  ;;  %v9983_v54 = vld [vmem:[#allocation2 + $0x58] sm:$0xff] }
0x1054   : > { %v7006_v12 = vpop.f32.mrf.mxu1  ;;  %v7095_v40 = vadd.f32 %v12981_v38, %v7072_v15 }
0x1055   : > { %v13013_v19 = vadd.f32 %v13001_v62, %v7113_v47  ;;  %v7073_v59 = vadd.f32 %v9979_v26, %v7057_v7  ;;  %v7093_v4 = vadd.f32 %v12981_v38, %v7070_v1  ;;  %v7055_v49 = vadd.f32 %v7006_v12, %v5936_v41  ;;  %v9985_v7 = vld [vmem:[#allocation2 + $0x70] sm:$0xff]  ;;  %v9986_v12 = vld [vmem:[#allocation2 + $0x60] sm:$0xff] }
0x1056   : > { %v7152_v23 = vpack.c.bf16 %v13007_v56, %v13016_v5  ;;  %v7118_v13 = vmul.f32 %v12988_v27, %v7095_v40  ;;  %v9987_v40 = vld [vmem:[#allocation2 + $0x78] sm:$0xff] }
0x1057   : > { %v7096_v28 = vadd.f32 %v12981_v38, %v7073_v59  ;;  %v7151_v45 = vpack.c.bf16 %v13013_v19, %v13010_v37  ;;  %v7071_v18 = vadd.f32 %v9980_v32, %v7055_v49  ;;  %v7116_v16 = vmul.f32 %v12988_v27, %v7093_v4 }
0x1058   : > { %v13042_v22 = vadd.f32 %v13001_v62, %v7118_v13  ;;  %v9988_v13 = vld [vmem:[#allocation2 + $0x68] sm:$0xff] }
0x1059   : > { %v7119_v6 = vmul.f32 %v12988_v27, %v7096_v28  ;;  %9413 = vmatprep.mubr.msk.bf16.mxu0 %vm2483_vm12, %v7151_v45  ;;  %v7094_v61 = vadd.f32 %v12981_v38, %v7071_v18  ;;  %v13036_v51 = vadd.f32 %v13001_v62, %v7116_v16  ;;  %v9677_v45 = vld [vmem:[%s10961_s16 + $0x38] sm:$0xff]  }
0x105a   : > { %9414 = vmatmul.mubr.msk.bf16.vlgmr.msra.gmra.mxu0 %vm2483_vm12, %v7152_v23  ;;  %9429 = vmatprep.subr.bf16.mxu1 %v9677_v45 }
0x105b   : > { %v7117_v36 = vmul.f32 %v12988_v27, %v7094_v61  ;;  %v13033_v33 = vadd.f32 %v13001_v62, %v7119_v6  ;;  %9430 = vmatpush3.bf16.msra.mxu1 %v9677_v45 }
0x105d   : > { %v13039_v8 = vadd.f32 %v13001_v62, %v7117_v36  ;;  %v7154_v11 = vpack.c.bf16 %v13033_v33, %v13042_v22 }
0x105f   : > { %v7153_v42 = vpack.c.bf16 %v13039_v8, %v13036_v51 }
0x1061   : > { %9417 = vmatprep.mubr.msk.bf16.mxu0 %vm2483_vm12, %v7153_v42 }
0x1062   : > { %9418 = vmatmul.mubr.msk.bf16.gmra.mxu0 %vm2483_vm12, %v7154_v11 }
0x108b   : > { %v9399_v50 = vpop.f32.mrf.mxu1 }
0x108c   : > { %v7060_v57 = vadd.f32 %v9399_v50, %v12776_v46 }
0x108d   : > { %v7019_v48 = vpop.f32.mrf.mxu1 }
0x108e   : > { %v7058_v31 = vadd.f32 %v7019_v48, %v12780_v20  ;;  %v7076_v55 = vadd.f32 %v9981_v21, %v7060_v57  ;;  %v9984_v20 = vld [vmem:[#allocation2 + $0x48] sm:$0xff] }
0x108f   : > { %v9400_v30 = vpop.f32.mrf.mxu1  ;;  %v9679_v21 = vld [vmem:[%s10961_s16 + $0x28] sm:$0xff]  }
0x1090   : > { %v7074_v52 = vadd.f32 %v9982_v58, %v7058_v31  ;;  %v7061_v34 = vadd.f32 %v9400_v30, %v12785_v9  ;;  %v7099_v25 = vadd.f32 %v12981_v38, %v7076_v55 }
0x1091   : > { %v7022_v17 = vpop.f32.mrf.mxu1 }
0x1092   : > { %v7097_v43 = vadd.f32 %v12981_v38, %v7074_v52  ;;  %v7077_v2 = vadd.f32 %v9983_v54, %v7061_v34  ;;  %v7059_v29 = vadd.f32 %v7022_v17, %v12789_v60  ;;  %v7122_v60 = vmul.f32 %v12988_v27, %v7099_v25  ;;  %v9680_v52 = vld [vmem:[%s10961_s16 + $0x20] sm:$0xff]   ;;  %v9682_v34 = vld [vmem:[%s10961_s16 + $0x10] sm:$0xff]   ;;  %v9683_v17 = vld [vmem:[%s10961_s16 + $0x8] sm:$0xff]  }
0x1093   : > { %v9403_v46 = vpop.f32.mrf.mxu1  ;;  %v13120_v54 = vld [vmem:[%s13530_s2] ss:$0 sm:$0xff] }
0x1094   : > { %v7100_v3 = vadd.f32 %v12981_v38, %v7077_v2  ;;  %v7075_v35 = vadd.f32 %v9984_v20, %v7059_v29  ;;  %v7064_v10 = vadd.f32 %v9403_v46, %v12795_v39  ;;  %v7120_v47 = vmul.f32 %v12988_v27, %v7097_v43  ;;  %v9684_v43 = vld [vmem:[%s10961_s16] sm:$0xff]  }
0x1095   : > { %v7035_v0 = vpop.f32.mrf.mxu1  ;;  %v13076_v23 = vadd.f32 %v13001_v62, %v7122_v60 }
0x1096   : > { %v7123_v9 = vmul.f32 %v12988_v27, %v7100_v3  ;;  %v7098_v63 = vadd.f32 %v12981_v38, %v7075_v35  ;;  %v7062_v15 = vadd.f32 %v7035_v0, %v12799_v14  ;;  %v7080_v41 = vadd.f32 %v9985_v7, %v7064_v10 }
0x1097   : > { %v9404_v44 = vpop.f32.mrf.mxu1  ;;  %v13069_v49 = vadd.f32 %v13001_v62, %v7120_v47 }
0x1098   : > { %v7121_v1 = vmul.f32 %v12988_v27, %v7098_v63  ;;  %v7078_v26 = vadd.f32 %v9986_v12, %v7062_v15  ;;  %v7065_v39 = vadd.f32 %v9404_v44, %v12805_v24  ;;  %v13066_v59 = vadd.f32 %v13001_v62, %v7123_v9 }
0x1099   : > { %v7038_v4 = vpop.f32.mrf.mxu1  ;;  %v7103_v18 = vadd.f32 %v12981_v38, %v7080_v41 }
0x109a   : > { %v13072_v14 = vadd.f32 %v13001_v62, %v7121_v1  ;;  %v7081_v28 = vadd.f32 %v9987_v40, %v7065_v39  ;;  %v7101_v32 = vadd.f32 %v12981_v38, %v7078_v26  ;;  %v7063_v24 = vadd.f32 %v7038_v4, %v12807_v53  ;;  %v9678_v53 = vld [vmem:[%s10961_s16 + $0x30] sm:$0xff]  }
0x109b   : > { %v7156_v61 = vpack.c.bf16 %v13066_v59, %v13076_v23  ;;  %v7126_v57 = vmul.f32 %v12988_v27, %v7103_v18  ;;  %9431 = vmatprep.subr.bf16.mxu1 %v9678_v53 }
0x109c   : > { %v7104_v6 = vadd.f32 %v12981_v38, %v7081_v28  ;;  %v7155_v16 = vpack.c.bf16 %v13072_v14, %v13069_v49  ;;  %v7079_v36 = vadd.f32 %v9988_v13, %v7063_v24  ;;  %v7124_v11 = vmul.f32 %v12988_v27, %v7101_v32  ;;  %9432 = vmatpush3.bf16.msra.mxu1 %v9678_v53 }
0x109d   : > { %9433 = vmatprep.subr.bf16.mxu1 %v9679_v21 }
0x109e   : > { %v7127_v42 = vmul.f32 %v12988_v27, %v7104_v6  ;;  %9421 = vmatprep.mubr.msk.bf16.mxu0 %vm2483_vm12, %v7155_v16  ;;  %v7102_v50 = vadd.f32 %v12981_v38, %v7079_v36  ;;  %v13099_v55 = vadd.f32 %v13001_v62, %v7124_v11  ;;  %v13105_v38 = vadd.f32 %v13001_v62, %v7126_v57 }
0x109f   : > { %9422 = vmatmul.mubr.msk.bf16.gmra.mxu0 %vm2483_vm12, %v7156_v61 }
0x10a0   : > { %v7125_v48 = vmul.f32 %v12988_v27, %v7102_v50  ;;  %v13095_v31 = vadd.f32 %v13001_v62, %v7127_v42  ;;  %9434 = vmatpush3.bf16.msra.mxu1 %v9679_v21 }
0x10a1   : > { %9435 = vmatprep.subr.bf16.mxu1 %v9680_v52 }
0x10a2   : > { %v13102_v30 = vadd.f32 %v13001_v62, %v7125_v48  ;;  %v7158_v58 = vpack.c.bf16 %v13095_v31, %v13105_v38  ;;  %v9681_v62 = vld [vmem:[%s10961_s16 + $0x18] sm:$0xff]   ;;  %s13531_s16 = scalar_lea.vmem [#allocation17], %s10910_s21  ;;  %s13534_s21 = sld [smem:[#allocation35_spill]] }
0x10a4   : > { %v7157_v27 = vpack.c.bf16 %v13102_v30, %v13099_v55  ;;  %9436 = vmatpush3.bf16.msra.mxu1 %v9680_v52 }
0x10a5   : > { %9437 = vmatprep.subr.bf16.mxu1 %v9681_v62 }
0x10a6   : > { %9425 = vmatprep.mubr.msk.bf16.mxu0 %vm2483_vm12, %v7157_v27 }
0x10a7   : > { %9426 = vmatmul.mubr.msk.bf16.gmra.mxu0 %vm2483_vm12, %v7158_v58 }
0x10a8   : > { %9438 = vmatpush3.bf16.msra.mxu1 %v9681_v62  ;;  %p8492_p7 = scmp.ne.s32.totalorder %s13534_s21, 1 }
0x10a9   : > { %9439 = vmatprep.subr.bf16.mxu1 %v9682_v34 }
0x10ac   : > { %9440 = vmatpush3.bf16.msra.mxu1 %v9682_v34 }
0x10ad   : > { %9441 = vmatprep.subr.bf16.mxu1 %v9683_v17 }
0x10b0   : > { %9442 = vmatpush3.bf16.msra.mxu1 %v9683_v17 }
0x10b1   : > { %9443 = vmatprep.subr.bf16.mxu1 %v9684_v43 }
0x10b4   : > { %9444 = vmatpush3.bf16.msra.mxu1 %v9684_v43 }
0x111a   : > { %v9415_v2 = vpop.f32.mrf.mxu0 }
0x111b   : > { %v7265_v29 = vadd.f32 %v9415_v2, %v13120_v54 }
0x111c   : > { %v7256_v25 = vpop.f32.mrf.mxu0 }
0x111d   : > { %v7257_v46 = vadd.f32 %v13120_v54, %v7256_v25  ;;  %v7337_v3 = vmul.f32 0.70710677, %v7265_v29  ;;  %v7321_v11 = vmul.f32 0.5, %v7265_v29 }
0x111e   : > { %v9416_v20 = vpop.f32.mrf.mxu0 }
0x111f   : > { %v7335_v35 = vmul.f32 0.70710677, %v7257_v46  ;;  %v7268_v10 = vadd.f32 %v9416_v20, %v13120_v54  ;;  %v7319_v36 = vmul.f32 0.5, %v7257_v46 }
0x1120   : > { %v7259_v0 = vpop.f32.mrf.mxu0 }
0x1121   : > { %9941 = verf.f32 %v7335_v35  ;;  %v7338_v47 = vmul.f32 0.70710677, %v7268_v10  ;;  %v7260_v9 = vadd.f32 %v13120_v54, %v7259_v0  ;;  %v7322_v13 = vmul.f32 0.5, %v7268_v10 }
0x1122   : > { %9943 = verf.f32 %v7337_v3  ;;  %v9419_v15 = vpop.f32.mrf.mxu0 }
0x1123   : > { %9945 = verf.f32 %v7338_v47  ;;  %v7336_v63 = vmul.f32 0.70710677, %v7260_v9  ;;  %v7281_v60 = vadd.f32 %v9419_v15, %v13120_v54  ;;  %v7320_v42 = vmul.f32 0.5, %v7260_v9 }
0x1124   : > { %v7272_v44 = vpop.f32.mrf.mxu0 }
0x1125   : > { %9947 = verf.f32 %v7336_v63  ;;  %v7273_v1 = vadd.f32 %v13120_v54, %v7272_v44  ;;  %v7341_v7 = vmul.f32 0.70710677, %v7281_v60  ;;  %v7325_v29 = vmul.f32 0.5, %v7281_v60 }
0x1126   : > { %v9420_v41 = vpop.f32.mrf.mxu0 }
0x1127   : > { %v7339_v12 = vmul.f32 0.70710677, %v7273_v1  ;;  %v7284_v26 = vadd.f32 %v9420_v41, %v13120_v54  ;;  %v7323_v46 = vmul.f32 0.5, %v7273_v1 }
0x1128   : > { %v7275_v39 = vpop.f32.mrf.mxu0 }
0x1129   : > { %9949 = verf.f32 %v7339_v12  ;;  %v7342_v4 = vmul.f32 0.70710677, %v7284_v26  ;;  %v7276_v40 = vadd.f32 %v13120_v54, %v7275_v39  ;;  %v7326_v3 = vmul.f32 0.5, %v7284_v26 }
0x112a   : > { %9951 = verf.f32 %v7341_v7 }
0x112b   : > { %9953 = verf.f32 %v7342_v4  ;;  %v7340_v28 = vmul.f32 0.70710677, %v7276_v40  ;;  %v7324_v20 = vmul.f32 0.5, %v7276_v40 }
0x112d   : > { %9955 = verf.f32 %v7340_v28 }
0x112e   : > { %v9942_v45 = vpop.eup %9941 }
0x112f   : > { %v9944_v32 = vpop.eup %9943  ;;  %v7367_v18 = vadd.f32 1.0, %v9942_v45 }
0x1130   : > { %v9946_v24 = vpop.eup %9945  ;;  %v7369_v61 = vadd.f32 1.0, %v9944_v32 }
0x1131   : > { %v7370_v6 = vadd.f32 1.0, %v9946_v24  ;;  %v7383_v57 = vmul.f32 %v7367_v18, %v7319_v36 }
0x1132   : > { %v9948_v16 = vpop.eup %9947  ;;  %v7385_v21 = vmul.f32 %v7369_v61, %v7321_v11 }
0x1133   : > { %v7368_v53 = vadd.f32 1.0, %v9948_v16  ;;  %v7386_v50 = vmul.f32 %v7370_v6, %v7322_v13 }
0x1135   : > { %v7384_v48 = vmul.f32 %v7368_v53, %v7320_v42  ;;  %v7400_v62 = vpack.c.bf16 %v7386_v50, %v7385_v21 }
0x1136   : > { %v9950_v27 = vpop.eup %9949 }
0x1137   : > { %v7399_v58 = vpack.c.bf16 %v7384_v48, %v7383_v57  ;;  %v9952_v52 = vpop.eup %9951  ;;  %v7371_v17 = vadd.f32 1.0, %v9950_v27 }
0x1138   : > { %v9954_v34 = vpop.eup %9953  ;;  %v7373_v25 = vadd.f32 1.0, %v9952_v52 }
0x1139   : > { %9445 = vmatprep.mubr.bf16.mxu1 %v7399_v58  ;;  %v7374_v43 = vadd.f32 1.0, %v9954_v34  ;;  %v7387_v0 = vmul.f32 %v7371_v17, %v7323_v46 }
0x113a   : > { %9446 = vmatmul.mubr.bf16.vlgmr.msra.gmra.mxu1 %v7400_v62  ;;  %v9956_v2 = vpop.eup %9955  ;;  %v7389_v9 = vmul.f32 %v7373_v25, %v7325_v29 }
0x113b   : > { %v7372_v35 = vadd.f32 1.0, %v9956_v2  ;;  %v7390_v10 = vmul.f32 %v7374_v43, %v7326_v3 }
0x113d   : > { %v7388_v47 = vmul.f32 %v7372_v35, %v7324_v20  ;;  %v7402_v15 = vpack.c.bf16 %v7390_v10, %v7389_v9 }
0x113f   : > { %v7401_v63 = vpack.c.bf16 %v7388_v47, %v7387_v0 }
0x1141   : > { %9449 = vmatprep.mubr.bf16.mxu1 %v7401_v63 }
0x1142   : > { %9450 = vmatmul.mubr.bf16.gmra.mxu1 %v7402_v15 }
0x115f   : > { %v9423_v44 = vpop.f32.mrf.mxu0 }
0x1160   : > { %v7297_v7 = vadd.f32 %v9423_v44, %v13120_v54 }
0x1161   : > { %v7288_v41 = vpop.f32.mrf.mxu0 }
0x1162   : > { %v7289_v12 = vadd.f32 %v13120_v54, %v7288_v41  ;;  %v7345_v39 = vmul.f32 0.70710677, %v7297_v7  ;;  %v7329_v25 = vmul.f32 0.5, %v7297_v7 }
0x1163   : > { %v9424_v26 = vpop.f32.mrf.mxu0 }
0x1164   : > { %v7343_v1 = vmul.f32 0.70710677, %v7289_v12  ;;  %v7300_v4 = vadd.f32 %v9424_v26, %v13120_v54  ;;  %v7327_v17 = vmul.f32 0.5, %v7289_v12 }
0x1165   : > { %v7291_v60 = vpop.f32.mrf.mxu0 }
0x1166   : > { %9957 = verf.f32 %v7343_v1  ;;  %v7346_v40 = vmul.f32 0.70710677, %v7300_v4  ;;  %v7292_v28 = vadd.f32 %v13120_v54, %v7291_v60  ;;  %v7330_v34 = vmul.f32 0.5, %v7300_v4 }
0x1167   : > { %9959 = verf.f32 %v7345_v39  ;;  %v9427_v32 = vpop.f32.mrf.mxu0 }
0x1168   : > { %9961 = verf.f32 %v7346_v40  ;;  %v7344_v45 = vmul.f32 0.70710677, %v7292_v28  ;;  %v7313_v24 = vadd.f32 %v9427_v32, %v13120_v54  ;;  %v7328_v43 = vmul.f32 0.5, %v7292_v28 }
0x1169   : > { %v7304_v18 = vpop.f32.mrf.mxu0 }
0x116a   : > { %9963 = verf.f32 %v7344_v45  ;;  %v7305_v6 = vadd.f32 %v13120_v54, %v7304_v18  ;;  %v7349_v16 = vmul.f32 0.70710677, %v7313_v24  ;;  %v7333_v26 = vmul.f32 0.5, %v7313_v24  ;;  %v13140_v18 = vld [vmem:[%s13531_s16] ss:$0 sm:$0xff] }
0x116b   : > { %v9428_v61 = vpop.f32.mrf.mxu0 }
0x116c   : > { %v7347_v13 = vmul.f32 0.70710677, %v7305_v6  ;;  %v7316_v36 = vadd.f32 %v9428_v61, %v13120_v54  ;;  %v7331_v12 = vmul.f32 0.5, %v7305_v6  ;;  %v13145_v6 = vld [vmem:[%s13532_s26] ss:$0 sm:$0xff] }
0x116d   : > { %v7307_v42 = vpop.f32.mrf.mxu0 }
0x116e   : > { %9965 = verf.f32 %v7347_v13  ;;  %v7350_v53 = vmul.f32 0.70710677, %v7316_v36  ;;  %v7308_v11 = vadd.f32 %v13120_v54, %v7307_v42  ;;  %v7334_v41 = vmul.f32 0.5, %v7316_v36  ;;  %v13151_v36 = vld [vmem:[%s13533_s27] ss:$0 sm:$0xff] }
0x116f   : > { %9967 = verf.f32 %v7349_v16 }
0x1170   : > { %9969 = verf.f32 %v7350_v53  ;;  %v7348_v50 = vmul.f32 0.70710677, %v7308_v11  ;;  %v7332_v7 = vmul.f32 0.5, %v7308_v11 }
0x1172   : > { %9971 = verf.f32 %v7348_v50 }
0x1173   : > { %v9958_v57 = vpop.eup %9957 }
0x1174   : > { %v9960_v48 = vpop.eup %9959  ;;  %v7375_v27 = vadd.f32 1.0, %v9958_v57 }
0x1175   : > { %v9962_v21 = vpop.eup %9961  ;;  %v7377_v62 = vadd.f32 1.0, %v9960_v48 }
0x1176   : > { %v7378_v58 = vadd.f32 1.0, %v9962_v21  ;;  %v7391_v46 = vmul.f32 %v7375_v27, %v7327_v17 }
0x1177   : > { %v9964_v52 = vpop.eup %9963  ;;  %v7393_v54 = vmul.f32 %v7377_v62, %v7329_v25 }
0x1178   : > { %v7376_v2 = vadd.f32 1.0, %v9964_v52  ;;  %v7394_v3 = vmul.f32 %v7378_v58, %v7330_v34 }
0x117a   : > { %v7392_v20 = vmul.f32 %v7376_v2, %v7328_v43  ;;  %v7404_v0 = vpack.c.bf16 %v7394_v3, %v7393_v54 }
0x117b   : > { %v9966_v35 = vpop.eup %9965 }
0x117c   : > { %v7403_v29 = vpack.c.bf16 %v7392_v20, %v7391_v46  ;;  %v9968_v10 = vpop.eup %9967  ;;  %v7379_v9 = vadd.f32 1.0, %v9966_v35 }
0x117d   : > { %v9970_v47 = vpop.eup %9969  ;;  %v7381_v44 = vadd.f32 1.0, %v9968_v10 }
0x117e   : > { %9453 = vmatprep.mubr.bf16.mxu1 %v7403_v29  ;;  %v7382_v63 = vadd.f32 1.0, %v9970_v47  ;;  %v7395_v4 = vmul.f32 %v7379_v9, %v7331_v12 }
0x117f   : > { %9454 = vmatmul.mubr.bf16.gmra.mxu1 %v7404_v0  ;;  %v9972_v15 = vpop.eup %9971  ;;  %v7397_v40 = vmul.f32 %v7381_v44, %v7333_v26 }
0x1180   : > { %v7380_v39 = vadd.f32 1.0, %v9972_v15  ;;  %v7398_v1 = vmul.f32 %v7382_v63, %v7334_v41 }
0x1182   : > { %v7396_v60 = vmul.f32 %v7380_v39, %v7332_v7  ;;  %v7406_v45 = vpack.c.bf16 %v7398_v1, %v7397_v40 }
0x1184   : > { %v7405_v28 = vpack.c.bf16 %v7396_v60, %v7395_v4 }
0x1186   : > { %9457 = vmatprep.mubr.bf16.mxu1 %v7405_v28 }
0x1187   : > { %9458 = vmatmul.mubr.bf16.gmra.mxu1 %v7406_v45 }
0x11fa   : > { %v9447_v32 = vpop.f32.mrf.mxu1 }
0x11fb   : > { %v7570_v16 = vadd.f32 %v9447_v32, %v13016_v5 }
0x11fc   : > { %v7505_v61 = vpop.f32.mrf.mxu1 }
0x11fd   : > { %v7593_v24 = vadd.f32 %v13140_v18, %v7570_v16  ;;  %v7568_v13 = vadd.f32 %v7505_v61, %v13010_v37 }
0x11fe   : > { %v9448_v42 = vpop.f32.mrf.mxu1 }
0x11ff   : > { %v7616_v53 = vmul.f32 %v13145_v6, %v7593_v24  ;;  %v7591_v11 = vadd.f32 %v13140_v18, %v7568_v13  ;;  %v7571_v50 = vadd.f32 %v9448_v42, %v13007_v56 }
0x1200   : > { %v7508_v57 = vpop.f32.mrf.mxu1 }
0x1201   : > { %v13157_v5 = vadd.f32 %v13151_v36, %v7616_v53  ;;  %v7614_v48 = vmul.f32 %v13145_v6, %v7591_v11  ;;  %v7594_v21 = vadd.f32 %v13140_v18, %v7571_v50  ;;  %v7569_v37 = vadd.f32 %v7508_v57, %v13013_v19 }
0x1202   : > { %v9451_v52 = vpop.f32.mrf.mxu1 }
0x1203   : > { %7655 = vst.msk [vmem:[#allocation2 + $0x10] sm:$0xff] %vm2483_vm12, %v13157_v5  ;;  %v13165_v27 = vadd.f32 %v13151_v36, %v7614_v48  ;;  %v7617_v58 = vmul.f32 %v13145_v6, %v7594_v21  ;;  %v7592_v56 = vadd.f32 %v13140_v18, %v7569_v37  ;;  %v7574_v62 = vadd.f32 %v9451_v52, %v13042_v22 }
0x1204   : > { %v7521_v17 = vpop.f32.mrf.mxu1 }
0x1205   : > { %7653 = vst.msk [vmem:[#allocation2] sm:$0xff] %vm2483_vm12, %v13165_v27  ;;  %v13173_v34 = vadd.f32 %v13151_v36, %v7617_v58  ;;  %v7615_v19 = vmul.f32 %v13145_v6, %v7592_v56  ;;  %v7597_v43 = vadd.f32 %v13140_v18, %v7574_v62  ;;  %v7572_v2 = vadd.f32 %v7521_v17, %v13036_v51 }
0x1206   : > { %v9452_v22 = vpop.f32.mrf.mxu1 }
0x1207   : > { %7656 = vst.msk [vmem:[#allocation2 + $0x18] sm:$0xff] %vm2483_vm12, %v13173_v34  ;;  %v13181_v25 = vadd.f32 %v13151_v36, %v7615_v19  ;;  %v7620_v3 = vmul.f32 %v13145_v6, %v7597_v43  ;;  %v7595_v46 = vadd.f32 %v13140_v18, %v7572_v2  ;;  %v7575_v20 = vadd.f32 %v9452_v22, %v13033_v33 }
0x1208   : > { %v7524_v54 = vpop.f32.mrf.mxu1 }
0x1209   : > { %7654 = vst.msk [vmem:[#allocation2 + $0x8] sm:$0xff] %vm2483_vm12, %v13181_v25  ;;  %v13189_v35 = vadd.f32 %v13151_v36, %v7620_v3  ;;  %v7618_v51 = vmul.f32 %v13145_v6, %v7595_v46  ;;  %v7598_v29 = vadd.f32 %v13140_v18, %v7575_v20  ;;  %v7573_v10 = vadd.f32 %v7524_v54, %v13039_v8 }
0x120b   : > { %7659 = vst.msk [vmem:[#allocation2 + $0x30] sm:$0xff] %vm2483_vm12, %v13189_v35  ;;  %v13197_v0 = vadd.f32 %v13151_v36, %v7618_v51  ;;  %v7621_v33 = vmul.f32 %v13145_v6, %v7598_v29  ;;  %v7596_v47 = vadd.f32 %v13140_v18, %v7573_v10 }
0x120d   : > { %7657 = vst.msk [vmem:[#allocation2 + $0x20] sm:$0xff] %vm2483_vm12, %v13197_v0  ;;  %v13204_v9 = vadd.f32 %v13151_v36, %v7621_v33  ;;  %v7619_v63 = vmul.f32 %v13145_v6, %v7596_v47 }
0x120f   : > { %7660 = vst.msk [vmem:[#allocation2 + $0x38] sm:$0xff] %vm2483_vm12, %v13204_v9  ;;  %v13210_v8 = vadd.f32 %v13151_v36, %v7619_v63 }
0x1211   : > { %7658 = vst.msk [vmem:[#allocation2 + $0x28] sm:$0xff] %vm2483_vm12, %v13210_v8 }
0x123f   : > { %v9455_v15 = vpop.f32.mrf.mxu1 }
0x1240   : > { %v7578_v44 = vadd.f32 %v9455_v15, %v13076_v23 }
0x1241   : > { %v7537_v41 = vpop.f32.mrf.mxu1 }
0x1242   : > { %v7601_v12 = vadd.f32 %v13140_v18, %v7578_v44  ;;  %v7576_v7 = vadd.f32 %v7537_v41, %v13069_v49 }
0x1243   : > { %v9456_v39 = vpop.f32.mrf.mxu1 }
0x1244   : > { %v7624_v26 = vmul.f32 %v13145_v6, %v7601_v12  ;;  %v7599_v1 = vadd.f32 %v13140_v18, %v7576_v7  ;;  %v7579_v4 = vadd.f32 %v9456_v39, %v13066_v59 }
0x1245   : > { %v7540_v60 = vpop.f32.mrf.mxu1 }
0x1246   : > { %v13221_v40 = vadd.f32 %v13151_v36, %v7624_v26  ;;  %v7622_v28 = vmul.f32 %v13145_v6, %v7599_v1  ;;  %v7602_v23 = vadd.f32 %v13140_v18, %v7579_v4  ;;  %v7577_v45 = vadd.f32 %v7540_v60, %v13072_v14 }
0x1247   : > { %v9459_v16 = vpop.f32.mrf.mxu1 }
0x1248   : > { %7663 = vst.msk [vmem:[#allocation2 + $0x50] sm:$0xff] %vm2483_vm12, %v13221_v40  ;;  %v13229_v49 = vadd.f32 %v13151_v36, %v7622_v28  ;;  %v7625_v32 = vmul.f32 %v13145_v6, %v7602_v23  ;;  %v7600_v59 = vadd.f32 %v13140_v18, %v7577_v45  ;;  %v7582_v61 = vadd.f32 %v9459_v16, %v13105_v38 }
0x1249   : > { %v7553_v13 = vpop.f32.mrf.mxu1 }
0x124a   : > { %7661 = vst.msk [vmem:[#allocation2 + $0x40] sm:$0xff] %vm2483_vm12, %v13229_v49  ;;  %v13237_v24 = vadd.f32 %v13151_v36, %v7625_v32  ;;  %v7623_v14 = vmul.f32 %v13145_v6, %v7600_v59  ;;  %v7605_v42 = vadd.f32 %v13140_v18, %v7582_v61  ;;  %v7580_v53 = vadd.f32 %v7553_v13, %v13099_v55 }
0x124b   : > { %v9460_v38 = vpop.f32.mrf.mxu1 }
0x124c   : > { %7664 = vst.msk [vmem:[#allocation2 + $0x58] sm:$0xff] %vm2483_vm12, %v13237_v24  ;;  %v13245_v11 = vadd.f32 %v13151_v36, %v7623_v14  ;;  %v7628_v50 = vmul.f32 %v13145_v6, %v7605_v42  ;;  %v7603_v57 = vadd.f32 %v13140_v18, %v7580_v53  ;;  %v7583_v48 = vadd.f32 %v9460_v38, %v13095_v31 }
0x124d   : > { %v7556_v21 = vpop.f32.mrf.mxu1 }
0x124e   : > { %7662 = vst.msk [vmem:[#allocation2 + $0x48] sm:$0xff] %vm2483_vm12, %v13245_v11  ;;  %v13253_v37 = vadd.f32 %v13151_v36, %v7628_v50  ;;  %v7626_v55 = vmul.f32 %v13145_v6, %v7603_v57  ;;  %v7606_v58 = vadd.f32 %v13140_v18, %v7583_v48  ;;  %v7581_v56 = vadd.f32 %v7556_v21, %v13102_v30 }
0x1250   : > { %7667 = vst.msk [vmem:[#allocation2 + $0x70] sm:$0xff] %vm2483_vm12, %v13253_v37  ;;  %v13261_v52 = vadd.f32 %v13151_v36, %v7626_v55  ;;  %v7629_v31 = vmul.f32 %v13145_v6, %v7606_v58  ;;  %v7604_v62 = vadd.f32 %v13140_v18, %v7581_v56 }
0x1252   : > { %7665 = vst.msk [vmem:[#allocation2 + $0x60] sm:$0xff] %vm2483_vm12, %v13261_v52  ;;  %v13268_v19 = vadd.f32 %v13151_v36, %v7629_v31  ;;  %v7627_v17 = vmul.f32 %v13145_v6, %v7604_v62  ;;  %7672 = sbr.rel (%p8492_p7) target bundleno = 4733 (0x127d), region = 156 }
0x1254   : > { %7668 = vst.msk [vmem:[#allocation2 + $0x78] sm:$0xff] %vm2483_vm12, %v13268_v19  ;;  %v13274_v30 = vadd.f32 %v13151_v36, %v7627_v17 }
0x1256   : > { %7666 = vst.msk [vmem:[#allocation2 + $0x68] sm:$0xff] %vm2483_vm12, %v13274_v30 }
0x1257   : > { %v7689_v18 = vmul.f32 0.70710677, %v13165_v27  ;;  %v7690_v43 = vmul.f32 0.70710677, %v13181_v25  ;;  %v7691_v2 = vmul.f32 0.70710677, %v13157_v5 }
0x1258   : > { %v7692_v6 = vmul.f32 0.70710677, %v13173_v34  ;;  %v7693_v22 = vmul.f32 0.70710677, %v13197_v0  ;;  %v7694_v36 = vmul.f32 0.70710677, %v13210_v8 }
0x1259   : > { %9989 = verf.f32 %v7689_v18  ;;  %v7695_v3 = vmul.f32 0.70710677, %v13189_v35  ;;  %v7696_v46 = vmul.f32 0.70710677, %v13204_v9  ;;  %v7697_v20 = vmul.f32 0.70710677, %v13229_v49 }
0x125a   : > { %9991 = verf.f32 %v7690_v43  ;;  %v7698_v54 = vmul.f32 0.70710677, %v13245_v11  ;;  %v7699_v51 = vmul.f32 0.70710677, %v13221_v40  ;;  %v7700_v29 = vmul.f32 0.70710677, %v13237_v24 }
0x125b   : > { %9993 = verf.f32 %v7691_v2  ;;  %v7701_v10 = vmul.f32 0.70710677, %v13261_v52  ;;  %v7702_v33 = vmul.f32 0.70710677, %v13274_v30  ;;  %v7703_v47 = vmul.f32 0.70710677, %v13253_v37 }
0x125c   : > { %9995 = verf.f32 %v7692_v6  ;;  %v7704_v63 = vmul.f32 0.70710677, %v13268_v19  ;;  %v7673_v15 = vmul.f32 0.5, %v13165_v27  ;;  %v7674_v41 = vmul.f32 0.5, %v13181_v25 }
0x125d   : > { %9997 = verf.f32 %v7693_v22  ;;  %v7675_v39 = vmul.f32 0.5, %v13157_v5  ;;  %v7676_v4 = vmul.f32 0.5, %v13173_v34  ;;  %v7677_v27 = vmul.f32 0.5, %v13197_v0 }
0x125e   : > { %9999 = verf.f32 %v7694_v36  ;;  %vm7817_vm15 = vcmask 519168   ;;  %v7678_v59 = vmul.f32 0.5, %v13210_v8  ;;  %v7679_v34 = vmul.f32 0.5, %v13189_v35 }
0x125f   : > { %10001 = verf.f32 %v7695_v3  ;;  %v7680_v0 = vmul.f32 0.5, %v13204_v9  ;;  %v7681_v21 = vmul.f32 0.5, %v13229_v49  ;;  %v7682_v31 = vmul.f32 0.5, %v13245_v11 }
0x1260   : > { %10003 = verf.f32 %v7696_v46  ;;  %v7683_v43 = vmul.f32 0.5, %v13221_v40  ;;  %v7684_v36 = vmul.f32 0.5, %v13237_v24 }
0x1261   : > { %10005 = verf.f32 %v7697_v20 }
0x1262   : > { %10007 = verf.f32 %v7698_v54  ;;  %v7685_v54 = vmul.f32 0.5, %v13261_v52 }
0x1263   : > { %10009 = verf.f32 %v7699_v51 }
0x1264   : > { %10011 = verf.f32 %v7700_v29 }
0x1265   : > { %10013 = verf.f32 %v7701_v10 }
0x1266   : > { %v9990_v44 = vpop.eup %9989  ;;  %10015 = verf.f32 %v7702_v33  ;;  %v7686_v33 = vmul.f32 0.5, %v13274_v30 }
0x1267   : > { %v9992_v12 = vpop.eup %9991  ;;  %v7721_v7 = vadd.f32 1.0, %v9990_v44  ;;  %10017 = verf.f32 %v7703_v47  ;;  %v7687_v44 = vmul.f32 0.5, %v13253_v37 }
0x1268   : > { %v9994_v26 = vpop.eup %9993  ;;  %v7722_v1 = vadd.f32 1.0, %v9992_v12  ;;  %10019 = verf.f32 %v7704_v63 }
0x1269   : > { %v9996_v60 = vpop.eup %9995  ;;  %v7737_v28 = vmul.f32 %v7721_v7, %v7673_v15  ;;  %v7723_v23 = vadd.f32 1.0, %v9994_v26 }
0x126a   : > { %v9998_v45 = vpop.eup %9997  ;;  %v7738_v25 = vmul.f32 %v7722_v1, %v7674_v41  ;;  %v7724_v32 = vadd.f32 1.0, %v9996_v60 }
0x126b   : > { %v10000_v16 = vpop.eup %9999  ;;  %v8516_v5 = vpack.c.bf16 %v7737_v28, %v7737_v28  ;;  %v7739_v61 = vmul.f32 %v7723_v23, %v7675_v39  ;;  %v7725_v14 = vadd.f32 1.0, %v9998_v45  ;;  %v7688_v39 = vmul.f32 0.5, %v13268_v19 }
0x126c   : > { %v10002_v13 = vpop.eup %10001  ;;  %v8517_v42 = vpack.c.bf16 %v7738_v25, %v7738_v25  ;;  %v7740_v53 = vmul.f32 %v7724_v32, %v7676_v4  ;;  %v7726_v38 = vadd.f32 1.0, %v10000_v16 }
0x126d   : > { %v10004_v50 = vpop.eup %10003  ;;  %7818 = vst.msk [vmem:[%s10971_s4] sm:$0xf] %vm7817_vm15, %v8516_v5  ;;  %v8518_v57 = vpack.c.bf16 %v7739_v61, %v7739_v61  ;;  %v7741_v48 = vmul.f32 %v7725_v14, %v7677_v27  ;;  %v7727_v8 = vadd.f32 1.0, %v10002_v13 }
0x126e   : > { %v10006_v55 = vpop.eup %10005  ;;  %7819 = vst.msk [vmem:[%s10971_s4 + $0x4] sm:$0xf] %vm7817_vm15, %v8517_v42  ;;  %v8519_v35 = vpack.c.bf16 %v7740_v53, %v7740_v53  ;;  %v7742_v58 = vmul.f32 %v7726_v38, %v7678_v59  ;;  %v7728_v56 = vadd.f32 1.0, %v10004_v50 }
0x126f   : > { %v10008_v62 = vpop.eup %10007  ;;  %7820 = vst.msk [vmem:[%s10971_s4 + $0x8] sm:$0xf] %vm7817_vm15, %v8518_v57  ;;  %v8520_v9 = vpack.c.bf16 %v7741_v48, %v7741_v48  ;;  %v7743_v17 = vmul.f32 %v7727_v8, %v7679_v34  ;;  %v7729_v18 = vadd.f32 1.0, %v10006_v55 }
0x1270   : > { %v10010_v2 = vpop.eup %10009  ;;  %7821 = vst.msk [vmem:[%s10971_s4 + $0xc] sm:$0xf] %vm7817_vm15, %v8519_v35  ;;  %v8521_v49 = vpack.c.bf16 %v7742_v58, %v7742_v58  ;;  %v7744_v6 = vmul.f32 %v7728_v56, %v7680_v0  ;;  %v7730_v22 = vadd.f32 1.0, %v10008_v62 }
0x1271   : > { %v10012_v3 = vpop.eup %10011  ;;  %7822 = vst.msk [vmem:[%s10971_s4 + $0x10] sm:$0xf] %vm7817_vm15, %v8520_v9  ;;  %v8522_v11 = vpack.c.bf16 %v7743_v17, %v7743_v17  ;;  %v7745_v46 = vmul.f32 %v7729_v18, %v7681_v21  ;;  %v7731_v20 = vadd.f32 1.0, %v10010_v2 }
0x1272   : > { %v10014_v51 = vpop.eup %10013  ;;  %7823 = vst.msk [vmem:[%s10971_s4 + $0x14] sm:$0xf] %vm7817_vm15, %v8521_v49  ;;  %v8523_v40 = vpack.c.bf16 %v7744_v6, %v7744_v6  ;;  %v7746_v29 = vmul.f32 %v7730_v22, %v7682_v31  ;;  %v7732_v10 = vadd.f32 1.0, %v10012_v3 }
0x1273   : > { %v10016_v47 = vpop.eup %10015  ;;  %7824 = vst.msk [vmem:[%s10971_s4 + $0x18] sm:$0xf] %vm7817_vm15, %v8522_v11  ;;  %v8524_v24 = vpack.c.bf16 %v7745_v46, %v7745_v46  ;;  %v7747_v63 = vmul.f32 %v7731_v20, %v7683_v43  ;;  %v7733_v15 = vadd.f32 1.0, %v10014_v51 }
0x1274   : > { %v10018_v52 = vpop.eup %10017  ;;  %7825 = vst.msk [vmem:[%s10971_s4 + $0x1c] sm:$0xf] %vm7817_vm15, %v8523_v40  ;;  %v8525_v41 = vpack.c.bf16 %v7746_v29, %v7746_v29  ;;  %v7748_v12 = vmul.f32 %v7732_v10, %v7684_v36  ;;  %v7734_v7 = vadd.f32 1.0, %v10016_v47 }
0x1275   : > { %v10020_v30 = vpop.eup %10019  ;;  %7826 = vst.msk [vmem:[%s10971_s4 + $0x20] sm:$0xf] %vm7817_vm15, %v8524_v24  ;;  %v8526_v26 = vpack.c.bf16 %v7747_v63, %v7747_v63  ;;  %v7749_v1 = vmul.f32 %v7733_v15, %v7685_v54  ;;  %v7735_v4 = vadd.f32 1.0, %v10018_v52 }
0x1276   : > { %7827 = vst.msk [vmem:[%s10971_s4 + $0x24] sm:$0xf] %vm7817_vm15, %v8525_v41  ;;  %v8527_v37 = vpack.c.bf16 %v7748_v12, %v7748_v12  ;;  %v7750_v60 = vmul.f32 %v7734_v7, %v7686_v33  ;;  %v7736_v28 = vadd.f32 1.0, %v10020_v30 }
0x1277   : > { %7828 = vst.msk [vmem:[%s10971_s4 + $0x28] sm:$0xf] %vm7817_vm15, %v8526_v26  ;;  %v8528_v23 = vpack.c.bf16 %v7749_v1, %v7749_v1  ;;  %v7751_v27 = vmul.f32 %v7735_v4, %v7687_v44 }
0x1278   : > { %7829 = vst.msk [vmem:[%s10971_s4 + $0x2c] sm:$0xf] %vm7817_vm15, %v8527_v37  ;;  %v8529_v19 = vpack.c.bf16 %v7750_v60, %v7750_v60  ;;  %v7752_v45 = vmul.f32 %v7736_v28, %v7688_v39 }
0x1279   : > { %7830 = vst.msk [vmem:[%s10971_s4 + $0x30] sm:$0xf] %vm7817_vm15, %v8528_v23  ;;  %v8530_v25 = vpack.c.bf16 %v7751_v27, %v7751_v27 }
0x127a   : > { %7831 = vst.msk [vmem:[%s10971_s4 + $0x34] sm:$0xf] %vm7817_vm15, %v8529_v19  ;;  %v8531_v32 = vpack.c.bf16 %v7752_v45, %v7752_v45 }
0x127b   : > { %7832 = vst.msk [vmem:[%s10971_s4 + $0x38] sm:$0xf] %vm7817_vm15, %v8530_v25 }
0x127c   : > { %7833 = vst.msk [vmem:[%s10971_s4 + $0x3c] sm:$0xf] %vm7817_vm15, %v8531_v32 }
0x127d PF: > { %s13535_s18 = sld [smem:[#allocation38_spill]]  ;;  %s13542_s30 = smov %s10493_s19 }
0x127e   : > { %s13536_s27 = sld [smem:[#allocation33_spill]] }
0x127f   : > { %s13537_s28 = sld [smem:[#allocation34_spill]] }
0x1280   : > { %s13538_s29 = sld [smem:[#allocation44_spill]] }
0x1281   : > { %s13539_s0 = sld [smem:[#allocation37_spill]] }
0x1282   : > { %s13540_s12 = sld [smem:[#allocation42_spill]] }
0x1283   : > { %s48_s20 = sadd.s32 1, %s13535_s18   ;;  %s13541_s1 = sld [smem:[#allocation43_spill]] }
0x1284   : > { %p45_p9 = scmp.ge.s32.totalorder %s48_s20, 6  }
0x1286   :  { %47 = sbr.rel (!%p45_p9) target bundleno = 31 (0x1f), region = 283 }
0x1288   : > { %s13543_s19 = smov %s13540_s12 }
0x128b   :  { %7856 = vsyncpa [#allocation4], 1 }
0x128c   :  { %7858 = vsyncpa [#allocation4 + $0x1], 1 }
0x128d   :  { %7859 = vsyncpa [#allocation6], 1 }
0x128e   :  { %7860 = vsyncpa [#allocation9], 1 }
0x128f   :  { %7862 = vsyncpa [#allocation9 + $0x1], 1 }
0x1290   :  { %7863 = vsyncpa [#allocation12], 1 }
0x1291   :  { %7865 = vsyncpa [#allocation12 + $0x1], 1 }
0x1292   :  { %7866 = vsyncpa [#allocation15], 1 }
0x1293   :  { %7868 = vsyncpa [#allocation15 + $0x1], 1 }
0x1294   :  { %7869 = vsyncpa [#allocation18], 1 }
0x1295   :  { %7871 = vsyncpa [#allocation18 + $0x1], 1 }
0x1296   :  { %7872 = vsyncpa [#allocation21], 1 }
0x1297   :  { %7874 = vsyncpa [#allocation21 + $0x1], 1 }
0x1298   :  { %7875 = vsyncpa [#allocation24], 1 }
0x1299   :  { %7877 = vsyncpa [#allocation24 + $0x1], 1 }

</bundles_post_ra>
